<compile_context>
chip_gen: v7x
topology: tpu7x:2x2x1
jax: 0.10.0
libtpu: 0.0.40
codegen_flags: <defaults>
</compile_context>

<pallas_src>
import math
from functools import partial

import jax
import jax.numpy as jnp
from jax.experimental import pallas as pl
from jax.experimental.pallas import tpu as pltpu

VMEM_LIMIT = 48 * 1024 * 1024  # explicit scoped-VMEM limit (fits all gens)


def _pick_tile(dim, target, align=128):
    """Largest multiple of `align` that divides `dim` and is <= `target`.
    Falls back to the full dim (full-extent blocks are always legal)."""
    if dim <= target:
        return dim
    t = max((target // align) * align, align)
    while dim % t:
        t -= align
        if t < align:
            return dim
    return t


# ---------------------------------------------------------------------------
# Tiled GEMM kernels (bf16 MXU inputs, f32 accumulation)
# ---------------------------------------------------------------------------
def _matmul_fullk_kernel(x_ref, w_ref, o_ref):
    o_ref[...] = jnp.dot(x_ref[...], w_ref[...],
                         preferred_element_type=jnp.float32).astype(o_ref.dtype)


def _matmul_fullk_bias_kernel(x_ref, w_ref, b_ref, o_ref):
    o_ref[...] = (jnp.dot(x_ref[...], w_ref[...],
                          preferred_element_type=jnp.float32)
                  + b_ref[...]).astype(o_ref.dtype)


def _matmul_kloop_kernel(x_ref, w_ref, o_ref, acc_ref):
    part = jnp.dot(x_ref[...], w_ref[...], preferred_element_type=jnp.float32)

    @pl.when(pl.program_id(2) == 0)
    def _init():                        # direct store: no zero-fill + add
        acc_ref[...] = part

    @pl.when(pl.program_id(2) > 0)
    def _accum():
        acc_ref[...] += part

    @pl.when(pl.program_id(2) == pl.num_programs(2) - 1)
    def _store():
        o_ref[...] = acc_ref[...].astype(o_ref.dtype)


def _matmul_kloop_bias_kernel(x_ref, w_ref, b_ref, o_ref, acc_ref):
    part = jnp.dot(x_ref[...], w_ref[...], preferred_element_type=jnp.float32)

    @pl.when(pl.program_id(2) == 0)
    def _init():
        acc_ref[...] = part

    @pl.when(pl.program_id(2) > 0)
    def _accum():
        acc_ref[...] += part

    @pl.when(pl.program_id(2) == pl.num_programs(2) - 1)
    def _store():
        o_ref[...] = (acc_ref[...] + b_ref[...]).astype(o_ref.dtype)


def matmul(x, w, bias=None, *, out_dtype=jnp.float32,
           tm=256, tn=512, tk=512, fullk_budget=32 * 1024 * 1024):
    """y = x @ w (+ bias).  x:(M,K), w:(K,N).  MXU in bf16, f32 accumulate.

    When the full-K stripes fit VMEM (true for Flux-scale dims), the K grid
    axis is collapsed: no accumulator scratch, single output write."""
    x = x.astype(jnp.bfloat16)
    w = w.astype(jnp.bfloat16)
    M, K = x.shape
    K2, N = w.shape
    assert K == K2
    tm = _pick_tile(M, tm)
    tn = _pick_tile(N, tn)

    out_bytes = jnp.dtype(out_dtype).itemsize
    cost = pl.CostEstimate(
        flops=2 * M * N * K,
        transcendentals=0,
        bytes_accessed=(M * K + K * N) * 2 + M * N * out_bytes,
    )

    # Double-buffered x stripe + w tile + output tile for the full-K path.
    fullk_bytes = 2 * (tm * K + K * tn) * 2 + 2 * tm * tn * out_bytes
    use_fullk = fullk_bytes <= fullk_budget

    args = [x, w]
    if bias is not None:
        args.append(bias.reshape(1, N).astype(jnp.float32))

    if use_fullk:
        grid = (M // tm, N // tn)
        in_specs = [
            pl.BlockSpec((tm, K), lambda i, j: (i, 0)),
            pl.BlockSpec((K, tn), lambda i, j: (0, j)),
        ]
        if bias is not None:
            in_specs.append(pl.BlockSpec((1, tn), lambda i, j: (0, j)))
            kernel = _matmul_fullk_bias_kernel
        else:
            kernel = _matmul_fullk_kernel
        out_specs = pl.BlockSpec((tm, tn), lambda i, j: (i, j))
        scratch_shapes = []
        dims = ("parallel", "parallel")
    else:
        tk = _pick_tile(K, tk)
        grid = (M // tm, N // tn, K // tk)
        in_specs = [
            pl.BlockSpec((tm, tk), lambda i, j, k: (i, k)),
            pl.BlockSpec((tk, tn), lambda i, j, k: (k, j)),
        ]
        if bias is not None:
            in_specs.append(pl.BlockSpec((1, tn), lambda i, j, k: (0, j)))
            kernel = _matmul_kloop_bias_kernel
        else:
            kernel = _matmul_kloop_kernel
        out_specs = pl.BlockSpec((tm, tn), lambda i, j, k: (i, j))
        scratch_shapes = [pltpu.VMEM((tm, tn), jnp.float32)]
        dims = ("parallel", "parallel", "arbitrary")

    return pl.pallas_call(
        kernel,
        out_shape=jax.ShapeDtypeStruct((M, N), out_dtype),
        grid=grid,
        in_specs=in_specs,
        out_specs=out_specs,
        scratch_shapes=scratch_shapes,
        compiler_params=pltpu.CompilerParams(
            dimension_semantics=dims, vmem_limit_bytes=VMEM_LIMIT),
        cost_estimate=cost,
    )(*args)


# ---------------------------------------------------------------------------
# Prologue kernel: RMSNorm + RoPE on Q and K (done ONCE per token, bf16 out)
# ---------------------------------------------------------------------------
def _norm_rope_kernel(q_ref, k_ref, w1_ref, w2_ref, qs_ref, ks_ref,
                      qo_ref, ko_ref):
    D = q_ref.shape[-1]
    w1 = w1_ref[...].astype(jnp.float32)
    w2 = w2_ref[...].astype(jnp.float32)

    def nr(xv, scale):
        # RMSNorm (f32) + RoPE in the half-split channel layout:
        #   out = w1 * xn + w2 * roll(xn, D//2)   (pair swap == half roll, XLU)
        x = xv.astype(jnp.float32)
        rrms = jax.lax.rsqrt(jnp.mean(x * x, axis=-1, keepdims=True) + 1e-6)
        xn = x * rrms * scale
        return (w1 * xn + w2 * pltpu.roll(xn, D // 2, 1)).astype(jnp.bfloat16)

    qo_ref[...] = nr(q_ref[...], qs_ref[...])   # 1/sqrt(D) folded into qs
    ko_ref[...] = nr(k_ref[...], ks_ref[...])


def norm_rope(qkv, w1, w2, q_scale, k_scale, num_heads, *, tl=256):
    """qkv: (B, L, 3*H*D) bf16 packed slab (q/k channels half-split per head).
    Returns normed/roped q and k slabs of shape (B, L, H*D), bf16."""
    B, L, threeHD = qkv.shape
    H = num_heads
    D = threeHD // (3 * H)
    tl = _pick_tile(L, tl)
    nl = L // tl
    grid = (B, nl, H)   # H innermost: rope coeff block (b, li, 0) stays resident

    def q_map(b, li, h): return (b, li, h)
    def k_map(b, li, h): return (b, li, H + h)
    def w_map(b, li, h): return (b, li, 0)
    def s_map(b, li, h): return (0, 0)
    def o_map(b, li, h): return (b, li, h)

    out_shape = (jax.ShapeDtypeStruct((B, L, H * D), jnp.bfloat16),
                 jax.ShapeDtypeStruct((B, L, H * D), jnp.bfloat16))
    return pl.pallas_call(
        _norm_rope_kernel,
        out_shape=out_shape,
        grid=grid,
        in_specs=[
            pl.BlockSpec((None, tl, D), q_map),   # q tile from packed qkv
            pl.BlockSpec((None, tl, D), k_map),   # k tile from packed qkv
            pl.BlockSpec((None, tl, D), w_map),   # rope w1 (bf16)
            pl.BlockSpec((None, tl, D), w_map),   # rope w2 (bf16)
            pl.BlockSpec((1, D), s_map),          # q scale (incl. 1/sqrt(D))
            pl.BlockSpec((1, D), s_map),          # k scale
        ],
        out_specs=(pl.BlockSpec((None, tl, D), o_map),
                   pl.BlockSpec((None, tl, D), o_map)),
        compiler_params=pltpu.CompilerParams(
            dimension_semantics=("parallel", "parallel", "parallel"),
            vmem_limit_bytes=VMEM_LIMIT),
    )(qkv, qkv, w1, w2, q_scale, k_scale)


# ---------------------------------------------------------------------------
# Flash attention kernel (pure bf16 streams; norm/RoPE already applied)
# ---------------------------------------------------------------------------
def _flash_attn_kernel(q_ref, k_ref, v_ref, o_ref, m_ref, l_ref, acc_ref):
    ki = pl.program_id(3)
    nk = pl.num_programs(3)

    @pl.when(ki == 0)
    def _init():
        m_ref[...] = jnp.full(m_ref.shape, -jnp.inf, jnp.float32)
        l_ref[...] = jnp.zeros(l_ref.shape, jnp.float32)
        acc_ref[...] = jnp.zeros(acc_ref.shape, jnp.float32)

    # s = q @ k^T without materializing a transposed K tile.
    s = jax.lax.dot_general(q_ref[...], k_ref[...], (((1,), (1,)), ((), ())),
                            preferred_element_type=jnp.float32)      # (tq, tk)

    m_prev = m_ref[...]
    m_new = jnp.maximum(m_prev, jnp.max(s, axis=-1, keepdims=True))
    alpha = jnp.exp(m_prev - m_new)
    p = jnp.exp(s - m_new)
    l_ref[...] = alpha * l_ref[...] + jnp.sum(p, axis=-1, keepdims=True)
    acc_ref[...] = alpha * acc_ref[...] + jnp.dot(
        p.astype(jnp.bfloat16), v_ref[...], preferred_element_type=jnp.float32)
    m_ref[...] = m_new

    @pl.when(ki == nk - 1)
    def _finalize():
        inv = pl.reciprocal(l_ref[...], approx=True)
        o_ref[...] = (acc_ref[...] * inv).astype(o_ref.dtype)


def flash_attention(q_r, k_r, qkv, num_heads, *, tq=256, tk=512):
    """q_r, k_r: (B, L, H*D) bf16 normed/roped slabs.  qkv: packed (B, L, 3*H*D)
    bf16 slab (V read from it directly).  Returns (B, L, H*D) bf16."""
    B, L, HD = q_r.shape
    H = num_heads
    D = HD // H
    tq = _pick_tile(L, tq)
    # Prefer nk=1 (full-length KV residency across q tiles of a head) when the
    # per-head K/V blocks and the (tq, L) score temporaries comfortably fit VMEM.
    if L <= 4096:
        tk = L
    else:
        tk = _pick_tile(L, tk)
    nq, nk = L // tq, L // tk
    grid = (B, H, nq, nk)

    def q_map(b, h, qi, ki): return (b, qi, h)
    def k_map(b, h, qi, ki): return (b, ki, h)
    def v_map(b, h, qi, ki): return (b, ki, 2 * H + h)
    def o_map(b, h, qi, ki): return (b, qi, h)

    if nk > 1:  # deepen KV pipelining only when the KV loop actually streams
        k_spec = pl.BlockSpec((None, tk, D), k_map, pipeline_mode=pl.Buffered(3))
        v_spec = pl.BlockSpec((None, tk, D), v_map, pipeline_mode=pl.Buffered(3))
    else:
        k_spec = pl.BlockSpec((None, tk, D), k_map)
        v_spec = pl.BlockSpec((None, tk, D), v_map)

    kv_reads = nq if nk > 1 else 1
    cost = pl.CostEstimate(
        flops=4 * B * H * L * L * D,
        transcendentals=B * H * L * L,
        bytes_accessed=B * H * (L * D * 2 + 2 * kv_reads * L * D * 2)
                       + B * L * H * D * 2,
    )
    return pl.pallas_call(
        _flash_attn_kernel,
        out_shape=jax.ShapeDtypeStruct((B, L, H * D), jnp.bfloat16),
        grid=grid,
        in_specs=[
            pl.BlockSpec((None, tq, D), q_map),   # roped q tile
            k_spec,                               # roped k tile
            v_spec,                               # v tile from packed qkv
        ],
        out_specs=pl.BlockSpec((None, tq, D), o_map),
        scratch_shapes=[
            pltpu.VMEM((tq, 1), jnp.float32),     # running max
            pltpu.VMEM((tq, 1), jnp.float32),     # running sum
            pltpu.VMEM((tq, D), jnp.float32),     # output accumulator
        ],
        compiler_params=pltpu.CompilerParams(
            dimension_semantics=("parallel", "parallel", "parallel", "arbitrary"),
            vmem_limit_bytes=VMEM_LIMIT),
        cost_estimate=cost,
    )(q_r, k_r, qkv)


# ---------------------------------------------------------------------------
# Host-side (one-time) parameter prep + per-call pe decomposition
# ---------------------------------------------------------------------------
def prepare_params(params, num_heads):
    """Pre-transpose weights, fold the RoPE pair interleave into the qkv weight
    columns (q/k heads become [even dims..., odd dims...]), fold 1/sqrt(D) into
    the q RMSNorm scale, cast MXU weights to bf16.  Done once, off the hot path."""
    w_qkv = params["w_qkv"]            # (3*dim, dim), torch (out, in) convention
    w_proj = params["w_proj"]          # (dim, dim)
    dim = w_qkv.shape[1]
    D = dim // num_heads
    half = jnp.concatenate([jnp.arange(0, D, 2), jnp.arange(1, D, 2)])  # de-interleave
    qk_perm = (jnp.arange(2 * num_heads)[:, None] * D + half[None, :]).reshape(-1)
    v_perm = 2 * num_heads * D + jnp.arange(num_heads * D)
    perm = jnp.concatenate([qk_perm, v_perm])
    # TODO(synk): if qkv_bias=True, permute the qkv bias with `perm` and pass it
    # through the bias path of `matmul` (module default is qkv_bias=False).
    return {
        "w_qkv_t": w_qkv.T[:, perm].astype(jnp.bfloat16),      # (dim, 3*dim)
        "w_proj_t": w_proj.T.astype(jnp.bfloat16),             # (dim, dim)
        "b_proj": params["b_proj"].astype(jnp.float32),
        "q_scale": (params["q_scale"][half] / math.sqrt(D)).reshape(1, D)
                   .astype(jnp.float32),
        "k_scale": params["k_scale"][half].reshape(1, D).astype(jnp.float32),
    }


def rope_coeffs_from_pe(pe):
    """pe: (B, 1, L, D/2, 2, 2) -> w1, w2 of shape (B, L, D) bf16 in the
    half-split layout, so that rope(x) = w1*x + w2*roll(x, D//2)."""
    pe_b = pe[:, 0].astype(jnp.float32)       # (B, L, D/2, 2, 2)
    a = pe_b[..., 0, 0]
    b = pe_b[..., 0, 1]
    c = pe_b[..., 1, 0]
    d = pe_b[..., 1, 1]
    w1 = jnp.concatenate([a, d], axis=-1).astype(jnp.bfloat16)   # (B, L, D)
    w2 = jnp.concatenate([b, c], axis=-1).astype(jnp.bfloat16)   # (B, L, D)
    return w1, w2


@partial(jax.jit, static_argnums=(3,))
def self_attention_forward(x, pe, prepared, num_heads):
    B, L, dim = x.shape
    # qkv = self.qkv(x)   (qkv_bias=False; q/k channels half-split per head)
    qkv = matmul(x.reshape(B * L, dim), prepared["w_qkv_t"],
                 out_dtype=jnp.bfloat16).reshape(B, L, 3 * dim)

    # RMSNorm + RoPE hoisted out of attention (done once per token).
    w1, w2 = rope_coeffs_from_pe(pe)
    q_r, k_r = norm_rope(qkv, w1, w2, prepared["q_scale"], prepared["k_scale"],
                         num_heads)

    # scaled_dot_product_attention, output already (B, L, H*D)
    attn = flash_attention(q_r, k_r, qkv, num_heads)

    # x = self.proj(x)
    out = matmul(attn.reshape(B * L, dim), prepared["w_proj_t"],
                 bias=prepared["b_proj"], out_dtype=jnp.float32)
    return out.reshape(B, L, dim)


# ---------------------------------------------------------------------------
# Pure-JAX reference (mirrors the PyTorch module exactly, f32)
# ---------------------------------------------------------------------------
def reference_forward(x, pe, params, num_heads):
    B, L, dim = x.shape
    Dh = dim // num_heads
    qkv = x @ params["w_qkv"].T
    qkv = qkv.reshape(B, L, 3, num_heads, Dh)
    q = jnp.transpose(qkv[:, :, 0], (0, 2, 1, 3))
    k = jnp.transpose(qkv[:, :, 1], (0, 2, 1, 3))
    v = jnp.transpose(qkv[:, :, 2], (0, 2, 1, 3))

    def rmsnorm(t, scale):
        rrms = jax.lax.rsqrt(jnp.mean(t * t, axis=-1, keepdims=True) + 1e-6)
        return t * rrms * scale

    q = rmsnorm(q, params["q_scale"])
    k = rmsnorm(k, params["k_scale"])

    def apply_rope(t):
        t_ = t.reshape(B, num_heads, L, Dh // 2, 1, 2)
        out = pe[..., 0] * t_[..., 0] + pe[..., 1] * t_[..., 1]
        return out.reshape(B, num_heads, L, Dh)

    q, k = apply_rope(q), apply_rope(k)
    s = jnp.einsum("bhld,bhmd->bhlm", q, k) / math.sqrt(Dh)
    attn = jax.nn.softmax(s, axis=-1)
    o = jnp.einsum("bhlm,bhmd->bhld", attn, v)
    o = jnp.transpose(o, (0, 2, 1, 3)).reshape(B, L, dim)
    return o @ params["w_proj"].T + params["b_proj"]


# ---------------------------------------------------------------------------
def make_pe(B, L, Dh, theta=10000.0):
    pos = jnp.arange(L, dtype=jnp.float32)
    scale = jnp.arange(0, Dh, 2, dtype=jnp.float32) / Dh
    omega = 1.0 / (theta ** scale)                       # (Dh/2,)
    out = pos[:, None] * omega[None, :]                  # (L, Dh/2)
    cos, sin = jnp.cos(out), jnp.sin(out)
    mat = jnp.stack([cos, -sin, sin, cos], axis=-1).reshape(L, Dh // 2, 2, 2)
    return jnp.broadcast_to(mat[None, None], (B, 1, L, Dh // 2, 2, 2))


if __name__ == "__main__":
    # Small but TPU-tile-aligned shapes: head_dim=128 (lane width), L=256.
    B, L, num_heads, head_dim = 2, 256, 2, 128
    dim = num_heads * head_dim

    key = jax.random.PRNGKey(0)
    k_x, k_qkv, k_proj, k_bp, k_qs, k_ks = jax.random.split(key, 6)

    x = jax.random.normal(k_x, (B, L, dim), dtype=jnp.float32)
    pe = make_pe(B, L, head_dim)

    params = {
        "w_qkv": jax.random.normal(k_qkv, (3 * dim, dim), jnp.float32) * 0.05,
        "w_proj": jax.random.normal(k_proj, (dim, dim), jnp.float32) * 0.05,
        "b_proj": jax.random.normal(k_bp, (dim,), jnp.float32) * 0.05,
        "q_scale": 1.0 + 0.1 * jax.random.normal(k_qs, (head_dim,), jnp.float32),
        "k_scale": 1.0 + 0.1 * jax.random.normal(k_ks, (head_dim,), jnp.float32),
    }

    prepared = prepare_params(params, num_heads)

    out = self_attention_forward(x, pe, prepared, num_heads)
    out = jax.block_until_ready(out)

    ref = reference_forward(x, pe, params, num_heads)
    assert out.shape == (B, L, dim)
    max_err = float(jnp.max(jnp.abs(out - ref)))
    # bf16 MXU inputs / bf16 RoPE coeffs -> loosened tolerance vs f32 reference.
    assert jnp.allclose(out, ref, atol=5e-2, rtol=5e-2), max_err

    print("KERNEL_OK")
</pallas_src>

<mosaic_0001>
module attributes {stable_mosaic.version = 11 : i64} {
  func.func @_matmul_fullk_kernel(%arg0: i32, %arg1: i32, %arg2: memref<256x256xbf16, #tpu.memory_space<vmem>>, %arg3: memref<256x384xbf16, #tpu.memory_space<vmem>>, %arg4: memref<256x384xbf16, #tpu.memory_space<vmem>>) attributes {dimension_semantics = [#tpu.dimension_semantics<parallel>, #tpu.dimension_semantics<parallel>], iteration_bounds = array<i64: 2, 2>, scalar_prefetch = 0 : i64, scratch_operands = 0 : i64, tpu.core_type = #tpu.core_type<tc>, window_params = [{transform_indices = @transform_0, window_bounds = array<i64: 256, 256>}, {transform_indices = @transform_1, window_bounds = array<i64: 256, 384>}, {transform_indices = @transform_2, window_bounds = array<i64: 256, 384>}]} {
    %c0 = arith.constant 0 : index
    %c0_0 = arith.constant 0 : index
    %0 = vector.load %arg2[%c0, %c0_0] : memref<256x256xbf16, #tpu.memory_space<vmem>>, vector<256x256xbf16>
    %c0_1 = arith.constant 0 : index
    %c0_2 = arith.constant 0 : index
    %1 = vector.load %arg3[%c0_1, %c0_2] : memref<256x384xbf16, #tpu.memory_space<vmem>>, vector<256x384xbf16>
    %cst = arith.constant dense<0.000000e+00> : vector<256x384xf32>
    %2 = tpu.matmul %0, %1, %cst {dimension_numbers = #tpu.dot_dimension_numbers<[1], [0], [0], [1], [0, 0, 1, 1], [], []>} : vector<256x256xbf16>, vector<256x384xbf16>, vector<256x384xf32> -> vector<256x384xf32>
    %3 = arith.truncf %2 : vector<256x384xf32> to vector<256x384xbf16>
    %c0_3 = arith.constant 0 : index
    %c0_4 = arith.constant 0 : index
    %4 = vector.load %arg4[%c0_3, %c0_4] : memref<256x384xbf16, #tpu.memory_space<vmem>>, vector<256x384xbf16>
    tpu.vector_store %arg4[%c0_3, %c0_4], %3 {strides = array<i32>} : memref<256x384xbf16, #tpu.memory_space<vmem>>, vector<256x384xbf16>,
    return
  }
  func.func @transform_0(%arg0: i32, %arg1: i32) -> (i32, i32) {
    %c0_i32 = arith.constant 0 : i32
    %c0_i32_0 = arith.constant 0 : i32
    return %arg0, %c0_i32 : i32, i32
  }
  func.func @transform_1(%arg0: i32, %arg1: i32) -> (i32, i32) {
    %c0_i32 = arith.constant 0 : i32
    %c0_i32_0 = arith.constant 0 : i32
    return %c0_i32, %arg1 : i32, i32
  }
  func.func @transform_2(%arg0: i32, %arg1: i32) -> (i32, i32) {
    %c0_i32 = arith.constant 0 : i32
    return %arg0, %arg1 : i32, i32
  }
}

module attributes {stable_mosaic.version = 11 : i64} {
  func.func @_norm_rope_kernel(%arg0: i32, %arg1: i32, %arg2: i32, %arg3: memref<1x256x128xbf16, #tpu.memory_space<vmem>>, %arg4: memref<1x256x128xbf16, #tpu.memory_space<vmem>>, %arg5: memref<1x256x128xbf16, #tpu.memory_space<vmem>>, %arg6: memref<1x256x128xbf16, #tpu.memory_space<vmem>>, %arg7: memref<1x128xf32, #tpu.memory_space<vmem>>, %arg8: memref<1x128xf32, #tpu.memory_space<vmem>>, %arg9: memref<1x256x128xbf16, #tpu.memory_space<vmem>>, %arg10: memref<1x256x128xbf16, #tpu.memory_space<vmem>>) attributes {dimension_semantics = [#tpu.dimension_semantics<parallel>, #tpu.dimension_semantics<parallel>, #tpu.dimension_semantics<parallel>], iteration_bounds = array<i64: 2, 1, 2>, scalar_prefetch = 0 : i64, scratch_operands = 0 : i64, tpu.core_type = #tpu.core_type<tc>, window_params = [{transform_indices = @transform_0, window_bounds = array<i64: 1, 256, 128>}, {transform_indices = @transform_1, window_bounds = array<i64: 1, 256, 128>}, {transform_indices = @transform_2, window_bounds = array<i64: 1, 256, 128>}, {transform_indices = @transform_3, window_bounds = array<i64: 1, 256, 128>}, {pipeline_mode = #tpu.pipeline_mode<synchronous>, transform_indices = @transform_4, window_bounds = array<i64: 1, 128>}, {pipeline_mode = #tpu.pipeline_mode<synchronous>, transform_indices = @transform_5, window_bounds = array<i64: 1, 128>}, {transform_indices = @transform_6, window_bounds = array<i64: 1, 256, 128>}, {transform_indices = @transform_7, window_bounds = array<i64: 1, 256, 128>}]} {
    %c0 = arith.constant 0 : index
    %c0_0 = arith.constant 0 : index
    %c0_1 = arith.constant 0 : index
    %0 = vector.load %arg5[%c0, %c0_0, %c0_1] : memref<1x256x128xbf16, #tpu.memory_space<vmem>>, vector<1x256x128xbf16>
    %1 = vector.shape_cast %0 : vector<1x256x128xbf16> to vector<256x128xbf16>
    %2 = arith.extf %1 : vector<256x128xbf16> to vector<256x128xf32>
    %c0_2 = arith.constant 0 : index
    %c0_3 = arith.constant 0 : index
    %c0_4 = arith.constant 0 : index
    %3 = vector.load %arg6[%c0_2, %c0_3, %c0_4] : memref<1x256x128xbf16, #tpu.memory_space<vmem>>, vector<1x256x128xbf16>
    %4 = vector.shape_cast %3 : vector<1x256x128xbf16> to vector<256x128xbf16>
    %5 = arith.extf %4 : vector<256x128xbf16> to vector<256x128xf32>
    %c0_5 = arith.constant 0 : index
    %c0_6 = arith.constant 0 : index
    %c0_7 = arith.constant 0 : index
    %6 = vector.load %arg3[%c0_5, %c0_6, %c0_7] : memref<1x256x128xbf16, #tpu.memory_space<vmem>>, vector<1x256x128xbf16>
    %7 = vector.shape_cast %6 : vector<1x256x128xbf16> to vector<256x128xbf16>
    %c0_8 = arith.constant 0 : index
    %c0_9 = arith.constant 0 : index
    %8 = vector.load %arg7[%c0_8, %c0_9] : memref<1x128xf32, #tpu.memory_space<vmem>>, vector<1x128xf32>
    %9 = arith.extf %7 : vector<256x128xbf16> to vector<256x128xf32>
    %10 = arith.mulf %9, %9 : vector<256x128xf32>
    %cst = arith.constant dense<0.000000e+00> : vector<256xf32>
    %11 = vector.multi_reduction <add>, %10, %cst [1] : vector<256x128xf32> to vector<256xf32>
    %12 = vector.shape_cast %11 : vector<256xf32> to vector<256x1xf32>
    %cst_10 = arith.constant 1.280000e+02 : f32
    %13 = vector.broadcast %cst_10 : f32 to vector<256x1xf32>
    %14 = arith.divf %12, %13 : vector<256x1xf32>
    %cst_11 = arith.constant 9.99999997E-7 : f32
    %15 = vector.broadcast %cst_11 : f32 to vector<256x1xf32>
    %16 = arith.addf %14, %15 : vector<256x1xf32>
    %17 = math.rsqrt %16 : vector<256x1xf32>
    %18 = vector.broadcast %17 : vector<256x1xf32> to vector<256x128xf32>
    %19 = arith.mulf %9, %18 : vector<256x128xf32>
    %20 = vector.broadcast %8 : vector<1x128xf32> to vector<256x128xf32>
    %21 = arith.mulf %19, %20 : vector<256x128xf32>
    %22 = arith.mulf %2, %21 : vector<256x128xf32>
    %c64_i32 = arith.constant 64 : i32
    %23 = tpu.dynamic_rotate %21 by %c64_i32 dim 1 : vector<256x128xf32>, i32 -> vector<256x128xf32>
    %24 = arith.mulf %5, %23 : vector<256x128xf32>
    %25 = arith.addf %22, %24 : vector<256x128xf32>
    %26 = arith.truncf %25 : vector<256x128xf32> to vector<256x128xbf16>
    %c0_12 = arith.constant 0 : index
    %c0_13 = arith.constant 0 : index
    %c0_14 = arith.constant 0 : index
    %27 = vector.load %arg9[%c0_12, %c0_13, %c0_14] : memref<1x256x128xbf16, #tpu.memory_space<vmem>>, vector<1x256x128xbf16>
    %28 = vector.shape_cast %27 : vector<1x256x128xbf16> to vector<256x128xbf16>
    %29 = vector.shape_cast %26 : vector<256x128xbf16> to vector<1x256x128xbf16>
    tpu.vector_store %arg9[%c0_12, %c0_13, %c0_14], %29 {strides = array<i32>} : memref<1x256x128xbf16, #tpu.memory_space<vmem>>, vector<1x256x128xbf16>,
    %c0_15 = arith.constant 0 : index
    %c0_16 = arith.constant 0 : index
    %c0_17 = arith.constant 0 : index
    %30 = vector.load %arg4[%c0_15, %c0_16, %c0_17] : memref<1x256x128xbf16, #tpu.memory_space<vmem>>, vector<1x256x128xbf16>
    %31 = vector.shape_cast %30 : vector<1x256x128xbf16> to vector<256x128xbf16>
    %c0_18 = arith.constant 0 : index
    %c0_19 = arith.constant 0 : index
    %32 = vector.load %arg8[%c0_18, %c0_19] : memref<1x128xf32, #tpu.memory_space<vmem>>, vector<1x128xf32>
    %33 = arith.extf %31 : vector<256x128xbf16> to vector<256x128xf32>
    %34 = arith.mulf %33, %33 : vector<256x128xf32>
    %cst_20 = arith.constant dense<0.000000e+00> : vector<256xf32>
    %35 = vector.multi_reduction <add>, %34, %cst_20 [1] : vector<256x128xf32> to vector<256xf32>
    %36 = vector.shape_cast %35 : vector<256xf32> to vector<256x1xf32>
    %cst_21 = arith.constant 1.280000e+02 : f32
    %37 = vector.broadcast %cst_21 : f32 to vector<256x1xf32>
    %38 = arith.divf %36, %37 : vector<256x1xf32>
    %cst_22 = arith.constant 9.99999997E-7 : f32
    %39 = vector.broadcast %cst_22 : f32 to vector<256x1xf32>
    %40 = arith.addf %38, %39 : vector<256x1xf32>
    %41 = math.rsqrt %40 : vector<256x1xf32>
    %42 = vector.broadcast %41 : vector<256x1xf32> to vector<256x128xf32>
    %43 = arith.mulf %33, %42 : vector<256x128xf32>
    %44 = vector.broadcast %32 : vector<1x128xf32> to vector<256x128xf32>
    %45 = arith.mulf %43, %44 : vector<256x128xf32>
    %46 = arith.mulf %2, %45 : vector<256x128xf32>
    %c64_i32_23 = arith.constant 64 : i32
    %47 = tpu.dynamic_rotate %45 by %c64_i32_23 dim 1 : vector<256x128xf32>, i32 -> vector<256x128xf32>
    %48 = arith.mulf %5, %47 : vector<256x128xf32>
    %49 = arith.addf %46, %48 : vector<256x128xf32>
    %50 = arith.truncf %49 : vector<256x128xf32> to vector<256x128xbf16>
    %c0_24 = arith.constant 0 : index
    %c0_25 = arith.constant 0 : index
    %c0_26 = arith.constant 0 : index
    %51 = vector.load %arg10[%c0_24, %c0_25, %c0_26] : memref<1x256x128xbf16, #tpu.memory_space<vmem>>, vector<1x256x128xbf16>
    %52 = vector.shape_cast %51 : vector<1x256x128xbf16> to vector<256x128xbf16>
    %53 = vector.shape_cast %50 : vector<256x128xbf16> to vector<1x256x128xbf16>
    tpu.vector_store %arg10[%c0_24, %c0_25, %c0_26], %53 {strides = array<i32>} : memref<1x256x128xbf16, #tpu.memory_space<vmem>>, vector<1x256x128xbf16>,
    return
  }
  func.func @transform_0(%arg0: i32, %arg1: i32, %arg2: i32) -> (i32, i32, i32) {
    %c0_i32 = arith.constant 0 : i32
    return %arg0, %arg1, %arg2 : i32, i32, i32
  }
  func.func @transform_1(%arg0: i32, %arg1: i32, %arg2: i32) -> (i32, i32, i32) {
    %c2_i32 = arith.constant 2 : i32
    %0 = arith.addi %c2_i32, %arg2 : i32
    %c0_i32 = arith.constant 0 : i32
    return %arg0, %arg1, %0 : i32, i32, i32
  }
  func.func @transform_2(%arg0: i32, %arg1: i32, %arg2: i32) -> (i32, i32, i32) {
    %c0_i32 = arith.constant 0 : i32
    %c0_i32_0 = arith.constant 0 : i32
    return %arg0, %arg1, %c0_i32 : i32, i32, i32
  }
  func.func @transform_3(%arg0: i32, %arg1: i32, %arg2: i32) -> (i32, i32, i32) {
    %c0_i32 = arith.constant 0 : i32
    %c0_i32_0 = arith.constant 0 : i32
    return %arg0, %arg1, %c0_i32 : i32, i32, i32
  }
  func.func @transform_4(%arg0: i32, %arg1: i32, %arg2: i32) -> (i32, i32) {
    %c0_i32 = arith.constant 0 : i32
    %c0_i32_0 = arith.constant 0 : i32
    %c0_i32_1 = arith.constant 0 : i32
    return %c0_i32, %c0_i32_0 : i32, i32
  }
  func.func @transform_5(%arg0: i32, %arg1: i32, %arg2: i32) -> (i32, i32) {
    %c0_i32 = arith.constant 0 : i32
    %c0_i32_0 = arith.constant 0 : i32
    %c0_i32_1 = arith.constant 0 : i32
    return %c0_i32, %c0_i32_0 : i32, i32
  }
  func.func @transform_6(%arg0: i32, %arg1: i32, %arg2: i32) -> (i32, i32, i32) {
    %c0_i32 = arith.constant 0 : i32
    return %arg0, %arg1, %arg2 : i32, i32, i32
  }
  func.func @transform_7(%arg0: i32, %arg1: i32, %arg2: i32) -> (i32, i32, i32) {
    %c0_i32 = arith.constant 0 : i32
    return %arg0, %arg1, %arg2 : i32, i32, i32
  }
}

module attributes {stable_mosaic.version = 11 : i64} {
  func.func @_matmul_fullk_bias_kernel(%arg0: i32, %arg1: i32, %arg2: memref<256x256xbf16, #tpu.memory_space<vmem>>, %arg3: memref<256x256xbf16, #tpu.memory_space<vmem>>, %arg4: memref<1x256xf32, #tpu.memory_space<vmem>>, %arg5: memref<256x256xf32, #tpu.memory_space<vmem>>) attributes {dimension_semantics = [#tpu.dimension_semantics<parallel>, #tpu.dimension_semantics<parallel>], iteration_bounds = array<i64: 2, 1>, scalar_prefetch = 0 : i64, scratch_operands = 0 : i64, tpu.core_type = #tpu.core_type<tc>, window_params = [{transform_indices = @transform_0, window_bounds = array<i64: 256, 256>}, {transform_indices = @transform_1, window_bounds = array<i64: 256, 256>}, {transform_indices = @transform_2, window_bounds = array<i64: 1, 256>}, {transform_indices = @transform_3, window_bounds = array<i64: 256, 256>}]} {
    %c0 = arith.constant 0 : index
    %c0_0 = arith.constant 0 : index
    %0 = vector.load %arg2[%c0, %c0_0] : memref<256x256xbf16, #tpu.memory_space<vmem>>, vector<256x256xbf16>
    %c0_1 = arith.constant 0 : index
    %c0_2 = arith.constant 0 : index
    %1 = vector.load %arg3[%c0_1, %c0_2] : memref<256x256xbf16, #tpu.memory_space<vmem>>, vector<256x256xbf16>
    %cst = arith.constant dense<0.000000e+00> : vector<256x256xf32>
    %2 = tpu.matmul %0, %1, %cst {dimension_numbers = #tpu.dot_dimension_numbers<[1], [0], [0], [1], [0, 0, 1, 1], [], []>} : vector<256x256xbf16>, vector<256x256xbf16>, vector<256x256xf32> -> vector<256x256xf32>
    %c0_3 = arith.constant 0 : index
    %c0_4 = arith.constant 0 : index
    %3 = vector.load %arg4[%c0_3, %c0_4] : memref<1x256xf32, #tpu.memory_space<vmem>>, vector<1x256xf32>
    %4 = vector.broadcast %3 : vector<1x256xf32> to vector<256x256xf32>
    %5 = arith.addf %2, %4 : vector<256x256xf32>
    %c0_5 = arith.constant 0 : index
    %c0_6 = arith.constant 0 : index
    %6 = vector.load %arg5[%c0_5, %c0_6] : memref<256x256xf32, #tpu.memory_space<vmem>>, vector<256x256xf32>
    tpu.vector_store %arg5[%c0_5, %c0_6], %5 {strides = array<i32>} : memref<256x256xf32, #tpu.memory_space<vmem>>, vector<256x256xf32>,
    return
  }
  func.func @transform_0(%arg0: i32, %arg1: i32) -> (i32, i32) {
    %c0_i32 = arith.constant 0 : i32
    %c0_i32_0 = arith.constant 0 : i32
    return %arg0, %c0_i32 : i32, i32
  }
  func.func @transform_1(%arg0: i32, %arg1: i32) -> (i32, i32) {
    %c0_i32 = arith.constant 0 : i32
    %c0_i32_0 = arith.constant 0 : i32
    return %c0_i32, %arg1 : i32, i32
  }
  func.func @transform_2(%arg0: i32, %arg1: i32) -> (i32, i32) {
    %c0_i32 = arith.constant 0 : i32
    %c0_i32_0 = arith.constant 0 : i32
    return %c0_i32, %arg1 : i32, i32
  }
  func.func @transform_3(%arg0: i32, %arg1: i32) -> (i32, i32) {
    %c0_i32 = arith.constant 0 : i32
    return %arg0, %arg1 : i32, i32
  }
}

module attributes {stable_mosaic.version = 11 : i64} {
  func.func @_flash_attn_kernel(%arg0: i32, %arg1: i32, %arg2: i32, %arg3: i32, %arg4: memref<1x256x128xbf16, #tpu.memory_space<vmem>>, %arg5: memref<1x256x128xbf16, #tpu.memory_space<vmem>>, %arg6: memref<1x256x128xbf16, #tpu.memory_space<vmem>>, %arg7: memref<1x256x128xbf16, #tpu.memory_space<vmem>>, %arg8: memref<256x1xf32, #tpu.memory_space<vmem>>, %arg9: memref<256x1xf32, #tpu.memory_space<vmem>>, %arg10: memref<256x128xf32, #tpu.memory_space<vmem>>) attributes {dimension_semantics = [#tpu.dimension_semantics<parallel>, #tpu.dimension_semantics<parallel>, #tpu.dimension_semantics<parallel>, #tpu.dimension_semantics<arbitrary>], iteration_bounds = array<i64: 2, 2, 1, 1>, scalar_prefetch = 0 : i64, scratch_operands = 3 : i64, tpu.core_type = #tpu.core_type<tc>, window_params = [{transform_indices = @transform_0, window_bounds = array<i64: 1, 256, 128>}, {transform_indices = @transform_1, window_bounds = array<i64: 1, 256, 128>}, {transform_indices = @transform_2, window_bounds = array<i64: 1, 256, 128>}, {transform_indices = @transform_3, window_bounds = array<i64: 1, 256, 128>}]} {
    %c0_i32 = arith.constant 0 : i32
    %0 = arith.cmpi eq, %arg3, %c0_i32 : i32
    %1 = arith.extui %0 : i1 to i32
    %c0_i32_0 = arith.constant 0 : i32
    %2 = arith.cmpi ne, %1, %c0_i32_0 : i32
    scf.if %2 {
      %cst_26 = arith.constant 0xFF800000 : f32
      %36 = vector.broadcast %cst_26 : f32 to vector<256x1xf32>
      %c0_27 = arith.constant 0 : index
      %c0_28 = arith.constant 0 : index
      %37 = vector.load %arg8[%c0_27, %c0_28] : memref<256x1xf32, #tpu.memory_space<vmem>>, vector<256x1xf32>
      tpu.vector_store %arg8[%c0_27, %c0_28], %36 {strides = array<i32>} : memref<256x1xf32, #tpu.memory_space<vmem>>, vector<256x1xf32>,
      %cst_29 = arith.constant 0.000000e+00 : f32
      %38 = vector.broadcast %cst_29 : f32 to vector<256x1xf32>
      %c0_30 = arith.constant 0 : index
      %c0_31 = arith.constant 0 : index
      %39 = vector.load %arg9[%c0_30, %c0_31] : memref<256x1xf32, #tpu.memory_space<vmem>>, vector<256x1xf32>
      tpu.vector_store %arg9[%c0_30, %c0_31], %38 {strides = array<i32>} : memref<256x1xf32, #tpu.memory_space<vmem>>, vector<256x1xf32>,
      %cst_32 = arith.constant 0.000000e+00 : f32
      %40 = vector.broadcast %cst_32 : f32 to vector<256x128xf32>
      %c0_33 = arith.constant 0 : index
      %c0_34 = arith.constant 0 : index
      %41 = vector.load %arg10[%c0_33, %c0_34] : memref<256x128xf32, #tpu.memory_space<vmem>>, vector<256x128xf32>
      tpu.vector_store %arg10[%c0_33, %c0_34], %40 {strides = array<i32>} : memref<256x128xf32, #tpu.memory_space<vmem>>, vector<256x128xf32>,
    } else {
    }
    %c0 = arith.constant 0 : index
    %c0_1 = arith.constant 0 : index
    %c0_2 = arith.constant 0 : index
    %3 = vector.load %arg4[%c0, %c0_1, %c0_2] : memref<1x256x128xbf16, #tpu.memory_space<vmem>>, vector<1x256x128xbf16>
    %4 = vector.shape_cast %3 : vector<1x256x128xbf16> to vector<256x128xbf16>
    %c0_3 = arith.constant 0 : index
    %c0_4 = arith.constant 0 : index
    %c0_5 = arith.constant 0 : index
    %5 = vector.load %arg5[%c0_3, %c0_4, %c0_5] : memref<1x256x128xbf16, #tpu.memory_space<vmem>>, vector<1x256x128xbf16>
    %6 = vector.shape_cast %5 : vector<1x256x128xbf16> to vector<256x128xbf16>
    %cst = arith.constant dense<0.000000e+00> : vector<256x256xf32>
    %7 = tpu.matmul %4, %6, %cst {dimension_numbers = #tpu.dot_dimension_numbers<[1], [1], [0], [0], [0, 0, 1, 0], [], []>} : vector<256x128xbf16>, vector<256x128xbf16>, vector<256x256xf32> -> vector<256x256xf32>
    %c0_6 = arith.constant 0 : index
    %c0_7 = arith.constant 0 : index
    %8 = vector.load %arg8[%c0_6, %c0_7] : memref<256x1xf32, #tpu.memory_space<vmem>>, vector<256x1xf32>
    %cst_8 = arith.constant dense<0xFF800000> : vector<256xf32>
    %9 = vector.multi_reduction <maximumf>, %7, %cst_8 [1] : vector<256x256xf32> to vector<256xf32>
    %10 = vector.shape_cast %9 : vector<256xf32> to vector<256x1xf32>
    %11 = arith.maximumf %8, %10 : vector<256x1xf32>
    %12 = arith.subf %8, %11 : vector<256x1xf32>
    %13 = math.exp %12 : vector<256x1xf32>
    %14 = vector.broadcast %11 : vector<256x1xf32> to vector<256x256xf32>
    %15 = arith.subf %7, %14 : vector<256x256xf32>
    %16 = math.exp %15 : vector<256x256xf32>
    %c0_9 = arith.constant 0 : index
    %c0_10 = arith.constant 0 : index
    %17 = vector.load %arg9[%c0_9, %c0_10] : memref<256x1xf32, #tpu.memory_space<vmem>>, vector<256x1xf32>
    %18 = arith.mulf %13, %17 : vector<256x1xf32>
    %cst_11 = arith.constant dense<0.000000e+00> : vector<256xf32>
    %19 = vector.multi_reduction <add>, %16, %cst_11 [1] : vector<256x256xf32> to vector<256xf32>
    %20 = vector.shape_cast %19 : vector<256xf32> to vector<256x1xf32>
    %21 = arith.addf %18, %20 : vector<256x1xf32>
    %c0_12 = arith.constant 0 : index
    %c0_13 = arith.constant 0 : index
    %22 = vector.load %arg9[%c0_12, %c0_13] : memref<256x1xf32, #tpu.memory_space<vmem>>, vector<256x1xf32>
    tpu.vector_store %arg9[%c0_12, %c0_13], %21 {strides = array<i32>} : memref<256x1xf32, #tpu.memory_space<vmem>>, vector<256x1xf32>,
    %c0_14 = arith.constant 0 : index
    %c0_15 = arith.constant 0 : index
    %23 = vector.load %arg10[%c0_14, %c0_15] : memref<256x128xf32, #tpu.memory_space<vmem>>, vector<256x128xf32>
    %24 = vector.broadcast %13 : vector<256x1xf32> to vector<256x128xf32>
    %25 = arith.mulf %24, %23 : vector<256x128xf32>
    %26 = arith.truncf %16 : vector<256x256xf32> to vector<256x256xbf16>
    %c0_16 = arith.constant 0 : index
    %c0_17 = arith.constant 0 : index
    %c0_18 = arith.constant 0 : index
    %27 = vector.load %arg6[%c0_16, %c0_17, %c0_18] : memref<1x256x128xbf16, #tpu.memory_space<vmem>>, vector<1x256x128xbf16>
    %28 = vector.shape_cast %27 : vector<1x256x128xbf16> to vector<256x128xbf16>
    %cst_19 = arith.constant dense<0.000000e+00> : vector<256x128xf32>
    %29 = tpu.matmul %26, %28, %cst_19 {dimension_numbers = #tpu.dot_dimension_numbers<[1], [0], [0], [1], [0, 0, 1, 1], [], []>} : vector<256x256xbf16>, vector<256x128xbf16>, vector<256x128xf32> -> vector<256x128xf32>
    %30 = arith.addf %25, %29 : vector<256x128xf32>
    %c0_20 = arith.constant 0 : index
    %c0_21 = arith.constant 0 : index
    %31 = vector.load %arg10[%c0_20, %c0_21] : memref<256x128xf32, #tpu.memory_space<vmem>>, vector<256x128xf32>
    tpu.vector_store %arg10[%c0_20, %c0_21], %30 {strides = array<i32>} : memref<256x128xf32, #tpu.memory_space<vmem>>, vector<256x128xf32>,
    %c0_22 = arith.constant 0 : index
    %c0_23 = arith.constant 0 : index
    %32 = vector.load %arg8[%c0_22, %c0_23] : memref<256x1xf32, #tpu.memory_space<vmem>>, vector<256x1xf32>
    tpu.vector_store %arg8[%c0_22, %c0_23], %11 {strides = array<i32>} : memref<256x1xf32, #tpu.memory_space<vmem>>, vector<256x1xf32>,
    %c0_i32_24 = arith.constant 0 : i32
    %33 = arith.cmpi eq, %arg3, %c0_i32_24 : i32
    %34 = arith.extui %33 : i1 to i32
    %c0_i32_25 = arith.constant 0 : i32
    %35 = arith.cmpi ne, %34, %c0_i32_25 : i32
    scf.if %35 {
      %c0_26 = arith.constant 0 : index
      %c0_27 = arith.constant 0 : index
      %36 = vector.load %arg9[%c0_26, %c0_27] : memref<256x1xf32, #tpu.memory_space<vmem>>, vector<256x1xf32>
      %37 = tpu.reciprocal %36 {approx = true} : vector<256x1xf32> -> vector<256x1xf32>
      %c0_28 = arith.constant 0 : index
      %c0_29 = arith.constant 0 : index
      %38 = vector.load %arg10[%c0_28, %c0_29] : memref<256x128xf32, #tpu.memory_space<vmem>>, vector<256x128xf32>
      %39 = vector.broadcast %37 : vector<256x1xf32> to vector<256x128xf32>
      %40 = arith.mulf %38, %39 : vector<256x128xf32>
      %41 = arith.truncf %40 : vector<256x128xf32> to vector<256x128xbf16>
      %c0_30 = arith.constant 0 : index
      %c0_31 = arith.constant 0 : index
      %c0_32 = arith.constant 0 : index
      %42 = vector.load %arg7[%c0_30, %c0_31, %c0_32] : memref<1x256x128xbf16, #tpu.memory_space<vmem>>, vector<1x256x128xbf16>
      %43 = vector.shape_cast %42 : vector<1x256x128xbf16> to vector<256x128xbf16>
      %44 = vector.shape_cast %41 : vector<256x128xbf16> to vector<1x256x128xbf16>
      tpu.vector_store %arg7[%c0_30, %c0_31, %c0_32], %44 {strides = array<i32>} : memref<1x256x128xbf16, #tpu.memory_space<vmem>>, vector<1x256x128xbf16>,
    } else {
    }
    return
  }
  func.func @transform_0(%arg0: i32, %arg1: i32, %arg2: i32, %arg3: i32) -> (i32, i32, i32) {
    %c0_i32 = arith.constant 0 : i32
    return %arg0, %arg2, %arg1 : i32, i32, i32
  }
  func.func @transform_1(%arg0: i32, %arg1: i32, %arg2: i32, %arg3: i32) -> (i32, i32, i32) {
    %c0_i32 = arith.constant 0 : i32
    return %arg0, %arg3, %arg1 : i32, i32, i32
  }
  func.func @transform_2(%arg0: i32, %arg1: i32, %arg2: i32, %arg3: i32) -> (i32, i32, i32) {
    %c4_i32 = arith.constant 4 : i32
    %0 = arith.addi %c4_i32, %arg1 : i32
    %c0_i32 = arith.constant 0 : i32
    return %arg0, %arg3, %0 : i32, i32, i32
  }
  func.func @transform_3(%arg0: i32, %arg1: i32, %arg2: i32, %arg3: i32) -> (i32, i32, i32) {
    %c0_i32 = arith.constant 0 : i32
    return %arg0, %arg2, %arg1 : i32, i32, i32
  }
}

</mosaic_0001>

<bundles_post_ra>
// kernel: self_attention_forward.4
= control target key start
LH: loop header
LB: loop body
LE: loop exit
PB: predicated region body
PF: predicated region fallthrough
CT: control target
= control target key end

     0   :  { %s2581_s9 = smov 0   ;;  %s2583_s10 = smov 0   ;;  %s3115_s0 = inlined_call_operand.vmem [shape: bf16[512,256], index: 0, kind: input, shape index: {}]   ;;  %s3116_s1 = inlined_call_operand.vmem [shape: bf16[256,768], index: 1, kind: input, shape index: {}]   ;;  %s3117_s2 = inlined_call_operand.vmem [shape: bf16[512,768], index: 2, kind: output, shape index: {}]  }
   0x1   :  { %s2585_s11 = smov 0   ;;  %s2587_s12 = smov 0  }
   0x2   :  { %s2589_s13 = smov 0   ;;  %s2591_s14 = smov 0  }
   0x3   :  { %s2593_s15 = smov 0   ;;  %s2595_s16 = smov 0  }
   0x4   :  { %s2597_s17 = smov 0  }
   0x5 LB: > { %s1842_s18 = sadd.s32 4294967295, %s2564_s17   ;;  %s21_s19 = sadd.s32 1, %s2556_s15  ;;  %s2564_s17 = sphi %s2597_s17, %s12_s17   ;;  %s2560_s16 = sphi %s2595_s16, %s3126_s16   ;;  %s2556_s15 = sphi %s2593_s15, %s3125_s15   ;;  %s2552_s14 = sphi %s2591_s14, %s3124_s14   ;;  %s2548_s13 = sphi %s2589_s13, %s3123_s13   ;;  %s2544_s12 = sphi %s2587_s12, %s3122_s12   ;;  %s2540_s11 = sphi %s2585_s11, %s3121_s11   ;;  %s2536_s10 = sphi %s2583_s10, %s3120_s10   ;;  %s2532_s9 = sphi %s2581_s9, %s3119_s9  }
   0x6   : > { %p22_p0 = scmp.ge.s32.totalorder %s21_s19, 2  ;;  %s24_s20 = sadd.s32 1, %s2560_s16 }
   0x7   : > { %s57_s21 = sadd.s32 1, %s2544_s12  ;;  %p64_p1 = scmp.ne.s32.totalorder %s2544_s12, %s2540_s11 }
   0x8   : > { %s3128_s19 = smov (%p22_p0, %s21_s19), 0  ;;  %s3130_s20 = smov (!%p22_p0, %s24_s20), %s2560_s16 }
   0x9   : > { %s54_s22 = ssub.s32 %s2556_s15, %s3128_s19  ;;  %p65_p2 = scmp.eq.s32.totalorder %s2564_s17, 0 }
   0xa   : > { %p26_p3 = scmp.ge.s32.totalorder %s3130_s20, 2  ;;  %p55_p4 = scmp.eq.s32.totalorder %s54_s22, 0 }
   0xb   : > { %p66_p5 = por %p65_p2, %p64_p1  ;;  %s85_s23 = sadd.s32 1, %s2536_s10 }
   0xc   : > { %s3132_s20 = smov (%p26_p3, %s3130_s20), 0  ;;  %p95_p6 = scmp.ne.s32.totalorder %s2536_s10, %s2532_s9 }
   0xd   : > { %s2642_s24 = scalar_select %p55_p4, %s2544_s12, %s57_s21  }
   0xe   : > { %s80_s25 = ssub.s32 %s2560_s16, %s3132_s20  ;;  %p96_p7 = scmp.eq.s32.totalorder %s1842_s18, 3 }
   0xf   : > { %s82_s26 = sor.u32 %s80_s25, %s54_s22  ;;  %p1845_p10 = scmp.ge.s32.totalorder %s2564_s17, 4 }
  0x10   : > { %p83_p8 = scmp.eq.s32.totalorder %s82_s26, 0  ;;  %p2648_p9 = por %p96_p7, %p95_p6 }
  0x11   : > { %118 = sbr.rel (%p1845_p10) target bundleno = 66 (0x42), region = 16 }
  0x12   : > { %s2653_s28 = scalar_select %p83_p8, %s2536_s10, %s85_s23  }
  0x18   : > { %131 = sbr.rel (!%p66_p5) target bundleno = 66 (0x42), region = 24  ;;  %s133_s29 = sand.u32 (%p66_p5), 1, %s2544_s12  }
  0x19   : > { %s2128_s30 = smul.u32 (%p66_p5), 12, %s2556_s15 }
  0x1a   : > { %s2306_s3 = smul.u32 (%p66_p5), 384, %s133_s29 }
  0x1b   : > { %s2661_s6 = scalar_lea.vmem (%p66_p5), %s3116_s1, %s2128_s30 }
  0x1c   : > { %v153_v0 = vld [vmem:[%s2661_s6] sm:$0xff] (%p66_p5)  ;;  %v155_v1 = vld [vmem:[%s2661_s6 + $0x18] sm:$0xff] (%p66_p5)  ;;  %v157_v2 = vld [vmem:[%s2661_s6 + $0x30] sm:$0xff] (%p66_p5)  ;;  %s2666_s7 = scalar_lea.vmem (%p66_p5), [#allocation2], %s2306_s3 }
  0x1d   : > { %154 = vst [vmem:[%s2666_s7] sm:$0xff] (%p66_p5), %v153_v0  ;;  %156 = vst [vmem:[%s2666_s7 + $0xc] sm:$0xff] (%p66_p5), %v155_v1  ;;  %v159_v3 = vld [vmem:[%s2661_s6 + $0x48] sm:$0xff] (%p66_p5)  ;;  %v161_v4 = vld [vmem:[%s2661_s6 + $0x60] sm:$0xff] (%p66_p5) }
  0x1e   : > { %158 = vst [vmem:[%s2666_s7 + $0x18] sm:$0xff] (%p66_p5), %v157_v2  ;;  %v163_v5 = vld [vmem:[%s2661_s6 + $0x78] sm:$0xff] (%p66_p5)  ;;  %160 = vst [vmem:[%s2666_s7 + $0x24] sm:$0xff] (%p66_p5), %v159_v3  ;;  %v165_v6 = vld [vmem:[%s2661_s6 + $0x90] sm:$0xff] (%p66_p5) }
  0x1f   : > { %162 = vst [vmem:[%s2666_s7 + $0x30] sm:$0xff] %v161_v4  ;;  %164 = vst [vmem:[%s2666_s7 + $0x3c] sm:$0xff] %v163_v5  ;;  %v167_v7 = vld [vmem:[%s2661_s6 + $0xa8] sm:$0xff]  ;;  %v169_v8 = vld [vmem:[%s2661_s6 + $0xc0] sm:$0xff] }
  0x20   : > { %166 = vst [vmem:[%s2666_s7 + $0x48] sm:$0xff] %v165_v6  ;;  %168 = vst [vmem:[%s2666_s7 + $0x54] sm:$0xff] %v167_v7  ;;  %v171_v9 = vld [vmem:[%s2661_s6 + $0xd8] sm:$0xff]  ;;  %v173_v10 = vld [vmem:[%s2661_s6 + $0xf0] sm:$0xff] }
  0x21   : > { %170 = vst [vmem:[%s2666_s7 + $0x60] sm:$0xff] %v169_v8  ;;  %v175_v11 = vld [vmem:[%s2661_s6 + $0x108] sm:$0xff]  ;;  %172 = vst [vmem:[%s2666_s7 + $0x6c] sm:$0xff] %v171_v9  ;;  %v177_v12 = vld [vmem:[%s2661_s6 + $0x120] sm:$0xff] }
  0x22   : > { %174 = vst [vmem:[%s2666_s7 + $0x78] sm:$0xff] %v173_v10  ;;  %176 = vst [vmem:[%s2666_s7 + $0x84] sm:$0xff] %v175_v11  ;;  %v179_v13 = vld [vmem:[%s2661_s6 + $0x138] sm:$0xff]  ;;  %v181_v14 = vld [vmem:[%s2661_s6 + $0x150] sm:$0xff] }
  0x23   : > { %178 = vst [vmem:[%s2666_s7 + $0x90] sm:$0xff] %v177_v12  ;;  %180 = vst [vmem:[%s2666_s7 + $0x9c] sm:$0xff] %v179_v13  ;;  %v183_v15 = vld [vmem:[%s2661_s6 + $0x168] sm:$0xff]  ;;  %v185_v16 = vld [vmem:[%s2661_s6 + $0x180] sm:$0xff] }
  0x24   : > { %182 = vst [vmem:[%s2666_s7 + $0xa8] sm:$0xff] %v181_v14  ;;  %v187_v17 = vld [vmem:[%s2661_s6 + $0x198] sm:$0xff]  ;;  %184 = vst [vmem:[%s2666_s7 + $0xb4] sm:$0xff] %v183_v15  ;;  %v189_v18 = vld [vmem:[%s2661_s6 + $0x1b0] sm:$0xff] }
  0x25   : > { %186 = vst [vmem:[%s2666_s7 + $0xc0] sm:$0xff] %v185_v16  ;;  %188 = vst [vmem:[%s2666_s7 + $0xcc] sm:$0xff] %v187_v17  ;;  %v191_v19 = vld [vmem:[%s2661_s6 + $0x1c8] sm:$0xff]  ;;  %v193_v20 = vld [vmem:[%s2661_s6 + $0x1e0] sm:$0xff] }
  0x26   : > { %190 = vst [vmem:[%s2666_s7 + $0xd8] sm:$0xff] %v189_v18  ;;  %192 = vst [vmem:[%s2666_s7 + $0xe4] sm:$0xff] %v191_v19  ;;  %v195_v21 = vld [vmem:[%s2661_s6 + $0x1f8] sm:$0xff]  ;;  %v197_v22 = vld [vmem:[%s2661_s6 + $0x210] sm:$0xff] }
  0x27   : > { %194 = vst [vmem:[%s2666_s7 + $0xf0] sm:$0xff] %v193_v20  ;;  %v199_v23 = vld [vmem:[%s2661_s6 + $0x228] sm:$0xff]  ;;  %196 = vst [vmem:[%s2666_s7 + $0xfc] sm:$0xff] %v195_v21  ;;  %v201_v24 = vld [vmem:[%s2661_s6 + $0x240] sm:$0xff] }
  0x28   : > { %198 = vst [vmem:[%s2666_s7 + $0x108] sm:$0xff] %v197_v22  ;;  %200 = vst [vmem:[%s2666_s7 + $0x114] sm:$0xff] %v199_v23  ;;  %v203_v25 = vld [vmem:[%s2661_s6 + $0x258] sm:$0xff]  ;;  %v205_v26 = vld [vmem:[%s2661_s6 + $0x270] sm:$0xff] }
  0x29   : > { %202 = vst [vmem:[%s2666_s7 + $0x120] sm:$0xff] %v201_v24  ;;  %204 = vst [vmem:[%s2666_s7 + $0x12c] sm:$0xff] %v203_v25  ;;  %v207_v27 = vld [vmem:[%s2661_s6 + $0x288] sm:$0xff]  ;;  %v209_v28 = vld [vmem:[%s2661_s6 + $0x2a0] sm:$0xff] }
  0x2a   : > { %206 = vst [vmem:[%s2666_s7 + $0x138] sm:$0xff] %v205_v26  ;;  %v211_v29 = vld [vmem:[%s2661_s6 + $0x2b8] sm:$0xff]  ;;  %208 = vst [vmem:[%s2666_s7 + $0x144] sm:$0xff] %v207_v27  ;;  %v213_v30 = vld [vmem:[%s2661_s6 + $0x2d0] sm:$0xff] }
  0x2b   : > { %210 = vst [vmem:[%s2666_s7 + $0x150] sm:$0xff] %v209_v28  ;;  %212 = vst [vmem:[%s2666_s7 + $0x15c] sm:$0xff] %v211_v29  ;;  %v215_v31 = vld [vmem:[%s2661_s6 + $0x2e8] sm:$0xff]  ;;  %v1849_v33 = vld [vmem:[%s2661_s6 + $0x20] sm:$0xf] }
  0x2c   : > { %v1847_v32 = vld [vmem:[%s2661_s6 + $0x8] sm:$0xf]  ;;  %214 = vst [vmem:[%s2666_s7 + $0x168] sm:$0xff] %v213_v30  ;;  %216 = vst [vmem:[%s2666_s7 + $0x174] sm:$0xff] %v215_v31  ;;  %v1851_v34 = vld [vmem:[%s2661_s6 + $0x38] sm:$0xf] }
  0x2d   : > { %1848 = vst [vmem:[%s2666_s7 + $0x8] sm:$0xf] %v1847_v32  ;;  %v1853_v35 = vld [vmem:[%s2661_s6 + $0x50] sm:$0xf]  ;;  %1850 = vst [vmem:[%s2666_s7 + $0x14] sm:$0xf] %v1849_v33 }
  0x2e   : > { %1852 = vst [vmem:[%s2666_s7 + $0x20] sm:$0xf] %v1851_v34  ;;  %1854 = vst [vmem:[%s2666_s7 + $0x2c] sm:$0xf] %v1853_v35  ;;  %v1855_v36 = vld [vmem:[%s2661_s6 + $0x68] sm:$0xf] }
  0x2f   : > { %v1857_v37 = vld [vmem:[%s2661_s6 + $0x80] sm:$0xf]  ;;  %v1859_v38 = vld [vmem:[%s2661_s6 + $0x98] sm:$0xf]  ;;  %1856 = vst [vmem:[%s2666_s7 + $0x38] sm:$0xf] %v1855_v36 }
  0x30   : > { %1858 = vst [vmem:[%s2666_s7 + $0x44] sm:$0xf] %v1857_v37  ;;  %1860 = vst [vmem:[%s2666_s7 + $0x50] sm:$0xf] %v1859_v38  ;;  %v1861_v39 = vld [vmem:[%s2661_s6 + $0xb0] sm:$0xf] }
  0x31   : > { %v1863_v40 = vld [vmem:[%s2661_s6 + $0xc8] sm:$0xf]  ;;  %v1865_v41 = vld [vmem:[%s2661_s6 + $0xe0] sm:$0xf]  ;;  %1862 = vst [vmem:[%s2666_s7 + $0x5c] sm:$0xf] %v1861_v39 }
  0x32   : > { %1864 = vst [vmem:[%s2666_s7 + $0x68] sm:$0xf] %v1863_v40  ;;  %1866 = vst [vmem:[%s2666_s7 + $0x74] sm:$0xf] %v1865_v41  ;;  %v1867_v42 = vld [vmem:[%s2661_s6 + $0xf8] sm:$0xf] }
  0x33   : > { %v1869_v43 = vld [vmem:[%s2661_s6 + $0x110] sm:$0xf]  ;;  %v1871_v44 = vld [vmem:[%s2661_s6 + $0x128] sm:$0xf]  ;;  %1868 = vst [vmem:[%s2666_s7 + $0x80] sm:$0xf] %v1867_v42 }
  0x34   : > { %1870 = vst [vmem:[%s2666_s7 + $0x8c] sm:$0xf] %v1869_v43  ;;  %1872 = vst [vmem:[%s2666_s7 + $0x98] sm:$0xf] %v1871_v44  ;;  %v1873_v45 = vld [vmem:[%s2661_s6 + $0x140] sm:$0xf] }
  0x35   : > { %v1875_v46 = vld [vmem:[%s2661_s6 + $0x158] sm:$0xf]  ;;  %v1877_v47 = vld [vmem:[%s2661_s6 + $0x170] sm:$0xf]  ;;  %1874 = vst [vmem:[%s2666_s7 + $0xa4] sm:$0xf] %v1873_v45 }
  0x36   : > { %1876 = vst [vmem:[%s2666_s7 + $0xb0] sm:$0xf] %v1875_v46  ;;  %1878 = vst [vmem:[%s2666_s7 + $0xbc] sm:$0xf] %v1877_v47  ;;  %v1879_v48 = vld [vmem:[%s2661_s6 + $0x188] sm:$0xf] }
  0x37   : > { %v1881_v49 = vld [vmem:[%s2661_s6 + $0x1a0] sm:$0xf]  ;;  %v1883_v50 = vld [vmem:[%s2661_s6 + $0x1b8] sm:$0xf]  ;;  %1880 = vst [vmem:[%s2666_s7 + $0xc8] sm:$0xf] %v1879_v48 }
  0x38   : > { %1882 = vst [vmem:[%s2666_s7 + $0xd4] sm:$0xf] %v1881_v49  ;;  %1884 = vst [vmem:[%s2666_s7 + $0xe0] sm:$0xf] %v1883_v50  ;;  %v1885_v51 = vld [vmem:[%s2661_s6 + $0x1d0] sm:$0xf] }
  0x39   : > { %v1887_v52 = vld [vmem:[%s2661_s6 + $0x1e8] sm:$0xf]  ;;  %v1889_v53 = vld [vmem:[%s2661_s6 + $0x200] sm:$0xf]  ;;  %1886 = vst [vmem:[%s2666_s7 + $0xec] sm:$0xf] %v1885_v51 }
  0x3a   : > { %1888 = vst [vmem:[%s2666_s7 + $0xf8] sm:$0xf] %v1887_v52  ;;  %1890 = vst [vmem:[%s2666_s7 + $0x104] sm:$0xf] %v1889_v53  ;;  %v1891_v54 = vld [vmem:[%s2661_s6 + $0x218] sm:$0xf] }
  0x3b   : > { %v1893_v55 = vld [vmem:[%s2661_s6 + $0x230] sm:$0xf]  ;;  %v1895_v56 = vld [vmem:[%s2661_s6 + $0x248] sm:$0xf]  ;;  %1892 = vst [vmem:[%s2666_s7 + $0x110] sm:$0xf] %v1891_v54 }
  0x3c   : > { %1894 = vst [vmem:[%s2666_s7 + $0x11c] sm:$0xf] %v1893_v55  ;;  %1896 = vst [vmem:[%s2666_s7 + $0x128] sm:$0xf] %v1895_v56  ;;  %v1897_v57 = vld [vmem:[%s2661_s6 + $0x260] sm:$0xf] }
  0x3d   : > { %v1899_v58 = vld [vmem:[%s2661_s6 + $0x278] sm:$0xf]  ;;  %v1901_v59 = vld [vmem:[%s2661_s6 + $0x290] sm:$0xf]  ;;  %1898 = vst [vmem:[%s2666_s7 + $0x134] sm:$0xf] %v1897_v57 }
  0x3e   : > { %1900 = vst [vmem:[%s2666_s7 + $0x140] sm:$0xf] %v1899_v58  ;;  %1902 = vst [vmem:[%s2666_s7 + $0x14c] sm:$0xf] %v1901_v59  ;;  %v1903_v60 = vld [vmem:[%s2661_s6 + $0x2a8] sm:$0xf] }
  0x3f   : > { %v1905_v61 = vld [vmem:[%s2661_s6 + $0x2c0] sm:$0xf]  ;;  %v1907_v62 = vld [vmem:[%s2661_s6 + $0x2d8] sm:$0xf]  ;;  %1904 = vst [vmem:[%s2666_s7 + $0x158] sm:$0xf] %v1903_v60 }
  0x40   : > { %1906 = vst [vmem:[%s2666_s7 + $0x164] sm:$0xf] %v1905_v61  ;;  %1908 = vst [vmem:[%s2666_s7 + $0x170] sm:$0xf] %v1907_v62  ;;  %v1909_v63 = vld [vmem:[%s2661_s6 + $0x2f0] sm:$0xf] }
  0x41   : > { %1910 = vst [vmem:[%s2666_s7 + $0x17c] sm:$0xf] %v1909_v63 }
  0x42 PF: > { %p1911_p11 = scmp.ge.s32.totalorder %s2564_s17, 1  ;;  %p292_p12 = scmp.lt.s32.totalorder %s2564_s17, 5 }
  0x44   : > { %p293_p13 = pnand %p1911_p11, %p292_p12 }
  0x45   : > { %s299_s8 = sand.u32 (!%p293_p13), 1, %s2540_s11   ;;  %s1912_s11 = sshll.u32 (!%p293_p13), %s2552_s14, 5 }
  0x46   : > { %296 = sbr.rel (%p293_p13) target bundleno = 485 (0x1e5), region = 50  ;;  %p326_p0 = scmp.lt.s32.totalorder (!%p293_p13), %s1912_s11, 63 }
  0x47   : > { %s2307_s18 = smul.u32 (!%p293_p13), 384, %s299_s8  ;;  %s322_s29 = sand.u32 (!%p293_p13), 1, %s2532_s9  }
  0x48   : > { %s2308_s30 = smul.u32 (!%p293_p13), 384, %s322_s29 }
  0x49   : > { %s2796_s21 = scalar_lea.vmem (!%p293_p13), [#allocation2], %s2307_s18 }
  0x4a   : > { %v2382_v0 = vld [vmem:[%s2796_s21 + $0x4] ss:$12 sps:$4 sm:$0xff] (!%p293_p13)   ;;  %v2384_v1 = vld [vmem:[%s2796_s21] ss:$12 sps:$4 sm:$0xff] (!%p293_p13)   ;;  %v2385_v2 = vld [vmem:[%s2796_s21 + $0x1c] ss:$12 sps:$4 sm:$0xff] (!%p293_p13)  }
  0x4b   : > { %848 = vmatprep.subr.bf16.mxu0 (!%p293_p13), %v2382_v0  ;;  %v2387_v3 = vld [vmem:[%s2796_s21 + $0x18] ss:$12 sps:$4 sm:$0xff] (!%p293_p13)   ;;  %v2388_v4 = vld [vmem:[%s2796_s21 + $0x34] ss:$12 sps:$4 sm:$0xff] (!%p293_p13)   ;;  %v2390_v5 = vld [vmem:[%s2796_s21 + $0x30] ss:$12 sps:$4 sm:$0xff] (!%p293_p13)  }
  0x4c   : > { %849 = vmatpush1.bf16.msra.mxu0 (!%p293_p13), %v2384_v1  ;;  %v2391_v6 = vld [vmem:[%s2796_s21 + $0x4c] ss:$12 sps:$4 sm:$0xff] (!%p293_p13)   ;;  %v2403_v7 = vld [vmem:[%s2796_s21 + $0xc8] ss:$12 sps:$4 sm:$0xff] (!%p293_p13)   ;;  %v2394_v9 = vld [vmem:[%s2796_s21 + $0x64] ss:$12 sps:$4 sm:$0xff] (!%p293_p13)  }
  0x4d   : > { %850 = vmatprep.subr.bf16.mxu0 %v2385_v2  ;;  %v2393_v8 = vld [vmem:[%s2796_s21 + $0x48] ss:$12 sps:$4 sm:$0xff]   ;;  %2194 = vmatprep.subr.bf16.mxu1 %v2403_v7  ;;  %v2408_v11 = vld [vmem:[%s2796_s21 + $0xe0] ss:$12 sps:$4 sm:$0xff]   ;;  %v2413_v15 = vld [vmem:[%s2796_s21 + $0xf8] ss:$12 sps:$4 sm:$0xff]  }
  0x4e   : > { %v2406_v10 = vld [vmem:[%s2796_s21 + $0x8] ss:$12 sps:$4 sm:$0xff]   ;;  %v2396_v12 = vld [vmem:[%s2796_s21 + $0x60] ss:$12 sps:$4 sm:$0xff]   ;;  %v2399_v16 = vld [vmem:[%s2796_s21 + $0x78] ss:$12 sps:$4 sm:$0xff]  }
  0x4f   : > { %2195 = vmatpush3.bf16.msra.mxu1 %v2406_v10  ;;  %v2397_v13 = vld [vmem:[%s2796_s21 + $0x7c] ss:$12 sps:$4 sm:$0xff]   ;;  %v2411_v14 = vld [vmem:[%s2796_s21 + $0x20] ss:$12 sps:$4 sm:$0xff]   ;;  %v2416_v17 = vld [vmem:[%s2796_s21 + $0x38] ss:$12 sps:$4 sm:$0xff]  }
  0x50   : > { %851 = vmatpush1.bf16.msra.mxu0 %v2387_v3  ;;  %2196 = vmatprep.subr.bf16.mxu1 %v2408_v11  ;;  %v2400_v18 = vld [vmem:[%s2796_s21 + $0x94] ss:$12 sps:$4 sm:$0xff]   ;;  %v2418_v19 = vld [vmem:[%s2796_s21 + $0x110] ss:$12 sps:$4 sm:$0xff]   ;;  %v2404_v23 = vld [vmem:[%s2796_s21 + $0xac] ss:$12 sps:$4 sm:$0xff]  }
  0x51   : > { %852 = vmatprep.subr.bf16.mxu0 %v2388_v4  ;;  %v2402_v20 = vld [vmem:[%s2796_s21 + $0x90] ss:$12 sps:$4 sm:$0xff]   ;;  %v2423_v22 = vld [vmem:[%s2796_s21 + $0x128] ss:$12 sps:$4 sm:$0xff]   ;;  %s3134_s11 = smov (!%p326_p0, %s1912_s11), 63  ;;  %s2885_s3 = scalar_lea.vmem [#allocation3], %s2308_s30 }
  0x52   : > { %v2421_v21 = vld [vmem:[%s2796_s21 + $0x50] ss:$12 sps:$4 sm:$0xff]   ;;  %v2407_v24 = vld [vmem:[%s2796_s21 + $0xa8] ss:$12 sps:$4 sm:$0xff]   ;;  %v2428_v26 = vld [vmem:[%s2796_s21 + $0x140] ss:$12 sps:$4 sm:$0xff]  }
  0x53   : > { %2197 = vmatpush3.bf16.msra.mxu1 %v2411_v14  ;;  %v2426_v25 = vld [vmem:[%s2796_s21 + $0x68] ss:$12 sps:$4 sm:$0xff]   ;;  %v2409_v27 = vld [vmem:[%s2796_s21 + $0xc4] ss:$12 sps:$4 sm:$0xff]   ;;  %v2412_v28 = vld [vmem:[%s2796_s21 + $0xc0] ss:$12 sps:$4 sm:$0xff]  }
  0x54   : > { %853 = vmatpush1.bf16.msra.mxu0 %v2390_v5  ;;  %2198 = vmatprep.subr.bf16.mxu1 %v2413_v15  ;;  %v2431_v29 = vld [vmem:[%s2796_s21 + $0x80] ss:$12 sps:$4 sm:$0xff]   ;;  %s2129_s22 = sshll.u32 %s3134_s11, 3  ;;  %v2433_v30 = vld [vmem:[%s2796_s21 + $0x158] ss:$12 sps:$4 sm:$0xff]   ;;  %s1594_s9 = smul.u32 (%p2648_p9), 3, %s2548_s13 }
  0x55   : > { %854 = vmatprep.subr.bf16.mxu0 %v2391_v6  ;;  %v2414_v31 = vld [vmem:[%s2796_s21 + $0xdc] ss:$12 sps:$4 sm:$0xff]   ;;  %v2436_v32 = vld [vmem:[%s2796_s21 + $0x98] ss:$12 sps:$4 sm:$0xff]   ;;  %s2835_s26 = scalar_lea.vmem %s3115_s0, %s2129_s22  ;;  %v2419_v35 = vld [vmem:[%s2796_s21 + $0xf4] ss:$12 sps:$4 sm:$0xff]  }
  0x56   : > { %v2417_v33 = vld [vmem:[%s2796_s21 + $0xd8] ss:$12 sps:$4 sm:$0xff]   ;;  %v2438_v34 = vld [vmem:[%s2796_s21 + $0x170] ss:$12 sps:$4 sm:$0xff]   ;;  %v2443_v40 = vld [vmem:[%s2835_s26] ss:$8 sps:$4 sm:$0xff]  }
  0x57   : > { %2199 = vmatpush3.bf16.msra.mxu1 %v2416_v17  ;;  %v2445_v36 = vld [vmem:[%s2835_s26 + $0x4] ss:$8 sps:$4 sm:$0xff]   ;;  %v2441_v37 = vld [vmem:[%s2796_s21 + $0xb0] ss:$12 sps:$4 sm:$0xff]   ;;  %v2427_v42 = vld [vmem:[%s2796_s21 + $0x108] ss:$12 sps:$4 sm:$0xff]  }
  0x58   : > { %855 = vmatpush1.bf16.msra.mxu0 %v2393_v8  ;;  %2200 = vmatprep.subr.bf16.mxu1 %v2418_v19  ;;  %v2422_v38 = vld [vmem:[%s2796_s21 + $0xf0] ss:$12 sps:$4 sm:$0xff]   ;;  %v2424_v39 = vld [vmem:[%s2796_s21 + $0x10c] ss:$12 sps:$4 sm:$0xff]   ;;  %v2439_v49 = vld [vmem:[%s2796_s21 + $0x154] ss:$12 sps:$4 sm:$0xff]  }
  0x59   : > { %856 = vmatprep.subr.bf16.mxu0 %v2394_v9  ;;  %1073 = vmatprep.mubr.bf16.mxu1 %v2445_v36  ;;  %v2449_v41 = vld [vmem:[%s2835_s26 + $0x14] ss:$8 sps:$4 sm:$0xff]   ;;  %v2429_v43 = vld [vmem:[%s2796_s21 + $0x124] ss:$12 sps:$4 sm:$0xff]   ;;  %v2432_v44 = vld [vmem:[%s2796_s21 + $0x120] ss:$12 sps:$4 sm:$0xff]  }
  0x5a   : > { %880 = vmatprep.mubr.bf16.mxu0 %v2445_v36  ;;  %v2434_v45 = vld [vmem:[%s2796_s21 + $0x13c] ss:$12 sps:$4 sm:$0xff]   ;;  %v2451_v46 = vld [vmem:[%s2835_s26 + $0x10] ss:$8 sps:$4 sm:$0xff]   ;;  %v2452_v47 = vld [vmem:[%s2835_s26 + $0x24] ss:$8 sps:$4 sm:$0xff]  }
  0x5b   : > { %2201 = vmatpush3.bf16.msra.mxu1 %v2421_v21  ;;  %v2437_v48 = vld [vmem:[%s2796_s21 + $0x138] ss:$12 sps:$4 sm:$0xff]   ;;  %v2442_v50 = vld [vmem:[%s2796_s21 + $0x150] ss:$12 sps:$4 sm:$0xff]   ;;  %v2454_v52 = vld [vmem:[%s2835_s26 + $0x20] ss:$8 sps:$4 sm:$0xff]  }
  0x5c   : > { %857 = vmatpush1.bf16.msra.mxu0 %v2396_v12  ;;  %2202 = vmatprep.subr.bf16.mxu1 %v2423_v22  ;;  %v2446_v51 = vld [vmem:[%s2796_s21 + $0x16c] ss:$12 sps:$4 sm:$0xff]   ;;  %v2455_v53 = vld [vmem:[%s2835_s26 + $0x34] ss:$8 sps:$4 sm:$0xff]   ;;  %v2460_v57 = vld [vmem:[%s2835_s26 + $0x40] ss:$8 sps:$4 sm:$0xff]  }
  0x5d   : > { %858 = vmatprep.subr.bf16.mxu0 %v2397_v13  ;;  %v2448_v54 = vld [vmem:[%s2796_s21 + $0x168] ss:$12 sps:$4 sm:$0xff]   ;;  %v2457_v55 = vld [vmem:[%s2835_s26 + $0x30] ss:$8 sps:$4 sm:$0xff]   ;;  %v2458_v56 = vld [vmem:[%s2835_s26 + $0x44] ss:$8 sps:$4 sm:$0xff]  }
  0x5e   : > { %v2461_v58 = vld [vmem:[%s2835_s26 + $0x54] ss:$8 sps:$4 sm:$0xff]   ;;  %v2463_v59 = vld [vmem:[%s2835_s26 + $0x50] ss:$8 sps:$4 sm:$0xff]   ;;  %v2464_v60 = vld [vmem:[%s2835_s26 + $0x64] ss:$8 sps:$4 sm:$0xff]  }
  0x5f   : > { %2203 = vmatpush3.bf16.msra.mxu1 %v2426_v25  ;;  %v2466_v61 = vld [vmem:[%s2835_s26 + $0x60] ss:$8 sps:$4 sm:$0xff]   ;;  %v2467_v62 = vld [vmem:[%s2835_s26 + $0x74] ss:$8 sps:$4 sm:$0xff]   ;;  %v2469_v63 = vld [vmem:[%s2835_s26 + $0x70] ss:$8 sps:$4 sm:$0xff]  }
  0x60   : > { %859 = vmatpush1.bf16.msra.mxu0 %v2399_v16  ;;  %2204 = vmatprep.subr.bf16.mxu1 %v2428_v26  ;;  %v2470_v0 = vld [vmem:[%s2835_s26 + $0x84] ss:$8 sps:$4 sm:$0xff]   ;;  %v2472_v1 = vld [vmem:[%s2835_s26 + $0x80] ss:$8 sps:$4 sm:$0xff]   ;;  %v2473_v2 = vld [vmem:[%s2835_s26 + $0x94] ss:$8 sps:$4 sm:$0xff]  }
  0x61   : > { %860 = vmatprep.subr.bf16.mxu0 %v2400_v18  ;;  %v2475_v3 = vld [vmem:[%s2835_s26 + $0x90] ss:$8 sps:$4 sm:$0xff]   ;;  %v2476_v4 = vld [vmem:[%s2835_s26 + $0xa4] ss:$8 sps:$4 sm:$0xff]   ;;  %v2478_v5 = vld [vmem:[%s2835_s26 + $0xa0] ss:$8 sps:$4 sm:$0xff]  }
  0x62   : > { %v2479_v6 = vld [vmem:[%s2835_s26 + $0xb4] ss:$8 sps:$4 sm:$0xff]   ;;  %v2481_v7 = vld [vmem:[%s2835_s26 + $0xb0] ss:$8 sps:$4 sm:$0xff]   ;;  %v2482_v8 = vld [vmem:[%s2835_s26 + $0xc4] ss:$8 sps:$4 sm:$0xff]  }
  0x63   : > { %2205 = vmatpush3.bf16.msra.mxu1 %v2431_v29  ;;  %v2484_v9 = vld [vmem:[%s2835_s26 + $0xc0] ss:$8 sps:$4 sm:$0xff]   ;;  %v2485_v10 = vld [vmem:[%s2835_s26 + $0xd4] ss:$8 sps:$4 sm:$0xff]   ;;  %v2487_v11 = vld [vmem:[%s2835_s26 + $0xd0] ss:$8 sps:$4 sm:$0xff]  }
  0x64   : > { %861 = vmatpush1.bf16.msra.mxu0 %v2402_v20  ;;  %2206 = vmatprep.subr.bf16.mxu1 %v2433_v30  ;;  %v2488_v12 = vld [vmem:[%s2835_s26 + $0xe4] ss:$8 sps:$4 sm:$0xff]   ;;  %v2490_v13 = vld [vmem:[%s2835_s26 + $0xe0] ss:$8 sps:$4 sm:$0xff]   ;;  %v2491_v14 = vld [vmem:[%s2835_s26 + $0xf4] ss:$8 sps:$4 sm:$0xff]  }
  0x65   : > { %862 = vmatprep.subr.bf16.mxu0 %v2404_v23  ;;  %v2493_v15 = vld [vmem:[%s2835_s26 + $0xf0] ss:$8 sps:$4 sm:$0xff]   ;;  %s2309_s4 = smul.u32 (%p2648_p9), 192, %s2552_s14 }
  0x67   : > { %2207 = vmatpush3.bf16.msra.mxu1 %v2436_v32  ;;  %s1596_s27 = sadd.s32 (%p2648_p9), %s2309_s4, %s1594_s9 }
  0x68   : > { %863 = vmatpush1.bf16.msra.mxu0 %v2407_v24  ;;  %2208 = vmatprep.subr.bf16.mxu1 %v2438_v34  ;;  %s2061_s13 = sshll.u32 (%p2648_p9), %s1596_s27, 2 }
  0x69   : > { %864 = vmatprep.subr.bf16.mxu0 %v2409_v27  ;;  %s2973_s6 = scalar_lea.vmem (%p2648_p9), %s3117_s2, %s2061_s13 }
  0x6b   : > { %2209 = vmatpush3.bf16.msra.mxu1 %v2441_v37 }
  0x6c   : > { %865 = vmatpush1.bf16.msra.mxu0 %v2412_v28 }
  0x6d   : > { %866 = vmatprep.subr.bf16.mxu0 %v2414_v31 }
  0x6e   : > { %1074 = vmatmul.mubr.bf16.vlgmr.msra.gmra.mrb[0].mxu1 %v2443_v40 }
  0x6f   : > { %1081 = vmatprep.mubr.bf16.mxu1 %v2449_v41 }
  0x70   : > { %867 = vmatpush1.bf16.msra.mxu0 %v2417_v33 }
  0x71   : > { %868 = vmatprep.subr.bf16.mxu0 %v2419_v35 }
  0x74   : > { %869 = vmatpush1.bf16.msra.mxu0 %v2422_v38 }
  0x75   : > { %870 = vmatprep.subr.bf16.mxu0 %v2424_v39 }
  0x76   : > { %1082 = vmatmul.mubr.bf16.gmra.mrb[4].mxu1 %v2451_v46 }
  0x77   : > { %1089 = vmatprep.mubr.bf16.mxu1 %v2452_v47 }
  0x78   : > { %871 = vmatpush1.bf16.msra.mxu0 %v2427_v42 }
  0x79   : > { %872 = vmatprep.subr.bf16.mxu0 %v2429_v43 }
  0x7c   : > { %873 = vmatpush1.bf16.msra.mxu0 %v2432_v44 }
  0x7d   : > { %874 = vmatprep.subr.bf16.mxu0 %v2434_v45 }
  0x7e   : > { %1090 = vmatmul.mubr.bf16.gmra.mrb[8].mxu1 %v2454_v52 }
  0x7f   : > { %1097 = vmatprep.mubr.bf16.mxu1 %v2455_v53 }
  0x80   : > { %875 = vmatpush1.bf16.msra.mxu0 %v2437_v48 }
  0x81   : > { %876 = vmatprep.subr.bf16.mxu0 %v2439_v49 }
  0x84   : > { %877 = vmatpush1.bf16.msra.mxu0 %v2442_v50 }
  0x85   : > { %878 = vmatprep.subr.bf16.mxu0 %v2446_v51 }
  0x86   : > { %1098 = vmatmul.mubr.bf16.gmra.mrb[12].mxu1 %v2457_v55 }
  0x87   : > { %1105 = vmatprep.mubr.bf16.mxu1 %v2458_v56 }
  0x88   : > { %879 = vmatpush1.bf16.msra.mxu0 %v2448_v54 }
  0x8b   : > { %881 = vmatmul.mubr.bf16.vlgmr.msra.gmra.mrb[0].mxu0 %v2443_v40 }
  0x8c   : > { %890 = vmatprep.mubr.bf16.mxu0 %v2449_v41 }
  0x8e   : > { %1106 = vmatmul.mubr.bf16.gmra.mrb[16].mxu1 %v2460_v57 }
  0x8f   : > { %1113 = vmatprep.mubr.bf16.mxu1 %v2461_v58 }
  0x93   : > { %891 = vmatmul.mubr.bf16.gmra.mrb[4].mxu0 %v2451_v46 }
  0x94   : > { %900 = vmatprep.mubr.bf16.mxu0 %v2452_v47 }
  0x96   : > { %1114 = vmatmul.mubr.bf16.gmra.mrb[20].mxu1 %v2463_v59 }
  0x97   : > { %1121 = vmatprep.mubr.bf16.mxu1 %v2464_v60 }
  0x9b   : > { %901 = vmatmul.mubr.bf16.gmra.mrb[8].mxu0 %v2454_v52 }
  0x9c   : > { %910 = vmatprep.mubr.bf16.mxu0 %v2455_v53 }
  0x9e   : > { %1122 = vmatmul.mubr.bf16.gmra.mrb[24].mxu1 %v2466_v61 }
  0x9f   : > { %1129 = vmatprep.mubr.bf16.mxu1 %v2467_v62 }
  0xa3   : > { %911 = vmatmul.mubr.bf16.gmra.mrb[12].mxu0 %v2457_v55 }
  0xa4   : > { %920 = vmatprep.mubr.bf16.mxu0 %v2458_v56 }
  0xa6   : > { %1130 = vmatmul.mubr.bf16.gmra.mrb[28].mxu1 %v2469_v63 }
  0xa7   : > { %1137 = vmatprep.mubr.bf16.mxu1 %v2470_v0 }
  0xab   : > { %921 = vmatmul.mubr.bf16.gmra.mrb[16].mxu0 %v2460_v57 }
  0xac   : > { %930 = vmatprep.mubr.bf16.mxu0 %v2461_v58 }
  0xae   : > { %1138 = vmatmul.mubr.bf16.gmra.mrb[32].mxu1 %v2472_v1 }
  0xaf   : > { %1145 = vmatprep.mubr.bf16.mxu1 %v2473_v2 }
  0xb3   : > { %931 = vmatmul.mubr.bf16.gmra.mrb[20].mxu0 %v2463_v59 }
  0xb4   : > { %940 = vmatprep.mubr.bf16.mxu0 %v2464_v60 }
  0xb6   : > { %1146 = vmatmul.mubr.bf16.gmra.mrb[36].mxu1 %v2475_v3 }
  0xb7   : > { %1153 = vmatprep.mubr.bf16.mxu1 %v2476_v4 }
  0xbb   : > { %941 = vmatmul.mubr.bf16.gmra.mrb[24].mxu0 %v2466_v61 }
  0xbc   : > { %950 = vmatprep.mubr.bf16.mxu0 %v2467_v62 }
  0xbe   : > { %1154 = vmatmul.mubr.bf16.gmra.mrb[40].mxu1 %v2478_v5 }
  0xbf   : > { %1161 = vmatprep.mubr.bf16.mxu1 %v2479_v6 }
  0xc3   : > { %951 = vmatmul.mubr.bf16.gmra.mrb[28].mxu0 %v2469_v63 }
  0xc4   : > { %960 = vmatprep.mubr.bf16.mxu0 %v2470_v0 }
  0xc6   : > { %1162 = vmatmul.mubr.bf16.gmra.mrb[44].mxu1 %v2481_v7 }
  0xc7   : > { %1169 = vmatprep.mubr.bf16.mxu1 %v2482_v8 }
  0xcb   : > { %961 = vmatmul.mubr.bf16.gmra.mrb[32].mxu0 %v2472_v1 }
  0xcc   : > { %970 = vmatprep.mubr.bf16.mxu0 %v2473_v2 }
  0xce   : > { %1170 = vmatmul.mubr.bf16.gmra.mrb[48].mxu1 %v2484_v9 }
  0xcf   : > { %1177 = vmatprep.mubr.bf16.mxu1 %v2485_v10 }
  0xd3   : > { %971 = vmatmul.mubr.bf16.gmra.mrb[36].mxu0 %v2475_v3 }
  0xd4   : > { %980 = vmatprep.mubr.bf16.mxu0 %v2476_v4 }
  0xd6   : > { %1178 = vmatmul.mubr.bf16.gmra.mrb[52].mxu1 %v2487_v11 }
  0xd7   : > { %1185 = vmatprep.mubr.bf16.mxu1 %v2488_v12 }
  0xdb   : > { %981 = vmatmul.mubr.bf16.gmra.mrb[40].mxu0 %v2478_v5 }
  0xdc   : > { %990 = vmatprep.mubr.bf16.mxu0 %v2479_v6 }
  0xde   : > { %1186 = vmatmul.mubr.bf16.gmra.mrb[56].mxu1 %v2490_v13 }
  0xdf   : > { %1193 = vmatprep.mubr.bf16.mxu1 %v2491_v14 }
  0xe3   : > { %991 = vmatmul.mubr.bf16.gmra.mrb[44].mxu0 %v2481_v7 }
  0xe4   : > { %1000 = vmatprep.mubr.bf16.mxu0 %v2482_v8 }
  0xe6   : > { %1194 = vmatmul.mubr.bf16.gmra.mrb[60].mxu1 %v2493_v15 }
  0xeb   : > { %1001 = vmatmul.mubr.bf16.gmra.mrb[48].mxu0 %v2484_v9 }
  0xec   : > { %1010 = vmatprep.mubr.bf16.mxu0 %v2485_v10 }
  0xf3   : > { %1011 = vmatmul.mubr.bf16.gmra.mrb[52].mxu0 %v2487_v11 }
  0xf4   : > { %1020 = vmatprep.mubr.bf16.mxu0 %v2488_v12 }
  0xfb   : > { %1021 = vmatmul.mubr.bf16.gmra.mrb[56].mxu0 %v2490_v13 }
  0xfc   : > { %1030 = vmatprep.mubr.bf16.mxu0 %v2491_v14 }
 0x103   : > { %1031 = vmatmul.mubr.bf16.gmra.mrb[60].mxu0 %v2493_v15 }
 0x141   : > { %v2210_v16 = vpop.f32.mrb[0].mxu1 }
 0x142   : > { %v2211_v17 = vpop.f32.mrb[1].mxu1 }
 0x143   : > { %v2212_v18 = vadd.f32 %v2211_v17, %v2210_v16  ;;  %v2213_v19 = vpop.f32.mrb[2].mxu1 }
 0x144   : > { %v2214_v20 = vpop.f32.mrb[3].mxu1 }
 0x145   : > { %v2131_v21 = vpack.c.bf16 %v2212_v18, %v2212_v18  ;;  %v2215_v22 = vadd.f32 %v2214_v20, %v2213_v19 }
 0x147   : > { %1523 = vst [vmem:[%s2885_s3 + $0x8] sm:$0xf] %v2131_v21  ;;  %v2133_v23 = vpack.c.bf16 %v2215_v22, %v2215_v22 }
 0x149   : > { %1525 = vst [vmem:[%s2885_s3 + $0x14] sm:$0xf] %v2133_v23  ;;  %v2216_v24 = vpop.f32.mrb[4].mxu1 }
 0x14a   : > { %v2217_v25 = vpop.f32.mrb[5].mxu1 }
 0x14b   : > { %v2218_v26 = vadd.f32 %v2217_v25, %v2216_v24  ;;  %v2219_v27 = vpop.f32.mrb[6].mxu1 }
 0x14c   : > { %v2220_v28 = vpop.f32.mrb[7].mxu1 }
 0x14d   : > { %v2135_v29 = vpack.c.bf16 %v2218_v26, %v2218_v26  ;;  %v2221_v30 = vadd.f32 %v2220_v28, %v2219_v27 }
 0x14f   : > { %1527 = vst [vmem:[%s2885_s3 + $0x20] sm:$0xf] %v2135_v29  ;;  %v2137_v31 = vpack.c.bf16 %v2221_v30, %v2221_v30 }
 0x151   : > { %1529 = vst [vmem:[%s2885_s3 + $0x2c] sm:$0xf] %v2137_v31  ;;  %v2222_v32 = vpop.f32.mrb[8].mxu1 }
 0x152   : > { %v2223_v33 = vpop.f32.mrb[9].mxu1 }
 0x153   : > { %v2224_v34 = vadd.f32 %v2223_v33, %v2222_v32  ;;  %v2225_v35 = vpop.f32.mrb[10].mxu1 }
 0x154   : > { %v2226_v36 = vpop.f32.mrb[11].mxu1 }
 0x155   : > { %v2139_v37 = vpack.c.bf16 %v2224_v34, %v2224_v34  ;;  %v2227_v38 = vadd.f32 %v2226_v36, %v2225_v35 }
 0x157   : > { %1531 = vst [vmem:[%s2885_s3 + $0x38] sm:$0xf] %v2139_v37  ;;  %v2141_v41 = vpack.c.bf16 %v2227_v38, %v2227_v38 }
 0x159   : > { %1533 = vst [vmem:[%s2885_s3 + $0x44] sm:$0xf] %v2141_v41  ;;  %v2228_v45 = vpop.f32.mrb[12].mxu1 }
 0x15a   : > { %v2229_v47 = vpop.f32.mrb[13].mxu1 }
 0x15b   : > { %v2230_v48 = vadd.f32 %v2229_v47, %v2228_v45  ;;  %v2231_v49 = vpop.f32.mrb[14].mxu1 }
 0x15c   : > { %v2232_v50 = vpop.f32.mrb[15].mxu1 }
 0x15d   : > { %v2143_v51 = vpack.c.bf16 %v2230_v48, %v2230_v48  ;;  %v2233_v52 = vadd.f32 %v2232_v50, %v2231_v49 }
 0x15e   : > { %v882_v39 = vpop.f32.mrb[0].mxu0 }
 0x15f   : > { %v884_v40 = vpop.f32.mrb[1].mxu0  ;;  %1535 = vst [vmem:[%s2885_s3 + $0x50] sm:$0xf] %v2143_v51  ;;  %v2145_v55 = vpack.c.bf16 %v2233_v52, %v2233_v52 }
 0x160   : > { %v2130_v42 = vpack.c.bf16 %v884_v40, %v882_v39  ;;  %v886_v43 = vpop.f32.mrb[2].mxu0 }
 0x161   : > { %v888_v44 = vpop.f32.mrb[3].mxu0  ;;  %1537 = vst [vmem:[%s2885_s3 + $0x5c] sm:$0xf] %v2145_v55  ;;  %v2234_v59 = vpop.f32.mrb[16].mxu1 }
 0x162   : > { %1522 = vst [vmem:[%s2885_s3] sm:$0xff] %v2130_v42  ;;  %v2132_v46 = vpack.c.bf16 %v888_v44, %v886_v43  ;;  %v2235_v61 = vpop.f32.mrb[17].mxu1 }
 0x163   : > { %v2236_v62 = vadd.f32 %v2235_v61, %v2234_v59  ;;  %v2237_v63 = vpop.f32.mrb[18].mxu1 }
 0x164   : > { %1524 = vst [vmem:[%s2885_s3 + $0xc] sm:$0xff] %v2132_v46  ;;  %v2238_v0 = vpop.f32.mrb[19].mxu1 }
 0x165   : > { %v2147_v1 = vpack.c.bf16 %v2236_v62, %v2236_v62  ;;  %v2239_v2 = vadd.f32 %v2238_v0, %v2237_v63 }
 0x166   : > { %v892_v53 = vpop.f32.mrb[4].mxu0 }
 0x167   : > { %v894_v54 = vpop.f32.mrb[5].mxu0  ;;  %1539 = vst [vmem:[%s2885_s3 + $0x68] sm:$0xf] %v2147_v1  ;;  %v2149_v5 = vpack.c.bf16 %v2239_v2, %v2239_v2 }
 0x168   : > { %v2134_v56 = vpack.c.bf16 %v894_v54, %v892_v53  ;;  %v896_v57 = vpop.f32.mrb[6].mxu0 }
 0x169   : > { %v898_v58 = vpop.f32.mrb[7].mxu0  ;;  %1541 = vst [vmem:[%s2885_s3 + $0x74] sm:$0xf] %v2149_v5  ;;  %v2240_v9 = vpop.f32.mrb[20].mxu1 }
 0x16a   : > { %1526 = vst [vmem:[%s2885_s3 + $0x18] sm:$0xff] %v2134_v56  ;;  %v2136_v60 = vpack.c.bf16 %v898_v58, %v896_v57  ;;  %v2241_v11 = vpop.f32.mrb[21].mxu1 }
 0x16b   : > { %v2242_v12 = vadd.f32 %v2241_v11, %v2240_v9  ;;  %v2243_v13 = vpop.f32.mrb[22].mxu1 }
 0x16c   : > { %1528 = vst [vmem:[%s2885_s3 + $0x24] sm:$0xff] %v2136_v60  ;;  %v2244_v14 = vpop.f32.mrb[23].mxu1 }
 0x16d   : > { %v2151_v15 = vpack.c.bf16 %v2242_v12, %v2242_v12  ;;  %v2245_v16 = vadd.f32 %v2244_v14, %v2243_v13 }
 0x16e   : > { %v902_v3 = vpop.f32.mrb[8].mxu0 }
 0x16f   : > { %v904_v4 = vpop.f32.mrb[9].mxu0  ;;  %1543 = vst [vmem:[%s2885_s3 + $0x80] sm:$0xf] %v2151_v15  ;;  %v2153_v19 = vpack.c.bf16 %v2245_v16, %v2245_v16 }
 0x170   : > { %v2138_v6 = vpack.c.bf16 %v904_v4, %v902_v3  ;;  %v906_v7 = vpop.f32.mrb[10].mxu0 }
 0x171   : > { %v908_v8 = vpop.f32.mrb[11].mxu0  ;;  %1545 = vst [vmem:[%s2885_s3 + $0x8c] sm:$0xf] %v2153_v19  ;;  %v2246_v23 = vpop.f32.mrb[24].mxu1 }
 0x172   : > { %1530 = vst [vmem:[%s2885_s3 + $0x30] sm:$0xff] %v2138_v6  ;;  %v2140_v10 = vpack.c.bf16 %v908_v8, %v906_v7  ;;  %v2247_v25 = vpop.f32.mrb[25].mxu1 }
 0x173   : > { %v2248_v26 = vadd.f32 %v2247_v25, %v2246_v23  ;;  %v2249_v27 = vpop.f32.mrb[26].mxu1 }
 0x174   : > { %1532 = vst [vmem:[%s2885_s3 + $0x3c] sm:$0xff] %v2140_v10  ;;  %v2250_v28 = vpop.f32.mrb[27].mxu1 }
 0x175   : > { %v2155_v29 = vpack.c.bf16 %v2248_v26, %v2248_v26  ;;  %v2251_v30 = vadd.f32 %v2250_v28, %v2249_v27 }
 0x176   : > { %v912_v17 = vpop.f32.mrb[12].mxu0 }
 0x177   : > { %v914_v18 = vpop.f32.mrb[13].mxu0  ;;  %1547 = vst [vmem:[%s2885_s3 + $0x98] sm:$0xf] %v2155_v29  ;;  %v2157_v33 = vpack.c.bf16 %v2251_v30, %v2251_v30 }
 0x178   : > { %v2142_v20 = vpack.c.bf16 %v914_v18, %v912_v17  ;;  %v916_v21 = vpop.f32.mrb[14].mxu0 }
 0x179   : > { %v918_v22 = vpop.f32.mrb[15].mxu0  ;;  %1549 = vst [vmem:[%s2885_s3 + $0xa4] sm:$0xf] %v2157_v33  ;;  %v2252_v37 = vpop.f32.mrb[28].mxu1 }
 0x17a   : > { %1534 = vst [vmem:[%s2885_s3 + $0x48] sm:$0xff] %v2142_v20  ;;  %v2144_v24 = vpack.c.bf16 %v918_v22, %v916_v21  ;;  %v2253_v39 = vpop.f32.mrb[29].mxu1 }
 0x17b   : > { %v2254_v40 = vadd.f32 %v2253_v39, %v2252_v37  ;;  %v2255_v41 = vpop.f32.mrb[30].mxu1 }
 0x17c   : > { %1536 = vst [vmem:[%s2885_s3 + $0x54] sm:$0xff] %v2144_v24  ;;  %v2256_v42 = vpop.f32.mrb[31].mxu1 }
 0x17d   : > { %v2159_v43 = vpack.c.bf16 %v2254_v40, %v2254_v40  ;;  %v2257_v44 = vadd.f32 %v2256_v42, %v2255_v41 }
 0x17e   : > { %v922_v31 = vpop.f32.mrb[16].mxu0 }
 0x17f   : > { %v924_v32 = vpop.f32.mrb[17].mxu0  ;;  %1551 = vst [vmem:[%s2885_s3 + $0xb0] sm:$0xf] %v2159_v43  ;;  %v2161_v47 = vpack.c.bf16 %v2257_v44, %v2257_v44 }
 0x180   : > { %v2146_v34 = vpack.c.bf16 %v924_v32, %v922_v31  ;;  %v926_v35 = vpop.f32.mrb[18].mxu0 }
 0x181   : > { %v928_v36 = vpop.f32.mrb[19].mxu0  ;;  %1553 = vst [vmem:[%s2885_s3 + $0xbc] sm:$0xf] %v2161_v47  ;;  %v2258_v51 = vpop.f32.mrb[32].mxu1 }
 0x182   : > { %1538 = vst [vmem:[%s2885_s3 + $0x60] sm:$0xff] %v2146_v34  ;;  %v2148_v38 = vpack.c.bf16 %v928_v36, %v926_v35  ;;  %v2259_v53 = vpop.f32.mrb[33].mxu1 }
 0x183   : > { %v2260_v54 = vadd.f32 %v2259_v53, %v2258_v51  ;;  %v2261_v55 = vpop.f32.mrb[34].mxu1 }
 0x184   : > { %1540 = vst [vmem:[%s2885_s3 + $0x6c] sm:$0xff] %v2148_v38  ;;  %v2262_v56 = vpop.f32.mrb[35].mxu1 }
 0x185   : > { %v2163_v57 = vpack.c.bf16 %v2260_v54, %v2260_v54  ;;  %v2263_v58 = vadd.f32 %v2262_v56, %v2261_v55 }
 0x186   : > { %v932_v45 = vpop.f32.mrb[20].mxu0 }
 0x187   : > { %v934_v46 = vpop.f32.mrb[21].mxu0  ;;  %1555 = vst [vmem:[%s2885_s3 + $0xc8] sm:$0xf] %v2163_v57  ;;  %v2165_v61 = vpack.c.bf16 %v2263_v58, %v2263_v58 }
 0x188   : > { %v2150_v48 = vpack.c.bf16 %v934_v46, %v932_v45  ;;  %v936_v49 = vpop.f32.mrb[22].mxu0 }
 0x189   : > { %v938_v50 = vpop.f32.mrb[23].mxu0  ;;  %1557 = vst [vmem:[%s2885_s3 + $0xd4] sm:$0xf] %v2165_v61  ;;  %v2264_v1 = vpop.f32.mrb[36].mxu1 }
 0x18a   : > { %1542 = vst [vmem:[%s2885_s3 + $0x78] sm:$0xff] %v2150_v48  ;;  %v2152_v52 = vpack.c.bf16 %v938_v50, %v936_v49  ;;  %v2265_v3 = vpop.f32.mrb[37].mxu1 }
 0x18b   : > { %v2266_v4 = vadd.f32 %v2265_v3, %v2264_v1  ;;  %v2267_v5 = vpop.f32.mrb[38].mxu1 }
 0x18c   : > { %1544 = vst [vmem:[%s2885_s3 + $0x84] sm:$0xff] %v2152_v52  ;;  %v2268_v6 = vpop.f32.mrb[39].mxu1 }
 0x18d   : > { %v2167_v7 = vpack.c.bf16 %v2266_v4, %v2266_v4  ;;  %v2269_v8 = vadd.f32 %v2268_v6, %v2267_v5 }
 0x18e   : > { %v942_v59 = vpop.f32.mrb[24].mxu0 }
 0x18f   : > { %v944_v60 = vpop.f32.mrb[25].mxu0  ;;  %1559 = vst [vmem:[%s2885_s3 + $0xe0] sm:$0xf] %v2167_v7  ;;  %v2169_v11 = vpack.c.bf16 %v2269_v8, %v2269_v8 }
 0x190   : > { %v2154_v62 = vpack.c.bf16 %v944_v60, %v942_v59  ;;  %v946_v63 = vpop.f32.mrb[26].mxu0 }
 0x191   : > { %v948_v0 = vpop.f32.mrb[27].mxu0  ;;  %1561 = vst [vmem:[%s2885_s3 + $0xec] sm:$0xf] %v2169_v11  ;;  %v2270_v15 = vpop.f32.mrb[40].mxu1 }
 0x192   : > { %1546 = vst [vmem:[%s2885_s3 + $0x90] sm:$0xff] %v2154_v62  ;;  %v2156_v2 = vpack.c.bf16 %v948_v0, %v946_v63  ;;  %v2271_v17 = vpop.f32.mrb[41].mxu1 }
 0x193   : > { %v2272_v18 = vadd.f32 %v2271_v17, %v2270_v15  ;;  %v2273_v19 = vpop.f32.mrb[42].mxu1 }
 0x194   : > { %1548 = vst [vmem:[%s2885_s3 + $0x9c] sm:$0xff] %v2156_v2  ;;  %v2274_v20 = vpop.f32.mrb[43].mxu1 }
 0x195   : > { %v2171_v21 = vpack.c.bf16 %v2272_v18, %v2272_v18  ;;  %v2275_v22 = vadd.f32 %v2274_v20, %v2273_v19 }
 0x196   : > { %v952_v9 = vpop.f32.mrb[28].mxu0 }
 0x197   : > { %v954_v10 = vpop.f32.mrb[29].mxu0  ;;  %1563 = vst [vmem:[%s2885_s3 + $0xf8] sm:$0xf] %v2171_v21  ;;  %v2173_v25 = vpack.c.bf16 %v2275_v22, %v2275_v22 }
 0x198   : > { %v2158_v12 = vpack.c.bf16 %v954_v10, %v952_v9  ;;  %v956_v13 = vpop.f32.mrb[30].mxu0 }
 0x199   : > { %v958_v14 = vpop.f32.mrb[31].mxu0  ;;  %1565 = vst [vmem:[%s2885_s3 + $0x104] sm:$0xf] %v2173_v25  ;;  %v2276_v29 = vpop.f32.mrb[44].mxu1 }
 0x19a   : > { %1550 = vst [vmem:[%s2885_s3 + $0xa8] sm:$0xff] %v2158_v12  ;;  %v2160_v16 = vpack.c.bf16 %v958_v14, %v956_v13  ;;  %v2277_v31 = vpop.f32.mrb[45].mxu1 }
 0x19b   : > { %v2278_v32 = vadd.f32 %v2277_v31, %v2276_v29  ;;  %v2279_v33 = vpop.f32.mrb[46].mxu1 }
 0x19c   : > { %1552 = vst [vmem:[%s2885_s3 + $0xb4] sm:$0xff] %v2160_v16  ;;  %v2280_v34 = vpop.f32.mrb[47].mxu1 }
 0x19d   : > { %v2175_v35 = vpack.c.bf16 %v2278_v32, %v2278_v32  ;;  %v2281_v36 = vadd.f32 %v2280_v34, %v2279_v33 }
 0x19e   : > { %v962_v23 = vpop.f32.mrb[32].mxu0 }
 0x19f   : > { %v964_v24 = vpop.f32.mrb[33].mxu0  ;;  %1567 = vst [vmem:[%s2885_s3 + $0x110] sm:$0xf] %v2175_v35  ;;  %v2177_v39 = vpack.c.bf16 %v2281_v36, %v2281_v36 }
 0x1a0   : > { %v2162_v26 = vpack.c.bf16 %v964_v24, %v962_v23  ;;  %v966_v27 = vpop.f32.mrb[34].mxu0 }
 0x1a1   : > { %v968_v28 = vpop.f32.mrb[35].mxu0  ;;  %1569 = vst [vmem:[%s2885_s3 + $0x11c] sm:$0xf] %v2177_v39  ;;  %v2282_v43 = vpop.f32.mrb[48].mxu1 }
 0x1a2   : > { %1554 = vst [vmem:[%s2885_s3 + $0xc0] sm:$0xff] %v2162_v26  ;;  %v2164_v30 = vpack.c.bf16 %v968_v28, %v966_v27  ;;  %v2283_v45 = vpop.f32.mrb[49].mxu1 }
 0x1a3   : > { %v2284_v46 = vadd.f32 %v2283_v45, %v2282_v43  ;;  %v2285_v47 = vpop.f32.mrb[50].mxu1 }
 0x1a4   : > { %1556 = vst [vmem:[%s2885_s3 + $0xcc] sm:$0xff] %v2164_v30  ;;  %v2286_v48 = vpop.f32.mrb[51].mxu1 }
 0x1a5   : > { %v2179_v49 = vpack.c.bf16 %v2284_v46, %v2284_v46  ;;  %v2287_v50 = vadd.f32 %v2286_v48, %v2285_v47  ;;  %v1613_v48 = vld [vmem:[%s2885_s3] sm:$0xff] (%p2648_p9) }
 0x1a6   : > { %v972_v37 = vpop.f32.mrb[36].mxu0  ;;  %1614 = vst [vmem:[%s2973_s6] sm:$0xff] (%p2648_p9), %v1613_v48 }
 0x1a7   : > { %v974_v38 = vpop.f32.mrb[37].mxu0  ;;  %1571 = vst [vmem:[%s2885_s3 + $0x128] sm:$0xf] %v2179_v49  ;;  %v2181_v53 = vpack.c.bf16 %v2287_v50, %v2287_v50  ;;  %v1615_v49 = vld [vmem:[%s2885_s3 + $0xc] sm:$0xff] (%p2648_p9)  ;;  %v1617_v50 = vld [vmem:[%s2885_s3 + $0x18] sm:$0xff] (%p2648_p9) }
 0x1a8   : > { %v2166_v40 = vpack.c.bf16 %v974_v38, %v972_v37  ;;  %v976_v41 = vpop.f32.mrb[38].mxu0  ;;  %1616 = vst [vmem:[%s2973_s6 + $0x18] sm:$0xff] (%p2648_p9), %v1615_v49  ;;  %1618 = vst [vmem:[%s2973_s6 + $0x30] sm:$0xff] (%p2648_p9), %v1617_v50 }
 0x1a9   : > { %v978_v42 = vpop.f32.mrb[39].mxu0  ;;  %1573 = vst [vmem:[%s2885_s3 + $0x134] sm:$0xf] %v2181_v53  ;;  %v2288_v57 = vpop.f32.mrb[52].mxu1  ;;  %v1623_v53 = vld [vmem:[%s2885_s3 + $0x3c] sm:$0xff] (%p2648_p9) }
 0x1aa   : > { %1558 = vst [vmem:[%s2885_s3 + $0xd8] sm:$0xff] %v2166_v40  ;;  %v2168_v44 = vpack.c.bf16 %v978_v42, %v976_v41  ;;  %v2289_v59 = vpop.f32.mrb[53].mxu1  ;;  %1624 = vst [vmem:[%s2973_s6 + $0x78] sm:$0xff] (%p2648_p9), %v1623_v53 }
 0x1ab   : > { %v2290_v60 = vadd.f32 %v2289_v59, %v2288_v57  ;;  %v2291_v61 = vpop.f32.mrb[54].mxu1  ;;  %v1631_v57 = vld [vmem:[%s2885_s3 + $0x6c] sm:$0xff] (%p2648_p9)  ;;  %v1635_v59 = vld [vmem:[%s2885_s3 + $0x84] sm:$0xff] (%p2648_p9) }
 0x1ac   : > { %1560 = vst [vmem:[%s2885_s3 + $0xe4] sm:$0xff] %v2168_v44  ;;  %v2292_v62 = vpop.f32.mrb[55].mxu1  ;;  %1632 = vst [vmem:[%s2973_s6 + $0xd8] sm:$0xff] (%p2648_p9), %v1631_v57 }
 0x1ad   : > { %v2183_v63 = vpack.c.bf16 %v2290_v60, %v2290_v60  ;;  %v2293_v0 = vadd.f32 %v2292_v62, %v2291_v61  ;;  %v1637_v60 = vld [vmem:[%s2885_s3 + $0x90] sm:$0xff] (%p2648_p9)  ;;  %v1639_v61 = vld [vmem:[%s2885_s3 + $0x9c] sm:$0xff] (%p2648_p9)  ;;  %v1641_v62 = vld [vmem:[%s2885_s3 + $0xa8] sm:$0xff] (%p2648_p9)  ;;  %1636 = vst [vmem:[%s2973_s6 + $0x108] sm:$0xff] (%p2648_p9), %v1635_v59 }
 0x1ae   : > { %v982_v51 = vpop.f32.mrb[40].mxu0  ;;  %1638 = vst [vmem:[%s2973_s6 + $0x120] sm:$0xff] (%p2648_p9), %v1637_v60  ;;  %1640 = vst [vmem:[%s2973_s6 + $0x138] sm:$0xff] (%p2648_p9), %v1639_v61 }
 0x1af   : > { %v984_v52 = vpop.f32.mrb[41].mxu0  ;;  %1575 = vst [vmem:[%s2885_s3 + $0x140] sm:$0xf] %v2183_v63  ;;  %v2185_v3 = vpack.c.bf16 %v2293_v0, %v2293_v0  ;;  %v1643_v63 = vld [vmem:[%s2885_s3 + $0xb4] sm:$0xff] (%p2648_p9)  ;;  %v1645_v0 = vld [vmem:[%s2885_s3 + $0xc0] sm:$0xff] (%p2648_p9)  ;;  %1642 = vst [vmem:[%s2973_s6 + $0x150] sm:$0xff] (%p2648_p9), %v1641_v62 }
 0x1b0   : > { %v2170_v54 = vpack.c.bf16 %v984_v52, %v982_v51  ;;  %v986_v55 = vpop.f32.mrb[42].mxu0  ;;  %v1619_v51 = vld [vmem:[%s2885_s3 + $0x24] sm:$0xff] (%p2648_p9)  ;;  %v1621_v52 = vld [vmem:[%s2885_s3 + $0x30] sm:$0xff] (%p2648_p9)  ;;  %1644 = vst [vmem:[%s2973_s6 + $0x168] sm:$0xff] (%p2648_p9), %v1643_v63  ;;  %1646 = vst [vmem:[%s2973_s6 + $0x180] sm:$0xff] (%p2648_p9), %v1645_v0 }
 0x1b1   : > { %v988_v56 = vpop.f32.mrb[43].mxu0  ;;  %1577 = vst [vmem:[%s2885_s3 + $0x14c] sm:$0xf] %v2185_v3  ;;  %v2294_v7 = vpop.f32.mrb[56].mxu1  ;;  %1620 = vst [vmem:[%s2973_s6 + $0x48] sm:$0xff] (%p2648_p9), %v1619_v51 }
 0x1b2   : > { %1562 = vst [vmem:[%s2885_s3 + $0xf0] sm:$0xff] %v2170_v54  ;;  %v2172_v58 = vpack.c.bf16 %v988_v56, %v986_v55  ;;  %v2295_v9 = vpop.f32.mrb[57].mxu1  ;;  %v1625_v54 = vld [vmem:[%s2885_s3 + $0x48] sm:$0xff] (%p2648_p9)  ;;  %v1627_v55 = vld [vmem:[%s2885_s3 + $0x54] sm:$0xff] (%p2648_p9)  ;;  %v1629_v56 = vld [vmem:[%s2885_s3 + $0x60] sm:$0xff] (%p2648_p9) }
 0x1b3   : > { %v2296_v10 = vadd.f32 %v2295_v9, %v2294_v7  ;;  %v2297_v11 = vpop.f32.mrb[58].mxu1  ;;  %1622 = vst [vmem:[%s2973_s6 + $0x60] sm:$0xff] (%p2648_p9), %v1621_v52  ;;  %1626 = vst [vmem:[%s2973_s6 + $0x90] sm:$0xff] (%p2648_p9), %v1625_v54  ;;  %v1651_v3 = vld [vmem:[%s2885_s3 + $0xe4] sm:$0xff] (%p2648_p9) }
 0x1b4   : > { %1564 = vst [vmem:[%s2885_s3 + $0xfc] sm:$0xff] %v2172_v58  ;;  %v2298_v12 = vpop.f32.mrb[59].mxu1  ;;  %v1633_v58 = vld [vmem:[%s2885_s3 + $0x78] sm:$0xff] (%p2648_p9)  ;;  %1628 = vst [vmem:[%s2973_s6 + $0xa8] sm:$0xff] (%p2648_p9), %v1627_v55 }
 0x1b5   : > { %v2187_v13 = vpack.c.bf16 %v2296_v10, %v2296_v10  ;;  %v2299_v14 = vadd.f32 %v2298_v12, %v2297_v11  ;;  %1630 = vst [vmem:[%s2973_s6 + $0xc0] sm:$0xff] (%p2648_p9), %v1629_v56  ;;  %1634 = vst [vmem:[%s2973_s6 + $0xf0] sm:$0xff] (%p2648_p9), %v1633_v58 }
 0x1b6   : > { %v992_v1 = vpop.f32.mrb[44].mxu0  ;;  %1652 = vst [vmem:[%s2973_s6 + $0x1c8] sm:$0xff] (%p2648_p9), %v1651_v3 }
 0x1b7   : > { %v994_v2 = vpop.f32.mrb[45].mxu0  ;;  %1579 = vst [vmem:[%s2885_s3 + $0x158] sm:$0xf] %v2187_v13  ;;  %v2189_v17 = vpack.c.bf16 %v2299_v14, %v2299_v14 }
 0x1b8   : > { %v2174_v4 = vpack.c.bf16 %v994_v2, %v992_v1  ;;  %v996_v5 = vpop.f32.mrb[46].mxu0  ;;  %v1647_v1 = vld [vmem:[%s2885_s3 + $0xcc] sm:$0xff] (%p2648_p9)  ;;  %v1649_v2 = vld [vmem:[%s2885_s3 + $0xd8] sm:$0xff] (%p2648_p9) }
 0x1b9   : > { %v998_v6 = vpop.f32.mrb[47].mxu0  ;;  %1581 = vst [vmem:[%s2885_s3 + $0x164] sm:$0xf] %v2189_v17  ;;  %v2300_v21 = vpop.f32.mrb[60].mxu1  ;;  %1648 = vst [vmem:[%s2973_s6 + $0x198] sm:$0xff] (%p2648_p9), %v1647_v1 }
 0x1ba   : > { %1566 = vst [vmem:[%s2885_s3 + $0x108] sm:$0xff] %v2174_v4  ;;  %v2176_v8 = vpack.c.bf16 %v998_v6, %v996_v5  ;;  %v2301_v23 = vpop.f32.mrb[61].mxu1  ;;  %v1653_v4 = vld [vmem:[%s2885_s3 + $0xf0] sm:$0xff] (%p2648_p9)  ;;  %1650 = vst [vmem:[%s2973_s6 + $0x1b0] sm:$0xff] (%p2648_p9), %v1649_v2 }
 0x1bb   : > { %v2302_v24 = vadd.f32 %v2301_v23, %v2300_v21  ;;  %v2303_v25 = vpop.f32.mrb[62].mxu1  ;;  %1654 = vst [vmem:[%s2973_s6 + $0x1e0] sm:$0xff] (%p2648_p9), %v1653_v4  ;;  %v1655_v5 = vld [vmem:[%s2885_s3 + $0xfc] sm:$0xff] (%p2648_p9)  ;;  %v2064_v17 = vld [vmem:[%s2885_s3 + $0x14] sm:$0xf] (%p2648_p9) }
 0x1bc   : > { %1568 = vst [vmem:[%s2885_s3 + $0x114] sm:$0xff] %v2176_v8  ;;  %v2304_v26 = vpop.f32.mrb[63].mxu1  ;;  %1656 = vst [vmem:[%s2973_s6 + $0x1f8] sm:$0xff] (%p2648_p9), %v1655_v5  ;;  %v2072_v21 = vld [vmem:[%s2885_s3 + $0x44] sm:$0xf] (%p2648_p9) }
 0x1bd   : > { %v2191_v27 = vpack.c.bf16 %v2302_v24, %v2302_v24  ;;  %v2305_v28 = vadd.f32 %v2304_v26, %v2303_v25  ;;  %2065 = vst [vmem:[%s2973_s6 + $0x20] sm:$0xf] (%p2648_p9), %v2064_v17  ;;  %2073 = vst [vmem:[%s2973_s6 + $0x80] sm:$0xf] (%p2648_p9), %v2072_v21  ;;  %v2076_v23 = vld [vmem:[%s2885_s3 + $0x5c] sm:$0xf] (%p2648_p9) }
 0x1be   : > { %v1002_v15 = vpop.f32.mrb[48].mxu0  ;;  %v2078_v24 = vld [vmem:[%s2885_s3 + $0x68] sm:$0xf] (%p2648_p9)  ;;  %v2080_v25 = vld [vmem:[%s2885_s3 + $0x74] sm:$0xf] (%p2648_p9) }
 0x1bf   : > { %v1004_v16 = vpop.f32.mrb[49].mxu0  ;;  %1583 = vst [vmem:[%s2885_s3 + $0x170] sm:$0xf] %v2191_v27  ;;  %v2193_v31 = vpack.c.bf16 %v2305_v28, %v2305_v28  ;;  %2077 = vst [vmem:[%s2973_s6 + $0xb0] sm:$0xf] (%p2648_p9), %v2076_v23 }
 0x1c0   : > { %v2178_v18 = vpack.c.bf16 %v1004_v16, %v1002_v15  ;;  %v1006_v19 = vpop.f32.mrb[50].mxu0  ;;  %v2062_v16 = vld [vmem:[%s2885_s3 + $0x8] sm:$0xf] (%p2648_p9)  ;;  %2079 = vst [vmem:[%s2973_s6 + $0xc8] sm:$0xf] (%p2648_p9), %v2078_v24 }
 0x1c1   : > { %v1008_v20 = vpop.f32.mrb[51].mxu0  ;;  %1585 = vst [vmem:[%s2885_s3 + $0x17c] sm:$0xf] %v2193_v31  ;;  %v1657_v6 = vld [vmem:[%s2885_s3 + $0x108] sm:$0xff] (%p2648_p9)  ;;  %2063 = vst [vmem:[%s2973_s6 + $0x8] sm:$0xf] (%p2648_p9), %v2062_v16 }
 0x1c2   : > { %1570 = vst [vmem:[%s2885_s3 + $0x120] sm:$0xff] %v2178_v18  ;;  %v2180_v22 = vpack.c.bf16 %v1008_v20, %v1006_v19  ;;  %1658 = vst [vmem:[%s2973_s6 + $0x210] sm:$0xff] (%p2648_p9), %v1657_v6  ;;  %v2066_v18 = vld [vmem:[%s2885_s3 + $0x20] sm:$0xf] (%p2648_p9)  ;;  %v2068_v19 = vld [vmem:[%s2885_s3 + $0x2c] sm:$0xf] (%p2648_p9) }
 0x1c3   : > { %v1659_v7 = vld [vmem:[%s2885_s3 + $0x114] sm:$0xff] (%p2648_p9)  ;;  %2067 = vst [vmem:[%s2973_s6 + $0x38] sm:$0xf] (%p2648_p9), %v2066_v18  ;;  %2069 = vst [vmem:[%s2973_s6 + $0x50] sm:$0xf] (%p2648_p9), %v2068_v19 }
 0x1c4   : > { %1572 = vst [vmem:[%s2885_s3 + $0x12c] sm:$0xff] %v2180_v22  ;;  %1660 = vst [vmem:[%s2973_s6 + $0x228] sm:$0xff] (%p2648_p9), %v1659_v7  ;;  %v2070_v20 = vld [vmem:[%s2885_s3 + $0x38] sm:$0xf] (%p2648_p9)  ;;  %v2074_v22 = vld [vmem:[%s2885_s3 + $0x50] sm:$0xf] (%p2648_p9) }
 0x1c5   : > { %2071 = vst [vmem:[%s2973_s6 + $0x68] sm:$0xf] (%p2648_p9), %v2070_v20  ;;  %2075 = vst [vmem:[%s2973_s6 + $0x98] sm:$0xf] (%p2648_p9), %v2074_v22  ;;  %v2082_v26 = vld [vmem:[%s2885_s3 + $0x80] sm:$0xf] (%p2648_p9) }
 0x1c6   : > { %v1012_v29 = vpop.f32.mrb[52].mxu0  ;;  %2081 = vst [vmem:[%s2973_s6 + $0xe0] sm:$0xf] (%p2648_p9), %v2080_v25  ;;  %v2084_v27 = vld [vmem:[%s2885_s3 + $0x8c] sm:$0xf] (%p2648_p9) }
 0x1c7   : > { %v1014_v30 = vpop.f32.mrb[53].mxu0  ;;  %v2086_v28 = vld [vmem:[%s2885_s3 + $0x98] sm:$0xf] (%p2648_p9)  ;;  %2083 = vst [vmem:[%s2973_s6 + $0xf8] sm:$0xf] (%p2648_p9), %v2082_v26 }
 0x1c8   : > { %v2182_v32 = vpack.c.bf16 %v1014_v30, %v1012_v29  ;;  %v1016_v33 = vpop.f32.mrb[54].mxu0  ;;  %2085 = vst [vmem:[%s2973_s6 + $0x110] sm:$0xf] (%p2648_p9), %v2084_v27  ;;  %2087 = vst [vmem:[%s2973_s6 + $0x128] sm:$0xf] (%p2648_p9), %v2086_v28 }
 0x1c9   : > { %v1018_v34 = vpop.f32.mrb[55].mxu0  ;;  %v1661_v8 = vld [vmem:[%s2885_s3 + $0x120] sm:$0xff] (%p2648_p9)  ;;  %v2090_v30 = vld [vmem:[%s2885_s3 + $0xb0] sm:$0xf] (%p2648_p9)  ;;  %v2092_v31 = vld [vmem:[%s2885_s3 + $0xbc] sm:$0xf] (%p2648_p9) }
 0x1ca   : > { %1574 = vst [vmem:[%s2885_s3 + $0x138] sm:$0xff] %v2182_v32  ;;  %v2184_v35 = vpack.c.bf16 %v1018_v34, %v1016_v33  ;;  %1662 = vst [vmem:[%s2973_s6 + $0x240] sm:$0xff] (%p2648_p9), %v1661_v8  ;;  %v2088_v29 = vld [vmem:[%s2885_s3 + $0xa4] sm:$0xf] (%p2648_p9)  ;;  %v2094_v32 = vld [vmem:[%s2885_s3 + $0xc8] sm:$0xf] (%p2648_p9) }
 0x1cb   : > { %v1663_v9 = vld [vmem:[%s2885_s3 + $0x12c] sm:$0xff] (%p2648_p9)  ;;  %2089 = vst [vmem:[%s2973_s6 + $0x140] sm:$0xf] (%p2648_p9), %v2088_v29  ;;  %2091 = vst [vmem:[%s2973_s6 + $0x158] sm:$0xf] (%p2648_p9), %v2090_v30 }
 0x1cc   : > { %1576 = vst [vmem:[%s2885_s3 + $0x144] sm:$0xff] %v2184_v35  ;;  %1664 = vst [vmem:[%s2973_s6 + $0x258] sm:$0xff] (%p2648_p9), %v1663_v9  ;;  %v2096_v33 = vld [vmem:[%s2885_s3 + $0xd4] sm:$0xf] (%p2648_p9)  ;;  %v2098_v34 = vld [vmem:[%s2885_s3 + $0xe0] sm:$0xf] (%p2648_p9) }
 0x1cd   : > { %2093 = vst [vmem:[%s2973_s6 + $0x170] sm:$0xf] (%p2648_p9), %v2092_v31  ;;  %2095 = vst [vmem:[%s2973_s6 + $0x188] sm:$0xf] (%p2648_p9), %v2094_v32  ;;  %v2100_v35 = vld [vmem:[%s2885_s3 + $0xec] sm:$0xf] (%p2648_p9) }
 0x1ce   : > { %v1022_v36 = vpop.f32.mrb[56].mxu0  ;;  %2097 = vst [vmem:[%s2973_s6 + $0x1a0] sm:$0xf] (%p2648_p9), %v2096_v33  ;;  %2099 = vst [vmem:[%s2973_s6 + $0x1b8] sm:$0xf] (%p2648_p9), %v2098_v34 }
 0x1cf   : > { %v1024_v37 = vpop.f32.mrb[57].mxu0  ;;  %2101 = vst [vmem:[%s2973_s6 + $0x1d0] sm:$0xf] (%p2648_p9), %v2100_v35 }
 0x1d0   : > { %v2186_v38 = vpack.c.bf16 %v1024_v37, %v1022_v36  ;;  %v1026_v39 = vpop.f32.mrb[58].mxu0  ;;  %v2102_v36 = vld [vmem:[%s2885_s3 + $0xf8] sm:$0xf] (%p2648_p9)  ;;  %v2104_v37 = vld [vmem:[%s2885_s3 + $0x104] sm:$0xf] (%p2648_p9) }
 0x1d1   : > { %v1028_v40 = vpop.f32.mrb[59].mxu0  ;;  %v1665_v10 = vld [vmem:[%s2885_s3 + $0x138] sm:$0xff] (%p2648_p9)  ;;  %2103 = vst [vmem:[%s2973_s6 + $0x1e8] sm:$0xf] (%p2648_p9), %v2102_v36  ;;  %2105 = vst [vmem:[%s2973_s6 + $0x200] sm:$0xf] (%p2648_p9), %v2104_v37 }
 0x1d2   : > { %1578 = vst [vmem:[%s2885_s3 + $0x150] sm:$0xff] %v2186_v38  ;;  %v2188_v41 = vpack.c.bf16 %v1028_v40, %v1026_v39  ;;  %1666 = vst [vmem:[%s2973_s6 + $0x270] sm:$0xff] (%p2648_p9), %v1665_v10  ;;  %v2106_v38 = vld [vmem:[%s2885_s3 + $0x110] sm:$0xf] (%p2648_p9)  ;;  %v2108_v39 = vld [vmem:[%s2885_s3 + $0x11c] sm:$0xf] (%p2648_p9) }
 0x1d3   : > { %v1667_v11 = vld [vmem:[%s2885_s3 + $0x144] sm:$0xff] (%p2648_p9)  ;;  %2107 = vst [vmem:[%s2973_s6 + $0x218] sm:$0xf] (%p2648_p9), %v2106_v38  ;;  %2109 = vst [vmem:[%s2973_s6 + $0x230] sm:$0xf] (%p2648_p9), %v2108_v39 }
 0x1d4   : > { %1580 = vst [vmem:[%s2885_s3 + $0x15c] sm:$0xff] %v2188_v41  ;;  %1668 = vst [vmem:[%s2973_s6 + $0x288] sm:$0xff] (%p2648_p9), %v1667_v11  ;;  %v2110_v40 = vld [vmem:[%s2885_s3 + $0x128] sm:$0xf] (%p2648_p9)  ;;  %v2112_v41 = vld [vmem:[%s2885_s3 + $0x134] sm:$0xf] (%p2648_p9) }
 0x1d5   : > { %2111 = vst [vmem:[%s2973_s6 + $0x248] sm:$0xf] (%p2648_p9), %v2110_v40  ;;  %2113 = vst [vmem:[%s2973_s6 + $0x260] sm:$0xf] (%p2648_p9), %v2112_v41 }
 0x1d6   : > { %v1032_v42 = vpop.f32.mrb[60].mxu0  ;;  %1592 = sbr.rel (!%p2648_p9) target bundleno = 485 (0x1e5), region = 58 }
 0x1d7   : > { %v1034_v43 = vpop.f32.mrb[61].mxu0 }
 0x1d8   : > { %v2190_v44 = vpack.c.bf16 %v1034_v43, %v1032_v42  ;;  %v1036_v45 = vpop.f32.mrb[62].mxu0  ;;  %v2114_v42 = vld [vmem:[%s2885_s3 + $0x140] sm:$0xf] (%p2648_p9)  ;;  %v2116_v43 = vld [vmem:[%s2885_s3 + $0x14c] sm:$0xf] (%p2648_p9) }
 0x1d9   : > { %v1038_v46 = vpop.f32.mrb[63].mxu0  ;;  %v1669_v12 = vld [vmem:[%s2885_s3 + $0x150] sm:$0xff] (%p2648_p9)  ;;  %2115 = vst [vmem:[%s2973_s6 + $0x278] sm:$0xf] (%p2648_p9), %v2114_v42  ;;  %2117 = vst [vmem:[%s2973_s6 + $0x290] sm:$0xf] (%p2648_p9), %v2116_v43 }
 0x1da   : > { %1582 = vst [vmem:[%s2885_s3 + $0x168] sm:$0xff] %v2190_v44  ;;  %v2192_v47 = vpack.c.bf16 %v1038_v46, %v1036_v45  ;;  %1670 = vst [vmem:[%s2973_s6 + $0x2a0] sm:$0xff] (%p2648_p9), %v1669_v12  ;;  %v2118_v44 = vld [vmem:[%s2885_s3 + $0x158] sm:$0xf] (%p2648_p9)  ;;  %v2120_v45 = vld [vmem:[%s2885_s3 + $0x164] sm:$0xf] (%p2648_p9) }
 0x1db   : > { %v1671_v13 = vld [vmem:[%s2885_s3 + $0x15c] sm:$0xff] (%p2648_p9)  ;;  %v2122_v46 = vld [vmem:[%s2885_s3 + $0x170] sm:$0xf] (%p2648_p9)  ;;  %2119 = vst [vmem:[%s2973_s6 + $0x2a8] sm:$0xf] (%p2648_p9), %v2118_v44 }
 0x1dc   : > { %1584 = vst [vmem:[%s2885_s3 + $0x174] sm:$0xff] %v2192_v47  ;;  %1672 = vst [vmem:[%s2973_s6 + $0x2b8] sm:$0xff] (%p2648_p9), %v1671_v13  ;;  %v2124_v47 = vld [vmem:[%s2885_s3 + $0x17c] sm:$0xf] (%p2648_p9) }
 0x1dd   : > { %2121 = vst [vmem:[%s2973_s6 + $0x2c0] sm:$0xf] %v2120_v45  ;;  %2123 = vst [vmem:[%s2973_s6 + $0x2d8] sm:$0xf] %v2122_v46 }
 0x1de   : > { %2125 = vst [vmem:[%s2973_s6 + $0x2f0] sm:$0xf] %v2124_v47 }
 0x1e1   : > { %v1673_v14 = vld [vmem:[%s2885_s3 + $0x168] sm:$0xff] }
 0x1e2   : > { %1674 = vst [vmem:[%s2973_s6 + $0x2d0] sm:$0xff] %v1673_v14 }
 0x1e3   : > { %v1675_v15 = vld [vmem:[%s2885_s3 + $0x174] sm:$0xff] }
 0x1e4   : > { %1676 = vst [vmem:[%s2973_s6 + $0x2e8] sm:$0xff] %v1675_v15 }
 0x1e5 PF: > { %s12_s17 = sadd.s32 1, %s2564_s17   ;;  %s3119_s9 = smov %s2536_s10 }
 0x1e6   : > { %p9_p1 = scmp.ge.s32.totalorder %s12_s17, 6   ;;  %s3120_s10 = smov %s2653_s28 }
 0x1e7   : > { %s3121_s11 = smov %s2544_s12  ;;  %s3122_s12 = smov %s2642_s24 }
 0x1e8   : > { %s3123_s13 = smov %s2556_s15  ;;  %s3124_s14 = smov %s2560_s16 }
 0x1e9   : > { %s3125_s15 = smov %s3128_s19  ;;  %s3126_s16 = smov %s3132_s20 }
 0x1ea   :  { %11 = sbr.rel (!%p9_p1) target bundleno = 5 (0x5), region = 130 }

// kernel: self_attention_forward.5
= control target key start
LH: loop header
LB: loop body
LE: loop exit
PB: predicated region body
PF: predicated region fallthrough
CT: control target
= control target key end

     0   :  { %s5386_s0 = inlined_call_operand.vmem [shape: bf16[2,256,768], index: 0, kind: input, shape index: {}, may-alias: {0,1}]   ;;  %s5387_s1 = inlined_call_operand.vmem [shape: bf16[2,256,768], index: 1, kind: input, shape index: {}, may-alias: {0,1}]   ;;  %s5388_s2 = inlined_call_operand.vmem [shape: bf16[2,256,128], index: 2, kind: input, shape index: {}]   ;;  %s5389_s3 = inlined_call_operand.vmem [shape: bf16[2,256,128], index: 3, kind: input, shape index: {}]   ;;  %s5390_s4 = inlined_call_operand.vmem [shape: f32[1,128], index: 4, kind: input, shape index: {}]   ;;  %s5391_s5 = inlined_call_operand.vmem [shape: f32[1,128], index: 5, kind: input, shape index: {}]   ;;  %s5392_s6 = inlined_call_operand.vmem [shape: bf16[2,256,256], index: 6, kind: output, shape index: {0}]   ;;  %s5393_s7 = inlined_call_operand.vmem [shape: bf16[2,256,256], index: 7, kind: output, shape index: {1}]  }
   0x1   :  { %5488 = sst [smem:[#allocation41_spill]] %s5393_s7 }
   0x2   :  { %s3713_s24 = smov 0   ;;  %s3715_s25 = smov 0  }
   0x3   :  { %s3717_s26 = smov 0   ;;  %s3719_s27 = smov 0  }
   0x4   :  { %s3721_s28 = smov 0   ;;  %s3723_s29 = smov 0  }
   0x5   :  { %s3725_s30 = smov 0   ;;  %s3727_s8 = smov 0  }
   0x6   :  { %s3729_s9 = smov 0  }
   0x7 LB: > { %s2702_s10 = sadd.s32 4294967295, %s3670_s9   ;;  %s30_s11 = sadd.s32 1, %s3662_s30  ;;  %s3670_s9 = sphi %s3729_s9, %s18_s9   ;;  %s3666_s8 = sphi %s3727_s8, %s5679_s8   ;;  %s3662_s30 = sphi %s3725_s30, %s5678_s30   ;;  %s3658_s29 = sphi %s3723_s29, %s5677_s29   ;;  %s3654_s28 = sphi %s3721_s28, %s5676_s28   ;;  %s3650_s27 = sphi %s3719_s27, %s5675_s27   ;;  %s3646_s26 = sphi %s3717_s26, %s5674_s26   ;;  %s3642_s25 = sphi %s3715_s25, %s5673_s25   ;;  %s3638_s24 = sphi %s3713_s24, %s5672_s24  }
   0x8   : > { %p31_p0 = scmp.ge.s32.totalorder %s30_s11, 2  ;;  %s37_s12 = sadd.s32 1, %s3666_s8 }
   0x9   : > { %s48_s13 = sadd.s32 1, %s3650_s27  ;;  %p55_p1 = scmp.ne.s32.totalorder %s3650_s27, %s3646_s26 }
   0xa   : > { %s5681_s11 = smov (%p31_p0, %s30_s11), 0  ;;  %s5683_s12 = smov (!%p31_p0, %s37_s12), %s3666_s8 }
   0xb   : > { %5489 = sst [smem:[#allocation6_spill]] %s5681_s11  ;;  %s44_s14 = ssub.s32 %s3662_s30, %s5681_s11 }
   0xc   : > { %p56_p2 = scmp.eq.s32.totalorder %s3670_s9, 0  ;;  %p39_p3 = scmp.ge.s32.totalorder %s5683_s12, 2 }
   0xd   : > { %s71_s15 = sadd.s32 2, %s3662_s30  ;;  %s72_s17 = sadd.s32 2, %s5681_s11 }
   0xe   : > { %p3776_p4 = por %p56_p2, %p55_p1  ;;  %s5685_s12 = smov (%p39_p3, %s5683_s12), 0 }
   0xf   : > { %s76_s18 = ssub.s32 %s71_s15, %s72_s17  ;;  %s80_s19 = sadd.s32 1, %s3642_s25 }
  0x10   : > { %s41_s20 = ssub.s32 %s3666_s8, %s5685_s12  ;;  %p87_p5 = scmp.ne.s32.totalorder %s3642_s25, %s3638_s24 }
  0x11   : > { %s45_s21 = sor.u32 %s44_s14, %s41_s20  ;;  %s77_s22 = sor.u32 %s76_s18, %s41_s20 }
  0x12   : > { %p46_p6 = scmp.eq.s32.totalorder %s45_s21, 0  ;;  %p78_p7 = scmp.eq.s32.totalorder %s77_s22, 0 }
  0x13   : > { %p3790_p8 = por %p87_p5, %p56_p2  ;;  %p219_p9 = scmp.eq.s32.totalorder %s2702_s10, 3 }
  0x14   : > { %s3795_s7 = scalar_select %p46_p6, %s3650_s27, %s48_s13  }
  0x15   : > { %s3798_s11 = scalar_select %p78_p7, %s3642_s25, %s80_s19  }
  0x16   : > { %p3803_p10 = por %p219_p9, %p55_p1  ;;  %p2705_p11 = scmp.ge.s32.totalorder %s3670_s9, 4 }
  0x18   : > { %277 = sbr.rel (%p2705_p11) target bundleno = 87 (0x57), region = 24 }
  0x1f   : > { %280 = sbr.rel (!%p3776_p4) target bundleno = 59 (0x3b), region = 28  ;;  %s282_s14 = sand.u32 (%p3776_p4), 1, %s3650_s27  }
  0x20   : > { %s3397_s10 = smul.u32 (%p3776_p4), 192, %s3666_s8  ;;  %s2706_s13 = sshll.u32 (%p3776_p4), %s282_s14, 7 }
  0x21   : > { %s3821_s16 = scalar_lea.vmem (%p3776_p4), [#allocation2], %s2706_s13 }
  0x22   : > { %s289_s17 = sadd.s32 (%p3776_p4), %s3662_s30, %s3397_s10 }
  0x23   : > { %s2707_s18 = sshll.u32 (%p3776_p4), %s289_s17, 2 }
  0x24   : > { %s3816_s21 = scalar_lea.vmem (%p3776_p4), %s5386_s0, %s2707_s18 }
  0x25   : > { %v307_v0 = vld [vmem:[%s3816_s21] sm:$0xf] (%p3776_p4)  ;;  %v309_v1 = vld [vmem:[%s3816_s21 + $0x18] sm:$0xf] (%p3776_p4)  ;;  %v311_v2 = vld [vmem:[%s3816_s21 + $0x30] sm:$0xf] (%p3776_p4) }
  0x26   : > { %308 = vst [vmem:[%s3821_s16] sm:$0xf] %v307_v0  ;;  %310 = vst [vmem:[%s3821_s16 + $0x4] sm:$0xf] %v309_v1  ;;  %v313_v3 = vld [vmem:[%s3816_s21 + $0x48] sm:$0xf] }
  0x27   : > { %312 = vst [vmem:[%s3821_s16 + $0x8] sm:$0xf] %v311_v2  ;;  %v315_v4 = vld [vmem:[%s3816_s21 + $0x60] sm:$0xf]  ;;  %v317_v5 = vld [vmem:[%s3816_s21 + $0x78] sm:$0xf] }
  0x28   : > { %314 = vst [vmem:[%s3821_s16 + $0xc] sm:$0xf] %v313_v3  ;;  %316 = vst [vmem:[%s3821_s16 + $0x10] sm:$0xf] %v315_v4  ;;  %v319_v6 = vld [vmem:[%s3816_s21 + $0x90] sm:$0xf] }
  0x29   : > { %318 = vst [vmem:[%s3821_s16 + $0x14] sm:$0xf] %v317_v5  ;;  %v321_v7 = vld [vmem:[%s3816_s21 + $0xa8] sm:$0xf]  ;;  %v323_v8 = vld [vmem:[%s3816_s21 + $0xc0] sm:$0xf] }
  0x2a   : > { %320 = vst [vmem:[%s3821_s16 + $0x18] sm:$0xf] %v319_v6  ;;  %322 = vst [vmem:[%s3821_s16 + $0x1c] sm:$0xf] %v321_v7  ;;  %v325_v9 = vld [vmem:[%s3816_s21 + $0xd8] sm:$0xf] }
  0x2b   : > { %324 = vst [vmem:[%s3821_s16 + $0x20] sm:$0xf] %v323_v8  ;;  %v327_v10 = vld [vmem:[%s3816_s21 + $0xf0] sm:$0xf]  ;;  %v329_v11 = vld [vmem:[%s3816_s21 + $0x108] sm:$0xf] }
  0x2c   : > { %326 = vst [vmem:[%s3821_s16 + $0x24] sm:$0xf] %v325_v9  ;;  %328 = vst [vmem:[%s3821_s16 + $0x28] sm:$0xf] %v327_v10  ;;  %v331_v12 = vld [vmem:[%s3816_s21 + $0x120] sm:$0xf] }
  0x2d   : > { %330 = vst [vmem:[%s3821_s16 + $0x2c] sm:$0xf] %v329_v11  ;;  %v333_v13 = vld [vmem:[%s3816_s21 + $0x138] sm:$0xf]  ;;  %v335_v14 = vld [vmem:[%s3816_s21 + $0x150] sm:$0xf] }
  0x2e   : > { %332 = vst [vmem:[%s3821_s16 + $0x30] sm:$0xf] %v331_v12  ;;  %334 = vst [vmem:[%s3821_s16 + $0x34] sm:$0xf] %v333_v13  ;;  %v337_v15 = vld [vmem:[%s3816_s21 + $0x168] sm:$0xf] }
  0x2f   : > { %336 = vst [vmem:[%s3821_s16 + $0x38] sm:$0xf] %v335_v14  ;;  %v339_v16 = vld [vmem:[%s3816_s21 + $0x180] sm:$0xf]  ;;  %v341_v17 = vld [vmem:[%s3816_s21 + $0x198] sm:$0xf] }
  0x30   : > { %338 = vst [vmem:[%s3821_s16 + $0x3c] sm:$0xf] %v337_v15  ;;  %340 = vst [vmem:[%s3821_s16 + $0x40] sm:$0xf] %v339_v16  ;;  %v343_v18 = vld [vmem:[%s3816_s21 + $0x1b0] sm:$0xf] }
  0x31   : > { %342 = vst [vmem:[%s3821_s16 + $0x44] sm:$0xf] %v341_v17  ;;  %v345_v19 = vld [vmem:[%s3816_s21 + $0x1c8] sm:$0xf]  ;;  %v347_v20 = vld [vmem:[%s3816_s21 + $0x1e0] sm:$0xf] }
  0x32   : > { %344 = vst [vmem:[%s3821_s16 + $0x48] sm:$0xf] %v343_v18  ;;  %346 = vst [vmem:[%s3821_s16 + $0x4c] sm:$0xf] %v345_v19  ;;  %v349_v21 = vld [vmem:[%s3816_s21 + $0x1f8] sm:$0xf] }
  0x33   : > { %348 = vst [vmem:[%s3821_s16 + $0x50] sm:$0xf] %v347_v20  ;;  %v351_v22 = vld [vmem:[%s3816_s21 + $0x210] sm:$0xf]  ;;  %v353_v23 = vld [vmem:[%s3816_s21 + $0x228] sm:$0xf] }
  0x34   : > { %350 = vst [vmem:[%s3821_s16 + $0x54] sm:$0xf] %v349_v21  ;;  %352 = vst [vmem:[%s3821_s16 + $0x58] sm:$0xf] %v351_v22  ;;  %v355_v24 = vld [vmem:[%s3816_s21 + $0x240] sm:$0xf] }
  0x35   : > { %354 = vst [vmem:[%s3821_s16 + $0x5c] sm:$0xf] %v353_v23  ;;  %v357_v25 = vld [vmem:[%s3816_s21 + $0x258] sm:$0xf]  ;;  %v359_v26 = vld [vmem:[%s3816_s21 + $0x270] sm:$0xf] }
  0x36   : > { %356 = vst [vmem:[%s3821_s16 + $0x60] sm:$0xf] %v355_v24  ;;  %358 = vst [vmem:[%s3821_s16 + $0x64] sm:$0xf] %v357_v25  ;;  %v361_v27 = vld [vmem:[%s3816_s21 + $0x288] sm:$0xf] }
  0x37   : > { %360 = vst [vmem:[%s3821_s16 + $0x68] sm:$0xf] %v359_v26  ;;  %v363_v28 = vld [vmem:[%s3816_s21 + $0x2a0] sm:$0xf]  ;;  %v365_v29 = vld [vmem:[%s3816_s21 + $0x2b8] sm:$0xf] }
  0x38   : > { %362 = vst [vmem:[%s3821_s16 + $0x6c] sm:$0xf] %v361_v27  ;;  %364 = vst [vmem:[%s3821_s16 + $0x70] sm:$0xf] %v363_v28  ;;  %v367_v30 = vld [vmem:[%s3816_s21 + $0x2d0] sm:$0xf] }
  0x39   : > { %366 = vst [vmem:[%s3821_s16 + $0x74] sm:$0xf] %v365_v29  ;;  %v369_v31 = vld [vmem:[%s3816_s21 + $0x2e8] sm:$0xf]  ;;  %368 = vst [vmem:[%s3821_s16 + $0x78] sm:$0xf] %v367_v30 }
  0x3a   : > { %370 = vst [vmem:[%s3821_s16 + $0x7c] sm:$0xf] %v369_v31 }
  0x3b PF: > { %457 = sbr.rel (!%p3790_p8) target bundleno = 87 (0x57), region = 69  ;;  %s459_s22 = sand.u32 (%p3790_p8), 1, %s3642_s25  }
  0x3c   : > { %s2563_s14 = smul.u32 (%p3790_p8), 192, %s3666_s8  ;;  %s2708_s10 = sshll.u32 (%p3790_p8), %s459_s22, 7 }
  0x3d   : > { %s3897_s23 = scalar_lea.vmem (%p3790_p8), [#allocation3], %s2708_s10 }
  0x3e   : > { %s2564_s13 = sadd.s32 (%p3790_p8), %s3662_s30, %s2563_s14 }
  0x3f   : > { %s2709_s17 = sshll.u32 (%p3790_p8), %s2564_s13, 2 }
  0x40   : > { %s3892_s20 = scalar_lea.vmem (%p3790_p8), %s5387_s1, %s2709_s17 }
  0x41   : > { %v2710_v32 = vld [vmem:[%s3892_s20 + $0x8] sm:$0xf] (%p3790_p8)  ;;  %v2711_v33 = vld [vmem:[%s3892_s20 + $0x20] sm:$0xf] (%p3790_p8)  ;;  %v2712_v34 = vld [vmem:[%s3892_s20 + $0x38] sm:$0xf] (%p3790_p8) }
  0x42   : > { %486 = vst [vmem:[%s3897_s23] sm:$0xf] %v2710_v32  ;;  %488 = vst [vmem:[%s3897_s23 + $0x4] sm:$0xf] %v2711_v33  ;;  %v2713_v35 = vld [vmem:[%s3892_s20 + $0x50] sm:$0xf] }
  0x43   : > { %490 = vst [vmem:[%s3897_s23 + $0x8] sm:$0xf] %v2712_v34  ;;  %v2714_v36 = vld [vmem:[%s3892_s20 + $0x68] sm:$0xf]  ;;  %v2715_v37 = vld [vmem:[%s3892_s20 + $0x80] sm:$0xf] }
  0x44   : > { %492 = vst [vmem:[%s3897_s23 + $0xc] sm:$0xf] %v2713_v35  ;;  %494 = vst [vmem:[%s3897_s23 + $0x10] sm:$0xf] %v2714_v36  ;;  %v2716_v38 = vld [vmem:[%s3892_s20 + $0x98] sm:$0xf] }
  0x45   : > { %496 = vst [vmem:[%s3897_s23 + $0x14] sm:$0xf] %v2715_v37  ;;  %v2717_v39 = vld [vmem:[%s3892_s20 + $0xb0] sm:$0xf]  ;;  %v2718_v40 = vld [vmem:[%s3892_s20 + $0xc8] sm:$0xf] }
  0x46   : > { %498 = vst [vmem:[%s3897_s23 + $0x18] sm:$0xf] %v2716_v38  ;;  %500 = vst [vmem:[%s3897_s23 + $0x1c] sm:$0xf] %v2717_v39  ;;  %v2719_v41 = vld [vmem:[%s3892_s20 + $0xe0] sm:$0xf] }
  0x47   : > { %502 = vst [vmem:[%s3897_s23 + $0x20] sm:$0xf] %v2718_v40  ;;  %v2720_v42 = vld [vmem:[%s3892_s20 + $0xf8] sm:$0xf]  ;;  %v2721_v43 = vld [vmem:[%s3892_s20 + $0x110] sm:$0xf] }
  0x48   : > { %504 = vst [vmem:[%s3897_s23 + $0x24] sm:$0xf] %v2719_v41  ;;  %506 = vst [vmem:[%s3897_s23 + $0x28] sm:$0xf] %v2720_v42  ;;  %v2722_v44 = vld [vmem:[%s3892_s20 + $0x128] sm:$0xf] }
  0x49   : > { %508 = vst [vmem:[%s3897_s23 + $0x2c] sm:$0xf] %v2721_v43  ;;  %v2723_v45 = vld [vmem:[%s3892_s20 + $0x140] sm:$0xf]  ;;  %v2724_v46 = vld [vmem:[%s3892_s20 + $0x158] sm:$0xf] }
  0x4a   : > { %510 = vst [vmem:[%s3897_s23 + $0x30] sm:$0xf] %v2722_v44  ;;  %512 = vst [vmem:[%s3897_s23 + $0x34] sm:$0xf] %v2723_v45  ;;  %v2725_v47 = vld [vmem:[%s3892_s20 + $0x170] sm:$0xf] }
  0x4b   : > { %514 = vst [vmem:[%s3897_s23 + $0x38] sm:$0xf] %v2724_v46  ;;  %v2726_v48 = vld [vmem:[%s3892_s20 + $0x188] sm:$0xf]  ;;  %v2727_v49 = vld [vmem:[%s3892_s20 + $0x1a0] sm:$0xf] }
  0x4c   : > { %516 = vst [vmem:[%s3897_s23 + $0x3c] sm:$0xf] %v2725_v47  ;;  %518 = vst [vmem:[%s3897_s23 + $0x40] sm:$0xf] %v2726_v48  ;;  %v2728_v50 = vld [vmem:[%s3892_s20 + $0x1b8] sm:$0xf] }
  0x4d   : > { %520 = vst [vmem:[%s3897_s23 + $0x44] sm:$0xf] %v2727_v49  ;;  %v2729_v51 = vld [vmem:[%s3892_s20 + $0x1d0] sm:$0xf]  ;;  %v2730_v52 = vld [vmem:[%s3892_s20 + $0x1e8] sm:$0xf] }
  0x4e   : > { %522 = vst [vmem:[%s3897_s23 + $0x48] sm:$0xf] %v2728_v50  ;;  %524 = vst [vmem:[%s3897_s23 + $0x4c] sm:$0xf] %v2729_v51  ;;  %v2731_v53 = vld [vmem:[%s3892_s20 + $0x200] sm:$0xf] }
  0x4f   : > { %526 = vst [vmem:[%s3897_s23 + $0x50] sm:$0xf] %v2730_v52  ;;  %v2732_v54 = vld [vmem:[%s3892_s20 + $0x218] sm:$0xf]  ;;  %v2733_v55 = vld [vmem:[%s3892_s20 + $0x230] sm:$0xf] }
  0x50   : > { %528 = vst [vmem:[%s3897_s23 + $0x54] sm:$0xf] %v2731_v53  ;;  %530 = vst [vmem:[%s3897_s23 + $0x58] sm:$0xf] %v2732_v54  ;;  %v2734_v56 = vld [vmem:[%s3892_s20 + $0x248] sm:$0xf] }
  0x51   : > { %532 = vst [vmem:[%s3897_s23 + $0x5c] sm:$0xf] %v2733_v55  ;;  %v2735_v57 = vld [vmem:[%s3892_s20 + $0x260] sm:$0xf]  ;;  %v2736_v58 = vld [vmem:[%s3892_s20 + $0x278] sm:$0xf] }
  0x52   : > { %534 = vst [vmem:[%s3897_s23 + $0x60] sm:$0xf] %v2734_v56  ;;  %536 = vst [vmem:[%s3897_s23 + $0x64] sm:$0xf] %v2735_v57  ;;  %v2737_v59 = vld [vmem:[%s3892_s20 + $0x290] sm:$0xf] }
  0x53   : > { %538 = vst [vmem:[%s3897_s23 + $0x68] sm:$0xf] %v2736_v58  ;;  %v2738_v60 = vld [vmem:[%s3892_s20 + $0x2a8] sm:$0xf]  ;;  %v2739_v61 = vld [vmem:[%s3892_s20 + $0x2c0] sm:$0xf] }
  0x54   : > { %540 = vst [vmem:[%s3897_s23 + $0x6c] sm:$0xf] %v2737_v59  ;;  %542 = vst [vmem:[%s3897_s23 + $0x70] sm:$0xf] %v2738_v60  ;;  %v2740_v62 = vld [vmem:[%s3892_s20 + $0x2d8] sm:$0xf] }
  0x55   : > { %544 = vst [vmem:[%s3897_s23 + $0x74] sm:$0xf] %v2739_v61  ;;  %v2741_v63 = vld [vmem:[%s3892_s20 + $0x2f0] sm:$0xf]  ;;  %546 = vst [vmem:[%s3897_s23 + $0x78] sm:$0xf] %v2740_v62 }
  0x56   : > { %548 = vst [vmem:[%s3897_s23 + $0x7c] sm:$0xf] %v2741_v63 }
  0x57 PF: > { %p2742_p12 = scmp.ge.s32.totalorder %s3670_s9, 1  ;;  %p660_p13 = scmp.lt.s32.totalorder %s3670_s9, 5 }
  0x59   : > { %p661_p0 = pnand %p2742_p12, %p660_p13 }
  0x5b   : > { %664 = sbr.rel (%p661_p0) target bundleno = 735 (0x2df), region = 118 }
  0x62   : > { %s667_s21 = sand.u32 1, %s3646_s26   ;;  %s674_s26 = sand.u32 1, %s3638_s24  }
  0x63   : > { %s3963_s16 = sshll.u32 %s667_s21, 7  ;;  %s2744_s14 = sshll.u32 %s674_s26, 7 }
  0x64   : > { %s3966_s22 = scalar_lea.vmem [#allocation2], %s3963_s16  ;;  %s4109_s24 = scalar_lea.vmem [#allocation3], %s2744_s14 }
  0x65   : > { %v3020_v0 = vld [vmem:[%s3966_s22] sm:$0xff]   ;;  %v3337_v1 = vld [vmem:[%s3966_s22 + $0x8] sm:$0xff]   ;;  %v3338_v5 = vld [vmem:[%s3966_s22 + $0x10] sm:$0xff]   ;;  %s3672_s17 = smov 64   ;;  %p734_p1 = scmp.lt.s32.totalorder %s3658_s29, 1 }
  0x66   : > { %v3970_v2 = vunpack.c.l.bf16 %v3020_v0  ;;  %v3972_v3 = vunpack.c.h.bf16 %v3020_v0  ;;  %v3974_v4 = vunpack.c.l.bf16 %v3337_v1  ;;  %v3977_v6 = vunpack.c.h.bf16 %v3337_v1  ;;  %v3339_v13 = vld [vmem:[%s3966_s22 + $0x18] sm:$0xff]   ;;  %v3340_v18 = vld [vmem:[%s3966_s22 + $0x20] sm:$0xff]   ;;  %v3341_v23 = vld [vmem:[%s3966_s22 + $0x28] sm:$0xff]   ;;  %s4458_s10 = scalar_lea.vmem [#allocation4], %s3963_s16 }
  0x67   : > { %v3985_v10 = vunpack.c.l.bf16 %v3338_v5  ;;  %v3989_v12 = vunpack.c.h.bf16 %v3338_v5  ;;  %v3994_v15 = vunpack.c.l.bf16 %v3339_v13  ;;  %v3998_v17 = vunpack.c.h.bf16 %v3339_v13  ;;  %v3342_v28 = vld [vmem:[%s3966_s22 + $0x30] sm:$0xff]   ;;  %v3343_v33 = vld [vmem:[%s3966_s22 + $0x38] sm:$0xff]   ;;  %v3344_v38 = vld [vmem:[%s3966_s22 + $0x40] sm:$0xff]   ;;  %s735_s18 = scalar_select %p734_p1, %s3658_s29, 1 }
  0x68   : > { %v948_v7 = vmul.f32 %v3970_v2, %v3970_v2  ;;  %v950_v8 = vmul.f32 %v3974_v4, %v3974_v4  ;;  %v949_v9 = vmul.f32 %v3972_v3, %v3972_v3  ;;  %v951_v11 = vmul.f32 %v3977_v6, %v3977_v6  ;;  %v3345_v43 = vld [vmem:[%s3966_s22 + $0x48] sm:$0xff]   ;;  %v3346_v48 = vld [vmem:[%s3966_s22 + $0x50] sm:$0xff]   ;;  %v3347_v53 = vld [vmem:[%s3966_s22 + $0x58] sm:$0xff]  }
  0x69   : > { %v952_v14 = vmul.f32 %v3985_v10, %v3985_v10  ;;  %v953_v16 = vmul.f32 %v3989_v12, %v3989_v12  ;;  %v954_v19 = vmul.f32 %v3994_v15, %v3994_v15  ;;  %v4003_v20 = vunpack.c.l.bf16 %v3340_v18  ;;  %v3348_v58 = vld [vmem:[%s3966_s22 + $0x60] sm:$0xff]   ;;  %v3349_v63 = vld [vmem:[%s3966_s22 + $0x68] sm:$0xff]   ;;  %s2825_s19 = sshll.u32 %s735_s18, 7 }
  0x6a   : > { %980 = vadd.xlane.f32.xlu0 %v948_v7  ;;  %984 = vadd.xlane.f32.xlu1 %v950_v8  ;;  %v955_v21 = vmul.f32 %v3998_v17, %v3998_v17  ;;  %v4007_v22 = vunpack.c.h.bf16 %v3340_v18  ;;  %v4012_v25 = vunpack.c.l.bf16 %v3341_v23  ;;  %v4016_v27 = vunpack.c.h.bf16 %v3341_v23  ;;  %v3350_v8 = vld [vmem:[%s3966_s22 + $0x70] sm:$0xff]   ;;  %s4365_s21 = scalar_lea.vmem %s5389_s3, %s2825_s19  ;;  %s4379_s14 = scalar_lea.vmem %s5388_s2, %s2825_s19 }
  0x6b   : > { %v956_v24 = vmul.f32 %v4003_v20, %v4003_v20  ;;  %v4021_v30 = vunpack.c.l.bf16 %v3342_v28  ;;  %v4025_v32 = vunpack.c.h.bf16 %v3342_v28  ;;  %v4030_v35 = vunpack.c.l.bf16 %v3343_v33 }
  0x6c   : > { %v957_v26 = vmul.f32 %v4007_v22, %v4007_v22  ;;  %v958_v29 = vmul.f32 %v4012_v25, %v4012_v25  ;;  %v959_v31 = vmul.f32 %v4016_v27, %v4016_v27  ;;  %v4034_v37 = vunpack.c.h.bf16 %v3343_v33 }
  0x6d   : > { %v960_v34 = vmul.f32 %v4021_v30, %v4021_v30  ;;  %v961_v36 = vmul.f32 %v4025_v32, %v4025_v32  ;;  %v962_v39 = vmul.f32 %v4030_v35, %v4030_v35  ;;  %v4039_v40 = vunpack.c.l.bf16 %v3344_v38 }
  0x6e   : > { %982 = vadd.xlane.f32.xlu0 %v949_v9  ;;  %986 = vadd.xlane.f32.xlu1 %v951_v11  ;;  %v963_v41 = vmul.f32 %v4034_v37, %v4034_v37  ;;  %v4043_v42 = vunpack.c.h.bf16 %v3344_v38  ;;  %v4048_v45 = vunpack.c.l.bf16 %v3345_v43  ;;  %v4052_v47 = vunpack.c.h.bf16 %v3345_v43 }
  0x6f   : > { %v964_v44 = vmul.f32 %v4039_v40, %v4039_v40  ;;  %v4057_v50 = vunpack.c.l.bf16 %v3346_v48  ;;  %v4061_v52 = vunpack.c.h.bf16 %v3346_v48  ;;  %v4066_v55 = vunpack.c.l.bf16 %v3347_v53 }
  0x70   : > { %v965_v46 = vmul.f32 %v4043_v42, %v4043_v42  ;;  %v966_v49 = vmul.f32 %v4048_v45, %v4048_v45  ;;  %v967_v51 = vmul.f32 %v4052_v47, %v4052_v47  ;;  %v4070_v57 = vunpack.c.h.bf16 %v3347_v53 }
  0x71   : > { %v968_v54 = vmul.f32 %v4057_v50, %v4057_v50  ;;  %v969_v56 = vmul.f32 %v4061_v52, %v4061_v52  ;;  %v970_v59 = vmul.f32 %v4066_v55, %v4066_v55  ;;  %v4075_v60 = vunpack.c.l.bf16 %v3348_v58 }
  0x72   : > { %988 = vadd.xlane.f32.xlu0 %v952_v14  ;;  %990 = vadd.xlane.f32.xlu1 %v953_v16  ;;  %v971_v61 = vmul.f32 %v4070_v57, %v4070_v57  ;;  %v4079_v62 = vunpack.c.h.bf16 %v3348_v58  ;;  %v4084_v1 = vunpack.c.l.bf16 %v3349_v63  ;;  %v4088_v7 = vunpack.c.h.bf16 %v3349_v63  ;;  %v3351_v16 = vld [vmem:[%s3966_s22 + $0x78] sm:$0xff]  }
  0x73   : > { %v972_v0 = vmul.f32 %v4075_v60, %v4075_v60  ;;  %v4094_v11 = vunpack.c.l.bf16 %v3350_v8  ;;  %v4098_v14 = vunpack.c.h.bf16 %v3350_v8  ;;  %v4107_v23 = vunpack.c.h.bf16 %v3351_v16 }
  0x74   : > { %v973_v5 = vmul.f32 %v4079_v62, %v4079_v62  ;;  %v974_v9 = vmul.f32 %v4084_v1, %v4084_v1  ;;  %v975_v13 = vmul.f32 %v4088_v7, %v4088_v7 }
  0x75   : > { %v976_v18 = vmul.f32 %v4094_v11, %v4094_v11 }
  0x76   : > { %992 = vadd.xlane.f32.xlu0 %v954_v19  ;;  %994 = vadd.xlane.f32.xlu1 %v955_v21  ;;  %v977_v19 = vmul.f32 %v4098_v14, %v4098_v14  ;;  %v4105_v21 = vunpack.c.l.bf16 %v3351_v16 }
  0x7a   : > { %996 = vadd.xlane.f32.xlu0 %v956_v24  ;;  %998 = vadd.xlane.f32.xlu1 %v957_v26  ;;  %v4112_v24 = vld [vmem:[%s4109_s24] sm:$0xff]   ;;  %v978_v26 = vmul.f32 %v4105_v21, %v4105_v21 }
  0x7b   : > { %v4117_v28 = vunpack.c.l.bf16 %v4112_v24 }
  0x7e   : > { %1000 = vadd.xlane.f32.xlu0 %v958_v29  ;;  %1002 = vadd.xlane.f32.xlu1 %v959_v31  ;;  %v979_v29 = vmul.f32 %v4107_v23, %v4107_v23  ;;  %v1596_v31 = vmul.f32 %v4117_v28, %v4117_v28 }
  0x82   : > { %1004 = vadd.xlane.f32.xlu0 %v960_v34  ;;  %1006 = vadd.xlane.f32.xlu1 %v961_v36 }
  0x86   : > { %1008 = vadd.xlane.f32.xlu0 %v962_v39  ;;  %1010 = vadd.xlane.f32.xlu1 %v963_v41 }
  0x8a   : > { %1012 = vadd.xlane.f32.xlu0 %v964_v44  ;;  %1014 = vadd.xlane.f32.xlu1 %v965_v46 }
  0x8e   : > { %1016 = vadd.xlane.f32.xlu0 %v966_v49  ;;  %1018 = vadd.xlane.f32.xlu1 %v967_v51 }
  0x92   : > { %1020 = vadd.xlane.f32.xlu0 %v968_v54  ;;  %1022 = vadd.xlane.f32.xlu1 %v969_v56 }
  0x96   : > { %1024 = vadd.xlane.f32.xlu0 %v970_v59  ;;  %1026 = vadd.xlane.f32.xlu1 %v971_v61 }
  0x9a   : > { %1028 = vadd.xlane.f32.xlu0 %v972_v0  ;;  %1030 = vadd.xlane.f32.xlu1 %v973_v5 }
  0x9e   : > { %1032 = vadd.xlane.f32.xlu0 %v974_v9  ;;  %1034 = vadd.xlane.f32.xlu1 %v975_v13 }
  0xa2   : > { %1036 = vadd.xlane.f32.xlu0 %v976_v18  ;;  %1038 = vadd.xlane.f32.xlu1 %v977_v19  ;;  %v4126_v18 = vld [vmem:[%s5390_s4] ss:$0 sm:$0xff] }
  0xa6   : > { %1040 = vadd.xlane.f32.xlu0 %v978_v26  ;;  %1042 = vadd.xlane.f32.xlu1 %v979_v29 }
  0xaa   : > { %1628 = vadd.xlane.f32.xlu0 %v1596_v31 }
  0xf7   : > { %v981_v33 = vpop.xlane.xlu0 %980  ;;  %v985_v34 = vpop.xlane.xlu1 %984 }
  0xf8   : > { %v1045_v36 = vmul.f32 0.0078125, %v981_v33  ;;  %v1047_v38 = vmul.f32 0.0078125, %v985_v34 }
  0xfa   : > { %v1077_v39 = vadd.f32 1e-06, %v1045_v36  ;;  %v1079_v41 = vadd.f32 1e-06, %v1047_v38 }
  0xfb   : > { %v983_v43 = vpop.xlane.xlu0 %982  ;;  %v987_v44 = vpop.xlane.xlu1 %986 }
  0xfc   : > { %3471 = vrsqrt.f32 %v1077_v39  ;;  %v1046_v46 = vmul.f32 0.0078125, %v983_v43  ;;  %v1048_v48 = vmul.f32 0.0078125, %v987_v44 }
  0xfd   : > { %3473 = vrsqrt.f32 %v1079_v41 }
  0xfe   : > { %v1078_v49 = vadd.f32 1e-06, %v1046_v46  ;;  %v1080_v51 = vadd.f32 1e-06, %v1048_v48 }
  0xff   : > { %v989_v53 = vpop.xlane.xlu0 %988  ;;  %v991_v54 = vpop.xlane.xlu1 %990 }
 0x100   : > { %3475 = vrsqrt.f32 %v1078_v49  ;;  %v1049_v56 = vmul.f32 0.0078125, %v989_v53  ;;  %v1050_v58 = vmul.f32 0.0078125, %v991_v54 }
 0x101   : > { %3477 = vrsqrt.f32 %v1080_v51 }
 0x102   : > { %v1081_v59 = vadd.f32 1e-06, %v1049_v56  ;;  %v1082_v61 = vadd.f32 1e-06, %v1050_v58 }
 0x103   : > { %v993_v63 = vpop.xlane.xlu0 %992  ;;  %v995_v0 = vpop.xlane.xlu1 %994 }
 0x104   : > { %3479 = vrsqrt.f32 %v1081_v59  ;;  %v1051_v5 = vmul.f32 0.0078125, %v993_v63  ;;  %v1052_v8 = vmul.f32 0.0078125, %v995_v0 }
 0x105   : > { %3481 = vrsqrt.f32 %v1082_v61 }
 0x106   : > { %v3472_v9 = vpop.eup %3471  ;;  %v1083_v13 = vadd.f32 1e-06, %v1051_v5  ;;  %v1084_v16 = vadd.f32 1e-06, %v1052_v8 }
 0x107   : > { %v997_v19 = vpop.xlane.xlu0 %996  ;;  %v1141_v26 = vmul.f32 %v3472_v9, %v3970_v2  ;;  %v999_v29 = vpop.xlane.xlu1 %998 }
 0x108   : > { %v3474_v31 = vpop.eup %3473  ;;  %3483 = vrsqrt.f32 %v1083_v13  ;;  %v1053_v33 = vmul.f32 0.0078125, %v997_v19  ;;  %v1054_v34 = vmul.f32 0.0078125, %v999_v29 }
 0x109   : > { %v4130_v36 = vmul.f32 %v4126_v18, %v1141_v26  ;;  %3485 = vrsqrt.f32 %v1084_v16  ;;  %v1143_v46 = vmul.f32 %v3474_v31, %v3974_v4 }
 0x10a   : > { %v3476_v38 = vpop.eup %3475  ;;  %v1085_v39 = vadd.f32 1e-06, %v1053_v33  ;;  %v1086_v41 = vadd.f32 1e-06, %v1054_v34 }
 0x10b   : > { %1243 = vrot.lane.b32.xlu0 %v4130_v36, %s3672_s17  ;;  %v1001_v43 = vpop.xlane.xlu0 %1000  ;;  %v1142_v44 = vmul.f32 %v3476_v38, %v3972_v3  ;;  %v1003_v2 = vpop.xlane.xlu1 %1002  ;;  %v4142_v3 = vmul.f32 %v4126_v18, %v1143_v46 }
 0x10c   : > { %v3478_v48 = vpop.eup %3477  ;;  %3487 = vrsqrt.f32 %v1085_v39  ;;  %v1055_v49 = vmul.f32 0.0078125, %v1001_v43  ;;  %v1056_v51 = vmul.f32 0.0078125, %v1003_v2 }
 0x10d   : > { %v4137_v53 = vmul.f32 %v4126_v18, %v1142_v44  ;;  %3489 = vrsqrt.f32 %v1086_v41  ;;  %v1144_v63 = vmul.f32 %v3478_v48, %v3977_v6 }
 0x10e   : > { %v3480_v54 = vpop.eup %3479  ;;  %v1087_v56 = vadd.f32 1e-06, %v1055_v49  ;;  %v1088_v58 = vadd.f32 1e-06, %v1056_v51 }
 0x10f   : > { %1245 = vrot.lane.b32.xlu1 %v4137_v53, %s3672_s17  ;;  %v1005_v59 = vpop.xlane.xlu0 %1004  ;;  %v1145_v4 = vmul.f32 %v3480_v54, %v3985_v10  ;;  %v1007_v61 = vpop.xlane.xlu1 %1006  ;;  %v4154_v6 = vmul.f32 %v4126_v18, %v1144_v63 }
 0x110   : > { %v3482_v0 = vpop.eup %3481  ;;  %3491 = vrsqrt.f32 %v1087_v56  ;;  %v1057_v5 = vmul.f32 0.0078125, %v1005_v59  ;;  %v1058_v8 = vmul.f32 0.0078125, %v1007_v61 }
 0x111   : > { %v4147_v9 = vmul.f32 %v4126_v18, %v1145_v4  ;;  %3493 = vrsqrt.f32 %v1088_v58  ;;  %v1146_v31 = vmul.f32 %v3482_v0, %v3989_v12 }
 0x112   : > { %v3484_v13 = vpop.eup %3483  ;;  %v1089_v16 = vadd.f32 1e-06, %v1057_v5  ;;  %v1090_v19 = vadd.f32 1e-06, %v1058_v8 }
 0x113   : > { %1247 = vrot.lane.b32.xlu1 %v4142_v3, %s3672_s17  ;;  %1251 = vrot.lane.b32.xlu0 %v4147_v9, %s3672_s17  ;;  %v1009_v10 = vpop.xlane.xlu0 %1008  ;;  %v1147_v26 = vmul.f32 %v3484_v13, %v3994_v15  ;;  %v1011_v29 = vpop.xlane.xlu1 %1010  ;;  %v4166_v12 = vmul.f32 %v4126_v18, %v1146_v31 }
 0x114   : > { %v3486_v33 = vpop.eup %3485  ;;  %3495 = vrsqrt.f32 %v1089_v16  ;;  %v1059_v34 = vmul.f32 0.0078125, %v1009_v10  ;;  %v1060_v38 = vmul.f32 0.0078125, %v1011_v29 }
 0x115   : > { %v4159_v39 = vmul.f32 %v4126_v18, %v1147_v26  ;;  %3497 = vrsqrt.f32 %v1090_v19  ;;  %v1148_v48 = vmul.f32 %v3486_v33, %v3998_v17 }
 0x116   : > { %v3488_v41 = vpop.eup %3487  ;;  %v1091_v43 = vadd.f32 1e-06, %v1059_v34  ;;  %v1092_v44 = vadd.f32 1e-06, %v1060_v38 }
 0x117   : > { %1249 = vrot.lane.b32.xlu1 %v4154_v6, %s3672_s17  ;;  %1255 = vrot.lane.b32.xlu0 %v4159_v39, %s3672_s17  ;;  %v1013_v15 = vpop.xlane.xlu0 %1012  ;;  %v1149_v2 = vmul.f32 %v3488_v41, %v4003_v20  ;;  %v1015_v46 = vpop.xlane.xlu1 %1014  ;;  %v4178_v17 = vmul.f32 %v4126_v18, %v1148_v48 }
 0x118   : > { %v3490_v49 = vpop.eup %3489  ;;  %3499 = vrsqrt.f32 %v1091_v43  ;;  %v1061_v51 = vmul.f32 0.0078125, %v1013_v15  ;;  %v1062_v54 = vmul.f32 0.0078125, %v1015_v46 }
 0x119   : > { %v4171_v56 = vmul.f32 %v4126_v18, %v1149_v2  ;;  %3501 = vrsqrt.f32 %v1092_v44  ;;  %v1150_v0 = vmul.f32 %v3490_v49, %v4007_v22 }
 0x11a   : > { %v3492_v58 = vpop.eup %3491  ;;  %v1093_v59 = vadd.f32 1e-06, %v1061_v51  ;;  %v1094_v4 = vadd.f32 1e-06, %v1062_v54 }
 0x11b   : > { %1253 = vrot.lane.b32.xlu1 %v4166_v12, %s3672_s17  ;;  %1259 = vrot.lane.b32.xlu0 %v4171_v56, %s3672_s17  ;;  %v1017_v20 = vpop.xlane.xlu0 %1016  ;;  %v1151_v61 = vmul.f32 %v3492_v58, %v4012_v25  ;;  %v1019_v63 = vpop.xlane.xlu1 %1018  ;;  %v4190_v22 = vmul.f32 %v4126_v18, %v1150_v0 }
 0x11c   : > { %v3494_v5 = vpop.eup %3493  ;;  %3503 = vrsqrt.f32 %v1093_v59  ;;  %v1063_v8 = vmul.f32 0.0078125, %v1017_v20  ;;  %v1064_v13 = vmul.f32 0.0078125, %v1019_v63 }
 0x11d   : > { %v4183_v16 = vmul.f32 %v4126_v18, %v1151_v61  ;;  %3505 = vrsqrt.f32 %v1094_v4  ;;  %v1152_v33 = vmul.f32 %v3494_v5, %v4016_v27 }
 0x11e   : > { %v3496_v19 = vpop.eup %3495  ;;  %v1095_v10 = vadd.f32 1e-06, %v1063_v8  ;;  %v1096_v26 = vadd.f32 1e-06, %v1064_v13 }
 0x11f   : > { %1257 = vrot.lane.b32.xlu1 %v4178_v17, %s3672_s17  ;;  %1263 = vrot.lane.b32.xlu0 %v4183_v16, %s3672_s17  ;;  %v1021_v25 = vpop.xlane.xlu0 %1020  ;;  %v1153_v29 = vmul.f32 %v3496_v19, %v4021_v30  ;;  %v1023_v31 = vpop.xlane.xlu1 %1022  ;;  %v4202_v27 = vmul.f32 %v4126_v18, %v1152_v33 }
 0x120   : > { %v3498_v34 = vpop.eup %3497  ;;  %3507 = vrsqrt.f32 %v1095_v10  ;;  %v1065_v38 = vmul.f32 0.0078125, %v1021_v25  ;;  %v1066_v41 = vmul.f32 0.0078125, %v1023_v31 }
 0x121   : > { %v4195_v43 = vmul.f32 %v4126_v18, %v1153_v29  ;;  %3509 = vrsqrt.f32 %v1096_v26  ;;  %v1154_v49 = vmul.f32 %v3498_v34, %v4025_v32 }
 0x122   : > { %v3500_v44 = vpop.eup %3499  ;;  %v1097_v15 = vadd.f32 1e-06, %v1065_v38  ;;  %v1098_v2 = vadd.f32 1e-06, %v1066_v41 }
 0x123   : > { %1261 = vrot.lane.b32.xlu1 %v4190_v22, %s3672_s17  ;;  %1267 = vrot.lane.b32.xlu0 %v4195_v43, %s3672_s17  ;;  %v1025_v30 = vpop.xlane.xlu0 %1024  ;;  %v1155_v46 = vmul.f32 %v3500_v44, %v4030_v35  ;;  %v1027_v48 = vpop.xlane.xlu1 %1026  ;;  %v4214_v32 = vmul.f32 %v4126_v18, %v1154_v49 }
 0x124   : > { %v3502_v51 = vpop.eup %3501  ;;  %3511 = vrsqrt.f32 %v1097_v15  ;;  %v1067_v54 = vmul.f32 0.0078125, %v1025_v30  ;;  %v1068_v58 = vmul.f32 0.0078125, %v1027_v48 }
 0x125   : > { %v4207_v59 = vmul.f32 %v4126_v18, %v1155_v46  ;;  %3513 = vrsqrt.f32 %v1098_v2  ;;  %v1156_v5 = vmul.f32 %v3502_v51, %v4034_v37 }
 0x126   : > { %v3504_v4 = vpop.eup %3503  ;;  %v1099_v20 = vadd.f32 1e-06, %v1067_v54  ;;  %v1100_v61 = vadd.f32 1e-06, %v1068_v58 }
 0x127   : > { %1265 = vrot.lane.b32.xlu1 %v4202_v27, %s3672_s17  ;;  %1271 = vrot.lane.b32.xlu0 %v4207_v59, %s3672_s17  ;;  %v1029_v35 = vpop.xlane.xlu0 %1028  ;;  %v1157_v63 = vmul.f32 %v3504_v4, %v4039_v40  ;;  %v1031_v0 = vpop.xlane.xlu1 %1030  ;;  %v4226_v37 = vmul.f32 %v4126_v18, %v1156_v5 }
 0x128   : > { %v3506_v8 = vpop.eup %3505  ;;  %3515 = vrsqrt.f32 %v1099_v20  ;;  %v1069_v13 = vmul.f32 0.0078125, %v1029_v35  ;;  %v1070_v19 = vmul.f32 0.0078125, %v1031_v0 }
 0x129   : > { %v4219_v10 = vmul.f32 %v4126_v18, %v1157_v63  ;;  %3517 = vrsqrt.f32 %v1100_v61  ;;  %v1158_v34 = vmul.f32 %v3506_v8, %v4043_v42 }
 0x12a   : > { %v3508_v26 = vpop.eup %3507  ;;  %v1101_v25 = vadd.f32 1e-06, %v1069_v13  ;;  %v1102_v29 = vadd.f32 1e-06, %v1070_v19 }
 0x12b   : > { %1269 = vrot.lane.b32.xlu1 %v4214_v32, %s3672_s17  ;;  %1275 = vrot.lane.b32.xlu0 %v4219_v10, %s3672_s17  ;;  %v1033_v40 = vpop.xlane.xlu0 %1032  ;;  %v1159_v31 = vmul.f32 %v3508_v26, %v4048_v45  ;;  %v1035_v33 = vpop.xlane.xlu1 %1034  ;;  %v4238_v42 = vmul.f32 %v4126_v18, %v1158_v34 }
 0x12c   : > { %v3510_v38 = vpop.eup %3509  ;;  %3519 = vrsqrt.f32 %v1101_v25  ;;  %v1071_v41 = vmul.f32 0.0078125, %v1033_v40  ;;  %v1072_v44 = vmul.f32 0.0078125, %v1035_v33 }
 0x12d   : > { %v4231_v15 = vmul.f32 %v4126_v18, %v1159_v31  ;;  %3521 = vrsqrt.f32 %v1102_v29  ;;  %v1160_v51 = vmul.f32 %v3510_v38, %v4052_v47 }
 0x12e   : > { %v3512_v2 = vpop.eup %3511  ;;  %v1103_v30 = vadd.f32 1e-06, %v1071_v41  ;;  %v1104_v46 = vadd.f32 1e-06, %v1072_v44 }
 0x12f   : > { %1273 = vrot.lane.b32.xlu1 %v4226_v37, %s3672_s17  ;;  %1279 = vrot.lane.b32.xlu0 %v4231_v15, %s3672_s17  ;;  %v1037_v45 = vpop.xlane.xlu0 %1036  ;;  %v1161_v48 = vmul.f32 %v3512_v2, %v4057_v50  ;;  %v1039_v49 = vpop.xlane.xlu1 %1038  ;;  %v4250_v50 = vmul.f32 %v4126_v18, %v1160_v51  ;;  %v3369_v51 = vld [vmem:[%s4109_s24 + $0x18] sm:$0xff]  }
 0x130   : > { %v3514_v54 = vpop.eup %3513  ;;  %3523 = vrsqrt.f32 %v1103_v30  ;;  %v1073_v58 = vmul.f32 0.0078125, %v1037_v45  ;;  %v1074_v4 = vmul.f32 0.0078125, %v1039_v49 }
 0x131   : > { %v4243_v20 = vmul.f32 %v4126_v18, %v1161_v48  ;;  %3525 = vrsqrt.f32 %v1104_v46  ;;  %v1162_v0 = vmul.f32 %v3514_v54, %v4061_v52 }
 0x132   : > { %v3516_v61 = vpop.eup %3515  ;;  %v1105_v35 = vadd.f32 1e-06, %v1073_v58  ;;  %v1106_v63 = vadd.f32 1e-06, %v1074_v4  ;;  %v4323_v58 = vunpack.c.l.bf16 %v3369_v51  ;;  %v4326_v4 = vunpack.c.h.bf16 %v4112_v24 }
 0x133   : > { %1277 = vrot.lane.b32.xlu1 %v4238_v42, %s3672_s17  ;;  %1283 = vrot.lane.b32.xlu0 %v4243_v20, %s3672_s17  ;;  %v1163_v47 = vmul.f32 %v3516_v61, %v4066_v55  ;;  %v3518_v5 = vpop.eup %3517  ;;  %v4262_v19 = vmul.f32 %v4126_v18, %v1162_v0  ;;  %v3370_v61 = vld [vmem:[%s4109_s24 + $0x20] sm:$0xff]  }
 0x134   : > { %3527 = vrsqrt.f32 %v1105_v35  ;;  %v1164_v52 = vmul.f32 %v3518_v5, %v4070_v57  ;;  %v1602_v35 = vmul.f32 %v4323_v58, %v4323_v58  ;;  %v3371_v5 = vld [vmem:[%s4109_s24 + $0x28] sm:$0xff]  }
 0x135   : > { %v4255_v8 = vmul.f32 %v4126_v18, %v1163_v47  ;;  %3529 = vrsqrt.f32 %v1106_v63  ;;  %v4331_v63 = vunpack.c.l.bf16 %v3370_v61  ;;  %v1597_v47 = vmul.f32 %v4326_v4, %v4326_v4 }
 0x136   : > { %v3520_v13 = vpop.eup %3519  ;;  %v4274_v40 = vmul.f32 %v4126_v18, %v1164_v52  ;;  %v4345_v52 = vunpack.c.h.bf16 %v3369_v51 }
 0x137   : > { %1281 = vrot.lane.b32.xlu1 %v4250_v50, %s3672_s17  ;;  %1287 = vrot.lane.b32.xlu0 %v4255_v8, %s3672_s17  ;;  %v1165_v55 = vmul.f32 %v3520_v13, %v4075_v60  ;;  %v3522_v26 = vpop.eup %3521  ;;  %5494 = vst [vmem:[#allocation8_spill] sm:$0xff] %v4331_v63  ;;  %v1604_v24 = vmul.f32 %v4331_v63, %v4331_v63  ;;  %v4341_v13 = vunpack.c.l.bf16 %v3371_v5 }
 0x138   : > { %v1166_v60 = vmul.f32 %v3522_v26, %v4079_v62  ;;  %5497 = vst [vmem:[#allocation11_spill] sm:$0xff] %v4345_v52  ;;  %v3372_v26 = vld [vmem:[%s4109_s24 + $0x30] sm:$0xff]  }
 0x139   : > { %v4267_v25 = vmul.f32 %v4126_v18, %v1165_v55  ;;  %5496 = vst [vmem:[#allocation10_spill] sm:$0xff] %v4341_v13 }
 0x13a   : > { %v3524_v29 = vpop.eup %3523  ;;  %v4286_v38 = vmul.f32 %v4126_v18, %v1166_v60  ;;  %v4353_v60 = vunpack.c.l.bf16 %v3372_v26 }
 0x13b   : > { %1285 = vrot.lane.b32.xlu1 %v4262_v19, %s3672_s17  ;;  %1291 = vrot.lane.b32.xlu0 %v4267_v25, %s3672_s17  ;;  %v1167_v31 = vmul.f32 %v3524_v29, %v4084_v1  ;;  %v3526_v33 = vpop.eup %3525  ;;  %v4348_v29 = vpop.xlane.xlu0 %1040 }
 0x13c   : > { %v1168_v62 = vmul.f32 %v3526_v33, %v4088_v7  ;;  %5498 = vst [vmem:[#allocation12_spill] sm:$0xff] %v4353_v60  ;;  %v1603_v33 = vmul.f32 %v4345_v52, %v4345_v52  ;;  %v4414_v52 = vld [vmem:[%s4365_s21 + $0x8] sm:$0xff]  }
 0x13d   : > { %v4279_v57 = vmul.f32 %v4126_v18, %v1167_v31  ;;  %v1606_v31 = vmul.f32 %v4341_v13, %v4341_v13  ;;  %5509 = vst [vmem:[#allocation22_spill] sm:$0xff] %v4414_v52 }
 0x13e   : > { %v3528_v34 = vpop.eup %3527  ;;  %v4298_v2 = vmul.f32 %v4126_v18, %v1168_v62  ;;  %v1608_v62 = vmul.f32 %v4353_v60, %v4353_v60 }
 0x13f   : > { %1289 = vrot.lane.b32.xlu1 %v4274_v40, %s3672_s17  ;;  %1295 = vrot.lane.b32.xlu0 %v4279_v57, %s3672_s17  ;;  %v1169_v1 = vmul.f32 %v3528_v34, %v4094_v11  ;;  %v3530_v41 = vpop.eup %3529  ;;  %v3367_v11 = vld [vmem:[%s4109_s24 + $0x8] sm:$0xff]   ;;  %v4357_v34 = vunpack.c.h.bf16 %v3370_v61 }
 0x140   : > { %v1170_v30 = vmul.f32 %v3530_v41, %v4098_v14  ;;  %v4309_v46 = vunpack.c.l.bf16 %v3367_v11  ;;  %v4313_v48 = vunpack.c.h.bf16 %v3367_v11  ;;  %v3368_v14 = vld [vmem:[%s4109_s24 + $0x10] sm:$0xff]   ;;  %v3375_v61 = vld [vmem:[%s4109_s24 + $0x48] sm:$0xff]  }
 0x141   : > { %v4291_v44 = vmul.f32 %v4126_v18, %v1169_v1  ;;  %v4335_v0 = vunpack.c.h.bf16 %v3368_v14  ;;  %5499 = vst [vmem:[#allocation13_spill] sm:$0xff] %v4357_v34  ;;  %v3373_v1 = vld [vmem:[%s4109_s24 + $0x38] sm:$0xff]   ;;  %v1605_v11 = vmul.f32 %v4357_v34, %v4357_v34 }
 0x142   : > { %v4304_v7 = vmul.f32 %v4126_v18, %v1170_v30  ;;  %v1598_v45 = vmul.f32 %v4309_v46, %v4309_v46  ;;  %5493 = vst [vmem:[#allocation7_spill] sm:$0xff] %v4313_v48  ;;  %v1599_v49 = vmul.f32 %v4313_v48, %v4313_v48  ;;  %v4318_v18 = vunpack.c.l.bf16 %v3368_v14  ;;  %v4369_v30 = vpop.xlane.xlu0 %1628  ;;  %v3374_v14 = vld [vmem:[%s4109_s24 + $0x40] sm:$0xff]  }
 0x143   : > { %1293 = vrot.lane.b32.xlu1 %v4286_v38, %s3672_s17  ;;  %1299 = vrot.lane.b32.xlu0 %v4291_v44, %s3672_s17  ;;  %5495 = vst [vmem:[#allocation9_spill] sm:$0xff] %v4335_v0  ;;  %v1601_v55 = vmul.f32 %v4335_v0, %v4335_v0  ;;  %v4367_v41 = vunpack.c.l.bf16 %v3373_v1  ;;  %v4433_v0 = vunpack.c.h.bf16 %v3374_v14 }
 0x144   : > { %v1600_v54 = vmul.f32 %v4318_v18, %v4318_v18 }
 0x145   : > { %5500 = vst [vmem:[#allocation14_spill] sm:$0xff] %v4367_v41  ;;  %v1610_v51 = vmul.f32 %v4367_v41, %v4367_v41  ;;  %5515 = vst [vmem:[#allocation25_spill] sm:$0xff] %v4433_v0 }
 0x147   : > { %1297 = vrot.lane.b32.xlu1 %v4298_v2, %s3672_s17 }
 0x14b   : > { %1301 = vrot.lane.b32.xlu1 %v4304_v7, %s3672_s17 }
 0x162   : > { %1632 = vadd.xlane.f32.xlu0 %v1598_v45  ;;  %v4373_v45 = vunpack.c.h.bf16 %v3371_v5 }
 0x164   : > { %5501 = vst [vmem:[#allocation15_spill] sm:$0xff] %v4373_v45  ;;  %v1607_v5 = vmul.f32 %v4373_v45, %v4373_v45  ;;  %v3376_v45 = vld [vmem:[%s4109_s24 + $0x50] sm:$0xff]  }
 0x166   : > { %1634 = vadd.xlane.f32.xlu0 %v1599_v49  ;;  %v4382_v49 = vld [vmem:[%s4365_s21] sm:$0xff]  }
 0x167   : > { %5502 = vst [vmem:[#allocation16_spill] sm:$0xff] %v4382_v49  ;;  %v5508_v60 = vunpack.c.l.bf16 %v4382_v49 }
 0x16a   : > { %1636 = vadd.xlane.f32.xlu0 %v1600_v54  ;;  %v4386_v54 = vunpack.c.l.bf16 %v3374_v14 }
 0x16c   : > { %5503 = vst [vmem:[#allocation17_spill] sm:$0xff] %v4386_v54  ;;  %v1612_v34 = vmul.f32 %v4386_v54, %v4386_v54  ;;  %v5512_v54 = vunpack.c.h.bf16 %v4382_v49  ;;  %v4443_v49 = vld [vmem:[%s4379_s14 + $0x10] sm:$0xff]  }
 0x16d   : > { %5517 = vst [vmem:[#allocation27_spill] sm:$0xff] %v4443_v49 }
 0x16e   : > { %1640 = vadd.xlane.f32.xlu0 %v1602_v35  ;;  %v4389_v35 = vpop.xlane.xlu1 %1042 }
 0x16f   : > { %1630 = vadd.xlane.f32.xlu1 %v1597_v47  ;;  %v4392_v47 = vld [vmem:[%s4379_s14] sm:$0xff]  }
 0x170   : > { %5504 = vst [vmem:[#allocation18_spill] sm:$0xff] %v4392_v47 }
 0x172   : > { %1644 = vadd.xlane.f32.xlu0 %v1604_v24  ;;  %v4396_v24 = vunpack.c.h.bf16 %v3372_v26 }
 0x173   : > { %1638 = vadd.xlane.f32.xlu1 %v1601_v55  ;;  %v4408_v55 = vunpack.c.h.bf16 %v3373_v1 }
 0x174   : > { %5505 = vst [vmem:[#allocation19_spill] sm:$0xff] %v4396_v24  ;;  %v1609_v26 = vmul.f32 %v4396_v24, %v4396_v24  ;;  %v5511_v24 = vunpack.c.h.bf16 %v4392_v47 }
 0x175   : > { %5507 = vst [vmem:[#allocation21_spill] sm:$0xff] %v4408_v55 }
 0x176   : > { %1648 = vadd.xlane.f32.xlu0 %v1606_v31  ;;  %v1212_v1 = vmul.f32 %v5511_v24, %v4137_v53  ;;  %v5412_v53 = vunpack.c.l.bf16 %v4414_v52  ;;  %v4439_v24 = vld [vmem:[%s4365_s21 + $0x10] sm:$0xff]  }
 0x177   : > { %1642 = vadd.xlane.f32.xlu1 %v1603_v33  ;;  %v4399_v33 = vunpack.c.l.bf16 %v3375_v61  ;;  %5516 = vst [vmem:[#allocation26_spill] sm:$0xff] %v4439_v24 }
 0x179   : > { %5506 = vst [vmem:[#allocation20_spill] sm:$0xff] %v4399_v33  ;;  %v1614_v41 = vmul.f32 %v4399_v33, %v4399_v33  ;;  %v1611_v33 = vmul.f32 %v4408_v55, %v4408_v55  ;;  %v5524_v55 = vunpack.c.h.bf16 %v4414_v52  ;;  %v4498_v52 = vld [vmem:[%s4379_s14 + $0x20] sm:$0xff]  }
 0x17a   : > { %1652 = vadd.xlane.f32.xlu0 %v1608_v62  ;;  %5526 = vst [vmem:[#allocation32_spill] sm:$0xff] %v4498_v52 }
 0x17b   : > { %1646 = vadd.xlane.f32.xlu1 %v1605_v11  ;;  %v5510_v11 = vunpack.c.l.bf16 %v4392_v47 }
 0x17d   : > { %v1244_v31 = vpop.permute.xlu0 %1243 }
 0x17e   : > { %1656 = vadd.xlane.f32.xlu0 %v1610_v51  ;;  %v1307_v62 = vmul.f32 %v5508_v60, %v1244_v31  ;;  %v4427_v60 = vld [vmem:[%s4379_s14 + $0x8] sm:$0xff]   ;;  %v4429_v31 = vunpack.c.l.bf16 %v3376_v45 }
 0x17f   : > { %1650 = vadd.xlane.f32.xlu1 %v1607_v5  ;;  %v1211_v5 = vmul.f32 %v5510_v11, %v4130_v36  ;;  %5513 = vst [vmem:[#allocation23_spill] sm:$0xff] %v4427_v60  ;;  %v3377_v36 = vld [vmem:[%s4109_s24 + $0x58] sm:$0xff]  }
 0x180   : > { %5514 = vst [vmem:[#allocation24_spill] sm:$0xff] %v4429_v31  ;;  %v1616_v14 = vmul.f32 %v4429_v31, %v4429_v31 }
 0x181   : > { %v1246_v51 = vpop.permute.xlu1 %1245  ;;  %v1339_v11 = vadd.f32 %v1307_v62, %v1211_v5  ;;  %v4448_v62 = vunpack.c.l.bf16 %v3377_v36  ;;  %v1613_v5 = vmul.f32 %v4433_v0, %v4433_v0  ;;  %v4472_v0 = vld [vmem:[%s4365_s21 + $0x18] sm:$0xff]  }
 0x182   : > { %v1308_v13 = vmul.f32 %v5512_v54, %v1246_v51  ;;  %1660 = vadd.xlane.f32.xlu0 %v1612_v34  ;;  %v4455_v34 = vld [vmem:[%s4109_s24 + $0x60] sm:$0xff]   ;;  %5522 = vst [vmem:[#allocation31_spill] sm:$0xff] %v4472_v0 }
 0x183   : > { %1654 = vadd.xlane.f32.xlu1 %v1609_v26  ;;  %5518 = vst [vmem:[#allocation28_spill] sm:$0xff] %v4448_v62 }
 0x184   : > { %v1340_v63 = vadd.f32 %v1308_v13, %v1212_v1  ;;  %v4452_v1 = vunpack.c.h.bf16 %v3375_v61  ;;  %v4489_v61 = vunpack.c.h.bf16 %v3376_v45  ;;  %v5528_v45 = vunpack.c.h.bf16 %v4443_v49 }
 0x185   : > { %v1248_v54 = vpop.permute.xlu1 %1247  ;;  %v1252_v51 = vpop.permute.xlu0 %1251 }
 0x186   : > { %v3086_v47 = vpack.c.bf16 %v1340_v63, %v1339_v11  ;;  %1664 = vadd.xlane.f32.xlu0 %v1614_v41  ;;  %5519 = vst [vmem:[#allocation29_spill] sm:$0xff] %v4452_v1  ;;  %v1309_v63 = vmul.f32 %v5412_v53, %v1248_v54  ;;  %v4465_v11 = vld [vmem:[%s4379_s14 + $0x18] sm:$0xff]   ;;  %v5523_v53 = vunpack.c.h.bf16 %v4427_v60 }
 0x187   : > { %1658 = vadd.xlane.f32.xlu1 %v1611_v33  ;;  %5520 = vst [vmem:[#allocation30_spill] sm:$0xff] %v4465_v11  ;;  %v5521_v33 = vunpack.c.l.bf16 %v4427_v60 }
 0x188   : > { %3087 = vst [vmem:[%s4458_s10] sm:$0xff] %v3086_v47   ;;  %v1214_v41 = vmul.f32 %v5523_v53, %v4154_v6  ;;  %v1615_v47 = vmul.f32 %v4452_v1, %v4452_v1  ;;  %v4492_v6 = vld [vmem:[%s4109_s24 + $0x68] sm:$0xff]   ;;  %v1216_v1 = vmul.f32 %v5528_v45, %v4166_v12  ;;  %v1617_v12 = vmul.f32 %v4489_v61, %v4489_v61 }
 0x189   : > { %v1213_v13 = vmul.f32 %v5521_v33, %v4142_v3  ;;  %v1250_v26 = vpop.permute.xlu1 %1249  ;;  %v1256_v31 = vpop.permute.xlu0 %1255  ;;  %v1618_v3 = vmul.f32 %v4448_v62, %v4448_v62  ;;  %v4484_v33 = vunpack.c.l.bf16 %v4455_v34  ;;  %v5533_v45 = vunpack.c.h.bf16 %v4465_v11 }
 0x18a   : > { %v1310_v48 = vmul.f32 %v5524_v55, %v1250_v26  ;;  %1668 = vadd.xlane.f32.xlu0 %v1616_v14  ;;  %v5525_v55 = vunpack.c.l.bf16 %v4439_v24 }
 0x18b   : > { %1662 = vadd.xlane.f32.xlu1 %v1613_v5  ;;  %v1341_v53 = vadd.f32 %v1309_v63, %v1213_v13  ;;  %v5527_v5 = vunpack.c.l.bf16 %v4443_v49  ;;  %v4508_v63 = vld [vmem:[%s4365_s21 + $0x20] sm:$0xff]   ;;  %v4531_v49 = vld [vmem:[%s4379_s14 + $0x28] sm:$0xff]  }
 0x18c   : > { %v1311_v26 = vmul.f32 %v5525_v55, %v1252_v51  ;;  %v1342_v14 = vadd.f32 %v1310_v48, %v1214_v41  ;;  %5529 = vst [vmem:[#allocation33_spill] sm:$0xff] %v4508_v63  ;;  %v5530_v55 = vunpack.c.h.bf16 %v4439_v24  ;;  %v4521_v51 = vunpack.c.h.bf16 %v3377_v36 }
 0x18d   : > { %v1215_v62 = vmul.f32 %v5527_v5, %v4147_v9  ;;  %v1254_v13 = vpop.permute.xlu1 %1253  ;;  %v1260_v48 = vpop.permute.xlu0 %1259  ;;  %v1620_v9 = vmul.f32 %v4484_v33, %v4484_v33  ;;  %v4516_v5 = vunpack.c.l.bf16 %v4492_v6 }
 0x18e   : > { %v3091_v41 = vpack.c.bf16 %v1342_v14, %v1341_v53  ;;  %v1312_v60 = vmul.f32 %v5530_v55, %v1254_v13  ;;  %1672 = vadd.xlane.f32.xlu0 %v1618_v3  ;;  %v4524_v53 = vld [vmem:[%s4109_s24 + $0x70] sm:$0xff]   ;;  %v5531_v3 = vunpack.c.l.bf16 %v4472_v0 }
 0x18f   : > { %1666 = vadd.xlane.f32.xlu1 %v1615_v47  ;;  %v1343_v14 = vadd.f32 %v1311_v26, %v1215_v62  ;;  %v5532_v47 = vunpack.c.l.bf16 %v4465_v11  ;;  %v1218_v62 = vmul.f32 %v5533_v45, %v4178_v17  ;;  %v1619_v17 = vmul.f32 %v4521_v51, %v4521_v51  ;;  %v4565_v11 = vld [vmem:[%s4379_s14 + $0x30] sm:$0xff]   ;;  %v4596_v45 = vld [vmem:[%s4379_s14 + $0x38] sm:$0xff]  }
 0x190   : > { %3352 = vst [vmem:[%s4458_s10 + $0x8] sm:$0xff] %v3091_v41   ;;  %v1313_v13 = vmul.f32 %v5531_v3, %v1256_v31  ;;  %v1344_v55 = vadd.f32 %v1312_v60, %v1216_v1  ;;  %v4541_v41 = vld [vmem:[%s4365_s21 + $0x28] sm:$0xff]   ;;  %v5534_v3 = vunpack.c.h.bf16 %v4472_v0  ;;  %v4555_v31 = vunpack.c.h.bf16 %v4455_v34 }
 0x191   : > { %v1217_v24 = vmul.f32 %v5532_v47, %v4159_v39  ;;  %v1258_v26 = vpop.permute.xlu1 %1257  ;;  %v1264_v60 = vpop.permute.xlu0 %1263  ;;  %v1622_v39 = vmul.f32 %v4516_v5, %v4516_v5  ;;  %v4549_v47 = vunpack.c.l.bf16 %v4524_v53  ;;  %v5537_v34 = vunpack.c.h.bf16 %v4498_v52 }
 0x192   : > { %v3096_v1 = vpack.c.bf16 %v1344_v55, %v1343_v14  ;;  %v1314_v54 = vmul.f32 %v5534_v3, %v1258_v26  ;;  %1676 = vadd.xlane.f32.xlu0 %v1620_v9  ;;  %v4558_v14 = vld [vmem:[%s4109_s24 + $0x78] sm:$0xff]   ;;  %v5535_v9 = vunpack.c.l.bf16 %v4508_v63 }
 0x193   : > { %1670 = vadd.xlane.f32.xlu1 %v1617_v12  ;;  %v1345_v55 = vadd.f32 %v1313_v13, %v1217_v24  ;;  %v5536_v12 = vunpack.c.l.bf16 %v4498_v52  ;;  %v1220_v24 = vmul.f32 %v5537_v34, %v4190_v22  ;;  %v1621_v22 = vmul.f32 %v4555_v31, %v4555_v31 }
 0x194   : > { %3353 = vst [vmem:[%s4458_s10 + $0x10] sm:$0xff] %v3096_v1   ;;  %v1315_v26 = vmul.f32 %v5535_v9, %v1260_v48  ;;  %v1346_v3 = vadd.f32 %v1314_v54, %v1218_v62  ;;  %v4575_v1 = vld [vmem:[%s4365_s21 + $0x30] sm:$0xff]   ;;  %v5538_v9 = vunpack.c.h.bf16 %v4508_v63  ;;  %v4589_v54 = vunpack.c.h.bf16 %v4492_v6 }
 0x195   : > { %v1219_v0 = vmul.f32 %v5536_v12, %v4171_v56  ;;  %v1262_v13 = vpop.permute.xlu1 %1261  ;;  %v1268_v48 = vpop.permute.xlu0 %1267  ;;  %v1624_v56 = vmul.f32 %v4549_v47, %v4549_v47  ;;  %v4583_v12 = vunpack.c.l.bf16 %v4558_v14  ;;  %v5540_v52 = vunpack.c.l.bf16 %v4531_v49 }
 0x196   : > { %v3101_v62 = vpack.c.bf16 %v1346_v3, %v1345_v55  ;;  %v1316_v36 = vmul.f32 %v5538_v9, %v1262_v13  ;;  %1680 = vadd.xlane.f32.xlu0 %v1622_v39  ;;  %v5539_v39 = vunpack.c.l.bf16 %v4541_v41  ;;  %v5433_v9 = vunpack.c.l.bf16 %v4575_v1 }
 0x197   : > { %1674 = vadd.xlane.f32.xlu1 %v1619_v17  ;;  %v1347_v55 = vadd.f32 %v1315_v26, %v1219_v0  ;;  %v1075_v17 = vmul.f32 0.0078125, %v4348_v29  ;;  %v1221_v63 = vmul.f32 %v5540_v52, %v4183_v16  ;;  %v5434_v6 = vunpack.c.l.bf16 %v4565_v11 }
 0x198   : > { %3354 = vst [vmem:[%s4458_s10 + $0x18] sm:$0xff] %v3101_v62   ;;  %v1317_v3 = vmul.f32 %v5539_v39, %v1264_v60  ;;  %v1348_v13 = vadd.f32 %v1316_v36, %v1220_v24  ;;  %v5541_v0 = vunpack.c.h.bf16 %v4531_v49  ;;  %v4607_v60 = vld [vmem:[%s4365_s21 + $0x38] sm:$0xff]   ;;  %v5542_v39 = vunpack.c.h.bf16 %v4541_v41 }
 0x199   : > { %v1266_v62 = vpop.permute.xlu1 %1265  ;;  %v1272_v36 = vpop.permute.xlu0 %1271  ;;  %v1626_v16 = vmul.f32 %v4583_v12, %v4583_v12  ;;  %v1107_v34 = vadd.f32 1e-06, %v1075_v17  ;;  %v1223_v52 = vmul.f32 %v5434_v6, %v4195_v43  ;;  %v5544_v17 = vunpack.c.h.bf16 %v4575_v1 }
 0x19a   : > { %v1222_v26 = vmul.f32 %v5541_v0, %v4202_v27  ;;  %v3106_v24 = vpack.c.bf16 %v1348_v13, %v1347_v55  ;;  %v1318_v29 = vmul.f32 %v5542_v39, %v1266_v62  ;;  %1684 = vadd.xlane.f32.xlu0 %v1624_v56  ;;  %v1623_v27 = vmul.f32 %v4589_v54, %v4589_v54  ;;  %v4625_v39 = vld [vmem:[%s4379_s14 + $0x40] sm:$0xff]  }
 0x19b   : > { %1678 = vadd.xlane.f32.xlu1 %v1621_v22  ;;  %v4618_v0 = vunpack.c.h.bf16 %v4524_v53  ;;  %v1349_v55 = vadd.f32 %v1317_v3, %v1221_v63  ;;  %v1319_v56 = vmul.f32 %v5433_v9, %v1268_v48  ;;  %v5436_v62 = vunpack.c.l.bf16 %v4607_v60  ;;  %v4633_v3 = vld [vmem:[%s4365_s21 + $0x40] sm:$0xff]  }
 0x19c   : > { %3355 = vst [vmem:[%s4458_s10 + $0x20] sm:$0xff] %v3106_v24   ;;  %v1350_v13 = vadd.f32 %v1318_v29, %v1222_v26  ;;  %v1076_v22 = vmul.f32 0.0078125, %v4389_v35  ;;  %v5543_v26 = vunpack.c.h.bf16 %v4565_v11  ;;  %v5435_v9 = vunpack.c.h.bf16 %v4607_v60 }
 0x19d   : > { %v1270_v63 = vpop.permute.xlu1 %1269  ;;  %v1276_v24 = vpop.permute.xlu0 %1275  ;;  %v1625_v6 = vmul.f32 %v4618_v0, %v4618_v0  ;;  %3531 = vrsqrt.f32 %v1107_v34  ;;  %v5545_v53 = vunpack.c.l.bf16 %v4596_v45 }
 0x19e   : > { %v3111_v48 = vpack.c.bf16 %v1350_v13, %v1349_v55  ;;  %v1224_v29 = vmul.f32 %v5543_v26, %v4214_v32  ;;  %v1320_v35 = vmul.f32 %v5544_v17, %v1270_v63  ;;  %1688 = vadd.xlane.f32.xlu0 %v1626_v16  ;;  %v4646_v55 = vunpack.c.h.bf16 %v4558_v14  ;;  %v4653_v26 = vld [vmem:[%s4379_s14 + $0x48] sm:$0xff]  }
 0x19f   : > { %1682 = vadd.xlane.f32.xlu1 %v1623_v27  ;;  %v1351_v13 = vadd.f32 %v1319_v56, %v1223_v52  ;;  %v1321_v32 = vmul.f32 %v5436_v62, %v1272_v36  ;;  %v5445_v63 = vunpack.c.l.bf16 %v4633_v3  ;;  %v1692_v27 = vmul.f32 0.0078125, %v4369_v30  ;;  %v4660_v52 = vld [vmem:[%s4365_s21 + $0x48] sm:$0xff]   ;;  %v4680_v62 = vld [vmem:[%s4365_s21 + $0x50] sm:$0xff]  }
 0x1a0   : > { %3356 = vst [vmem:[%s4458_s10 + $0x28] sm:$0xff] %v3111_v48   ;;  %v1352_v16 = vadd.f32 %v1320_v35, %v1224_v29  ;;  %v1108_v17 = vadd.f32 1e-06, %v1076_v22  ;;  %v1225_v14 = vmul.f32 %v5545_v53, %v4207_v59  ;;  %v5546_v36 = vunpack.c.h.bf16 %v4596_v45 }
 0x1a1   : > { %v1274_v43 = vpop.permute.xlu1 %1273  ;;  %v1280_v56 = vpop.permute.xlu0 %1279  ;;  %v5444_v30 = vunpack.c.h.bf16 %v4633_v3  ;;  %v1627_v22 = vmul.f32 %v4646_v55, %v4646_v55  ;;  %v5442_v59 = vunpack.c.h.bf16 %v4653_v26  ;;  %v1323_v35 = vmul.f32 %v5445_v63, %v1276_v24 }
 0x1a2   : > { %v3116_v48 = vpack.c.bf16 %v1352_v16, %v1351_v13  ;;  %v1226_v29 = vmul.f32 %v5546_v36, %v4226_v37  ;;  %v1322_v34 = vmul.f32 %v5435_v9, %v1274_v43  ;;  %v1353_v53 = vadd.f32 %v1321_v32, %v1225_v14 }
 0x1a3   : > { %1686 = vadd.xlane.f32.xlu1 %v1625_v6  ;;  %v5438_v37 = vunpack.c.l.bf16 %v4660_v52  ;;  %v1724_v16 = vadd.f32 1e-06, %v1692_v27  ;;  %3533 = vrsqrt.f32 %v1108_v17  ;;  %v5547_v6 = vunpack.c.l.bf16 %v4625_v39  ;;  %v4688_v17 = vld [vmem:[%s4379_s14 + $0x50] sm:$0xff]  }
 0x1a4   : > { %3357 = vst [vmem:[%s4458_s10 + $0x30] sm:$0xff] %v3116_v48   ;;  %v1354_v13 = vadd.f32 %v1322_v34, %v1226_v29  ;;  %v5437_v36 = vunpack.c.l.bf16 %v4653_v26  ;;  %v5548_v24 = vunpack.c.h.bf16 %v4625_v39  ;;  %v5441_v29 = vunpack.c.h.bf16 %v4660_v52 }
 0x1a5   : > { %v1227_v43 = vmul.f32 %v5547_v6, %v4219_v10  ;;  %v1278_v9 = vpop.permute.xlu1 %1277  ;;  %v1284_v32 = vpop.permute.xlu0 %1283  ;;  %v1325_v34 = vmul.f32 %v5438_v37, %v1280_v56  ;;  %3535 = vrsqrt.f32 %v1724_v16  ;;  %v1230_v56 = vmul.f32 %v5442_v59, %v4250_v50 }
 0x1a6   : > { %v3121_v14 = vpack.c.bf16 %v1354_v13, %v1353_v53  ;;  %v1228_v48 = vmul.f32 %v5548_v24, %v4238_v42  ;;  %v1324_v27 = vmul.f32 %v5444_v30, %v1278_v9  ;;  %v5439_v53 = vunpack.c.l.bf16 %v4680_v62  ;;  %v4709_v24 = vld [vmem:[%s4379_s14 + $0x58] sm:$0xff]  }
 0x1a7   : > { %1690 = vadd.xlane.f32.xlu1 %v1627_v22  ;;  %v1355_v10 = vadd.f32 %v1323_v35, %v1227_v43  ;;  %v1229_v42 = vmul.f32 %v5437_v36, %v4231_v15  ;;  %v5440_v9 = vunpack.c.l.bf16 %v4688_v17  ;;  %v4700_v22 = vld [vmem:[%s4365_s21 + $0x58] sm:$0xff]   ;;  %v5443_v43 = vunpack.c.h.bf16 %v4688_v17  ;;  %5549 = vst [vmem:[#allocation34_spill] sm:$0xff] %v4709_v24 }
 0x1a8   : > { %3358 = vst [vmem:[%s4458_s10 + $0x38] sm:$0xff] %v3121_v14   ;;  %v1356_v6 = vadd.f32 %v1324_v27, %v1228_v48  ;;  %v5462_v15 = vunpack.c.h.bf16 %v4680_v62  ;;  %v3532_v48 = vpop.eup %3531  ;;  %v1327_v36 = vmul.f32 %v5439_v53, %v1284_v32 }
 0x1a9   : > { %v1282_v13 = vpop.permute.xlu1 %1281  ;;  %v1288_v35 = vpop.permute.xlu0 %1287  ;;  %v1357_v27 = vadd.f32 %v1325_v34, %v1229_v42  ;;  %v1231_v50 = vmul.f32 %v5440_v9, %v4243_v20  ;;  %v1232_v34 = vmul.f32 %v5443_v43, %v4262_v19  ;;  %v5461_v20 = vunpack.c.h.bf16 %v4700_v22 }
 0x1aa   : > { %v3126_v14 = vpack.c.bf16 %v1356_v6, %v1355_v10  ;;  %v1326_v16 = vmul.f32 %v5441_v29, %v1282_v13  ;;  %v5448_v10 = vunpack.c.l.bf16 %v4700_v22  ;;  %v4717_v6 = vld [vmem:[%s4379_s14 + $0x60] sm:$0xff]   ;;  %v5446_v13 = vunpack.c.l.bf16 %v4709_v24 }
 0x1ab   : > { %5550 = vst [vmem:[#allocation35_spill] sm:$0xff] %v4717_v6  ;;  %v1171_v9 = vmul.f32 %v3532_v48, %v4105_v21  ;;  %v5460_v59 = vunpack.c.h.bf16 %v4717_v6  ;;  %v1359_v19 = vadd.f32 %v1327_v36, %v1231_v50  ;;  %v5450_v21 = vunpack.c.l.bf16 %v4717_v6  ;;  %v4750_v50 = vld [vmem:[%s4365_s21 + $0x68] sm:$0xff]  }
 0x1ac   : > { %3359 = vst [vmem:[%s4458_s10 + $0x40] sm:$0xff] %v3126_v14   ;;  %v1358_v37 = vadd.f32 %v1326_v16, %v1230_v56  ;;  %v4727_v14 = vld [vmem:[%s4365_s21 + $0x60] sm:$0xff]   ;;  %v5447_v56 = vunpack.c.h.bf16 %v4709_v24  ;;  %v1329_v43 = vmul.f32 %v5448_v10, %v1288_v35  ;;  %5553 = vst [vmem:[#allocation38_spill] sm:$0xff] %v4750_v50 }
 0x1ad   : > { %v1286_v42 = vpop.permute.xlu1 %1285  ;;  %5551 = vst [vmem:[#allocation36_spill] sm:$0xff] %v4727_v14  ;;  %v1292_v32 = vpop.permute.xlu0 %1291  ;;  %v5449_v63 = vunpack.c.l.bf16 %v4727_v14 }
 0x1ae   : > { %v3131_v16 = vpack.c.bf16 %v1358_v37, %v1357_v27  ;;  %v1328_v53 = vmul.f32 %v5462_v15, %v1286_v42  ;;  %v3534_v29 = vpop.eup %3533  ;;  %v4740_v37 = vld [vmem:[%s4379_s14 + $0x68] sm:$0xff]   ;;  %v1233_v27 = vmul.f32 %v5446_v13, %v4255_v8  ;;  %v1234_v36 = vmul.f32 %v5447_v56, %v4274_v40  ;;  %v3599_v42 = vld [vmem:[%s5390_s4] ss:$0 sm:$0xff] }
 0x1af   : > { %5552 = vst [vmem:[#allocation37_spill] sm:$0xff] %v4740_v37  ;;  %v4758_v8 = vmul.f32 %v3599_v42, %v1171_v9  ;;  %v3536_v13 = vpop.eup %3535  ;;  %v5456_v56 = vunpack.c.h.bf16 %v4740_v37  ;;  %v1236_v9 = vmul.f32 %v5460_v59, %v4286_v38 }
 0x1b0   : > { %3360 = vst [vmem:[%s4458_s10 + $0x48] sm:$0xff] %v3131_v16   ;;  %v1360_v30 = vadd.f32 %v1328_v53, %v1232_v34  ;;  %v5459_v53 = vunpack.c.h.bf16 %v4727_v14  ;;  %v1172_v16 = vmul.f32 %v3534_v29, %v4107_v23  ;;  %v1361_v10 = vadd.f32 %v1329_v43, %v1233_v27  ;;  %v4776_v27 = vld [vmem:[%s4365_s21 + $0x70] sm:$0xff]  }
 0x1b1   : > { %v1290_v48 = vpop.permute.xlu1 %1289  ;;  %v1296_v40 = vpop.permute.xlu0 %1295  ;;  %v1235_v23 = vmul.f32 %v5450_v21, %v4267_v25  ;;  %v5451_v29 = vunpack.c.l.bf16 %v4740_v37  ;;  %5554 = vst [vmem:[#allocation39_spill] sm:$0xff] %v4776_v27  ;;  %v1788_v25 = vmul.f32 %v3536_v13, %v4117_v28  ;;  %v4790_v21 = vld [vmem:[%s5391_s5] ss:$0 sm:$0xff] }
 0x1b2   : > { %v3136_v35 = vpack.c.bf16 %v1360_v30, %v1359_v19  ;;  %v1330_v34 = vmul.f32 %v5461_v20, %v1290_v48  ;;  %v1331_v30 = vmul.f32 %v5449_v63, %v1292_v32  ;;  %v5452_v48 = vunpack.c.l.bf16 %v4750_v50 }
 0x1b3   : > { %v5454_v32 = vunpack.c.h.bf16 %v4750_v50  ;;  %v4784_v63 = vmul.f32 %v3599_v42, %v1172_v16  ;;  %v1237_v28 = vmul.f32 %v5451_v29, %v4279_v57  ;;  %v4810_v57 = vmul.f32 %v4790_v21, %v1788_v25 }
 0x1b4   : > { %3361 = vst [vmem:[%s4458_s10 + $0x50] sm:$0xff] %v3136_v35   ;;  %v1362_v19 = vadd.f32 %v1330_v34, %v1234_v36  ;;  %1303 = vrot.lane.b32.xlu0 %v4758_v8, %s3672_s17  ;;  %v4782_v34 = vld [vmem:[%s4379_s14 + $0x70] sm:$0xff]   ;;  %v1363_v38 = vadd.f32 %v1331_v30, %v1235_v23  ;;  %v5458_v23 = vunpack.c.h.bf16 %v4776_v27 }
 0x1b5   : > { %v1294_v43 = vpop.permute.xlu1 %1293  ;;  %5555 = vst [vmem:[#allocation40_spill] sm:$0xff] %v4782_v34  ;;  %v5455_v13 = vunpack.c.l.bf16 %v4782_v34  ;;  %v1300_v42 = vpop.permute.xlu0 %1299  ;;  %v5457_v30 = vunpack.c.h.bf16 %v4782_v34 }
 0x1b6   : > { %v3141_v36 = vpack.c.bf16 %v1362_v19, %v1361_v10  ;;  %v1332_v35 = vmul.f32 %v5459_v53, %v1294_v43  ;;  %v1333_v10 = vmul.f32 %v5452_v48, %v1296_v40  ;;  %v5453_v43 = vunpack.c.l.bf16 %v4776_v27 }
 0x1b7   : > { %v1240_v25 = vmul.f32 %v5457_v30, %v4304_v7 }
 0x1b8   : > { %3362 = vst [vmem:[%s4458_s10 + $0x58] sm:$0xff] %v3141_v36   ;;  %v1364_v19 = vadd.f32 %v1332_v35, %v1236_v9  ;;  %1305 = vrot.lane.b32.xlu1 %v4784_v63, %s3672_s17  ;;  %v1238_v9 = vmul.f32 %v5456_v56, %v4298_v2  ;;  %v1365_v35 = vadd.f32 %v1333_v10, %v1237_v28 }
 0x1b9   : > { %v1298_v16 = vpop.permute.xlu1 %1297  ;;  %v1335_v29 = vmul.f32 %v5453_v43, %v1300_v42  ;;  %v1239_v2 = vmul.f32 %v5455_v13, %v4291_v44 }
 0x1ba   : > { %v3146_v40 = vpack.c.bf16 %v1364_v19, %v1363_v38  ;;  %v1334_v36 = vmul.f32 %v5454_v32, %v1298_v16 }
 0x1bb   : > { %v1367_v28 = vadd.f32 %v1335_v29, %v1239_v2 }
 0x1bc   : > { %3363 = vst [vmem:[%s4458_s10 + $0x60] sm:$0xff] %v3146_v40   ;;  %v1366_v48 = vadd.f32 %v1334_v36, %v1238_v9  ;;  %1890 = vrot.lane.b32.xlu1 %v4810_v57, %s3672_s17 }
 0x1bd   : > { %v1302_v38 = vpop.permute.xlu1 %1301 }
 0x1be   : > { %v3151_v19 = vpack.c.bf16 %v1366_v48, %v1365_v35  ;;  %v1336_v10 = vmul.f32 %v5458_v23, %v1302_v38 }
 0x1c0   : > { %3364 = vst [vmem:[%s4458_s10 + $0x68] sm:$0xff] %v3151_v19   ;;  %v1368_v42 = vadd.f32 %v1336_v10, %v1240_v25 }
 0x1c2   : > { %v3156_v16 = vpack.c.bf16 %v1368_v42, %v1367_v28 }
 0x1c4   : > { %3365 = vst [vmem:[%s4458_s10 + $0x70] sm:$0xff] %v3156_v16  }
 0x1ef   : > { %v1633_v40 = vpop.xlane.xlu0 %1632 }
 0x1f0   : > { %v1694_v9 = vmul.f32 0.0078125, %v1633_v40 }
 0x1f2   : > { %v1726_v36 = vadd.f32 1e-06, %v1694_v9 }
 0x1f3   : > { %v1635_v43 = vpop.xlane.xlu0 %1634 }
 0x1f4   : > { %3537 = vrsqrt.f32 %v1726_v36  ;;  %v1695_v32 = vmul.f32 0.0078125, %v1635_v43 }
 0x1f6   : > { %v1727_v13 = vadd.f32 1e-06, %v1695_v32 }
 0x1f7   : > { %v1637_v44 = vpop.xlane.xlu0 %1636 }
 0x1f8   : > { %v1696_v48 = vmul.f32 0.0078125, %v1637_v44 }
 0x1fa   : > { %v1728_v35 = vadd.f32 1e-06, %v1696_v48 }
 0x1fb   : > { %v1641_v56 = vpop.xlane.xlu0 %1640 }
 0x1fc   : > { %3539 = vrsqrt.f32 %v1728_v35  ;;  %v1698_v7 = vmul.f32 0.0078125, %v1641_v56  ;;  %v1631_v30 = vpop.xlane.xlu1 %1630 }
 0x1fd   : > { %v1693_v38 = vmul.f32 0.0078125, %v1631_v30  ;;  %3541 = vrsqrt.f32 %v1727_v13 }
 0x1fe   : > { %v3538_v29 = vpop.eup %3537  ;;  %v1730_v2 = vadd.f32 1e-06, %v1698_v7 }
 0x1ff   : > { %v1725_v19 = vadd.f32 1e-06, %v1693_v38  ;;  %v1645_v25 = vpop.xlane.xlu0 %1644  ;;  %v1790_v10 = vmul.f32 %v3538_v29, %v4309_v46 }
 0x200   : > { %3543 = vrsqrt.f32 %v1730_v2  ;;  %v1700_v28 = vmul.f32 0.0078125, %v1645_v25  ;;  %v1639_v42 = vpop.xlane.xlu1 %1638 }
 0x201   : > { %3545 = vrsqrt.f32 %v1725_v19  ;;  %v1697_v43 = vmul.f32 0.0078125, %v1639_v42  ;;  %v4829_v16 = vmul.f32 %v4790_v21, %v1790_v10 }
 0x202   : > { %v1732_v32 = vadd.f32 1e-06, %v1700_v28 }
 0x203   : > { %v1729_v40 = vadd.f32 1e-06, %v1697_v43  ;;  %1894 = vrot.lane.b32.xlu0 %v4829_v16, %s3672_s17  ;;  %v1649_v56 = vpop.xlane.xlu0 %1648 }
 0x204   : > { %3547 = vrsqrt.f32 %v1732_v32  ;;  %v1702_v13 = vmul.f32 0.0078125, %v1649_v56  ;;  %v1643_v30 = vpop.xlane.xlu1 %1642 }
 0x205   : > { %3549 = vrsqrt.f32 %v1729_v40  ;;  %v1699_v9 = vmul.f32 0.0078125, %v1643_v30 }
 0x206   : > { %v3540_v46 = vpop.eup %3539  ;;  %v1734_v36 = vadd.f32 1e-06, %v1702_v13  ;;  %v5556_v13 = vld [vmem:[#allocation7_spill] sm:$0xff] }
 0x207   : > { %v1731_v44 = vadd.f32 1e-06, %v1699_v9  ;;  %v1653_v48 = vpop.xlane.xlu0 %1652  ;;  %v1792_v35 = vmul.f32 %v3540_v46, %v4318_v18  ;;  %v3542_v29 = vpop.eup %3541 }
 0x208   : > { %3551 = vrsqrt.f32 %v1734_v36  ;;  %v1704_v7 = vmul.f32 0.0078125, %v1653_v48  ;;  %v1647_v38 = vpop.xlane.xlu1 %1646  ;;  %v1791_v30 = vmul.f32 %v3542_v29, %v5556_v13 }
 0x209   : > { %3553 = vrsqrt.f32 %v1731_v44  ;;  %v1701_v2 = vmul.f32 0.0078125, %v1647_v38  ;;  %v4835_v19 = vmul.f32 %v4790_v21, %v1792_v35  ;;  %v5557_v38 = vld [vmem:[#allocation8_spill] sm:$0xff] }
 0x20a   : > { %v3544_v25 = vpop.eup %3543  ;;  %v1736_v10 = vadd.f32 1e-06, %v1704_v7 }
 0x20b   : > { %v3546_v28 = vpop.eup %3545  ;;  %v1733_v42 = vadd.f32 1e-06, %v1701_v2  ;;  %1898 = vrot.lane.b32.xlu0 %v4835_v19, %s3672_s17  ;;  %v1657_v43 = vpop.xlane.xlu0 %1656  ;;  %v1794_v32 = vmul.f32 %v3544_v25, %v4323_v58  ;;  %v4854_v25 = vmul.f32 %v4790_v21, %v1791_v30 }
 0x20c   : > { %3555 = vrsqrt.f32 %v1736_v10  ;;  %v1706_v18 = vmul.f32 0.0078125, %v1657_v43  ;;  %v1651_v40 = vpop.xlane.xlu1 %1650  ;;  %v1789_v56 = vmul.f32 %v3546_v28, %v4326_v4  ;;  %v5558_v10 = vld [vmem:[#allocation9_spill] sm:$0xff] }
 0x20d   : > { %3557 = vrsqrt.f32 %v1733_v42  ;;  %v1703_v9 = vmul.f32 0.0078125, %v1651_v40  ;;  %v4843_v46 = vmul.f32 %v4790_v21, %v1794_v32 }
 0x20e   : > { %v3548_v36 = vpop.eup %3547  ;;  %v1738_v44 = vadd.f32 1e-06, %v1706_v18  ;;  %v4846_v48 = vmul.f32 %v4790_v21, %v1789_v56 }
 0x20f   : > { %v3550_v35 = vpop.eup %3549  ;;  %v1735_v7 = vadd.f32 1e-06, %v1703_v9  ;;  %1902 = vrot.lane.b32.xlu0 %v4843_v46, %s3672_s17  ;;  %v1661_v58 = vpop.xlane.xlu0 %1660  ;;  %v1796_v4 = vmul.f32 %v3548_v36, %v5557_v38  ;;  %v5559_v9 = vld [vmem:[#allocation10_spill] sm:$0xff] }
 0x210   : > { %3559 = vrsqrt.f32 %v1738_v44  ;;  %v1708_v29 = vmul.f32 0.0078125, %v1661_v58  ;;  %v1655_v2 = vpop.xlane.xlu1 %1654  ;;  %1892 = vrot.lane.b32.xlu1 %v4846_v48, %s3672_s17  ;;  %v1793_v28 = vmul.f32 %v3550_v35, %v5558_v10 }
 0x211   : > { %3561 = vrsqrt.f32 %v1735_v7  ;;  %v1705_v42 = vmul.f32 0.0078125, %v1655_v2  ;;  %v4858_v43 = vmul.f32 %v4790_v21, %v1796_v4  ;;  %v5560_v7 = vld [vmem:[#allocation11_spill] sm:$0xff] }
 0x212   : > { %v3552_v32 = vpop.eup %3551  ;;  %v1740_v18 = vadd.f32 1e-06, %v1708_v29  ;;  %v4866_v35 = vmul.f32 %v4790_v21, %v1793_v28 }
 0x213   : > { %v3554_v40 = vpop.eup %3553  ;;  %v1737_v56 = vadd.f32 1e-06, %v1705_v42  ;;  %1906 = vrot.lane.b32.xlu0 %v4858_v43, %s3672_s17  ;;  %v1665_v13 = vpop.xlane.xlu0 %1664  ;;  %v1798_v36 = vmul.f32 %v3552_v32, %v5559_v9 }
 0x214   : > { %3563 = vrsqrt.f32 %v1740_v18  ;;  %v1710_v30 = vmul.f32 0.0078125, %v1665_v13  ;;  %v1659_v44 = vpop.xlane.xlu1 %1658  ;;  %1896 = vrot.lane.b32.xlu1 %v4854_v25, %s3672_s17  ;;  %v1795_v58 = vmul.f32 %v3554_v40, %v5560_v7  ;;  %v5561_v18 = vld [vmem:[#allocation12_spill] sm:$0xff] }
 0x215   : > { %3565 = vrsqrt.f32 %v1737_v56  ;;  %v1707_v38 = vmul.f32 0.0078125, %v1659_v44  ;;  %v4870_v4 = vmul.f32 %v4790_v21, %v1798_v36  ;;  %v5562_v56 = vld [vmem:[#allocation13_spill] sm:$0xff] }
 0x216   : > { %v3556_v29 = vpop.eup %3555  ;;  %v1742_v2 = vadd.f32 1e-06, %v1710_v30  ;;  %v4878_v40 = vmul.f32 %v4790_v21, %v1795_v58 }
 0x217   : > { %v3558_v10 = vpop.eup %3557  ;;  %v1739_v42 = vadd.f32 1e-06, %v1707_v38  ;;  %1910 = vrot.lane.b32.xlu0 %v4870_v4, %s3672_s17  ;;  %v1669_v32 = vpop.xlane.xlu0 %1668  ;;  %v1800_v13 = vmul.f32 %v3556_v29, %v5561_v18 }
 0x218   : > { %3567 = vrsqrt.f32 %v1742_v2  ;;  %v1712_v28 = vmul.f32 0.0078125, %v1669_v32  ;;  %v1663_v9 = vpop.xlane.xlu1 %1662  ;;  %1900 = vrot.lane.b32.xlu1 %v4866_v35, %s3672_s17  ;;  %v1797_v36 = vmul.f32 %v3558_v10, %v5562_v56  ;;  %v5563_v32 = vld [vmem:[#allocation14_spill] sm:$0xff] }
 0x219   : > { %3569 = vrsqrt.f32 %v1739_v42  ;;  %v1709_v30 = vmul.f32 0.0078125, %v1663_v9  ;;  %v4882_v44 = vmul.f32 %v4790_v21, %v1800_v13  ;;  %v5564_v42 = vld [vmem:[#allocation15_spill] sm:$0xff] }
 0x21a   : > { %v3560_v7 = vpop.eup %3559  ;;  %v1744_v38 = vadd.f32 1e-06, %v1712_v28  ;;  %v4890_v10 = vmul.f32 %v4790_v21, %v1797_v36 }
 0x21b   : > { %v3562_v23 = vpop.eup %3561  ;;  %v1741_v29 = vadd.f32 1e-06, %v1709_v30  ;;  %1914 = vrot.lane.b32.xlu0 %v4882_v44, %s3672_s17  ;;  %v1673_v2 = vpop.xlane.xlu0 %1672  ;;  %v1802_v18 = vmul.f32 %v3560_v7, %v5563_v32 }
 0x21c   : > { %3571 = vrsqrt.f32 %v1744_v38  ;;  %v1714_v58 = vmul.f32 0.0078125, %v1673_v2  ;;  %v1667_v53 = vpop.xlane.xlu1 %1666  ;;  %1904 = vrot.lane.b32.xlu1 %v4878_v40, %s3672_s17  ;;  %v1799_v13 = vmul.f32 %v3562_v23, %v5564_v42  ;;  %v5565_v2 = vld [vmem:[#allocation17_spill] sm:$0xff]  ;;  %v5566_v23 = vld [vmem:[#allocation19_spill] sm:$0xff] }
 0x21d   : > { %3573 = vrsqrt.f32 %v1741_v29  ;;  %v1711_v28 = vmul.f32 0.0078125, %v1667_v53  ;;  %v4894_v9 = vmul.f32 %v4790_v21, %v1802_v18 }
 0x21e   : > { %v3564_v56 = vpop.eup %3563  ;;  %v1746_v30 = vadd.f32 1e-06, %v1714_v58  ;;  %v4902_v53 = vmul.f32 %v4790_v21, %v1799_v13 }
 0x21f   : > { %v3566_v59 = vpop.eup %3565  ;;  %v1743_v7 = vadd.f32 1e-06, %v1711_v28  ;;  %1918 = vrot.lane.b32.xlu0 %v4894_v9, %s3672_s17  ;;  %v1677_v38 = vpop.xlane.xlu0 %1676  ;;  %v1804_v32 = vmul.f32 %v3564_v56, %v5565_v2 }
 0x220   : > { %3575 = vrsqrt.f32 %v1746_v30  ;;  %v1716_v36 = vmul.f32 0.0078125, %v1677_v38  ;;  %v1671_v20 = vpop.xlane.xlu1 %1670  ;;  %1908 = vrot.lane.b32.xlu1 %v4890_v10, %s3672_s17  ;;  %v1801_v29 = vmul.f32 %v3566_v59, %v5566_v23  ;;  %v5567_v38 = vld [vmem:[#allocation20_spill] sm:$0xff] }
 0x221   : > { %3577 = vrsqrt.f32 %v1743_v7  ;;  %v1713_v18 = vmul.f32 0.0078125, %v1671_v20  ;;  %v4906_v58 = vmul.f32 %v4790_v21, %v1804_v32  ;;  %v5568_v20 = vld [vmem:[#allocation21_spill] sm:$0xff] }
 0x222   : > { %v3568_v42 = vpop.eup %3567  ;;  %v1748_v28 = vadd.f32 1e-06, %v1716_v36  ;;  %v4914_v59 = vmul.f32 %v4790_v21, %v1801_v29 }
 0x223   : > { %v3570_v15 = vpop.eup %3569  ;;  %v1745_v56 = vadd.f32 1e-06, %v1713_v18  ;;  %1922 = vrot.lane.b32.xlu0 %v4906_v58, %s3672_s17  ;;  %v1681_v30 = vpop.xlane.xlu0 %1680  ;;  %v1806_v2 = vmul.f32 %v3568_v42, %v5567_v38 }
 0x224   : > { %3579 = vrsqrt.f32 %v1748_v28  ;;  %v1718_v13 = vmul.f32 0.0078125, %v1681_v30  ;;  %v1675_v34 = vpop.xlane.xlu1 %1674  ;;  %1912 = vrot.lane.b32.xlu1 %v4902_v53, %s3672_s17  ;;  %v1803_v7 = vmul.f32 %v3570_v15, %v5568_v20  ;;  %v5569_v30 = vld [vmem:[#allocation24_spill] sm:$0xff] }
 0x225   : > { %3581 = vrsqrt.f32 %v1745_v56  ;;  %v1715_v32 = vmul.f32 0.0078125, %v1675_v34  ;;  %v4918_v36 = vmul.f32 %v4790_v21, %v1806_v2  ;;  %v5570_v34 = vld [vmem:[#allocation25_spill] sm:$0xff] }
 0x226   : > { %v3572_v23 = vpop.eup %3571  ;;  %v1750_v18 = vadd.f32 1e-06, %v1718_v13  ;;  %v4926_v15 = vmul.f32 %v4790_v21, %v1803_v7 }
 0x227   : > { %v3574_v27 = vpop.eup %3573  ;;  %v1747_v42 = vadd.f32 1e-06, %v1715_v32  ;;  %1926 = vrot.lane.b32.xlu0 %v4918_v36, %s3672_s17  ;;  %v1685_v28 = vpop.xlane.xlu0 %1684  ;;  %v1808_v38 = vmul.f32 %v3572_v23, %v5569_v30 }
 0x228   : > { %3583 = vrsqrt.f32 %v1750_v18  ;;  %v1720_v29 = vmul.f32 0.0078125, %v1685_v28  ;;  %v1679_v37 = vpop.xlane.xlu1 %1678  ;;  %1916 = vrot.lane.b32.xlu1 %v4914_v59, %s3672_s17  ;;  %v1805_v56 = vmul.f32 %v3574_v27, %v5570_v34  ;;  %v5571_v28 = vld [vmem:[#allocation28_spill] sm:$0xff]  ;;  %v5572_v27 = vld [vmem:[#allocation29_spill] sm:$0xff] }
 0x229   : > { %3585 = vrsqrt.f32 %v1747_v42  ;;  %v1717_v2 = vmul.f32 0.0078125, %v1679_v37  ;;  %v4930_v13 = vmul.f32 %v4790_v21, %v1808_v38 }
 0x22a   : > { %v3576_v20 = vpop.eup %3575  ;;  %v1752_v32 = vadd.f32 1e-06, %v1720_v29  ;;  %v4938_v37 = vmul.f32 %v4790_v21, %v1805_v56  ;;  %v4948_v56 = vld [vmem:[%s4365_s21 + $0x78] sm:$0xff]  }
 0x22b   : > { %v3578_v50 = vpop.eup %3577  ;;  %v1749_v23 = vadd.f32 1e-06, %v1717_v2  ;;  %1930 = vrot.lane.b32.xlu0 %v4930_v13, %s3672_s17  ;;  %v1689_v18 = vpop.xlane.xlu0 %1688  ;;  %v1810_v30 = vmul.f32 %v3576_v20, %v5571_v28  ;;  %5573 = vst [vmem:[#allocation7_spill] sm:$0xff] %v4948_v56 }
 0x22c   : > { %3587 = vrsqrt.f32 %v1752_v32  ;;  %v1722_v7 = vmul.f32 0.0078125, %v1689_v18  ;;  %v1683_v6 = vpop.xlane.xlu1 %1682  ;;  %1920 = vrot.lane.b32.xlu1 %v4926_v15, %s3672_s17  ;;  %v1807_v42 = vmul.f32 %v3578_v50, %v5572_v27 }
 0x22d   : > { %3589 = vrsqrt.f32 %v1749_v23  ;;  %v1719_v38 = vmul.f32 0.0078125, %v1683_v6  ;;  %v4942_v29 = vmul.f32 %v4790_v21, %v1810_v30  ;;  %v4957_v23 = vld [vmem:[%s4379_s14 + $0x78] sm:$0xff]  }
 0x22e   : > { %v3580_v34 = vpop.eup %3579  ;;  %v1754_v2 = vadd.f32 1e-06, %v1722_v7  ;;  %v4953_v6 = vmul.f32 %v4790_v21, %v1807_v42  ;;  %5574 = vst [vmem:[#allocation8_spill] sm:$0xff] %v4957_v23 }
 0x22f   : > { %v3582_v20 = vpop.eup %3581  ;;  %v1751_v32 = vadd.f32 1e-06, %v1719_v38  ;;  %1934 = vrot.lane.b32.xlu0 %v4942_v29, %s3672_s17  ;;  %v1812_v18 = vmul.f32 %v3580_v34, %v4484_v33 }
 0x230   : > { %3591 = vrsqrt.f32 %v1754_v2  ;;  %v1687_v28 = vpop.xlane.xlu1 %1686  ;;  %1924 = vrot.lane.b32.xlu1 %v4938_v37, %s3672_s17  ;;  %v1809_v50 = vmul.f32 %v3582_v20, %v4489_v61  ;;  %v1304_v61 = vpop.permute.xlu0 %1303 }
 0x231   : > { %3593 = vrsqrt.f32 %v1751_v32  ;;  %v1721_v30 = vmul.f32 0.0078125, %v1687_v28  ;;  %v4960_v7 = vmul.f32 %v4790_v21, %v1812_v18  ;;  %v5479_v32 = vunpack.c.h.bf16 %v4957_v23 }
 0x232   : > { %v3584_v33 = vpop.eup %3583  ;;  %v4971_v18 = vmul.f32 %v4790_v21, %v1809_v50 }
 0x233   : > { %5575 = vst [vmem:[#allocation9_spill] sm:$0xff] %v4960_v7  ;;  %v3586_v27 = vpop.eup %3585  ;;  %v1753_v34 = vadd.f32 1e-06, %v1721_v30  ;;  %1938 = vrot.lane.b32.xlu0 %v4960_v7, %s3672_s17  ;;  %v1814_v42 = vmul.f32 %v3584_v33, %v4516_v5  ;;  %v5478_v5 = vunpack.c.h.bf16 %v4948_v56  ;;  %v5576_v7 = vunpack.c.l.bf16 %v4948_v56 }
 0x234   : > { %v1691_v20 = vpop.xlane.xlu1 %1690  ;;  %1928 = vrot.lane.b32.xlu1 %v4953_v6, %s3672_s17  ;;  %v1811_v28 = vmul.f32 %v3586_v27, %v4521_v51  ;;  %v5577_v51 = vunpack.c.l.bf16 %v4957_v23 }
 0x235   : > { %3595 = vrsqrt.f32 %v1753_v34  ;;  %v1723_v30 = vmul.f32 0.0078125, %v1691_v20  ;;  %v4975_v38 = vmul.f32 %v4790_v21, %v1814_v42  ;;  %v1337_v14 = vmul.f32 %v5576_v7, %v1304_v61 }
 0x236   : > { %v3588_v33 = vpop.eup %3587  ;;  %v1241_v27 = vmul.f32 %v5577_v51, %v4758_v8  ;;  %v4989_v42 = vmul.f32 %v4790_v21, %v1811_v28  ;;  %v1242_v7 = vmul.f32 %v5479_v32, %v4784_v63 }
 0x237   : > { %v3590_v2 = vpop.eup %3589  ;;  %v1755_v24 = vadd.f32 1e-06, %v1723_v30  ;;  %1942 = vrot.lane.b32.xlu0 %v4975_v38, %s3672_s17  ;;  %v1816_v50 = vmul.f32 %v3588_v33, %v4549_v47 }
 0x238   : > { %v1306_v34 = vpop.permute.xlu1 %1305  ;;  %1932 = vrot.lane.b32.xlu1 %v4971_v18, %s3672_s17  ;;  %v1813_v20 = vmul.f32 %v3590_v2, %v4555_v31  ;;  %v1369_v33 = vadd.f32 %v1337_v14, %v1241_v27 }
 0x239   : > { %3597 = vrsqrt.f32 %v1755_v24  ;;  %v1338_v47 = vmul.f32 %v5478_v5, %v1306_v34  ;;  %v4998_v8 = vmul.f32 %v4790_v21, %v1816_v50  ;;  %v5588_v5 = vld [vmem:[#allocation22_spill] sm:$0xff] }
 0x23a   : > { %v3592_v61 = vpop.eup %3591  ;;  %v5006_v63 = vmul.f32 %v4790_v21, %v1813_v20  ;;  %v5589_v32 = vunpack.c.l.bf16 %v5588_v5 }
 0x23b   : > { %5578 = vst [vmem:[#allocation10_spill] sm:$0xff] %v4998_v8  ;;  %v3594_v30 = vpop.eup %3593  ;;  %v1370_v51 = vadd.f32 %v1338_v47, %v1242_v7  ;;  %1946 = vrot.lane.b32.xlu0 %v4998_v8, %s3672_s17  ;;  %v1818_v31 = vmul.f32 %v3592_v61, %v4583_v12  ;;  %v5582_v61 = vld [vmem:[#allocation16_spill] sm:$0xff] }
 0x23c   : > { %1936 = vrot.lane.b32.xlu1 %v4989_v42, %s3672_s17  ;;  %v1815_v24 = vmul.f32 %v3594_v30, %v4589_v54  ;;  %v1891_v47 = vpop.permute.xlu1 %1890  ;;  %v5583_v30 = vunpack.c.l.bf16 %v5582_v61 }
 0x23d   : > { %v3161_v2 = vpack.c.bf16 %v1370_v51, %v1369_v33  ;;  %v5010_v28 = vmul.f32 %v4790_v21, %v1818_v31 }
 0x23e   : > { %v5018_v12 = vmul.f32 %v4790_v21, %v1815_v24  ;;  %v1954_v33 = vmul.f32 %v5583_v30, %v1891_v47 }
 0x23f   : > { %5579 = vst [vmem:[#allocation11_spill] sm:$0xff] %v5010_v28  ;;  %v3596_v50 = vpop.eup %3595  ;;  %3366 = vst [vmem:[%s4458_s10 + $0x78] sm:$0xff] %v3161_v2   ;;  %1950 = vrot.lane.b32.xlu0 %v5010_v28, %s3672_s17  ;;  %v5590_v28 = vld [vmem:[#allocation23_spill] sm:$0xff] }
 0x240   : > { %1940 = vrot.lane.b32.xlu1 %v5006_v63, %s3672_s17  ;;  %v1817_v14 = vmul.f32 %v3596_v50, %v4618_v0  ;;  %v5591_v56 = vunpack.c.l.bf16 %v5590_v28 }
 0x242   : > { %v5024_v54 = vmul.f32 %v4790_v21, %v1817_v14  ;;  %v5587_v14 = vunpack.c.h.bf16 %v5582_v61 }
 0x243   : > { %v3598_v27 = vpop.eup %3597 }
 0x244   : > { %1944 = vrot.lane.b32.xlu1 %v5018_v12, %s3672_s17  ;;  %5580 = vst [vmem:[#allocation12_spill] sm:$0xff] %v5024_v54  ;;  %v1819_v34 = vmul.f32 %v3598_v27, %v4646_v55  ;;  %v5584_v55 = vld [vmem:[#allocation18_spill] sm:$0xff] }
 0x245   : > { %v5585_v24 = vunpack.c.l.bf16 %v5584_v55 }
 0x246   : > { %v5030_v20 = vmul.f32 %v4790_v21, %v1819_v34  ;;  %v5586_v21 = vunpack.c.h.bf16 %v5584_v55 }
 0x247   : > { %v1858_v2 = vmul.f32 %v5585_v24, %v4810_v57  ;;  %v5592_v57 = vunpack.c.h.bf16 %v5590_v28 }
 0x248   : > { %1948 = vrot.lane.b32.xlu1 %v5024_v54, %s3672_s17  ;;  %5581 = vst [vmem:[#allocation13_spill] sm:$0xff] %v5030_v20  ;;  %v1859_v50 = vmul.f32 %v5586_v21, %v4846_v48  ;;  %v1860_v54 = vmul.f32 %v5591_v56, %v4829_v16  ;;  %v5593_v48 = vunpack.c.h.bf16 %v5588_v5  ;;  %v5596_v56 = vld [vmem:[#allocation27_spill] sm:$0xff] }
 0x249   : > { %v1986_v34 = vadd.f32 %v1954_v33, %v1858_v2  ;;  %v1861_v55 = vmul.f32 %v5592_v57, %v4854_v25  ;;  %v5594_v33 = vld [vmem:[#allocation26_spill] sm:$0xff]  ;;  %v5598_v5 = vunpack.c.h.bf16 %v5596_v56 }
 0x24a   : > { %v5595_v24 = vunpack.c.l.bf16 %v5594_v33  ;;  %v5602_v57 = vld [vmem:[#allocation30_spill] sm:$0xff] }
 0x24c   : > { %1952 = vrot.lane.b32.xlu1 %v5030_v20, %s3672_s17  ;;  %s5057_s17 = scalar_lea.vmem [#allocation5], %s3963_s16  ;;  %s2819_s16 = sshll.u32 (%p3803_p10), %s3658_s29, 6 }
 0x24d   : > { %s2193_s20 = sadd.s32 (%p3803_p10), %s3654_s28, %s2819_s16 }
 0x24e   : > { %s2820_s23 = sshll.u32 (%p3803_p10), %s2193_s20, 2 }
 0x24f   : > { %s5227_s26 = scalar_lea.vmem (%p3803_p10), %s5392_s6, %s2820_s23 }
 0x275   : > { %v1895_v7 = vpop.permute.xlu0 %1894 }
 0x276   : > { %v1956_v20 = vmul.f32 %v5589_v32, %v1895_v7 }
 0x27d   : > { %v1899_v0 = vpop.permute.xlu0 %1898 }
 0x27e   : > { %v1958_v2 = vmul.f32 %v5595_v24, %v1899_v0 }
 0x281   : > { %v1903_v51 = vpop.permute.xlu0 %1902 }
 0x282   : > { %v1893_v31 = vpop.permute.xlu1 %1892 }
 0x283   : > { %v1955_v27 = vmul.f32 %v5587_v14, %v1893_v31  ;;  %v1988_v31 = vadd.f32 %v1956_v20, %v1860_v54  ;;  %v1863_v54 = vmul.f32 %v5598_v5, %v4866_v35  ;;  %v5599_v20 = vunpack.c.h.bf16 %v5594_v33 }
 0x284   : > { %v5604_v35 = vunpack.c.h.bf16 %v5602_v57 }
 0x285   : > { %v1987_v23 = vadd.f32 %v1955_v27, %v1859_v50  ;;  %v1907_v47 = vpop.permute.xlu0 %1906  ;;  %v5600_v50 = vld [vmem:[#allocation31_spill] sm:$0xff] }
 0x286   : > { %v1897_v30 = vpop.permute.xlu1 %1896  ;;  %v5601_v14 = vunpack.c.l.bf16 %v5600_v50 }
 0x287   : > { %v3230_v8 = vpack.c.bf16 %v1987_v23, %v1986_v34  ;;  %v1957_v61 = vmul.f32 %v5593_v48, %v1897_v30  ;;  %v5597_v23 = vunpack.c.l.bf16 %v5596_v56 }
 0x289   : > { %3231 = vst [vmem:[%s5057_s17] sm:$0xff] %v3230_v8   ;;  %v1989_v32 = vadd.f32 %v1957_v61, %v1861_v55  ;;  %v1911_v7 = vpop.permute.xlu0 %1910  ;;  %v1862_v28 = vmul.f32 %v5597_v23, %v4835_v19  ;;  %v1960_v8 = vmul.f32 %v5601_v14, %v1903_v51  ;;  %v5603_v19 = vunpack.c.l.bf16 %v5602_v57 }
 0x28a   : > { %v1901_v16 = vpop.permute.xlu1 %1900  ;;  %v1865_v61 = vmul.f32 %v5604_v35, %v4878_v40 }
 0x28b   : > { %v3235_v25 = vpack.c.bf16 %v1989_v32, %v1988_v31  ;;  %v1959_v0 = vmul.f32 %v5599_v20, %v1901_v16  ;;  %v1990_v21 = vadd.f32 %v1958_v2, %v1862_v28  ;;  %v1864_v55 = vmul.f32 %v5603_v19, %v4843_v46  ;;  %v5606_v2 = vld [vmem:[#allocation33_spill] sm:$0xff]  ;;  %v5608_v28 = vld [vmem:[#allocation32_spill] sm:$0xff] }
 0x28c   : > { %v5605_v31 = vunpack.c.h.bf16 %v5600_v50  ;;  %v5607_v51 = vunpack.c.l.bf16 %v5606_v2  ;;  %v5609_v46 = vunpack.c.l.bf16 %v5608_v28  ;;  %v5610_v40 = vunpack.c.h.bf16 %v5608_v28 }
 0x28d   : > { %3382 = vst [vmem:[%s5057_s17 + $0x8] sm:$0xff] %v3235_v25   ;;  %v1991_v27 = vadd.f32 %v1959_v0, %v1863_v54  ;;  %v1915_v34 = vpop.permute.xlu0 %1914  ;;  %v1992_v24 = vadd.f32 %v1960_v8, %v1864_v55  ;;  %v5611_v20 = vunpack.c.h.bf16 %v5606_v2  ;;  %v5615_v55 = vunpack.c.h.bf16 %v4541_v41 }
 0x28e   : > { %v1905_v30 = vpop.permute.xlu1 %1904  ;;  %v1962_v32 = vmul.f32 %v5607_v51, %v1907_v47  ;;  %v1866_v25 = vmul.f32 %v5609_v46, %v4858_v43  ;;  %v1867_v54 = vmul.f32 %v5610_v40, %v4890_v10  ;;  %v5612_v47 = vunpack.c.l.bf16 %v4541_v41 }
 0x28f   : > { %v3240_v48 = vpack.c.bf16 %v1991_v27, %v1990_v21  ;;  %v1961_v33 = vmul.f32 %v5605_v31, %v1905_v30  ;;  %v5613_v43 = vunpack.c.l.bf16 %v4531_v49  ;;  %v5614_v10 = vunpack.c.h.bf16 %v4531_v49 }
 0x290   : > { %v1994_v21 = vadd.f32 %v1962_v32, %v1866_v25  ;;  %v1964_v50 = vmul.f32 %v5612_v47, %v1911_v7  ;;  %v5616_v7 = vunpack.c.l.bf16 %v4575_v1  ;;  %v5618_v49 = vunpack.c.h.bf16 %v4565_v11 }
 0x291   : > { %3383 = vst [vmem:[%s5057_s17 + $0x10] sm:$0xff] %v3240_v48   ;;  %v1993_v16 = vadd.f32 %v1961_v33, %v1865_v61  ;;  %v1919_v56 = vpop.permute.xlu0 %1918  ;;  %v1868_v30 = vmul.f32 %v5613_v43, %v4870_v4  ;;  %v1869_v19 = vmul.f32 %v5614_v10, %v4902_v53  ;;  %v5617_v4 = vunpack.c.l.bf16 %v4565_v11 }
 0x292   : > { %v1909_v23 = vpop.permute.xlu1 %1908  ;;  %v1966_v61 = vmul.f32 %v5616_v7, %v1915_v34  ;;  %v1871_v53 = vmul.f32 %v5618_v49, %v4914_v59  ;;  %v5619_v41 = vunpack.c.h.bf16 %v4575_v1  ;;  %v5620_v34 = vunpack.c.l.bf16 %v4607_v60 }
 0x293   : > { %v3245_v5 = vpack.c.bf16 %v1993_v16, %v1992_v24  ;;  %v1963_v0 = vmul.f32 %v5611_v20, %v1909_v23  ;;  %v1996_v35 = vadd.f32 %v1964_v50, %v1868_v30  ;;  %v1870_v2 = vmul.f32 %v5617_v4, %v4882_v44 }
 0x294   : > { %v1968_v23 = vmul.f32 %v5620_v34, %v1919_v56  ;;  %v5621_v44 = vunpack.c.l.bf16 %v4596_v45  ;;  %v5622_v11 = vunpack.c.h.bf16 %v4596_v45  ;;  %v5623_v1 = vunpack.c.h.bf16 %v4607_v60 }
 0x295   : > { %3384 = vst [vmem:[%s5057_s17 + $0x18] sm:$0xff] %v3245_v5   ;;  %v1995_v14 = vadd.f32 %v1963_v0, %v1867_v54  ;;  %v1923_v8 = vpop.permute.xlu0 %1922  ;;  %v1998_v16 = vadd.f32 %v1966_v61, %v1870_v2  ;;  %v5624_v56 = vunpack.c.l.bf16 %v4633_v3  ;;  %v5626_v45 = vunpack.c.h.bf16 %v4625_v39 }
 0x296   : > { %v1913_v27 = vpop.permute.xlu1 %1912  ;;  %v1872_v5 = vmul.f32 %v5621_v44, %v4894_v9  ;;  %v1873_v59 = vmul.f32 %v5622_v11, %v4926_v15  ;;  %v5625_v9 = vunpack.c.l.bf16 %v4625_v39  ;;  %v5627_v60 = vunpack.c.h.bf16 %v4633_v3 }
 0x297   : > { %v3250_v57 = vpack.c.bf16 %v1995_v14, %v1994_v21  ;;  %v1965_v48 = vmul.f32 %v5615_v55, %v1913_v27  ;;  %v1970_v0 = vmul.f32 %v5624_v56, %v1923_v8  ;;  %v1875_v15 = vmul.f32 %v5626_v45, %v4938_v37  ;;  %v5644_v56 = vld [vmem:[#allocation35_spill] sm:$0xff] }
 0x298   : > { %v2000_v20 = vadd.f32 %v1968_v23, %v1872_v5  ;;  %v1874_v14 = vmul.f32 %v5625_v9, %v4906_v58  ;;  %v5628_v8 = vunpack.c.l.bf16 %v4660_v52  ;;  %v5629_v55 = vunpack.c.l.bf16 %v4653_v26 }
 0x299   : > { %3385 = vst [vmem:[%s5057_s17 + $0x20] sm:$0xff] %v3250_v57   ;;  %v1997_v31 = vadd.f32 %v1965_v48, %v1869_v19  ;;  %v1927_v33 = vpop.permute.xlu0 %1926  ;;  %v5630_v39 = vunpack.c.h.bf16 %v4653_v26  ;;  %v5631_v3 = vunpack.c.h.bf16 %v4660_v52  ;;  %v5634_v26 = vunpack.c.h.bf16 %v4688_v17 }
 0x29a   : > { %v1917_v24 = vpop.permute.xlu1 %1916  ;;  %v2002_v30 = vadd.f32 %v1970_v0, %v1874_v14  ;;  %v1972_v57 = vmul.f32 %v5628_v8, %v1927_v33  ;;  %v1876_v58 = vmul.f32 %v5629_v55, %v4918_v36  ;;  %v5633_v36 = vunpack.c.l.bf16 %v4688_v17 }
 0x29b   : > { %v3255_v51 = vpack.c.bf16 %v1997_v31, %v1996_v35  ;;  %v1967_v32 = vmul.f32 %v5619_v41, %v1917_v24  ;;  %v1877_v37 = vmul.f32 %v5630_v39, %v4953_v6  ;;  %v5632_v31 = vunpack.c.l.bf16 %v4680_v62  ;;  %v5654_v39 = vld [vmem:[#allocation39_spill] sm:$0xff] }
 0x29c   : > { %v2004_v61 = vadd.f32 %v1972_v57, %v1876_v58  ;;  %v1878_v2 = vmul.f32 %v5633_v36, %v4930_v13  ;;  %v1879_v6 = vmul.f32 %v5634_v26, %v4971_v18  ;;  %v5635_v52 = vunpack.c.h.bf16 %v4680_v62  ;;  %v5659_v36 = vld [vmem:[#allocation12_spill] sm:$0xff] }
 0x29d   : > { %3386 = vst [vmem:[%s5057_s17 + $0x28] sm:$0xff] %v3255_v51   ;;  %v1999_v28 = vadd.f32 %v1967_v32, %v1871_v53  ;;  %v1931_v46 = vpop.permute.xlu0 %1930  ;;  %v5636_v41 = vunpack.c.l.bf16 %v4700_v22  ;;  %v5640_v62 = vunpack.c.h.bf16 %v4700_v22  ;;  %v5645_v0 = vunpack.c.l.bf16 %v5644_v56 }
 0x29e   : > { %v1921_v25 = vpop.permute.xlu1 %1920  ;;  %v1974_v33 = vmul.f32 %v5632_v31, %v1931_v46  ;;  %v5656_v31 = vld [vmem:[#allocation10_spill] sm:$0xff] }
 0x29f   : > { %v3260_v40 = vpack.c.bf16 %v1999_v28, %v1998_v16  ;;  %v1969_v54 = vmul.f32 %v5623_v1, %v1921_v25  ;;  %v5637_v28 = vld [vmem:[#allocation34_spill] sm:$0xff] }
 0x2a0   : > { %v2006_v53 = vadd.f32 %v1974_v33, %v1878_v2  ;;  %v5638_v13 = vunpack.c.l.bf16 %v5637_v28  ;;  %v5639_v17 = vunpack.c.h.bf16 %v5637_v28 }
 0x2a1   : > { %3387 = vst [vmem:[%s5057_s17 + $0x30] sm:$0xff] %v3260_v40   ;;  %v2001_v21 = vadd.f32 %v1969_v54, %v1873_v59  ;;  %v1935_v47 = vpop.permute.xlu0 %1934  ;;  %v5641_v40 = vld [vmem:[#allocation36_spill] sm:$0xff] }
 0x2a2   : > { %v1925_v50 = vpop.permute.xlu1 %1924  ;;  %v1976_v32 = vmul.f32 %v5636_v41, %v1935_v47  ;;  %v1880_v46 = vmul.f32 %v5638_v13, %v4942_v29  ;;  %v1881_v18 = vmul.f32 %v5639_v17, %v4989_v42  ;;  %v5642_v11 = vunpack.c.l.bf16 %v5641_v40 }
 0x2a3   : > { %v3265_v27 = vpack.c.bf16 %v2001_v21, %v2000_v20  ;;  %v1971_v43 = vmul.f32 %v5627_v60, %v1925_v50  ;;  %v5643_v20 = vld [vmem:[#allocation9_spill] sm:$0xff]  ;;  %v5646_v47 = vunpack.c.h.bf16 %v5644_v56  ;;  %v5647_v22 = vunpack.c.h.bf16 %v5641_v40 }
 0x2a4   : > { %v2008_v5 = vadd.f32 %v1976_v32, %v1880_v46  ;;  %v1882_v29 = vmul.f32 %v5645_v0, %v5643_v20  ;;  %v5667_v46 = vld [vmem:[#allocation13_spill] sm:$0xff]  ;;  %v2223_v0 = vld [vmem:[%s4458_s10 + $0x18] sm:$0xf] (%p3803_p10) }
 0x2a5   : > { %3388 = vst [vmem:[%s5057_s17 + $0x38] sm:$0xff] %v3265_v27   ;;  %v2003_v10 = vadd.f32 %v1971_v43, %v1875_v15  ;;  %v1939_v7 = vpop.permute.xlu0 %1938  ;;  %v1883_v42 = vmul.f32 %v5646_v47, %v5006_v63  ;;  %v5648_v27 = vld [vmem:[#allocation38_spill] sm:$0xff]  ;;  %v2219_v20 = vld [vmem:[%s4458_s10 + $0x10] sm:$0xf] (%p3803_p10)  ;;  %v2221_v56 = vld [vmem:[%s4458_s10 + $0x14] sm:$0xf] (%p3803_p10) }
 0x2a6   : > { %v1929_v19 = vpop.permute.xlu1 %1928  ;;  %v1978_v59 = vmul.f32 %v5642_v11, %v1939_v7  ;;  %v5649_v45 = vunpack.c.l.bf16 %v5648_v27  ;;  %v5653_v55 = vunpack.c.h.bf16 %v5648_v27  ;;  %v2211_v11 = vld [vmem:[%s4458_s10] sm:$0xf] (%p3803_p10)  ;;  %v2229_v47 = vld [vmem:[%s4458_s10 + $0x24] sm:$0xf] (%p3803_p10)  ;;  %2220 = vst [vmem:[%s5227_s26 + $0x20] sm:$0xf] (%p3803_p10), %v2219_v20 }
 0x2a7   : > { %v3270_v48 = vpack.c.bf16 %v2003_v10, %v2002_v30  ;;  %v1973_v35 = vmul.f32 %v5631_v3, %v1929_v19  ;;  %v5650_v30 = vld [vmem:[#allocation37_spill] sm:$0xff]  ;;  %2212 = vst [vmem:[%s5227_s26] sm:$0xf] (%p3803_p10), %v2211_v11  ;;  %2222 = vst [vmem:[%s5227_s26 + $0x28] sm:$0xf] (%p3803_p10), %v2221_v56  ;;  %v2241_v27 = vld [vmem:[%s4458_s10 + $0x3c] sm:$0xf] (%p3803_p10) }
 0x2a8   : > { %v2010_v14 = vadd.f32 %v1978_v59, %v1882_v29  ;;  %v5651_v8 = vunpack.c.l.bf16 %v5650_v30  ;;  %v5652_v63 = vunpack.c.h.bf16 %v5650_v30  ;;  %v2213_v59 = vld [vmem:[%s4458_s10 + $0x4] sm:$0xf] (%p3803_p10)  ;;  %v2225_v29 = vld [vmem:[%s4458_s10 + $0x1c] sm:$0xf] (%p3803_p10)  ;;  %2224 = vst [vmem:[%s5227_s26 + $0x30] sm:$0xf] (%p3803_p10), %v2223_v0 }
 0x2a9   : > { %3389 = vst [vmem:[%s5057_s17 + $0x40] sm:$0xff] %v3270_v48   ;;  %v2005_v24 = vadd.f32 %v1973_v35, %v1877_v37  ;;  %v1943_v34 = vpop.permute.xlu0 %1942  ;;  %v5655_v37 = vunpack.c.l.bf16 %v5654_v39  ;;  %2214 = vst [vmem:[%s5227_s26 + $0x8] sm:$0xf] (%p3803_p10), %v2213_v59  ;;  %v2251_v30 = vld [vmem:[%s4458_s10 + $0x50] sm:$0xf] (%p3803_p10) }
 0x2aa   : > { %v1933_v4 = vpop.permute.xlu1 %1932  ;;  %v1980_v15 = vmul.f32 %v5649_v45, %v1943_v34  ;;  %v1884_v57 = vmul.f32 %v5651_v8, %v4975_v38  ;;  %v1885_v19 = vmul.f32 %v5652_v63, %v5018_v12  ;;  %v5657_v38 = vld [vmem:[#allocation40_spill] sm:$0xff]  ;;  %2226 = vst [vmem:[%s5227_s26 + $0x38] sm:$0xf] (%p3803_p10), %v2225_v29  ;;  %2230 = vst [vmem:[%s5227_s26 + $0x48] sm:$0xf] (%p3803_p10), %v2229_v47 }
 0x2ab   : > { %v3275_v51 = vpack.c.bf16 %v2005_v24, %v2004_v61  ;;  %v1975_v49 = vmul.f32 %v5635_v52, %v1933_v4  ;;  %v5658_v33 = vunpack.c.l.bf16 %v5657_v38  ;;  %v5660_v12 = vunpack.c.h.bf16 %v5657_v38  ;;  %v5662_v52 = vld [vmem:[#allocation7_spill] sm:$0xff]  ;;  %v5665_v34 = vld [vmem:[#allocation8_spill] sm:$0xff]  ;;  %2242 = vst [vmem:[%s5227_s26 + $0x78] sm:$0xf] (%p3803_p10), %v2241_v27  ;;  %v2253_v8 = vld [vmem:[%s4458_s10 + $0x54] sm:$0xf] (%p3803_p10) }
 0x2ac   : > { %v2012_v48 = vadd.f32 %v1980_v15, %v1884_v57  ;;  %v2243_v45 = vld [vmem:[%s4458_s10 + $0x40] sm:$0xf] (%p3803_p10)  ;;  %v2245_v15 = vld [vmem:[%s4458_s10 + $0x44] sm:$0xf] (%p3803_p10)  ;;  %2252 = vst [vmem:[%s5227_s26 + $0xa0] sm:$0xf] (%p3803_p10), %v2251_v30 }
 0x2ad   : > { %3390 = vst [vmem:[%s5057_s17 + $0x48] sm:$0xff] %v3275_v51   ;;  %v2007_v16 = vadd.f32 %v1975_v49, %v1879_v6  ;;  %v1947_v9 = vpop.permute.xlu0 %1946  ;;  %v1886_v24 = vmul.f32 %v5658_v33, %v5656_v31  ;;  %v1887_v2 = vmul.f32 %v5660_v12, %v5659_v36  ;;  %v5661_v51 = vunpack.c.h.bf16 %v5654_v39  ;;  %2244 = vst [vmem:[%s5227_s26 + $0x80] sm:$0xf] (%p3803_p10), %v2243_v45  ;;  %v2255_v57 = vld [vmem:[%s4458_s10 + $0x58] sm:$0xf] (%p3803_p10) }
 0x2ae   : > { %v1937_v23 = vpop.permute.xlu1 %1936  ;;  %v1982_v3 = vmul.f32 %v5655_v37, %v1947_v9  ;;  %v5663_v49 = vunpack.c.l.bf16 %v5662_v52  ;;  %v2237_v9 = vld [vmem:[%s4458_s10 + $0x34] sm:$0xf] (%p3803_p10)  ;;  %2246 = vst [vmem:[%s5227_s26 + $0x88] sm:$0xf] (%p3803_p10), %v2245_v15  ;;  %2254 = vst [vmem:[%s5227_s26 + $0xa8] sm:$0xf] (%p3803_p10), %v2253_v8 }
 0x2af   : > { %v3280_v25 = vpack.c.bf16 %v2007_v16, %v2006_v53  ;;  %v1977_v44 = vmul.f32 %v5640_v62, %v1937_v23  ;;  %v5664_v16 = vld [vmem:[#allocation11_spill] sm:$0xff]  ;;  %v5666_v23 = vunpack.c.l.bf16 %v5665_v34  ;;  %2238 = vst [vmem:[%s5227_s26 + $0x68] sm:$0xf] (%p3803_p10), %v2237_v9  ;;  %2256 = vst [vmem:[%s5227_s26 + $0xb0] sm:$0xf] (%p3803_p10), %v2255_v57 }
 0x2b0   : > { %v2014_v6 = vadd.f32 %v1982_v3, %v1886_v24  ;;  %v2259_v63 = vld [vmem:[%s4458_s10 + $0x60] sm:$0xf] (%p3803_p10)  ;;  %v2269_v39 = vld [vmem:[%s4458_s10 + $0x74] sm:$0xf] (%p3803_p10)  ;;  %v2271_v37 = vld [vmem:[%s4458_s10 + $0x78] sm:$0xf] (%p3803_p10) }
 0x2b1   : > { %3391 = vst [vmem:[%s5057_s17 + $0x50] sm:$0xff] %v3280_v25   ;;  %v2009_v1 = vadd.f32 %v1977_v44, %v1881_v18  ;;  %v1951_v7 = vpop.permute.xlu0 %1950  ;;  %v1888_v28 = vmul.f32 %v5666_v23, %v5664_v16  ;;  %v5668_v25 = vunpack.c.h.bf16 %v5665_v34  ;;  %v5669_v18 = vunpack.c.h.bf16 %v5662_v52  ;;  %2260 = vst [vmem:[%s5227_s26 + $0xc0] sm:$0xf] (%p3803_p10), %v2259_v63  ;;  %v2273_v3 = vld [vmem:[%s4458_s10 + $0x7c] sm:$0xf] (%p3803_p10) }
 0x2b2   : > { %v1941_v54 = vpop.permute.xlu1 %1940  ;;  %v1984_v53 = vmul.f32 %v5663_v49, %v1951_v7  ;;  %2270 = vst [vmem:[%s5227_s26 + $0xe8] sm:$0xf] (%p3803_p10), %v2269_v39  ;;  %2272 = vst [vmem:[%s5227_s26 + $0xf0] sm:$0xf] (%p3803_p10), %v2271_v37 }
 0x2b3   : > { %v3285_v21 = vpack.c.bf16 %v2009_v1, %v2008_v5  ;;  %v1979_v50 = vmul.f32 %v5647_v22, %v1941_v54  ;;  %v1889_v17 = vmul.f32 %v5668_v25, %v5667_v46  ;;  %v2215_v1 = vld [vmem:[%s4458_s10 + $0x8] sm:$0xf] (%p3803_p10)  ;;  %v2217_v54 = vld [vmem:[%s4458_s10 + $0xc] sm:$0xf] (%p3803_p10)  ;;  %2274 = vst [vmem:[%s5227_s26 + $0xf8] sm:$0xf] (%p3803_p10), %v2273_v3 }
 0x2b4   : > { %v2016_v44 = vadd.f32 %v1984_v53, %v1888_v28  ;;  %2216 = vst [vmem:[%s5227_s26 + $0x10] sm:$0xf] (%p3803_p10), %v2215_v1  ;;  %2218 = vst [vmem:[%s5227_s26 + $0x18] sm:$0xf] (%p3803_p10), %v2217_v54  ;;  %v2233_v22 = vld [vmem:[%s4458_s10 + $0x2c] sm:$0xf] (%p3803_p10) }
 0x2b5   : > { %3392 = vst [vmem:[%s5057_s17 + $0x58] sm:$0xff] %v3285_v21   ;;  %v2011_v60 = vadd.f32 %v1979_v50, %v1883_v42  ;;  %v2227_v21 = vld [vmem:[%s4458_s10 + $0x20] sm:$0xf] (%p3803_p10)  ;;  %v2231_v42 = vld [vmem:[%s4458_s10 + $0x28] sm:$0xf] (%p3803_p10) }
 0x2b6   : > { %v1945_v43 = vpop.permute.xlu1 %1944  ;;  %2228 = vst [vmem:[%s5227_s26 + $0x40] sm:$0xf] (%p3803_p10), %v2227_v21  ;;  %v2235_v50 = vld [vmem:[%s4458_s10 + $0x30] sm:$0xf] (%p3803_p10)  ;;  %2232 = vst [vmem:[%s5227_s26 + $0x50] sm:$0xf] (%p3803_p10), %v2231_v42 }
 0x2b7   : > { %v3290_v10 = vpack.c.bf16 %v2011_v60, %v2010_v14  ;;  %v1981_v58 = vmul.f32 %v5653_v55, %v1945_v43  ;;  %2234 = vst [vmem:[%s5227_s26 + $0x58] sm:$0xf] (%p3803_p10), %v2233_v22  ;;  %2236 = vst [vmem:[%s5227_s26 + $0x60] sm:$0xf] (%p3803_p10), %v2235_v50  ;;  %v2239_v14 = vld [vmem:[%s4458_s10 + $0x38] sm:$0xf] (%p3803_p10) }
 0x2b8   : > { %2240 = vst [vmem:[%s5227_s26 + $0x70] sm:$0xf] (%p3803_p10), %v2239_v14  ;;  %v2247_v60 = vld [vmem:[%s4458_s10 + $0x48] sm:$0xf] (%p3803_p10)  ;;  %v2249_v43 = vld [vmem:[%s4458_s10 + $0x4c] sm:$0xf] (%p3803_p10) }
 0x2b9   : > { %3393 = vst [vmem:[%s5057_s17 + $0x60] sm:$0xff] %v3290_v10   ;;  %v2013_v35 = vadd.f32 %v1981_v58, %v1885_v19  ;;  %2248 = vst [vmem:[%s5227_s26 + $0x90] sm:$0xf] (%p3803_p10), %v2247_v60  ;;  %v2257_v10 = vld [vmem:[%s4458_s10 + $0x5c] sm:$0xf] (%p3803_p10) }
 0x2ba   : > { %v1949_v61 = vpop.permute.xlu1 %1948  ;;  %2250 = vst [vmem:[%s5227_s26 + $0x98] sm:$0xf] (%p3803_p10), %v2249_v43  ;;  %2258 = vst [vmem:[%s5227_s26 + $0xb8] sm:$0xf] (%p3803_p10), %v2257_v10  ;;  %v2261_v19 = vld [vmem:[%s4458_s10 + $0x64] sm:$0xf] (%p3803_p10) }
 0x2bb   : > { %v3295_v4 = vpack.c.bf16 %v2013_v35, %v2012_v48  ;;  %v1983_v26 = vmul.f32 %v5661_v51, %v1949_v61  ;;  %v2263_v55 = vld [vmem:[%s4458_s10 + $0x68] sm:$0xf] (%p3803_p10)  ;;  %v2265_v58 = vld [vmem:[%s4458_s10 + $0x6c] sm:$0xf] (%p3803_p10)  ;;  %2262 = vst [vmem:[%s5227_s26 + $0xc8] sm:$0xf] (%p3803_p10), %v2261_v19 }
 0x2bc   : > { %2264 = vst [vmem:[%s5227_s26 + $0xd0] sm:$0xf] (%p3803_p10), %v2263_v55  ;;  %2266 = vst [vmem:[%s5227_s26 + $0xd8] sm:$0xf] (%p3803_p10), %v2265_v58  ;;  %v2267_v48 = vld [vmem:[%s4458_s10 + $0x70] sm:$0xf] (%p3803_p10) }
 0x2bd   : > { %3394 = vst [vmem:[%s5057_s17 + $0x68] sm:$0xff] %v3295_v4   ;;  %v2015_v41 = vadd.f32 %v1983_v26, %v1887_v2  ;;  %2268 = vst [vmem:[%s5227_s26 + $0xe0] sm:$0xf] (%p3803_p10), %v2267_v48 }
 0x2be   : > { %v1953_v32 = vpop.permute.xlu1 %1952 }
 0x2bf   : > { %v3300_v13 = vpack.c.bf16 %v2015_v41, %v2014_v6  ;;  %v1985_v62 = vmul.f32 %v5669_v18, %v1953_v32  ;;  %2188 = sbr.rel (!%p3803_p10) target bundleno = 710 (0x2c6), region = 130 }
 0x2c1   : > { %3395 = vst [vmem:[%s5057_s17 + $0x70] sm:$0xff] %v3300_v13   ;;  %v2017_v5 = vadd.f32 %v1985_v62, %v1889_v17 }
 0x2c3   : > { %v3305_v40 = vpack.c.bf16 %v2017_v5, %v2016_v44 }
 0x2c5   : > { %3396 = vst [vmem:[%s5057_s17 + $0x78] sm:$0xff] %v3305_v40  }
 0x2c6 PF: > { %2361 = sbr.rel (!%p3803_p10) target bundleno = 735 (0x2df), region = 171  ;;  %s2821_s14 = sshll.u32 (%p3803_p10), %s3658_s29, 6  ;;  %v2384_v35 = vld [vmem:[%s5057_s17] sm:$0xf] (%p3803_p10)  ;;  %v2386_v7 = vld [vmem:[%s5057_s17 + $0x4] sm:$0xf] (%p3803_p10) }
 0x2c7   : > { %s2366_s10 = sadd.s32 (%p3803_p10), %s3654_s28, %s2821_s14  ;;  %v2388_v61 = vld [vmem:[%s5057_s17 + $0x8] sm:$0xf] (%p3803_p10)  ;;  %v2390_v31 = vld [vmem:[%s5057_s17 + $0xc] sm:$0xf] (%p3803_p10)  ;;  %v2392_v38 = vld [vmem:[%s5057_s17 + $0x10] sm:$0xf] (%p3803_p10) }
 0x2c8   : > { %s2822_s15 = sshll.u32 (%p3803_p10), %s2366_s10, 2  ;;  %v2394_v33 = vld [vmem:[%s5057_s17 + $0x14] sm:$0xf] (%p3803_p10)  ;;  %v2396_v24 = vld [vmem:[%s5057_s17 + $0x18] sm:$0xf] (%p3803_p10)  ;;  %s5670_s18 = sld [smem:[#allocation41_spill]] (%p3803_p10) }
 0x2c9   : > { %v2398_v4 = vld [vmem:[%s5057_s17 + $0x1c] sm:$0xf] (%p3803_p10)  ;;  %v2400_v36 = vld [vmem:[%s5057_s17 + $0x20] sm:$0xf] (%p3803_p10)  ;;  %v2402_v12 = vld [vmem:[%s5057_s17 + $0x24] sm:$0xf] (%p3803_p10) }
 0x2ca   : > { %v2404_v2 = vld [vmem:[%s5057_s17 + $0x28] sm:$0xf] (%p3803_p10)  ;;  %v2406_v51 = vld [vmem:[%s5057_s17 + $0x2c] sm:$0xf] (%p3803_p10)  ;;  %v2408_v26 = vld [vmem:[%s5057_s17 + $0x30] sm:$0xf] (%p3803_p10) }
 0x2cb   : > { %v2410_v6 = vld [vmem:[%s5057_s17 + $0x34] sm:$0xf] (%p3803_p10)  ;;  %v2412_v52 = vld [vmem:[%s5057_s17 + $0x38] sm:$0xf] (%p3803_p10)  ;;  %v2414_v49 = vld [vmem:[%s5057_s17 + $0x3c] sm:$0xf] (%p3803_p10) }
 0x2cc   : > { %v2416_v53 = vld [vmem:[%s5057_s17 + $0x40] sm:$0xf] (%p3803_p10)  ;;  %v2418_v41 = vld [vmem:[%s5057_s17 + $0x44] sm:$0xf] (%p3803_p10)  ;;  %v2420_v32 = vld [vmem:[%s5057_s17 + $0x48] sm:$0xf] (%p3803_p10) }
 0x2cd   : > { %v2422_v16 = vld [vmem:[%s5057_s17 + $0x4c] sm:$0xf]  ;;  %v2424_v34 = vld [vmem:[%s5057_s17 + $0x50] sm:$0xf]  ;;  %v2426_v23 = vld [vmem:[%s5057_s17 + $0x54] sm:$0xf] }
 0x2ce   : > { %s5300_s19 = scalar_lea.vmem %s5670_s18, %s2822_s15  ;;  %v2428_v28 = vld [vmem:[%s5057_s17 + $0x58] sm:$0xf]  ;;  %v2430_v13 = vld [vmem:[%s5057_s17 + $0x5c] sm:$0xf]  ;;  %v2432_v46 = vld [vmem:[%s5057_s17 + $0x60] sm:$0xf] }
 0x2cf   : > { %2385 = vst [vmem:[%s5300_s19] sm:$0xf] %v2384_v35  ;;  %2387 = vst [vmem:[%s5300_s19 + $0x8] sm:$0xf] %v2386_v7  ;;  %v2434_v25 = vld [vmem:[%s5057_s17 + $0x64] sm:$0xf] }
 0x2d0   : > { %2389 = vst [vmem:[%s5300_s19 + $0x10] sm:$0xf] %v2388_v61  ;;  %2391 = vst [vmem:[%s5300_s19 + $0x18] sm:$0xf] %v2390_v31  ;;  %v2436_v17 = vld [vmem:[%s5057_s17 + $0x68] sm:$0xf] }
 0x2d1   : > { %2393 = vst [vmem:[%s5300_s19 + $0x20] sm:$0xf] %v2392_v38  ;;  %2395 = vst [vmem:[%s5300_s19 + $0x28] sm:$0xf] %v2394_v33  ;;  %v2438_v18 = vld [vmem:[%s5057_s17 + $0x6c] sm:$0xf] }
 0x2d2   : > { %2397 = vst [vmem:[%s5300_s19 + $0x30] sm:$0xf] %v2396_v24  ;;  %2399 = vst [vmem:[%s5300_s19 + $0x38] sm:$0xf] %v2398_v4  ;;  %v2440_v62 = vld [vmem:[%s5057_s17 + $0x70] sm:$0xf] }
 0x2d3   : > { %2401 = vst [vmem:[%s5300_s19 + $0x40] sm:$0xf] %v2400_v36  ;;  %2403 = vst [vmem:[%s5300_s19 + $0x48] sm:$0xf] %v2402_v12  ;;  %v2442_v44 = vld [vmem:[%s5057_s17 + $0x74] sm:$0xf] }
 0x2d4   : > { %2405 = vst [vmem:[%s5300_s19 + $0x50] sm:$0xf] %v2404_v2  ;;  %2407 = vst [vmem:[%s5300_s19 + $0x58] sm:$0xf] %v2406_v51  ;;  %v2444_v5 = vld [vmem:[%s5057_s17 + $0x78] sm:$0xf] }
 0x2d5   : > { %2409 = vst [vmem:[%s5300_s19 + $0x60] sm:$0xf] %v2408_v26  ;;  %2411 = vst [vmem:[%s5300_s19 + $0x68] sm:$0xf] %v2410_v6  ;;  %v2446_v40 = vld [vmem:[%s5057_s17 + $0x7c] sm:$0xf] }
 0x2d6   : > { %2413 = vst [vmem:[%s5300_s19 + $0x70] sm:$0xf] %v2412_v52  ;;  %2415 = vst [vmem:[%s5300_s19 + $0x78] sm:$0xf] %v2414_v49 }
 0x2d7   : > { %2417 = vst [vmem:[%s5300_s19 + $0x80] sm:$0xf] %v2416_v53  ;;  %2419 = vst [vmem:[%s5300_s19 + $0x88] sm:$0xf] %v2418_v41 }
 0x2d8   : > { %2421 = vst [vmem:[%s5300_s19 + $0x90] sm:$0xf] %v2420_v32  ;;  %2423 = vst [vmem:[%s5300_s19 + $0x98] sm:$0xf] %v2422_v16 }
 0x2d9   : > { %2425 = vst [vmem:[%s5300_s19 + $0xa0] sm:$0xf] %v2424_v34  ;;  %2427 = vst [vmem:[%s5300_s19 + $0xa8] sm:$0xf] %v2426_v23 }
 0x2da   : > { %2429 = vst [vmem:[%s5300_s19 + $0xb0] sm:$0xf] %v2428_v28  ;;  %2431 = vst [vmem:[%s5300_s19 + $0xb8] sm:$0xf] %v2430_v13 }
 0x2db   : > { %2433 = vst [vmem:[%s5300_s19 + $0xc0] sm:$0xf] %v2432_v46  ;;  %2435 = vst [vmem:[%s5300_s19 + $0xc8] sm:$0xf] %v2434_v25 }
 0x2dc   : > { %2437 = vst [vmem:[%s5300_s19 + $0xd0] sm:$0xf] %v2436_v17  ;;  %2439 = vst [vmem:[%s5300_s19 + $0xd8] sm:$0xf] %v2438_v18 }
 0x2dd   : > { %2441 = vst [vmem:[%s5300_s19 + $0xe0] sm:$0xf] %v2440_v62  ;;  %2443 = vst [vmem:[%s5300_s19 + $0xe8] sm:$0xf] %v2442_v44 }
 0x2de   : > { %2445 = vst [vmem:[%s5300_s19 + $0xf0] sm:$0xf] %v2444_v5  ;;  %2447 = vst [vmem:[%s5300_s19 + $0xf8] sm:$0xf] %v2446_v40 }
 0x2df PF: > { %s18_s9 = sadd.s32 1, %s3670_s9   ;;  %s5671_s16 = sld [smem:[#allocation6_spill]] }
 0x2e0   : > { %p15_p2 = scmp.ge.s32.totalorder %s18_s9, 6   ;;  %s5672_s24 = smov %s3642_s25 }
 0x2e1   : > { %s5673_s25 = smov %s3798_s11  ;;  %s5674_s26 = smov %s3650_s27 }
 0x2e2   : > { %s5675_s27 = smov %s3795_s7  ;;  %s5676_s28 = smov %s3662_s30 }
 0x2e3   : > { %s5677_s29 = smov %s3666_s8  ;;  %s5679_s8 = smov %s5685_s12 }
 0x2e4   :  { %17 = sbr.rel (!%p15_p2) target bundleno = 7 (0x7), region = 269 }
 0x2e5   : > { %s5678_s30 = smov %s5671_s16 }

// kernel: self_attention_forward.7
= control target key start
LH: loop header
LB: loop body
LE: loop exit
PB: predicated region body
PF: predicated region fallthrough
CT: control target
= control target key end

     0   :  { %8 = vsyncpa [#allocation3], 0  ;;  %s1759_s0 = inlined_call_operand.vmem [shape: bf16[512,256], index: 0, kind: input, shape index: {}]   ;;  %s1760_s1 = inlined_call_operand.vmem [shape: bf16[256,256], index: 1, kind: input, shape index: {}]   ;;  %s1761_s2 = inlined_call_operand.vmem [shape: f32[1,256], index: 2, kind: input, shape index: {}]   ;;  %s1762_s3 = inlined_call_operand.hbm [shape: f32[512,256], index: 3, kind: output, shape index: {}]  }
   0x1   :  { %10 = vsyncpa [#allocation3 + $0x1], 0  ;;  %s1373_s12 = smov 0   ;;  %s1375_s13 = smov 0  }
   0x2   :  { %s1377_s14 = smov 0   ;;  %s1379_s15 = smov 0  }
   0x3   :  { %s1381_s16 = smov 0   ;;  %s1383_s17 = smov 0  }
   0x4 LB: > { %s1001_s18 = sadd.s32 4294967295, %s1348_s17   ;;  %s1002_s19 = sadd.s32 4294967294, %s1348_s17   ;;  %s1348_s17 = sphi %s1383_s17, %s16_s17   ;;  %s1344_s16 = sphi %s1381_s16, %s1769_s16   ;;  %s1340_s15 = sphi %s1379_s15, %s1768_s15   ;;  %s1336_s14 = sphi %s1377_s14, %s1767_s14   ;;  %s1332_s13 = sphi %s1375_s13, %s1766_s13   ;;  %s1328_s12 = sphi %s1373_s12, %s1765_s12  }
   0x5   : > { %s28_s20 = sadd.s32 1, %s1344_s16  ;;  %s115_s21 = sadd.s32 1, %s1336_s14 }
   0x6   : > { %p30_p0 = scmp.ge.s32.totalorder %s28_s20, 2  ;;  %p125_p1 = scmp.ne.s32.totalorder %s1336_s14, %s1332_s13 }
   0x7   : > { %p126_p2 = scmp.eq.s32.totalorder %s1001_s18, 1  ;;  %p131_p3 = scmp.ne.s32.totalorder %s1332_s13, %s1328_s12 }
   0x8   : > { %s1771_s20 = smov (%p30_p0, %s28_s20), 0  ;;  %p132_p5 = scmp.eq.s32.totalorder %s1002_s19, 1 }
   0x9   : > { %p1413_p4 = por %p126_p2, %p125_p1  ;;  %s110_s23 = ssub.s32 %s1344_s16, %s1771_s20 }
   0xa   : > { %p1007_p6 = scmp.ge.s32.totalorder %s1348_s17, 1  ;;  %p113_p7 = scmp.eq.s32.totalorder %s110_s23, 0 }
   0xb   : > { %p1420_p8 = por %p132_p5, %p131_p3  ;;  %p177_p9 = scmp.lt.s32.totalorder %s1348_s17, 3 }
   0xc   : > { %s1426_s25 = scalar_select %p113_p7, %s1336_s14, %s115_s21  }
   0xd   : > { %p178_p10 = pnand %p1007_p6, %p177_p9 }
   0xe   : > { %v1174_v0 = vld [vmem:[%s1760_s1 + $0x4] ss:$8 sps:$4 sm:$0xff] (!%p178_p10)   ;;  %v1176_v1 = vld [vmem:[%s1760_s1] ss:$8 sps:$4 sm:$0xff] (!%p178_p10)   ;;  %v1177_v2 = vld [vmem:[%s1760_s1 + $0x14] ss:$8 sps:$4 sm:$0xff] (!%p178_p10)  }
   0xf   : > { %181 = sbr.rel (%p178_p10) target bundleno = 367 (0x16f), region = 32  ;;  %627 = vmatprep.subr.bf16.mxu0 (!%p178_p10), %v1174_v0  ;;  %1085 = vmatprep.subr.bf16.mxu1 (!%p178_p10), %v1174_v0  ;;  %v1179_v3 = vld [vmem:[%s1760_s1 + $0x10] ss:$8 sps:$4 sm:$0xff] (!%p178_p10)   ;;  %v1180_v4 = vld [vmem:[%s1760_s1 + $0x24] ss:$8 sps:$4 sm:$0xff] (!%p178_p10)   ;;  %s1009_s9 = sshll.u32 (!%p178_p10), %s1340_s15, 5  ;;  %v297_v0 = vlaneseq (!%p178_p10) }
  0x10   : > { %628 = vmatpush1.bf16.msra.mxu0 (!%p178_p10), %v1176_v1  ;;  %1101 = vmatpush1.bf16.msra.mxu1 (!%p178_p10), %v1176_v1  ;;  %v1182_v5 = vld [vmem:[%s1760_s1 + $0x20] ss:$8 sps:$4 sm:$0xff] (!%p178_p10)   ;;  %v1183_v6 = vld [vmem:[%s1760_s1 + $0x34] ss:$8 sps:$4 sm:$0xff] (!%p178_p10)   ;;  %p212_p11 = scmp.lt.s32.totalorder (!%p178_p10), %s1009_s9, 63  ;;  %s208_s29 = sand.u32 (!%p178_p10), 1, %s1332_s13  }
  0x11   : > { %629 = vmatprep.subr.bf16.mxu0 (!%p178_p10), %v1177_v2  ;;  %1086 = vmatprep.subr.bf16.mxu1 (!%p178_p10), %v1177_v2  ;;  %v1185_v7 = vld [vmem:[%s1760_s1 + $0x30] ss:$8 sps:$4 sm:$0xff] (!%p178_p10)   ;;  %v1186_v8 = vld [vmem:[%s1760_s1 + $0x44] ss:$8 sps:$4 sm:$0xff] (!%p178_p10)   ;;  %v1188_v9 = vld [vmem:[%s1760_s1 + $0x40] ss:$8 sps:$4 sm:$0xff] (!%p178_p10)  }
  0x12   : > { %v1189_v10 = vld [vmem:[%s1760_s1 + $0x54] ss:$8 sps:$4 sm:$0xff] (!%p178_p10)   ;;  %v1191_v11 = vld [vmem:[%s1760_s1 + $0x50] ss:$8 sps:$4 sm:$0xff] (!%p178_p10)   ;;  %v1192_v12 = vld [vmem:[%s1760_s1 + $0x64] ss:$8 sps:$4 sm:$0xff] (!%p178_p10)  }
  0x13   : > { %v1194_v14 = vld [vmem:[%s1760_s1 + $0x60] ss:$8 sps:$4 sm:$0xff] (!%p178_p10)   ;;  %v1195_v16 = vld [vmem:[%s1760_s1 + $0x74] ss:$8 sps:$4 sm:$0xff] (!%p178_p10)   ;;  %v1197_v17 = vld [vmem:[%s1760_s1 + $0x70] ss:$8 sps:$4 sm:$0xff] (!%p178_p10)  }
  0x14   : > { %630 = vmatpush1.bf16.msra.mxu0 (!%p178_p10), %v1179_v3  ;;  %1102 = vmatpush1.bf16.msra.mxu1 (!%p178_p10), %v1179_v3  ;;  %v1198_v18 = vld [vmem:[%s1760_s1 + $0x84] ss:$8 sps:$4 sm:$0xff] (!%p178_p10)   ;;  %v1200_v19 = vld [vmem:[%s1760_s1 + $0x80] ss:$8 sps:$4 sm:$0xff] (!%p178_p10)   ;;  %v1201_v20 = vld [vmem:[%s1760_s1 + $0x94] ss:$8 sps:$4 sm:$0xff] (!%p178_p10)  }
  0x15   : > { %631 = vmatprep.subr.bf16.mxu0 (!%p178_p10), %v1180_v4  ;;  %1087 = vmatprep.subr.bf16.mxu1 (!%p178_p10), %v1180_v4  ;;  %v1203_v21 = vld [vmem:[%s1760_s1 + $0x90] ss:$8 sps:$4 sm:$0xff] (!%p178_p10)   ;;  %v1204_v22 = vld [vmem:[%s1760_s1 + $0xa4] ss:$8 sps:$4 sm:$0xff] (!%p178_p10)   ;;  %v1206_v23 = vld [vmem:[%s1760_s1 + $0xa0] ss:$8 sps:$4 sm:$0xff] (!%p178_p10)  }
  0x16   : > { %s1773_s9 = smov (!%p212_p11, %s1009_s9), 63  ;;  %v1207_v24 = vld [vmem:[%s1760_s1 + $0xb4] ss:$8 sps:$4 sm:$0xff]   ;;  %v1209_v25 = vld [vmem:[%s1760_s1 + $0xb0] ss:$8 sps:$4 sm:$0xff]   ;;  %v298_v1 = vshrl.u32 %v297_v0, 7 }
  0x17   : > { %s1082_s5 = sshll.u32 %s1773_s9, 3  ;;  %v1210_v26 = vld [vmem:[%s1760_s1 + $0xc4] ss:$8 sps:$4 sm:$0xff]   ;;  %v1212_v27 = vld [vmem:[%s1760_s1 + $0xc0] ss:$8 sps:$4 sm:$0xff]   ;;  %s1084_s6 = sshll.u32 %s1340_s15, 13 }
  0x18   : > { %632 = vmatpush1.bf16.msra.mxu0 %v1182_v5  ;;  %1103 = vmatpush1.bf16.msra.mxu1 %v1182_v5  ;;  %s1468_s11 = scalar_lea.vmem %s1759_s0, %s1082_s5  ;;  %v1213_v28 = vld [vmem:[%s1760_s1 + $0xd4] ss:$8 sps:$4 sm:$0xff]   ;;  %v1215_v29 = vld [vmem:[%s1760_s1 + $0xd0] ss:$8 sps:$4 sm:$0xff]   ;;  %v1216_v30 = vld [vmem:[%s1760_s1 + $0xe4] ss:$8 sps:$4 sm:$0xff]   ;;  %s1699_s10 = scalar_lea.hbm %s1762_s3, %s1084_s6 }
  0x19   : > { %633 = vmatprep.subr.bf16.mxu0 %v1183_v6  ;;  %1088 = vmatprep.subr.bf16.mxu1 %v1183_v6  ;;  %v1224_v13 = vld [vmem:[%s1468_s11 + $0x4] ss:$8 sps:$4 sm:$0xff]   ;;  %v1218_v31 = vld [vmem:[%s1760_s1 + $0xe0] ss:$8 sps:$4 sm:$0xff]   ;;  %v1219_v32 = vld [vmem:[%s1760_s1 + $0xf4] ss:$8 sps:$4 sm:$0xff]  }
  0x1a   : > { %v1227_v15 = vld [vmem:[%s1468_s11 + $0x84] ss:$8 sps:$4 sm:$0xff]   ;;  %659 = vmatprep.mubr.bf16.mxu0 %v1224_v13  ;;  %v1221_v33 = vld [vmem:[%s1760_s1 + $0xf0] ss:$8 sps:$4 sm:$0xff]   ;;  %v1222_v34 = vld [vmem:[%s1468_s11] ss:$8 sps:$4 sm:$0xff]  }
  0x1b   : > { %739 = vmatprep.mubr.bf16.mxu1 %v1227_v15  ;;  %v1225_v35 = vld [vmem:[%s1468_s11 + $0x80] ss:$8 sps:$4 sm:$0xff]   ;;  %v1228_v36 = vld [vmem:[%s1468_s11 + $0x14] ss:$8 sps:$4 sm:$0xff]   ;;  %v1232_v38 = vld [vmem:[%s1468_s11 + $0x10] ss:$8 sps:$4 sm:$0xff]  }
  0x1c   : > { %634 = vmatpush1.bf16.msra.mxu0 %v1185_v7  ;;  %1104 = vmatpush1.bf16.msra.mxu1 %v1185_v7  ;;  %v1230_v37 = vld [vmem:[%s1468_s11 + $0x94] ss:$8 sps:$4 sm:$0xff]   ;;  %v1233_v39 = vld [vmem:[%s1468_s11 + $0x90] ss:$8 sps:$4 sm:$0xff]   ;;  %v1234_v40 = vld [vmem:[%s1468_s11 + $0x24] ss:$8 sps:$4 sm:$0xff]  }
  0x1d   : > { %635 = vmatprep.subr.bf16.mxu0 %v1186_v8  ;;  %1089 = vmatprep.subr.bf16.mxu1 %v1186_v8  ;;  %v1236_v41 = vld [vmem:[%s1468_s11 + $0xa4] ss:$8 sps:$4 sm:$0xff]   ;;  %v1238_v42 = vld [vmem:[%s1468_s11 + $0x20] ss:$8 sps:$4 sm:$0xff]   ;;  %v1240_v44 = vld [vmem:[%s1468_s11 + $0x34] ss:$8 sps:$4 sm:$0xff]  }
  0x1e   : > { %v1239_v43 = vld [vmem:[%s1468_s11 + $0xa0] ss:$8 sps:$4 sm:$0xff]   ;;  %v1242_v45 = vld [vmem:[%s1468_s11 + $0xb4] ss:$8 sps:$4 sm:$0xff]   ;;  %v1244_v46 = vld [vmem:[%s1468_s11 + $0x30] ss:$8 sps:$4 sm:$0xff]  }
  0x1f   : > { %v1245_v47 = vld [vmem:[%s1468_s11 + $0xb0] ss:$8 sps:$4 sm:$0xff]   ;;  %v1246_v48 = vld [vmem:[%s1468_s11 + $0x44] ss:$8 sps:$4 sm:$0xff]   ;;  %v1250_v50 = vld [vmem:[%s1468_s11 + $0x40] ss:$8 sps:$4 sm:$0xff]  }
  0x20   : > { %636 = vmatpush1.bf16.msra.mxu0 %v1188_v9  ;;  %1105 = vmatpush1.bf16.msra.mxu1 %v1188_v9  ;;  %v1248_v49 = vld [vmem:[%s1468_s11 + $0xc4] ss:$8 sps:$4 sm:$0xff]   ;;  %v1251_v51 = vld [vmem:[%s1468_s11 + $0xc0] ss:$8 sps:$4 sm:$0xff]   ;;  %v1252_v52 = vld [vmem:[%s1468_s11 + $0x54] ss:$8 sps:$4 sm:$0xff]  }
  0x21   : > { %637 = vmatprep.subr.bf16.mxu0 %v1189_v10  ;;  %1090 = vmatprep.subr.bf16.mxu1 %v1189_v10  ;;  %v1254_v53 = vld [vmem:[%s1468_s11 + $0xd4] ss:$8 sps:$4 sm:$0xff]   ;;  %v1256_v54 = vld [vmem:[%s1468_s11 + $0x50] ss:$8 sps:$4 sm:$0xff]   ;;  %v1258_v56 = vld [vmem:[%s1468_s11 + $0x64] ss:$8 sps:$4 sm:$0xff]  }
  0x22   : > { %v1257_v55 = vld [vmem:[%s1468_s11 + $0xd0] ss:$8 sps:$4 sm:$0xff]   ;;  %v1260_v57 = vld [vmem:[%s1468_s11 + $0xe4] ss:$8 sps:$4 sm:$0xff]   ;;  %v1262_v58 = vld [vmem:[%s1468_s11 + $0x60] ss:$8 sps:$4 sm:$0xff]  }
  0x23   : > { %v1263_v59 = vld [vmem:[%s1468_s11 + $0xe0] ss:$8 sps:$4 sm:$0xff]   ;;  %v1264_v60 = vld [vmem:[%s1468_s11 + $0x74] ss:$8 sps:$4 sm:$0xff]   ;;  %v1268_v62 = vld [vmem:[%s1468_s11 + $0x70] ss:$8 sps:$4 sm:$0xff]  }
  0x24   : > { %638 = vmatpush1.bf16.msra.mxu0 %v1191_v11  ;;  %1106 = vmatpush1.bf16.msra.mxu1 %v1191_v11  ;;  %v1266_v61 = vld [vmem:[%s1468_s11 + $0xf4] ss:$8 sps:$4 sm:$0xff]   ;;  %v1269_v63 = vld [vmem:[%s1468_s11 + $0xf0] ss:$8 sps:$4 sm:$0xff]   ;;  %v299_v2 = vsub.s32 0, %v298_v1  ;;  %v303_v4 = vsub.s32 1, %v298_v1 }
  0x25   : > { %639 = vmatprep.subr.bf16.mxu0 %v1192_v12  ;;  %1091 = vmatprep.subr.bf16.mxu1 %v1192_v12  ;;  %v295_v3 = vld [vmem:[%s1761_s2] sm:$0x3]  ;;  %s1008_s5 = sshll.u32 %s208_s29, 9  ;;  %s1713_s18 = scalar_lea.sflag [#allocation3], %s208_s29 }
  0x26   : > { %v1568_v5 = vrot.slane %v295_v3, %v299_v2  ;;  %v1570_v6 = vrot.slane %v295_v3, %v303_v4  ;;  %s1576_s11 = scalar_lea.vmem [#allocation2], %s1008_s5  ;;  %s1350_s9 = smov [#allocation2]  }
  0x27   : > { %s901_s7 = sshll.u32 %s1576_s11, 4  ;;  %s1274_s21 = sshll.u32 %s1350_s9, 4  ;;  %s1701_s7 = int_to_ptr.vmem [resolvable:$true] %s901_s7  ;;  %s1275_s21 = int_to_ptr.vmem [resolvable:$false] %s1274_s21 }
  0x28   : > { %640 = vmatpush1.bf16.msra.mxu0 %v1194_v14  ;;  %1107 = vmatpush1.bf16.msra.mxu1 %v1194_v14  ;;  %s1270_s19 = scalar_lea.vmem %s1701_s7, 8192  ;;  %s1276_s23 = scalar_lea.vmem %s1275_s21, 16384 }
  0x29   : > { %641 = vmatprep.subr.bf16.mxu0 %v1195_v16  ;;  %1092 = vmatprep.subr.bf16.mxu1 %v1195_v16  ;;  %p1271_p12 = scmp.ne.s32.totalorder %s1701_s7, %s1270_s19  ;;  %p1277_p1 = scmp.lt.s32.totalorder %s1701_s7, %s1275_s21 }
  0x2a   : > { %p1278_p2 = scmp.lt.s32.totalorder %s1276_s23, %s1270_s19 }
  0x2b   : > { %p1272_p13 = pnand %p1271_p12, %p1413_p4 }
  0x2c   : > { %642 = vmatpush1.bf16.msra.mxu0 %v1197_v17  ;;  %1108 = vmatpush1.bf16.msra.mxu1 %v1197_v17  ;;  %p1279_p3 = por %p1278_p2, %p1277_p1 }
  0x2d   : > { %643 = vmatprep.subr.bf16.mxu0 %v1198_v18  ;;  %1093 = vmatprep.subr.bf16.mxu1 %v1198_v18  ;;  %p1273_p0 = pneg %p1272_p13 }
  0x2f   : > { %p1280_p5 = pnand %p1279_p3, %p1273_p0 }
  0x30   : > { %644 = vmatpush1.bf16.msra.mxu0 %v1200_v19  ;;  %1109 = vmatpush1.bf16.msra.mxu1 %v1200_v19 }
  0x31   : > { %645 = vmatprep.subr.bf16.mxu0 %v1201_v20  ;;  %1094 = vmatprep.subr.bf16.mxu1 %v1201_v20 }
  0x34   : > { %646 = vmatpush1.bf16.msra.mxu0 %v1203_v21  ;;  %1110 = vmatpush1.bf16.msra.mxu1 %v1203_v21 }
  0x35   : > { %647 = vmatprep.subr.bf16.mxu0 %v1204_v22  ;;  %1095 = vmatprep.subr.bf16.mxu1 %v1204_v22 }
  0x38   : > { %648 = vmatpush1.bf16.msra.mxu0 %v1206_v23  ;;  %1111 = vmatpush1.bf16.msra.mxu1 %v1206_v23 }
  0x39   : > { %649 = vmatprep.subr.bf16.mxu0 %v1207_v24  ;;  %1096 = vmatprep.subr.bf16.mxu1 %v1207_v24 }
  0x3c   : > { %650 = vmatpush1.bf16.msra.mxu0 %v1209_v25  ;;  %1112 = vmatpush1.bf16.msra.mxu1 %v1209_v25 }
  0x3d   : > { %651 = vmatprep.subr.bf16.mxu0 %v1210_v26  ;;  %1097 = vmatprep.subr.bf16.mxu1 %v1210_v26 }
  0x40   : > { %652 = vmatpush1.bf16.msra.mxu0 %v1212_v27  ;;  %1113 = vmatpush1.bf16.msra.mxu1 %v1212_v27 }
  0x41   : > { %653 = vmatprep.subr.bf16.mxu0 %v1213_v28  ;;  %1098 = vmatprep.subr.bf16.mxu1 %v1213_v28 }
  0x44   : > { %654 = vmatpush1.bf16.msra.mxu0 %v1215_v29  ;;  %1114 = vmatpush1.bf16.msra.mxu1 %v1215_v29 }
  0x45   : > { %655 = vmatprep.subr.bf16.mxu0 %v1216_v30  ;;  %1099 = vmatprep.subr.bf16.mxu1 %v1216_v30 }
  0x48   : > { %656 = vmatpush1.bf16.msra.mxu0 %v1218_v31  ;;  %1115 = vmatpush1.bf16.msra.mxu1 %v1218_v31 }
  0x49   : > { %657 = vmatprep.subr.bf16.mxu0 %v1219_v32  ;;  %1100 = vmatprep.subr.bf16.mxu1 %v1219_v32 }
  0x4c   : > { %658 = vmatpush1.bf16.msra.mxu0 %v1221_v33  ;;  %1116 = vmatpush1.bf16.msra.mxu1 %v1221_v33 }
  0x4f   : > { %660 = vmatmul.mubr.bf16.vlgmr.msra.gmra.mrb[0].mxu0 %v1222_v34  ;;  %740 = vmatmul.mubr.bf16.vlgmr.msra.gmra.mrb[0].mxu1 %v1225_v35 }
  0x50   : > { %669 = vmatprep.mubr.bf16.mxu0 %v1228_v36  ;;  %749 = vmatprep.mubr.bf16.mxu1 %v1230_v37 }
  0x57   : > { %670 = vmatmul.mubr.bf16.gmra.mrb[4].mxu0 %v1232_v38  ;;  %750 = vmatmul.mubr.bf16.gmra.mrb[4].mxu1 %v1233_v39 }
  0x58   : > { %679 = vmatprep.mubr.bf16.mxu0 %v1234_v40  ;;  %759 = vmatprep.mubr.bf16.mxu1 %v1236_v41 }
  0x5f   : > { %680 = vmatmul.mubr.bf16.gmra.mrb[8].mxu0 %v1238_v42  ;;  %760 = vmatmul.mubr.bf16.gmra.mrb[8].mxu1 %v1239_v43 }
  0x60   : > { %689 = vmatprep.mubr.bf16.mxu0 %v1240_v44  ;;  %769 = vmatprep.mubr.bf16.mxu1 %v1242_v45 }
  0x67   : > { %690 = vmatmul.mubr.bf16.gmra.mrb[12].mxu0 %v1244_v46  ;;  %770 = vmatmul.mubr.bf16.gmra.mrb[12].mxu1 %v1245_v47 }
  0x68   : > { %699 = vmatprep.mubr.bf16.mxu0 %v1246_v48  ;;  %779 = vmatprep.mubr.bf16.mxu1 %v1248_v49 }
  0x6f   : > { %700 = vmatmul.mubr.bf16.gmra.mrb[16].mxu0 %v1250_v50  ;;  %780 = vmatmul.mubr.bf16.gmra.mrb[16].mxu1 %v1251_v51 }
  0x70   : > { %709 = vmatprep.mubr.bf16.mxu0 %v1252_v52  ;;  %789 = vmatprep.mubr.bf16.mxu1 %v1254_v53 }
  0x77   : > { %710 = vmatmul.mubr.bf16.gmra.mrb[20].mxu0 %v1256_v54  ;;  %790 = vmatmul.mubr.bf16.gmra.mrb[20].mxu1 %v1257_v55 }
  0x78   : > { %719 = vmatprep.mubr.bf16.mxu0 %v1258_v56  ;;  %799 = vmatprep.mubr.bf16.mxu1 %v1260_v57 }
  0x7f   : > { %720 = vmatmul.mubr.bf16.gmra.mrb[24].mxu0 %v1262_v58  ;;  %800 = vmatmul.mubr.bf16.gmra.mrb[24].mxu1 %v1263_v59 }
  0x80   : > { %729 = vmatprep.mubr.bf16.mxu0 %v1264_v60  ;;  %809 = vmatprep.mubr.bf16.mxu1 %v1266_v61 }
  0x87   : > { %730 = vmatmul.mubr.bf16.gmra.mrb[28].mxu0 %v1268_v62  ;;  %810 = vmatmul.mubr.bf16.gmra.mrb[28].mxu1 %v1269_v63 }
 0x122   : > { %v661_v7 = vpop.f32.mrb[0].mxu0  ;;  %v741_v8 = vpop.f32.mrb[0].mxu1 }
 0x123   : > { %v662_v9 = vadd.f32 %v661_v7, %v1568_v5  ;;  %v742_v10 = vadd.f32 %v741_v8, %v1568_v5  ;;  %v663_v11 = vpop.f32.mrb[1].mxu0  ;;  %v743_v12 = vpop.f32.mrb[1].mxu1 }
 0x124   : > { %v664_v13 = vadd.f32 %v663_v11, %v1570_v6  ;;  %v744_v14 = vadd.f32 %v743_v12, %v1570_v6  ;;  %v665_v15 = vpop.f32.mrb[2].mxu0  ;;  %v745_v16 = vpop.f32.mrb[2].mxu1 }
 0x125   : > { %820 = vst [vmem:[%s1576_s11] sm:$0xff] %v662_v9  ;;  %852 = vst [vmem:[%s1576_s11 + $0x100] sm:$0xff] %v742_v10  ;;  %v666_v17 = vadd.f32 %v665_v15, %v1568_v5  ;;  %v746_v18 = vadd.f32 %v745_v16, %v1568_v5  ;;  %v667_v19 = vpop.f32.mrb[3].mxu0  ;;  %v747_v20 = vpop.f32.mrb[3].mxu1 }
 0x126   : > { %821 = vst [vmem:[%s1576_s11 + $0x8] sm:$0xff] %v664_v13  ;;  %853 = vst [vmem:[%s1576_s11 + $0x108] sm:$0xff] %v744_v14  ;;  %v668_v21 = vadd.f32 %v667_v19, %v1570_v6  ;;  %v748_v22 = vadd.f32 %v747_v20, %v1570_v6 }
 0x127   : > { %822 = vst [vmem:[%s1576_s11 + $0x10] sm:$0xff] %v666_v17  ;;  %854 = vst [vmem:[%s1576_s11 + $0x110] sm:$0xff] %v746_v18 }
 0x128   : > { %823 = vst [vmem:[%s1576_s11 + $0x18] sm:$0xff] %v668_v21  ;;  %855 = vst [vmem:[%s1576_s11 + $0x118] sm:$0xff] %v748_v22 }
 0x12a   : > { %v671_v23 = vpop.f32.mrb[4].mxu0  ;;  %v751_v24 = vpop.f32.mrb[4].mxu1 }
 0x12b   : > { %v672_v25 = vadd.f32 %v671_v23, %v1568_v5  ;;  %v752_v26 = vadd.f32 %v751_v24, %v1568_v5  ;;  %v673_v27 = vpop.f32.mrb[5].mxu0  ;;  %v753_v28 = vpop.f32.mrb[5].mxu1 }
 0x12c   : > { %v674_v29 = vadd.f32 %v673_v27, %v1570_v6  ;;  %v754_v30 = vadd.f32 %v753_v28, %v1570_v6  ;;  %v675_v31 = vpop.f32.mrb[6].mxu0  ;;  %v755_v32 = vpop.f32.mrb[6].mxu1 }
 0x12d   : > { %824 = vst [vmem:[%s1576_s11 + $0x20] sm:$0xff] %v672_v25  ;;  %856 = vst [vmem:[%s1576_s11 + $0x120] sm:$0xff] %v752_v26  ;;  %v676_v33 = vadd.f32 %v675_v31, %v1568_v5  ;;  %v756_v34 = vadd.f32 %v755_v32, %v1568_v5  ;;  %v677_v35 = vpop.f32.mrb[7].mxu0  ;;  %v757_v36 = vpop.f32.mrb[7].mxu1 }
 0x12e   : > { %825 = vst [vmem:[%s1576_s11 + $0x28] sm:$0xff] %v674_v29  ;;  %857 = vst [vmem:[%s1576_s11 + $0x128] sm:$0xff] %v754_v30  ;;  %v678_v37 = vadd.f32 %v677_v35, %v1570_v6  ;;  %v758_v38 = vadd.f32 %v757_v36, %v1570_v6 }
 0x12f   : > { %826 = vst [vmem:[%s1576_s11 + $0x30] sm:$0xff] %v676_v33  ;;  %858 = vst [vmem:[%s1576_s11 + $0x130] sm:$0xff] %v756_v34 }
 0x130   : > { %827 = vst [vmem:[%s1576_s11 + $0x38] sm:$0xff] %v678_v37  ;;  %859 = vst [vmem:[%s1576_s11 + $0x138] sm:$0xff] %v758_v38 }
 0x132   : > { %v681_v39 = vpop.f32.mrb[8].mxu0  ;;  %v761_v40 = vpop.f32.mrb[8].mxu1 }
 0x133   : > { %v682_v41 = vadd.f32 %v681_v39, %v1568_v5  ;;  %v762_v42 = vadd.f32 %v761_v40, %v1568_v5  ;;  %v683_v43 = vpop.f32.mrb[9].mxu0  ;;  %v763_v44 = vpop.f32.mrb[9].mxu1 }
 0x134   : > { %v684_v45 = vadd.f32 %v683_v43, %v1570_v6  ;;  %v764_v46 = vadd.f32 %v763_v44, %v1570_v6  ;;  %v685_v47 = vpop.f32.mrb[10].mxu0  ;;  %v765_v48 = vpop.f32.mrb[10].mxu1 }
 0x135   : > { %828 = vst [vmem:[%s1576_s11 + $0x40] sm:$0xff] %v682_v41  ;;  %860 = vst [vmem:[%s1576_s11 + $0x140] sm:$0xff] %v762_v42  ;;  %v686_v49 = vadd.f32 %v685_v47, %v1568_v5  ;;  %v766_v50 = vadd.f32 %v765_v48, %v1568_v5  ;;  %v687_v51 = vpop.f32.mrb[11].mxu0  ;;  %v767_v52 = vpop.f32.mrb[11].mxu1 }
 0x136   : > { %829 = vst [vmem:[%s1576_s11 + $0x48] sm:$0xff] %v684_v45  ;;  %861 = vst [vmem:[%s1576_s11 + $0x148] sm:$0xff] %v764_v46  ;;  %v688_v53 = vadd.f32 %v687_v51, %v1570_v6  ;;  %v768_v54 = vadd.f32 %v767_v52, %v1570_v6 }
 0x137   : > { %830 = vst [vmem:[%s1576_s11 + $0x50] sm:$0xff] %v686_v49  ;;  %862 = vst [vmem:[%s1576_s11 + $0x150] sm:$0xff] %v766_v50 }
 0x138   : > { %831 = vst [vmem:[%s1576_s11 + $0x58] sm:$0xff] %v688_v53  ;;  %863 = vst [vmem:[%s1576_s11 + $0x158] sm:$0xff] %v768_v54 }
 0x13a   : > { %v691_v55 = vpop.f32.mrb[12].mxu0  ;;  %v771_v56 = vpop.f32.mrb[12].mxu1 }
 0x13b   : > { %v692_v57 = vadd.f32 %v691_v55, %v1568_v5  ;;  %v772_v58 = vadd.f32 %v771_v56, %v1568_v5  ;;  %v693_v59 = vpop.f32.mrb[13].mxu0  ;;  %v773_v60 = vpop.f32.mrb[13].mxu1 }
 0x13c   : > { %v694_v61 = vadd.f32 %v693_v59, %v1570_v6  ;;  %v774_v62 = vadd.f32 %v773_v60, %v1570_v6  ;;  %v695_v63 = vpop.f32.mrb[14].mxu0  ;;  %v775_v0 = vpop.f32.mrb[14].mxu1 }
 0x13d   : > { %832 = vst [vmem:[%s1576_s11 + $0x60] sm:$0xff] %v692_v57  ;;  %864 = vst [vmem:[%s1576_s11 + $0x160] sm:$0xff] %v772_v58  ;;  %v696_v1 = vadd.f32 %v695_v63, %v1568_v5  ;;  %v776_v2 = vadd.f32 %v775_v0, %v1568_v5  ;;  %v697_v3 = vpop.f32.mrb[15].mxu0  ;;  %v777_v4 = vpop.f32.mrb[15].mxu1 }
 0x13e   : > { %833 = vst [vmem:[%s1576_s11 + $0x68] sm:$0xff] %v694_v61  ;;  %865 = vst [vmem:[%s1576_s11 + $0x168] sm:$0xff] %v774_v62  ;;  %v698_v7 = vadd.f32 %v697_v3, %v1570_v6  ;;  %v778_v8 = vadd.f32 %v777_v4, %v1570_v6 }
 0x13f   : > { %834 = vst [vmem:[%s1576_s11 + $0x70] sm:$0xff] %v696_v1  ;;  %866 = vst [vmem:[%s1576_s11 + $0x170] sm:$0xff] %v776_v2 }
 0x140   : > { %835 = vst [vmem:[%s1576_s11 + $0x78] sm:$0xff] %v698_v7  ;;  %867 = vst [vmem:[%s1576_s11 + $0x178] sm:$0xff] %v778_v8 }
 0x142   : > { %v701_v9 = vpop.f32.mrb[16].mxu0  ;;  %v781_v10 = vpop.f32.mrb[16].mxu1 }
 0x143   : > { %v702_v11 = vadd.f32 %v701_v9, %v1568_v5  ;;  %v782_v12 = vadd.f32 %v781_v10, %v1568_v5  ;;  %v703_v13 = vpop.f32.mrb[17].mxu0  ;;  %v783_v14 = vpop.f32.mrb[17].mxu1 }
 0x144   : > { %v704_v15 = vadd.f32 %v703_v13, %v1570_v6  ;;  %v784_v16 = vadd.f32 %v783_v14, %v1570_v6  ;;  %v705_v17 = vpop.f32.mrb[18].mxu0  ;;  %v785_v18 = vpop.f32.mrb[18].mxu1 }
 0x145   : > { %836 = vst [vmem:[%s1576_s11 + $0x80] sm:$0xff] %v702_v11  ;;  %868 = vst [vmem:[%s1576_s11 + $0x180] sm:$0xff] %v782_v12  ;;  %v706_v19 = vadd.f32 %v705_v17, %v1568_v5  ;;  %v786_v20 = vadd.f32 %v785_v18, %v1568_v5  ;;  %v707_v21 = vpop.f32.mrb[19].mxu0  ;;  %v787_v22 = vpop.f32.mrb[19].mxu1 }
 0x146   : > { %837 = vst [vmem:[%s1576_s11 + $0x88] sm:$0xff] %v704_v15  ;;  %869 = vst [vmem:[%s1576_s11 + $0x188] sm:$0xff] %v784_v16  ;;  %v708_v23 = vadd.f32 %v707_v21, %v1570_v6  ;;  %v788_v24 = vadd.f32 %v787_v22, %v1570_v6 }
 0x147   : > { %838 = vst [vmem:[%s1576_s11 + $0x90] sm:$0xff] %v706_v19  ;;  %870 = vst [vmem:[%s1576_s11 + $0x190] sm:$0xff] %v786_v20 }
 0x148   : > { %839 = vst [vmem:[%s1576_s11 + $0x98] sm:$0xff] %v708_v23  ;;  %871 = vst [vmem:[%s1576_s11 + $0x198] sm:$0xff] %v788_v24 }
 0x14a   : > { %v711_v25 = vpop.f32.mrb[20].mxu0  ;;  %v791_v26 = vpop.f32.mrb[20].mxu1 }
 0x14b   : > { %v712_v27 = vadd.f32 %v711_v25, %v1568_v5  ;;  %v792_v28 = vadd.f32 %v791_v26, %v1568_v5  ;;  %v713_v29 = vpop.f32.mrb[21].mxu0  ;;  %v793_v30 = vpop.f32.mrb[21].mxu1 }
 0x14c   : > { %v714_v31 = vadd.f32 %v713_v29, %v1570_v6  ;;  %v794_v32 = vadd.f32 %v793_v30, %v1570_v6  ;;  %v715_v33 = vpop.f32.mrb[22].mxu0  ;;  %v795_v34 = vpop.f32.mrb[22].mxu1 }
 0x14d   : > { %840 = vst [vmem:[%s1576_s11 + $0xa0] sm:$0xff] %v712_v27  ;;  %872 = vst [vmem:[%s1576_s11 + $0x1a0] sm:$0xff] %v792_v28  ;;  %v716_v35 = vadd.f32 %v715_v33, %v1568_v5  ;;  %v796_v36 = vadd.f32 %v795_v34, %v1568_v5  ;;  %v717_v37 = vpop.f32.mrb[23].mxu0  ;;  %v797_v38 = vpop.f32.mrb[23].mxu1 }
 0x14e   : > { %841 = vst [vmem:[%s1576_s11 + $0xa8] sm:$0xff] %v714_v31  ;;  %873 = vst [vmem:[%s1576_s11 + $0x1a8] sm:$0xff] %v794_v32  ;;  %v718_v39 = vadd.f32 %v717_v37, %v1570_v6  ;;  %v798_v40 = vadd.f32 %v797_v38, %v1570_v6 }
 0x14f   : > { %842 = vst [vmem:[%s1576_s11 + $0xb0] sm:$0xff] %v716_v35  ;;  %874 = vst [vmem:[%s1576_s11 + $0x1b0] sm:$0xff] %v796_v36 }
 0x150   : > { %843 = vst [vmem:[%s1576_s11 + $0xb8] sm:$0xff] %v718_v39  ;;  %875 = vst [vmem:[%s1576_s11 + $0x1b8] sm:$0xff] %v798_v40 }
 0x152   : > { %v721_v41 = vpop.f32.mrb[24].mxu0  ;;  %v801_v42 = vpop.f32.mrb[24].mxu1 }
 0x153   : > { %v722_v43 = vadd.f32 %v721_v41, %v1568_v5  ;;  %v802_v44 = vadd.f32 %v801_v42, %v1568_v5  ;;  %v723_v45 = vpop.f32.mrb[25].mxu0  ;;  %v803_v46 = vpop.f32.mrb[25].mxu1 }
 0x154   : > { %v724_v47 = vadd.f32 %v723_v45, %v1570_v6  ;;  %v804_v48 = vadd.f32 %v803_v46, %v1570_v6  ;;  %v725_v49 = vpop.f32.mrb[26].mxu0  ;;  %v805_v50 = vpop.f32.mrb[26].mxu1 }
 0x155   : > { %844 = vst [vmem:[%s1576_s11 + $0xc0] sm:$0xff] %v722_v43  ;;  %876 = vst [vmem:[%s1576_s11 + $0x1c0] sm:$0xff] %v802_v44  ;;  %v726_v51 = vadd.f32 %v725_v49, %v1568_v5  ;;  %v806_v52 = vadd.f32 %v805_v50, %v1568_v5  ;;  %v727_v53 = vpop.f32.mrb[27].mxu0  ;;  %v807_v54 = vpop.f32.mrb[27].mxu1 }
 0x156   : > { %845 = vst [vmem:[%s1576_s11 + $0xc8] sm:$0xff] %v724_v47  ;;  %877 = vst [vmem:[%s1576_s11 + $0x1c8] sm:$0xff] %v804_v48  ;;  %v728_v55 = vadd.f32 %v727_v53, %v1570_v6  ;;  %v808_v56 = vadd.f32 %v807_v54, %v1570_v6 }
 0x157   : > { %846 = vst [vmem:[%s1576_s11 + $0xd0] sm:$0xff] %v726_v51  ;;  %878 = vst [vmem:[%s1576_s11 + $0x1d0] sm:$0xff] %v806_v52 }
 0x158   : > { %847 = vst [vmem:[%s1576_s11 + $0xd8] sm:$0xff] %v728_v55  ;;  %879 = vst [vmem:[%s1576_s11 + $0x1d8] sm:$0xff] %v808_v56 }
 0x15a   : > { %v731_v57 = vpop.f32.mrb[28].mxu0  ;;  %v811_v58 = vpop.f32.mrb[28].mxu1 }
 0x15b   : > { %v732_v59 = vadd.f32 %v731_v57, %v1568_v5  ;;  %v812_v60 = vadd.f32 %v811_v58, %v1568_v5  ;;  %v733_v61 = vpop.f32.mrb[29].mxu0  ;;  %v813_v62 = vpop.f32.mrb[29].mxu1 }
 0x15c   : > { %v734_v63 = vadd.f32 %v733_v61, %v1570_v6  ;;  %v814_v0 = vadd.f32 %v813_v62, %v1570_v6  ;;  %v735_v1 = vpop.f32.mrb[30].mxu0  ;;  %v815_v2 = vpop.f32.mrb[30].mxu1 }
 0x15d   : > { %848 = vst [vmem:[%s1576_s11 + $0xe0] sm:$0xff] %v732_v59  ;;  %880 = vst [vmem:[%s1576_s11 + $0x1e0] sm:$0xff] %v812_v60  ;;  %v736_v3 = vadd.f32 %v735_v1, %v1568_v5  ;;  %v816_v4 = vadd.f32 %v815_v2, %v1568_v5  ;;  %v737_v7 = vpop.f32.mrb[31].mxu0  ;;  %v817_v8 = vpop.f32.mrb[31].mxu1 }
 0x15e   : > { %849 = vst [vmem:[%s1576_s11 + $0xe8] sm:$0xff] %v734_v63  ;;  %881 = vst [vmem:[%s1576_s11 + $0x1e8] sm:$0xff] %v814_v0  ;;  %v738_v9 = vadd.f32 %v737_v7, %v1570_v6  ;;  %v818_v10 = vadd.f32 %v817_v8, %v1570_v6 }
 0x15f   : > { %850 = vst [vmem:[%s1576_s11 + $0xf0] sm:$0xff] %v736_v3  ;;  %882 = vst [vmem:[%s1576_s11 + $0x1f0] sm:$0xff] %v816_v4 }
 0x160   : > { %851 = vst [vmem:[%s1576_s11 + $0xf8] sm:$0xff] %v738_v9  ;;  %883 = vst [vmem:[%s1576_s11 + $0x1f8] sm:$0xff] %v818_v10 }
 0x161   : > { %1283 = shalt.err (!%p1280_p5)
}
 0x162   : > { %s1284_s26 = scalar_lea.hbm %s1699_s10, 8192  ;;  %s1288_s29 = scalar_lea.hbm %s1762_s3, 16384 }
 0x163   : > { %p1285_p6 = scmp.ne.s32.totalorder %s1699_s10, %s1284_s26  ;;  %p1289_p10 = scmp.lt.u32.totalorder %s1699_s10, %s1762_s3 }
 0x164   : > { %p1290_p11 = scmp.lt.u32.totalorder %s1288_s29, %s1284_s26  ;;  %p1292_p13 = scmp.lt.u32.totalorder %s1284_s26, %s1699_s10 }
 0x165   : > { %p1286_p7 = pnand %p1285_p6, %p1413_p4 }
 0x166   : > { %p1291_p12 = por %p1290_p11, %p1289_p10 }
 0x167   : > { %p1287_p9 = pneg %p1286_p7 }
 0x168   : > { %p1293_p0 = por %p1292_p13, %p1291_p12 }
 0x16a   : > { %p1294_p1 = pnand %p1293_p0, %p1287_p9 }
 0x16c   : > { %1297 = shalt.err (!%p1294_p1)
}
 0x16d   : > { %s1351_s5 = smov 256   ;;  %s1352_s11 = smov 16  }
 0x16e   : > { %1117 = dma.vmem_to_hbm [thread:$0]  (%p1413_p4), %s1701_s7, 8192, %s1699_s10, %s1713_s18, %s1351_s5, %s1351_s5, %s1352_s11  }
 0x16f PF: > { %p1123_p2 = scmp.ge.s32.totalorder %s1348_s17, 2  ;;  %s916_s6 = sand.u32 1, %s1328_s12  }
 0x170   : > { %s917_s15 = scalar_lea.sflag [#allocation3], %s916_s6 }
 0x171   : > { %p1120_p3 = pnand %p1123_p2, %p1420_p8 }
 0x173   : > { %1323 = dma.done.wait (!%p1120_p3), %s917_s15, 8192  }
 0x174   : > { %1325 = vsyncadd (!%p1120_p3), %s917_s15, 4294959104  ;;  %s16_s17 = sadd.s32 1, %s1348_s17   ;;  %s1765_s12 = smov %s1332_s13 }
 0x175   : > { %p13_p5 = scmp.ge.s32.totalorder %s16_s17, 4   ;;  %s1766_s13 = smov %s1336_s14 }
 0x176   : > { %s1767_s14 = smov %s1426_s25  ;;  %s1768_s15 = smov %s1344_s16 }
 0x177   : > { %s1769_s16 = smov %s1771_s20  ;;  %15 = sbr.rel (!%p13_p5) target bundleno = 4 (0x4), region = 73 }
 0x17e   :  { %922 = vsyncpa [#allocation3], 1 }
 0x17f   :  { %924 = vsyncpa [#allocation3 + $0x1], 1 }

// kernel: self_attention_forward.6
= control target key start
LH: loop header
LB: loop body
LE: loop exit
PB: predicated region body
PF: predicated region fallthrough
CT: control target
= control target key end

     0   :  { %s4442_s12 = smov 0   ;;  %s4444_s13 = smov 0   ;;  %s6088_s0 = inlined_call_operand.vmem [shape: bf16[2,256,256], index: 0, kind: input, shape index: {}]   ;;  %s6089_s1 = inlined_call_operand.vmem [shape: bf16[2,256,256], index: 1, kind: input, shape index: {}]   ;;  %s6090_s2 = inlined_call_operand.vmem [shape: bf16[2,256,768], index: 2, kind: input, shape index: {}]   ;;  %s6091_s3 = inlined_call_operand.vmem [shape: bf16[2,256,256], index: 3, kind: output, shape index: {}]  }
   0x1   :  { %s4446_s14 = smov 0   ;;  %s4448_s15 = smov 0  }
   0x2   :  { %s4450_s16 = smov 0   ;;  %s4452_s17 = smov 0  }
   0x3   :  { %s4454_s18 = smov 0   ;;  %s4456_s19 = smov 0  }
   0x4   :  { %s4458_s20 = smov 0  }
   0x5 LB: > { %s3545_s21 = sadd.s32 4294967295, %s4417_s20   ;;  %s35_s22 = sadd.s32 1, %s4409_s18  ;;  %s4417_s20 = sphi %s4458_s20, %s13_s20   ;;  %s4413_s19 = sphi %s4456_s19, %s6362_s19   ;;  %s4409_s18 = sphi %s4454_s18, %s6361_s18   ;;  %s4405_s17 = sphi %s4452_s17, %s6360_s17   ;;  %s4401_s16 = sphi %s4450_s16, %s6359_s16   ;;  %s4397_s15 = sphi %s4448_s15, %s6358_s15   ;;  %s4393_s14 = sphi %s4446_s14, %s6357_s14   ;;  %s4389_s13 = sphi %s4444_s13, %s6356_s13   ;;  %s4385_s12 = sphi %s4442_s12, %s6355_s12  }
   0x6   : > { %p37_p0 = scmp.ge.s32.totalorder %s35_s22, 2  ;;  %s39_s23 = sadd.s32 1, %s4413_s19 }
   0x7   : > { %s50_s24 = sadd.s32 1, %s4397_s15  ;;  %p57_p1 = scmp.ne.s32.totalorder %s4397_s15, %s4393_s14 }
   0x8   : > { %s6364_s22 = smov (%p37_p0, %s35_s22), 0  ;;  %s6366_s23 = smov (!%p37_p0, %s39_s23), %s4413_s19 }
   0x9   : > { %s46_s25 = ssub.s32 %s4409_s18, %s6364_s22  ;;  %p58_p2 = scmp.eq.s32.totalorder %s4417_s20, 0 }
   0xa   : > { %p41_p3 = scmp.ge.s32.totalorder %s6366_s23, 2  ;;  %s103_s26 = sadd.s32 4, %s4409_s18 }
   0xb   : > { %p4505_p4 = por %p58_p2, %p57_p1  ;;  %s104_s28 = sadd.s32 4, %s6364_s22 }
   0xc   : > { %s6368_s23 = smov (%p41_p3, %s6366_s23), 0  ;;  %s108_s29 = ssub.s32 %s103_s26, %s104_s28 }
   0xd   : > { %s112_s30 = sadd.s32 1, %s4389_s13  ;;  %s43_s4 = ssub.s32 %s4413_s19, %s6368_s23 }
   0xe   : > { %p119_p5 = scmp.ne.s32.totalorder %s4389_s13, %s4385_s12  ;;  %s47_s5 = sor.u32 %s46_s25, %s43_s4 }
   0xf   : > { %s109_s6 = sor.u32 %s108_s29, %s43_s4  ;;  %p48_p6 = scmp.eq.s32.totalorder %s47_s5, 0 }
  0x10   : > { %p110_p7 = scmp.eq.s32.totalorder %s109_s6, 0  ;;  %p4519_p8 = por %p119_p5, %p58_p2 }
  0x11   : > { %p153_p9 = scmp.eq.s32.totalorder %s3545_s21, 3  ;;  %p3548_p11 = scmp.ge.s32.totalorder %s4417_s20, 4 }
  0x12   : > { %s4524_s8 = scalar_select %p48_p6, %s4397_s15, %s50_s24  }
  0x13   : > { %s4527_s9 = scalar_select %p110_p7, %s4389_s13, %s112_s30  }
  0x14   : > { %p4532_p10 = por %p153_p9, %p57_p1  ;;  %175 = sbr.rel (%p3548_p11) target bundleno = 109 (0x6d), region = 16 }
  0x1b   : > { %178 = sbr.rel (!%p4505_p4) target bundleno = 54 (0x36), region = 20  ;;  %s180_s11 = sand.u32 (%p4505_p4), 1, %s4397_s15  }
  0x1c   : > { %s3550_s21 = sshll.u32 (%p4505_p4), %s4413_s19, 6  ;;  %s3549_s24 = sshll.u32 (%p4505_p4), %s180_s11, 7 }
  0x1d   : > { %s187_s25 = sadd.s32 (%p4505_p4), %s4409_s18, %s3550_s21  ;;  %s4550_s4 = scalar_lea.vmem (%p4505_p4), [#allocation5], %s3549_s24 }
  0x1e   : > { %s3551_s26 = sshll.u32 (%p4505_p4), %s187_s25, 2 }
  0x1f   : > { %s4545_s30 = scalar_lea.vmem (%p4505_p4), %s6088_s0, %s3551_s26 }
  0x20   : > { %v205_v0 = vld [vmem:[%s4545_s30] sm:$0xf] (%p4505_p4)  ;;  %v207_v1 = vld [vmem:[%s4545_s30 + $0x8] sm:$0xf] (%p4505_p4)  ;;  %v209_v2 = vld [vmem:[%s4545_s30 + $0x10] sm:$0xf] (%p4505_p4) }
  0x21   : > { %206 = vst [vmem:[%s4550_s4] sm:$0xf] (%p4505_p4), %v205_v0  ;;  %208 = vst [vmem:[%s4550_s4 + $0x4] sm:$0xf] (%p4505_p4), %v207_v1  ;;  %v211_v3 = vld [vmem:[%s4545_s30 + $0x18] sm:$0xf] (%p4505_p4) }
  0x22   : > { %210 = vst [vmem:[%s4550_s4 + $0x8] sm:$0xf] %v209_v2  ;;  %v213_v4 = vld [vmem:[%s4545_s30 + $0x20] sm:$0xf]  ;;  %v215_v5 = vld [vmem:[%s4545_s30 + $0x28] sm:$0xf] }
  0x23   : > { %212 = vst [vmem:[%s4550_s4 + $0xc] sm:$0xf] %v211_v3  ;;  %214 = vst [vmem:[%s4550_s4 + $0x10] sm:$0xf] %v213_v4  ;;  %v217_v6 = vld [vmem:[%s4545_s30 + $0x30] sm:$0xf] }
  0x24   : > { %216 = vst [vmem:[%s4550_s4 + $0x14] sm:$0xf] %v215_v5  ;;  %v219_v7 = vld [vmem:[%s4545_s30 + $0x38] sm:$0xf]  ;;  %v221_v8 = vld [vmem:[%s4545_s30 + $0x40] sm:$0xf] }
  0x25   : > { %218 = vst [vmem:[%s4550_s4 + $0x18] sm:$0xf] %v217_v6  ;;  %220 = vst [vmem:[%s4550_s4 + $0x1c] sm:$0xf] %v219_v7  ;;  %v223_v9 = vld [vmem:[%s4545_s30 + $0x48] sm:$0xf] }
  0x26   : > { %222 = vst [vmem:[%s4550_s4 + $0x20] sm:$0xf] %v221_v8  ;;  %v225_v10 = vld [vmem:[%s4545_s30 + $0x50] sm:$0xf]  ;;  %v227_v11 = vld [vmem:[%s4545_s30 + $0x58] sm:$0xf] }
  0x27   : > { %224 = vst [vmem:[%s4550_s4 + $0x24] sm:$0xf] %v223_v9  ;;  %226 = vst [vmem:[%s4550_s4 + $0x28] sm:$0xf] %v225_v10  ;;  %v229_v12 = vld [vmem:[%s4545_s30 + $0x60] sm:$0xf] }
  0x28   : > { %228 = vst [vmem:[%s4550_s4 + $0x2c] sm:$0xf] %v227_v11  ;;  %v231_v13 = vld [vmem:[%s4545_s30 + $0x68] sm:$0xf]  ;;  %v233_v14 = vld [vmem:[%s4545_s30 + $0x70] sm:$0xf] }
  0x29   : > { %230 = vst [vmem:[%s4550_s4 + $0x30] sm:$0xf] %v229_v12  ;;  %232 = vst [vmem:[%s4550_s4 + $0x34] sm:$0xf] %v231_v13  ;;  %v235_v15 = vld [vmem:[%s4545_s30 + $0x78] sm:$0xf] }
  0x2a   : > { %234 = vst [vmem:[%s4550_s4 + $0x38] sm:$0xf] %v233_v14  ;;  %v237_v16 = vld [vmem:[%s4545_s30 + $0x80] sm:$0xf]  ;;  %v239_v17 = vld [vmem:[%s4545_s30 + $0x88] sm:$0xf] }
  0x2b   : > { %236 = vst [vmem:[%s4550_s4 + $0x3c] sm:$0xf] %v235_v15  ;;  %238 = vst [vmem:[%s4550_s4 + $0x40] sm:$0xf] %v237_v16  ;;  %v241_v18 = vld [vmem:[%s4545_s30 + $0x90] sm:$0xf] }
  0x2c   : > { %240 = vst [vmem:[%s4550_s4 + $0x44] sm:$0xf] %v239_v17  ;;  %v243_v19 = vld [vmem:[%s4545_s30 + $0x98] sm:$0xf]  ;;  %v245_v20 = vld [vmem:[%s4545_s30 + $0xa0] sm:$0xf] }
  0x2d   : > { %242 = vst [vmem:[%s4550_s4 + $0x48] sm:$0xf] %v241_v18  ;;  %244 = vst [vmem:[%s4550_s4 + $0x4c] sm:$0xf] %v243_v19  ;;  %v247_v21 = vld [vmem:[%s4545_s30 + $0xa8] sm:$0xf] }
  0x2e   : > { %246 = vst [vmem:[%s4550_s4 + $0x50] sm:$0xf] %v245_v20  ;;  %v249_v22 = vld [vmem:[%s4545_s30 + $0xb0] sm:$0xf]  ;;  %v251_v23 = vld [vmem:[%s4545_s30 + $0xb8] sm:$0xf] }
  0x2f   : > { %248 = vst [vmem:[%s4550_s4 + $0x54] sm:$0xf] %v247_v21  ;;  %250 = vst [vmem:[%s4550_s4 + $0x58] sm:$0xf] %v249_v22  ;;  %v253_v24 = vld [vmem:[%s4545_s30 + $0xc0] sm:$0xf] }
  0x30   : > { %252 = vst [vmem:[%s4550_s4 + $0x5c] sm:$0xf] %v251_v23  ;;  %v255_v25 = vld [vmem:[%s4545_s30 + $0xc8] sm:$0xf]  ;;  %v257_v26 = vld [vmem:[%s4545_s30 + $0xd0] sm:$0xf] }
  0x31   : > { %254 = vst [vmem:[%s4550_s4 + $0x60] sm:$0xf] %v253_v24  ;;  %256 = vst [vmem:[%s4550_s4 + $0x64] sm:$0xf] %v255_v25  ;;  %v259_v27 = vld [vmem:[%s4545_s30 + $0xd8] sm:$0xf] }
  0x32   : > { %258 = vst [vmem:[%s4550_s4 + $0x68] sm:$0xf] %v257_v26  ;;  %v261_v28 = vld [vmem:[%s4545_s30 + $0xe0] sm:$0xf]  ;;  %v263_v29 = vld [vmem:[%s4545_s30 + $0xe8] sm:$0xf] }
  0x33   : > { %260 = vst [vmem:[%s4550_s4 + $0x6c] sm:$0xf] %v259_v27  ;;  %262 = vst [vmem:[%s4550_s4 + $0x70] sm:$0xf] %v261_v28  ;;  %v265_v30 = vld [vmem:[%s4545_s30 + $0xf0] sm:$0xf] }
  0x34   : > { %264 = vst [vmem:[%s4550_s4 + $0x74] sm:$0xf] %v263_v29  ;;  %v267_v31 = vld [vmem:[%s4545_s30 + $0xf8] sm:$0xf]  ;;  %266 = vst [vmem:[%s4550_s4 + $0x78] sm:$0xf] %v265_v30 }
  0x35   : > { %268 = vst [vmem:[%s4550_s4 + $0x7c] sm:$0xf] %v267_v31 }
  0x36 PF: > { %355 = sbr.rel (!%p4505_p4) target bundleno = 81 (0x51), region = 61  ;;  %s357_s5 = sand.u32 (%p4505_p4), 1, %s4397_s15  }
  0x37   : > { %s3553_s6 = sshll.u32 (%p4505_p4), %s4413_s19, 6  ;;  %s3552_s11 = sshll.u32 (%p4505_p4), %s357_s5, 7 }
  0x38   : > { %s364_s21 = sadd.s32 (%p4505_p4), %s4409_s18, %s3553_s6  ;;  %s4626_s27 = scalar_lea.vmem (%p4505_p4), [#allocation6], %s3552_s11 }
  0x39   : > { %s3554_s24 = sshll.u32 (%p4505_p4), %s364_s21, 2 }
  0x3a   : > { %s4621_s28 = scalar_lea.vmem (%p4505_p4), %s6089_s1, %s3554_s24 }
  0x3b   : > { %v382_v32 = vld [vmem:[%s4621_s28] sm:$0xf] (%p4505_p4)  ;;  %v384_v33 = vld [vmem:[%s4621_s28 + $0x8] sm:$0xf] (%p4505_p4)  ;;  %v386_v34 = vld [vmem:[%s4621_s28 + $0x10] sm:$0xf] (%p4505_p4) }
  0x3c   : > { %383 = vst [vmem:[%s4626_s27] sm:$0xf] (%p4505_p4), %v382_v32  ;;  %385 = vst [vmem:[%s4626_s27 + $0x4] sm:$0xf] (%p4505_p4), %v384_v33  ;;  %v388_v35 = vld [vmem:[%s4621_s28 + $0x18] sm:$0xf] (%p4505_p4) }
  0x3d   : > { %387 = vst [vmem:[%s4626_s27 + $0x8] sm:$0xf] %v386_v34  ;;  %v390_v36 = vld [vmem:[%s4621_s28 + $0x20] sm:$0xf]  ;;  %v392_v37 = vld [vmem:[%s4621_s28 + $0x28] sm:$0xf] }
  0x3e   : > { %389 = vst [vmem:[%s4626_s27 + $0xc] sm:$0xf] %v388_v35  ;;  %391 = vst [vmem:[%s4626_s27 + $0x10] sm:$0xf] %v390_v36  ;;  %v394_v38 = vld [vmem:[%s4621_s28 + $0x30] sm:$0xf] }
  0x3f   : > { %393 = vst [vmem:[%s4626_s27 + $0x14] sm:$0xf] %v392_v37  ;;  %v396_v39 = vld [vmem:[%s4621_s28 + $0x38] sm:$0xf]  ;;  %v398_v40 = vld [vmem:[%s4621_s28 + $0x40] sm:$0xf] }
  0x40   : > { %395 = vst [vmem:[%s4626_s27 + $0x18] sm:$0xf] %v394_v38  ;;  %397 = vst [vmem:[%s4626_s27 + $0x1c] sm:$0xf] %v396_v39  ;;  %v400_v41 = vld [vmem:[%s4621_s28 + $0x48] sm:$0xf] }
  0x41   : > { %399 = vst [vmem:[%s4626_s27 + $0x20] sm:$0xf] %v398_v40  ;;  %v402_v42 = vld [vmem:[%s4621_s28 + $0x50] sm:$0xf]  ;;  %v404_v43 = vld [vmem:[%s4621_s28 + $0x58] sm:$0xf] }
  0x42   : > { %401 = vst [vmem:[%s4626_s27 + $0x24] sm:$0xf] %v400_v41  ;;  %403 = vst [vmem:[%s4626_s27 + $0x28] sm:$0xf] %v402_v42  ;;  %v406_v44 = vld [vmem:[%s4621_s28 + $0x60] sm:$0xf] }
  0x43   : > { %405 = vst [vmem:[%s4626_s27 + $0x2c] sm:$0xf] %v404_v43  ;;  %v408_v45 = vld [vmem:[%s4621_s28 + $0x68] sm:$0xf]  ;;  %v410_v46 = vld [vmem:[%s4621_s28 + $0x70] sm:$0xf] }
  0x44   : > { %407 = vst [vmem:[%s4626_s27 + $0x30] sm:$0xf] %v406_v44  ;;  %409 = vst [vmem:[%s4626_s27 + $0x34] sm:$0xf] %v408_v45  ;;  %v412_v47 = vld [vmem:[%s4621_s28 + $0x78] sm:$0xf] }
  0x45   : > { %411 = vst [vmem:[%s4626_s27 + $0x38] sm:$0xf] %v410_v46  ;;  %v414_v48 = vld [vmem:[%s4621_s28 + $0x80] sm:$0xf]  ;;  %v416_v49 = vld [vmem:[%s4621_s28 + $0x88] sm:$0xf] }
  0x46   : > { %413 = vst [vmem:[%s4626_s27 + $0x3c] sm:$0xf] %v412_v47  ;;  %415 = vst [vmem:[%s4626_s27 + $0x40] sm:$0xf] %v414_v48  ;;  %v418_v50 = vld [vmem:[%s4621_s28 + $0x90] sm:$0xf] }
  0x47   : > { %417 = vst [vmem:[%s4626_s27 + $0x44] sm:$0xf] %v416_v49  ;;  %v420_v51 = vld [vmem:[%s4621_s28 + $0x98] sm:$0xf]  ;;  %v422_v52 = vld [vmem:[%s4621_s28 + $0xa0] sm:$0xf] }
  0x48   : > { %419 = vst [vmem:[%s4626_s27 + $0x48] sm:$0xf] %v418_v50  ;;  %421 = vst [vmem:[%s4626_s27 + $0x4c] sm:$0xf] %v420_v51  ;;  %v424_v53 = vld [vmem:[%s4621_s28 + $0xa8] sm:$0xf] }
  0x49   : > { %423 = vst [vmem:[%s4626_s27 + $0x50] sm:$0xf] %v422_v52  ;;  %v426_v54 = vld [vmem:[%s4621_s28 + $0xb0] sm:$0xf]  ;;  %v428_v55 = vld [vmem:[%s4621_s28 + $0xb8] sm:$0xf] }
  0x4a   : > { %425 = vst [vmem:[%s4626_s27 + $0x54] sm:$0xf] %v424_v53  ;;  %427 = vst [vmem:[%s4626_s27 + $0x58] sm:$0xf] %v426_v54  ;;  %v430_v56 = vld [vmem:[%s4621_s28 + $0xc0] sm:$0xf] }
  0x4b   : > { %429 = vst [vmem:[%s4626_s27 + $0x5c] sm:$0xf] %v428_v55  ;;  %v432_v57 = vld [vmem:[%s4621_s28 + $0xc8] sm:$0xf]  ;;  %v434_v58 = vld [vmem:[%s4621_s28 + $0xd0] sm:$0xf] }
  0x4c   : > { %431 = vst [vmem:[%s4626_s27 + $0x60] sm:$0xf] %v430_v56  ;;  %433 = vst [vmem:[%s4626_s27 + $0x64] sm:$0xf] %v432_v57  ;;  %v436_v59 = vld [vmem:[%s4621_s28 + $0xd8] sm:$0xf] }
  0x4d   : > { %435 = vst [vmem:[%s4626_s27 + $0x68] sm:$0xf] %v434_v58  ;;  %v438_v60 = vld [vmem:[%s4621_s28 + $0xe0] sm:$0xf]  ;;  %v440_v61 = vld [vmem:[%s4621_s28 + $0xe8] sm:$0xf] }
  0x4e   : > { %437 = vst [vmem:[%s4626_s27 + $0x6c] sm:$0xf] %v436_v59  ;;  %439 = vst [vmem:[%s4626_s27 + $0x70] sm:$0xf] %v438_v60  ;;  %v442_v62 = vld [vmem:[%s4621_s28 + $0xf0] sm:$0xf] }
  0x4f   : > { %441 = vst [vmem:[%s4626_s27 + $0x74] sm:$0xf] %v440_v61  ;;  %v444_v63 = vld [vmem:[%s4621_s28 + $0xf8] sm:$0xf]  ;;  %443 = vst [vmem:[%s4626_s27 + $0x78] sm:$0xf] %v442_v62 }
  0x50   : > { %445 = vst [vmem:[%s4626_s27 + $0x7c] sm:$0xf] %v444_v63 }
  0x51 PF: > { %532 = sbr.rel (!%p4519_p8) target bundleno = 109 (0x6d), region = 102  ;;  %s534_s29 = sand.u32 (%p4519_p8), 1, %s4389_s13  }
  0x52   : > { %s3450_s30 = smul.u32 (%p4519_p8), 192, %s4413_s19  ;;  %s3555_s4 = sshll.u32 (%p4519_p8), %s534_s29, 7 }
  0x53   : > { %s4702_s7 = scalar_lea.vmem (%p4519_p8), [#allocation7], %s3555_s4 }
  0x54   : > { %s3451_s5 = sadd.s32 (%p4519_p8), %s4409_s18, %s3450_s30 }
  0x55   : > { %s3556_s6 = sshll.u32 (%p4519_p8), %s3451_s5, 2 }
  0x56   : > { %s4697_s24 = scalar_lea.vmem (%p4519_p8), %s6090_s2, %s3556_s6 }
  0x57   : > { %v3557_v0 = vld [vmem:[%s4697_s24 + $0x10] sm:$0xf] (%p4519_p8)  ;;  %v3558_v1 = vld [vmem:[%s4697_s24 + $0x28] sm:$0xf] (%p4519_p8)  ;;  %v3559_v2 = vld [vmem:[%s4697_s24 + $0x40] sm:$0xf] (%p4519_p8) }
  0x58   : > { %561 = vst [vmem:[%s4702_s7] sm:$0xf] %v3557_v0  ;;  %563 = vst [vmem:[%s4702_s7 + $0x4] sm:$0xf] %v3558_v1  ;;  %v3560_v3 = vld [vmem:[%s4697_s24 + $0x58] sm:$0xf] }
  0x59   : > { %565 = vst [vmem:[%s4702_s7 + $0x8] sm:$0xf] %v3559_v2  ;;  %v3561_v4 = vld [vmem:[%s4697_s24 + $0x70] sm:$0xf]  ;;  %v3562_v5 = vld [vmem:[%s4697_s24 + $0x88] sm:$0xf] }
  0x5a   : > { %567 = vst [vmem:[%s4702_s7 + $0xc] sm:$0xf] %v3560_v3  ;;  %569 = vst [vmem:[%s4702_s7 + $0x10] sm:$0xf] %v3561_v4  ;;  %v3563_v6 = vld [vmem:[%s4697_s24 + $0xa0] sm:$0xf] }
  0x5b   : > { %571 = vst [vmem:[%s4702_s7 + $0x14] sm:$0xf] %v3562_v5  ;;  %v3564_v7 = vld [vmem:[%s4697_s24 + $0xb8] sm:$0xf]  ;;  %v3565_v8 = vld [vmem:[%s4697_s24 + $0xd0] sm:$0xf] }
  0x5c   : > { %573 = vst [vmem:[%s4702_s7 + $0x18] sm:$0xf] %v3563_v6  ;;  %575 = vst [vmem:[%s4702_s7 + $0x1c] sm:$0xf] %v3564_v7  ;;  %v3566_v9 = vld [vmem:[%s4697_s24 + $0xe8] sm:$0xf] }
  0x5d   : > { %577 = vst [vmem:[%s4702_s7 + $0x20] sm:$0xf] %v3565_v8  ;;  %v3567_v10 = vld [vmem:[%s4697_s24 + $0x100] sm:$0xf]  ;;  %v3568_v11 = vld [vmem:[%s4697_s24 + $0x118] sm:$0xf] }
  0x5e   : > { %579 = vst [vmem:[%s4702_s7 + $0x24] sm:$0xf] %v3566_v9  ;;  %581 = vst [vmem:[%s4702_s7 + $0x28] sm:$0xf] %v3567_v10  ;;  %v3569_v12 = vld [vmem:[%s4697_s24 + $0x130] sm:$0xf] }
  0x5f   : > { %583 = vst [vmem:[%s4702_s7 + $0x2c] sm:$0xf] %v3568_v11  ;;  %v3570_v13 = vld [vmem:[%s4697_s24 + $0x148] sm:$0xf]  ;;  %v3571_v14 = vld [vmem:[%s4697_s24 + $0x160] sm:$0xf] }
  0x60   : > { %585 = vst [vmem:[%s4702_s7 + $0x30] sm:$0xf] %v3569_v12  ;;  %587 = vst [vmem:[%s4702_s7 + $0x34] sm:$0xf] %v3570_v13  ;;  %v3572_v15 = vld [vmem:[%s4697_s24 + $0x178] sm:$0xf] }
  0x61   : > { %589 = vst [vmem:[%s4702_s7 + $0x38] sm:$0xf] %v3571_v14  ;;  %v3573_v16 = vld [vmem:[%s4697_s24 + $0x190] sm:$0xf]  ;;  %v3574_v17 = vld [vmem:[%s4697_s24 + $0x1a8] sm:$0xf] }
  0x62   : > { %591 = vst [vmem:[%s4702_s7 + $0x3c] sm:$0xf] %v3572_v15  ;;  %593 = vst [vmem:[%s4702_s7 + $0x40] sm:$0xf] %v3573_v16  ;;  %v3575_v18 = vld [vmem:[%s4697_s24 + $0x1c0] sm:$0xf] }
  0x63   : > { %595 = vst [vmem:[%s4702_s7 + $0x44] sm:$0xf] %v3574_v17  ;;  %v3576_v19 = vld [vmem:[%s4697_s24 + $0x1d8] sm:$0xf]  ;;  %v3577_v20 = vld [vmem:[%s4697_s24 + $0x1f0] sm:$0xf] }
  0x64   : > { %597 = vst [vmem:[%s4702_s7 + $0x48] sm:$0xf] %v3575_v18  ;;  %599 = vst [vmem:[%s4702_s7 + $0x4c] sm:$0xf] %v3576_v19  ;;  %v3578_v21 = vld [vmem:[%s4697_s24 + $0x208] sm:$0xf] }
  0x65   : > { %601 = vst [vmem:[%s4702_s7 + $0x50] sm:$0xf] %v3577_v20  ;;  %v3579_v22 = vld [vmem:[%s4697_s24 + $0x220] sm:$0xf]  ;;  %v3580_v23 = vld [vmem:[%s4697_s24 + $0x238] sm:$0xf] }
  0x66   : > { %603 = vst [vmem:[%s4702_s7 + $0x54] sm:$0xf] %v3578_v21  ;;  %605 = vst [vmem:[%s4702_s7 + $0x58] sm:$0xf] %v3579_v22  ;;  %v3581_v24 = vld [vmem:[%s4697_s24 + $0x250] sm:$0xf] }
  0x67   : > { %607 = vst [vmem:[%s4702_s7 + $0x5c] sm:$0xf] %v3580_v23  ;;  %v3582_v25 = vld [vmem:[%s4697_s24 + $0x268] sm:$0xf]  ;;  %v3583_v26 = vld [vmem:[%s4697_s24 + $0x280] sm:$0xf] }
  0x68   : > { %609 = vst [vmem:[%s4702_s7 + $0x60] sm:$0xf] %v3581_v24  ;;  %611 = vst [vmem:[%s4702_s7 + $0x64] sm:$0xf] %v3582_v25  ;;  %v3584_v27 = vld [vmem:[%s4697_s24 + $0x298] sm:$0xf] }
  0x69   : > { %613 = vst [vmem:[%s4702_s7 + $0x68] sm:$0xf] %v3583_v26  ;;  %v3585_v28 = vld [vmem:[%s4697_s24 + $0x2b0] sm:$0xf]  ;;  %v3586_v29 = vld [vmem:[%s4697_s24 + $0x2c8] sm:$0xf] }
  0x6a   : > { %615 = vst [vmem:[%s4702_s7 + $0x6c] sm:$0xf] %v3584_v27  ;;  %617 = vst [vmem:[%s4702_s7 + $0x70] sm:$0xf] %v3585_v28  ;;  %v3587_v30 = vld [vmem:[%s4697_s24 + $0x2e0] sm:$0xf] }
  0x6b   : > { %619 = vst [vmem:[%s4702_s7 + $0x74] sm:$0xf] %v3586_v29  ;;  %v3588_v31 = vld [vmem:[%s4697_s24 + $0x2f8] sm:$0xf]  ;;  %621 = vst [vmem:[%s4702_s7 + $0x78] sm:$0xf] %v3587_v30 }
  0x6c   : > { %623 = vst [vmem:[%s4702_s7 + $0x7c] sm:$0xf] %v3588_v31 }
  0x6d PF: > { %p3589_p12 = scmp.ge.s32.totalorder %s4417_s20, 1  ;;  %p709_p13 = scmp.lt.s32.totalorder %s4417_s20, 5 }
  0x6f   : > { %p710_p0 = pnand %p3589_p12, %p709_p13 }
  0x71   : > { %713 = sbr.rel (%p710_p0) target bundleno = 1131 (0x46b), region = 143 }
  0x78   : > { %s716_s25 = sand.u32 1, %s4393_s14   ;;  %vm770_vm0 = vcmask 7168   ;;  %v4419_v0 = vmov -inf   ;;  %v4420_v18 = vmov 0   ;;  %v4421_v26 = vmov 0.0   ;;  %s730_s27 = sand.u32 1, %s4385_s12  }
  0x79   : > { %s4768_s26 = sshll.u32 %s716_s25, 7  ;;  %771 = vst.msk [vmem:[#allocation2] sm:$0xff] %vm770_vm0, %v4419_v0  ;;  %772 = vst.msk [vmem:[#allocation2 + $0x8] sm:$0xff] %vm770_vm0, %v4419_v0  ;;  %4041 = vset.pattern.permute.xlu0 %v4420_v18  ;;  %4042 = vset.pattern.permute.xlu1 %v4420_v18  ;;  %s3592_s29 = sshll.u32 %s730_s27, 7 }
  0x7a   : > { %s4771_s28 = scalar_lea.vmem [#allocation6], %s4768_s26  ;;  %s4781_s14 = scalar_lea.vmem [#allocation5], %s4768_s26  ;;  %773 = vst.msk [vmem:[#allocation2 + $0x10] sm:$0xff] %vm770_vm0, %v4419_v0  ;;  %774 = vst.msk [vmem:[#allocation2 + $0x18] sm:$0xff] %vm770_vm0, %v4419_v0 }
  0x7b   : > { %v4043_v32 = vld [vmem:[%s4771_s28 + $0x40] sm:$0xff]   ;;  %v4045_v34 = vld [vmem:[%s4771_s28 + $0x48] sm:$0xff]   ;;  %v4047_v36 = vld [vmem:[%s4771_s28 + $0x50] sm:$0xff]   ;;  %775 = vst.msk [vmem:[#allocation2 + $0x20] sm:$0xff] %vm770_vm0, %v4419_v0  ;;  %s5065_s30 = scalar_lea.vmem [#allocation7], %s3592_s29  ;;  %s5939_s12 = scalar_lea.vmem [#allocation8], %s4768_s26 }
  0x7c   : > { %v4044_v33 = vld [vmem:[%s4771_s28] sm:$0xff]   ;;  %3806 = vmatprep.subr.bf16.mxu0 %v4043_v32  ;;  %v4046_v35 = vld [vmem:[%s4771_s28 + $0x8] sm:$0xff]   ;;  %v4048_v37 = vld [vmem:[%s4771_s28 + $0x10] sm:$0xff]   ;;  %776 = vst.msk [vmem:[#allocation2 + $0x28] sm:$0xff] %vm770_vm0, %v4419_v0  ;;  %s3675_s4 = sshll.u32 (%p4532_p10), %s4405_s17, 6 }
  0x7d   : > { %3807 = vmatpush3.bf16.xpose.msra.mxu0 %v4044_v33  ;;  %v4049_v38 = vld [vmem:[%s4771_s28 + $0x58] sm:$0xff]   ;;  %v4059_v39 = vld [vmem:[%s4781_s14] sm:$0xff]   ;;  %v4053_v43 = vld [vmem:[%s4771_s28 + $0x68] sm:$0xff]   ;;  %777 = vst.msk [vmem:[#allocation2 + $0x30] sm:$0xff] %vm770_vm0, %v4419_v0  ;;  %s3252_s5 = sadd.s32 (%p4532_p10), %s4401_s16, %s3675_s4 }
  0x7e   : > { %3808 = vmatprep.subr.bf16.mxu0 %v4045_v34  ;;  %3822 = vmatprep.mubr.bf16.mxu0 %v4059_v39  ;;  %v4050_v40 = vld [vmem:[%s4771_s28 + $0x18] sm:$0xff]   ;;  %v4051_v41 = vld [vmem:[%s4771_s28 + $0x60] sm:$0xff]   ;;  %v4054_v44 = vld [vmem:[%s4771_s28 + $0x28] sm:$0xff]   ;;  %778 = vst.msk [vmem:[#allocation2 + $0x38] sm:$0xff] %vm770_vm0, %v4419_v0  ;;  %s3676_s10 = sshll.u32 (%p4532_p10), %s3252_s5, 2 }
  0x7f   : > { %v4052_v42 = vld [vmem:[%s4771_s28 + $0x20] sm:$0xff]   ;;  %v4055_v45 = vld [vmem:[%s4771_s28 + $0x70] sm:$0xff]   ;;  %v4057_v47 = vld [vmem:[%s4771_s28 + $0x78] sm:$0xff]   ;;  %779 = vst.msk [vmem:[#allocation2 + $0x40] sm:$0xff] %vm770_vm0, %v4419_v0  ;;  %s6002_s21 = scalar_lea.vmem (%p4532_p10), %s6091_s3, %s3676_s10 }
  0x80   : > { %v4056_v46 = vld [vmem:[%s4771_s28 + $0x30] sm:$0xff]   ;;  %v4058_v48 = vld [vmem:[%s4771_s28 + $0x38] sm:$0xff]   ;;  %v4060_v49 = vld [vmem:[%s4781_s14 + $0x8] sm:$0xff]   ;;  %780 = vst.msk [vmem:[#allocation2 + $0x48] sm:$0xff] %vm770_vm0, %v4419_v0 }
  0x81   : > { %v4061_v50 = vld [vmem:[%s4781_s14 + $0x10] sm:$0xff]   ;;  %v4062_v51 = vld [vmem:[%s4781_s14 + $0x18] sm:$0xff]   ;;  %v4063_v52 = vld [vmem:[%s4781_s14 + $0x20] sm:$0xff]   ;;  %781 = vst.msk [vmem:[#allocation2 + $0x50] sm:$0xff] %vm770_vm0, %v4419_v0 }
  0x82   : > { %v4064_v53 = vld [vmem:[%s4781_s14 + $0x28] sm:$0xff]   ;;  %v4065_v54 = vld [vmem:[%s4781_s14 + $0x30] sm:$0xff]   ;;  %v4066_v55 = vld [vmem:[%s4781_s14 + $0x38] sm:$0xff]   ;;  %782 = vst.msk [vmem:[#allocation2 + $0x58] sm:$0xff] %vm770_vm0, %v4419_v0 }
  0x83   : > { %v4067_v56 = vld [vmem:[%s4781_s14 + $0x40] sm:$0xff]   ;;  %v4068_v57 = vld [vmem:[%s4781_s14 + $0x48] sm:$0xff]   ;;  %v4069_v58 = vld [vmem:[%s4781_s14 + $0x50] sm:$0xff]   ;;  %783 = vst.msk [vmem:[#allocation2 + $0x60] sm:$0xff] %vm770_vm0, %v4419_v0 }
  0x84   : > { %v4070_v59 = vld [vmem:[%s4781_s14 + $0x58] sm:$0xff]   ;;  %v4071_v60 = vld [vmem:[%s4781_s14 + $0x60] sm:$0xff]   ;;  %v4072_v61 = vld [vmem:[%s4781_s14 + $0x68] sm:$0xff]   ;;  %784 = vst.msk [vmem:[#allocation2 + $0x68] sm:$0xff] %vm770_vm0, %v4419_v0 }
  0x85   : > { %3809 = vmatpush3.bf16.xpose.msra.mxu0 %v4046_v35  ;;  %v4073_v62 = vld [vmem:[%s4781_s14 + $0x70] sm:$0xff]   ;;  %v4074_v63 = vld [vmem:[%s4781_s14 + $0x78] sm:$0xff]   ;;  %785 = vst.msk [vmem:[#allocation2 + $0x70] sm:$0xff] %vm770_vm0, %v4419_v0  ;;  %786 = vst.msk [vmem:[#allocation2 + $0x78] sm:$0xff] %vm770_vm0, %v4419_v0 }
  0x86   : > { %3810 = vmatprep.subr.bf16.mxu0 %v4047_v36  ;;  %787 = vst.msk [vmem:[#allocation2 + $0x80] sm:$0xff] %vm770_vm0, %v4419_v0  ;;  %788 = vst.msk [vmem:[#allocation2 + $0x88] sm:$0xff] %vm770_vm0, %v4419_v0 }
  0x87   : > { %789 = vst.msk [vmem:[#allocation2 + $0x90] sm:$0xff] %vm770_vm0, %v4419_v0  ;;  %790 = vst.msk [vmem:[#allocation2 + $0x98] sm:$0xff] %vm770_vm0, %v4419_v0 }
  0x88   : > { %791 = vst.msk [vmem:[#allocation2 + $0xa0] sm:$0xff] %vm770_vm0, %v4419_v0  ;;  %792 = vst.msk [vmem:[#allocation2 + $0xa8] sm:$0xff] %vm770_vm0, %v4419_v0 }
  0x89   : > { %793 = vst.msk [vmem:[#allocation2 + $0xb0] sm:$0xff] %vm770_vm0, %v4419_v0  ;;  %794 = vst.msk [vmem:[#allocation2 + $0xb8] sm:$0xff] %vm770_vm0, %v4419_v0 }
  0x8a   : > { %795 = vst.msk [vmem:[#allocation2 + $0xc0] sm:$0xff] %vm770_vm0, %v4419_v0  ;;  %796 = vst.msk [vmem:[#allocation2 + $0xc8] sm:$0xff] %vm770_vm0, %v4419_v0 }
  0x8b   : > { %797 = vst.msk [vmem:[#allocation2 + $0xd0] sm:$0xff] %vm770_vm0, %v4419_v0  ;;  %798 = vst.msk [vmem:[#allocation2 + $0xd8] sm:$0xff] %vm770_vm0, %v4419_v0 }
  0x8c   : > { %799 = vst.msk [vmem:[#allocation2 + $0xe0] sm:$0xff] %vm770_vm0, %v4419_v0  ;;  %800 = vst.msk [vmem:[#allocation2 + $0xe8] sm:$0xff] %vm770_vm0, %v4419_v0 }
  0x8d   : > { %3811 = vmatpush3.bf16.xpose.msra.mxu0 %v4048_v37  ;;  %801 = vst.msk [vmem:[#allocation2 + $0xf0] sm:$0xff] %vm770_vm0, %v4419_v0  ;;  %802 = vst.msk [vmem:[#allocation2 + $0xf8] sm:$0xff] %vm770_vm0, %v4419_v0 }
  0x8e   : > { %3812 = vmatprep.subr.bf16.mxu0 %v4049_v38  ;;  %804 = vst.msk [vmem:[#allocation3 + $0x8] sm:$0xff] %vm770_vm0, %v4421_v26  ;;  %803 = vst.msk [vmem:[#allocation3] sm:$0xff] %vm770_vm0, %v4421_v26 }
  0x8f   : > { %805 = vst.msk [vmem:[#allocation3 + $0x10] sm:$0xff] %vm770_vm0, %v4421_v26  ;;  %806 = vst.msk [vmem:[#allocation3 + $0x18] sm:$0xff] %vm770_vm0, %v4421_v26 }
  0x90   : > { %807 = vst.msk [vmem:[#allocation3 + $0x20] sm:$0xff] %vm770_vm0, %v4421_v26  ;;  %808 = vst.msk [vmem:[#allocation3 + $0x28] sm:$0xff] %vm770_vm0, %v4421_v26 }
  0x91   : > { %809 = vst.msk [vmem:[#allocation3 + $0x30] sm:$0xff] %vm770_vm0, %v4421_v26  ;;  %810 = vst.msk [vmem:[#allocation3 + $0x38] sm:$0xff] %vm770_vm0, %v4421_v26 }
  0x92   : > { %811 = vst.msk [vmem:[#allocation3 + $0x40] sm:$0xff] %vm770_vm0, %v4421_v26  ;;  %812 = vst.msk [vmem:[#allocation3 + $0x48] sm:$0xff] %vm770_vm0, %v4421_v26 }
  0x93   : > { %813 = vst.msk [vmem:[#allocation3 + $0x50] sm:$0xff] %vm770_vm0, %v4421_v26  ;;  %814 = vst.msk [vmem:[#allocation3 + $0x58] sm:$0xff] %vm770_vm0, %v4421_v26 }
  0x94   : > { %815 = vst.msk [vmem:[#allocation3 + $0x60] sm:$0xff] %vm770_vm0, %v4421_v26  ;;  %816 = vst.msk [vmem:[#allocation3 + $0x68] sm:$0xff] %vm770_vm0, %v4421_v26 }
  0x95   : > { %3813 = vmatpush3.bf16.xpose.msra.mxu0 %v4050_v40  ;;  %817 = vst.msk [vmem:[#allocation3 + $0x70] sm:$0xff] %vm770_vm0, %v4421_v26  ;;  %818 = vst.msk [vmem:[#allocation3 + $0x78] sm:$0xff] %vm770_vm0, %v4421_v26 }
  0x96   : > { %3814 = vmatprep.subr.bf16.mxu0 %v4051_v41  ;;  %819 = vst.msk [vmem:[#allocation3 + $0x80] sm:$0xff] %vm770_vm0, %v4421_v26  ;;  %820 = vst.msk [vmem:[#allocation3 + $0x88] sm:$0xff] %vm770_vm0, %v4421_v26 }
  0x97   : > { %821 = vst.msk [vmem:[#allocation3 + $0x90] sm:$0xff] %vm770_vm0, %v4421_v26  ;;  %822 = vst.msk [vmem:[#allocation3 + $0x98] sm:$0xff] %vm770_vm0, %v4421_v26 }
  0x98   : > { %823 = vst.msk [vmem:[#allocation3 + $0xa0] sm:$0xff] %vm770_vm0, %v4421_v26  ;;  %824 = vst.msk [vmem:[#allocation3 + $0xa8] sm:$0xff] %vm770_vm0, %v4421_v26 }
  0x99   : > { %825 = vst.msk [vmem:[#allocation3 + $0xb0] sm:$0xff] %vm770_vm0, %v4421_v26  ;;  %826 = vst.msk [vmem:[#allocation3 + $0xb8] sm:$0xff] %vm770_vm0, %v4421_v26 }
  0x9a   : > { %827 = vst.msk [vmem:[#allocation3 + $0xc0] sm:$0xff] %vm770_vm0, %v4421_v26  ;;  %828 = vst.msk [vmem:[#allocation3 + $0xc8] sm:$0xff] %vm770_vm0, %v4421_v26 }
  0x9b   : > { %829 = vst.msk [vmem:[#allocation3 + $0xd0] sm:$0xff] %vm770_vm0, %v4421_v26  ;;  %830 = vst.msk [vmem:[#allocation3 + $0xd8] sm:$0xff] %vm770_vm0, %v4421_v26 }
  0x9c   : > { %831 = vst.msk [vmem:[#allocation3 + $0xe0] sm:$0xff] %vm770_vm0, %v4421_v26  ;;  %832 = vst.msk [vmem:[#allocation3 + $0xe8] sm:$0xff] %vm770_vm0, %v4421_v26 }
  0x9d   : > { %3815 = vmatpush3.bf16.xpose.msra.mxu0 %v4052_v42  ;;  %833 = vst.msk [vmem:[#allocation3 + $0xf0] sm:$0xff] %vm770_vm0, %v4421_v26  ;;  %834 = vst.msk [vmem:[#allocation3 + $0xf8] sm:$0xff] %vm770_vm0, %v4421_v26 }
  0x9e   : > { %3816 = vmatprep.subr.bf16.mxu0 %v4053_v43 }
  0xa5   : > { %3817 = vmatpush3.bf16.xpose.msra.mxu0 %v4054_v44 }
  0xa6   : > { %3818 = vmatprep.subr.bf16.mxu0 %v4055_v45 }
  0xad   : > { %3819 = vmatpush3.bf16.xpose.msra.mxu0 %v4056_v46 }
  0xae   : > { %3820 = vmatprep.subr.bf16.mxu0 %v4057_v47 }
  0xb5   : > { %3821 = vmatpush3.bf16.xpose.msra.mxu0 %v4058_v48 }
  0xbc   : > { %3823 = vmatmul.mubr.bf16.vlgmr.msra.gmra.mrb[0].mxu0 %v4059_v39 }
  0xbd   : > { %3824 = vmatprep.mubr.bf16.mxu0 %v4060_v49 }
  0xc4   : > { %3825 = vmatmul.mubr.bf16.gmra.mrb[4].mxu0 %v4060_v49 }
  0xc5   : > { %3826 = vmatprep.mubr.bf16.mxu0 %v4061_v50 }
  0xcc   : > { %3827 = vmatmul.mubr.bf16.gmra.mrb[8].mxu0 %v4061_v50 }
  0xcd   : > { %3828 = vmatprep.mubr.bf16.mxu0 %v4062_v51 }
  0xd4   : > { %3829 = vmatmul.mubr.bf16.gmra.mrb[12].mxu0 %v4062_v51 }
  0xd5   : > { %3830 = vmatprep.mubr.bf16.mxu0 %v4063_v52 }
  0xdc   : > { %3831 = vmatmul.mubr.bf16.gmra.mrb[16].mxu0 %v4063_v52 }
  0xdd   : > { %3832 = vmatprep.mubr.bf16.mxu0 %v4064_v53 }
  0xe4   : > { %3833 = vmatmul.mubr.bf16.gmra.mrb[20].mxu0 %v4064_v53 }
  0xe5   : > { %3834 = vmatprep.mubr.bf16.mxu0 %v4065_v54 }
  0xec   : > { %3835 = vmatmul.mubr.bf16.gmra.mrb[24].mxu0 %v4065_v54 }
  0xed   : > { %3836 = vmatprep.mubr.bf16.mxu0 %v4066_v55 }
  0xf4   : > { %3837 = vmatmul.mubr.bf16.gmra.mrb[28].mxu0 %v4066_v55 }
  0xf5   : > { %3838 = vmatprep.mubr.bf16.mxu0 %v4067_v56 }
  0xfc   : > { %3839 = vmatmul.mubr.bf16.gmra.mrb[32].mxu0 %v4067_v56 }
  0xfd   : > { %3840 = vmatprep.mubr.bf16.mxu0 %v4068_v57 }
 0x104   : > { %3841 = vmatmul.mubr.bf16.gmra.mrb[36].mxu0 %v4068_v57 }
 0x105   : > { %3842 = vmatprep.mubr.bf16.mxu0 %v4069_v58 }
 0x10c   : > { %3843 = vmatmul.mubr.bf16.gmra.mrb[40].mxu0 %v4069_v58 }
 0x10d   : > { %3844 = vmatprep.mubr.bf16.mxu0 %v4070_v59 }
 0x114   : > { %3845 = vmatmul.mubr.bf16.gmra.mrb[44].mxu0 %v4070_v59 }
 0x115   : > { %3846 = vmatprep.mubr.bf16.mxu0 %v4071_v60 }
 0x11c   : > { %3847 = vmatmul.mubr.bf16.gmra.mrb[48].mxu0 %v4071_v60 }
 0x11d   : > { %3848 = vmatprep.mubr.bf16.mxu0 %v4072_v61 }
 0x124   : > { %3849 = vmatmul.mubr.bf16.gmra.mrb[52].mxu0 %v4072_v61 }
 0x125   : > { %3850 = vmatprep.mubr.bf16.mxu0 %v4073_v62 }
 0x12c   : > { %3851 = vmatmul.mubr.bf16.gmra.mrb[56].mxu0 %v4073_v62 }
 0x12d   : > { %3852 = vmatprep.mubr.bf16.mxu0 %v4074_v63 }
 0x134   : > { %3853 = vmatmul.mubr.bf16.gmra.mrb[60].mxu0 %v4074_v63 }
 0x18f   : > { %v4840_v1 = vpop.f32.mrb[0].mxu0 }
 0x190   : > { %v4842_v2 = vpop.f32.mrb[1].mxu0 }
 0x191   : > { %v4844_v3 = vpop.f32.mrb[2].mxu0  ;;  %v1348_v4 = vmax.f32 %v4840_v1, %v4842_v2 }
 0x192   : > { %v4848_v5 = vpop.f32.mrb[3].mxu0 }
 0x193   : > { %1349 = vmax.xlane.f32.xlu0 %v1348_v4  ;;  %v1351_v6 = vmax.f32 %v4844_v3, %v4848_v5 }
 0x197   : > { %1352 = vmax.xlane.f32.xlu0 %v1351_v6  ;;  %v4852_v7 = vpop.f32.mrb[4].mxu0 }
 0x198   : > { %v4854_v8 = vpop.f32.mrb[5].mxu0 }
 0x199   : > { %v4856_v9 = vpop.f32.mrb[6].mxu0  ;;  %v1354_v10 = vmax.f32 %v4852_v7, %v4854_v8 }
 0x19a   : > { %v4860_v11 = vpop.f32.mrb[7].mxu0 }
 0x19b   : > { %1355 = vmax.xlane.f32.xlu1 %v1354_v10  ;;  %v1357_v12 = vmax.f32 %v4856_v9, %v4860_v11 }
 0x19f   : > { %1358 = vmax.xlane.f32.xlu1 %v1357_v12  ;;  %v4864_v13 = vpop.f32.mrb[8].mxu0 }
 0x1a0   : > { %v4866_v14 = vpop.f32.mrb[9].mxu0 }
 0x1a1   : > { %v4868_v15 = vpop.f32.mrb[10].mxu0  ;;  %v1360_v16 = vmax.f32 %v4864_v13, %v4866_v14 }
 0x1a2   : > { %6168 = vst [vmem:[#allocation9_spill] sm:$0xff] %v4868_v15  ;;  %v4872_v17 = vpop.f32.mrb[11].mxu0 }
 0x1a3   : > { %6169 = vst [vmem:[#allocation10_spill] sm:$0xff] %v4872_v17  ;;  %1361 = vmax.xlane.f32.xlu0 %v1360_v16  ;;  %v1363_v19 = vmax.f32 %v4868_v15, %v4872_v17 }
 0x1a5   : > { %1364 = vmax.xlane.f32.xlu1 %v1363_v19 }
 0x1a7   : > { %v4876_v20 = vpop.f32.mrb[12].mxu0 }
 0x1a8   : > { %6170 = vst [vmem:[#allocation11_spill] sm:$0xff] %v4876_v20  ;;  %v4878_v21 = vpop.f32.mrb[13].mxu0 }
 0x1a9   : > { %6171 = vst [vmem:[#allocation12_spill] sm:$0xff] %v4878_v21  ;;  %v4880_v22 = vpop.f32.mrb[14].mxu0  ;;  %v1366_v23 = vmax.f32 %v4876_v20, %v4878_v21  ;;  %v5325_v21 = vld [vmem:[#allocation2 + $0xc8] sm:$0xff]  ;;  %v5339_v20 = vld [vmem:[#allocation2 + $0xd0] sm:$0xff] }
 0x1aa   : > { %6172 = vst [vmem:[#allocation13_spill] sm:$0xff] %v4880_v22  ;;  %v4884_v24 = vpop.f32.mrb[15].mxu0  ;;  %6227 = vst [vmem:[#allocation68_spill] sm:$0xff] %v5325_v21 }
 0x1ab   : > { %6173 = vst [vmem:[#allocation14_spill] sm:$0xff] %v4884_v24  ;;  %1367 = vmax.xlane.f32.xlu0 %v1366_v23  ;;  %v1369_v25 = vmax.f32 %v4880_v22, %v4884_v24  ;;  %6230 = vst [vmem:[#allocation71_spill] sm:$0xff] %v5339_v20 }
 0x1ad   : > { %1370 = vmax.xlane.f32.xlu1 %v1369_v25 }
 0x1af   : > { %v4920_v27 = vpop.f32.mrb[16].mxu0 }
 0x1b0   : > { %6174 = vst [vmem:[#allocation15_spill] sm:$0xff] %v4920_v27  ;;  %v4922_v28 = vpop.f32.mrb[17].mxu0 }
 0x1b1   : > { %6175 = vst [vmem:[#allocation16_spill] sm:$0xff] %v4922_v28  ;;  %v4924_v29 = vpop.f32.mrb[18].mxu0  ;;  %v1372_v30 = vmax.f32 %v4920_v27, %v4922_v28  ;;  %v5305_v28 = vld [vmem:[#allocation2 + $0xb8] sm:$0xff] }
 0x1b2   : > { %6176 = vst [vmem:[#allocation17_spill] sm:$0xff] %v4924_v29  ;;  %v4928_v31 = vpop.f32.mrb[19].mxu0  ;;  %6223 = vst [vmem:[#allocation64_spill] sm:$0xff] %v5305_v28 }
 0x1b3   : > { %6177 = vst [vmem:[#allocation18_spill] sm:$0xff] %v4928_v31  ;;  %1373 = vmax.xlane.f32.xlu0 %v1372_v30  ;;  %v1375_v32 = vmax.f32 %v4924_v29, %v4928_v31 }
 0x1b5   : > { %1376 = vmax.xlane.f32.xlu1 %v1375_v32 }
 0x1b7   : > { %v4932_v33 = vpop.f32.mrb[20].mxu0 }
 0x1b8   : > { %6178 = vst [vmem:[#allocation19_spill] sm:$0xff] %v4932_v33  ;;  %v4934_v34 = vpop.f32.mrb[21].mxu0 }
 0x1b9   : > { %6179 = vst [vmem:[#allocation20_spill] sm:$0xff] %v4934_v34  ;;  %v4936_v35 = vpop.f32.mrb[22].mxu0  ;;  %v1378_v36 = vmax.f32 %v4932_v33, %v4934_v34  ;;  %v5285_v34 = vld [vmem:[#allocation2 + $0xa8] sm:$0xff] }
 0x1ba   : > { %6180 = vst [vmem:[#allocation21_spill] sm:$0xff] %v4936_v35  ;;  %v4940_v37 = vpop.f32.mrb[23].mxu0 }
 0x1bb   : > { %6181 = vst [vmem:[#allocation22_spill] sm:$0xff] %v4940_v37  ;;  %1379 = vmax.xlane.f32.xlu0 %v1378_v36  ;;  %v1381_v38 = vmax.f32 %v4936_v35, %v4940_v37 }
 0x1bd   : > { %1382 = vmax.xlane.f32.xlu1 %v1381_v38 }
 0x1bf   : > { %v4944_v39 = vpop.f32.mrb[24].mxu0 }
 0x1c0   : > { %6182 = vst [vmem:[#allocation23_spill] sm:$0xff] %v4944_v39  ;;  %v4946_v40 = vpop.f32.mrb[25].mxu0 }
 0x1c1   : > { %6183 = vst [vmem:[#allocation24_spill] sm:$0xff] %v4946_v40  ;;  %v4948_v41 = vpop.f32.mrb[26].mxu0  ;;  %v1384_v42 = vmax.f32 %v4944_v39, %v4946_v40  ;;  %v5265_v40 = vld [vmem:[#allocation2 + $0x98] sm:$0xff] }
 0x1c2   : > { %6184 = vst [vmem:[#allocation25_spill] sm:$0xff] %v4948_v41  ;;  %v4952_v43 = vpop.f32.mrb[27].mxu0 }
 0x1c3   : > { %6185 = vst [vmem:[#allocation26_spill] sm:$0xff] %v4952_v43  ;;  %1385 = vmax.xlane.f32.xlu0 %v1384_v42  ;;  %v1387_v44 = vmax.f32 %v4948_v41, %v4952_v43 }
 0x1c5   : > { %1388 = vmax.xlane.f32.xlu1 %v1387_v44 }
 0x1c7   : > { %v4956_v45 = vpop.f32.mrb[28].mxu0 }
 0x1c8   : > { %6186 = vst [vmem:[#allocation27_spill] sm:$0xff] %v4956_v45  ;;  %v4958_v46 = vpop.f32.mrb[29].mxu0 }
 0x1c9   : > { %6187 = vst [vmem:[#allocation28_spill] sm:$0xff] %v4958_v46  ;;  %v4960_v47 = vpop.f32.mrb[30].mxu0  ;;  %v1390_v48 = vmax.f32 %v4956_v45, %v4958_v46  ;;  %v5245_v46 = vld [vmem:[#allocation2 + $0x88] sm:$0xff] }
 0x1ca   : > { %6188 = vst [vmem:[#allocation29_spill] sm:$0xff] %v4960_v47  ;;  %v4964_v49 = vpop.f32.mrb[31].mxu0 }
 0x1cb   : > { %6189 = vst [vmem:[#allocation30_spill] sm:$0xff] %v4964_v49  ;;  %1391 = vmax.xlane.f32.xlu0 %v1390_v48  ;;  %v1393_v50 = vmax.f32 %v4960_v47, %v4964_v49 }
 0x1cd   : > { %1394 = vmax.xlane.f32.xlu1 %v1393_v50 }
 0x1cf   : > { %v4968_v51 = vpop.f32.mrb[32].mxu0 }
 0x1d0   : > { %6190 = vst [vmem:[#allocation31_spill] sm:$0xff] %v4968_v51  ;;  %v4970_v52 = vpop.f32.mrb[33].mxu0 }
 0x1d1   : > { %6191 = vst [vmem:[#allocation32_spill] sm:$0xff] %v4970_v52  ;;  %v4972_v53 = vpop.f32.mrb[34].mxu0  ;;  %v1396_v54 = vmax.f32 %v4968_v51, %v4970_v52  ;;  %v5225_v52 = vld [vmem:[#allocation2 + $0x78] sm:$0xff] }
 0x1d2   : > { %6192 = vst [vmem:[#allocation33_spill] sm:$0xff] %v4972_v53  ;;  %v4976_v55 = vpop.f32.mrb[35].mxu0 }
 0x1d3   : > { %6193 = vst [vmem:[#allocation34_spill] sm:$0xff] %v4976_v55  ;;  %1397 = vmax.xlane.f32.xlu0 %v1396_v54  ;;  %v1399_v56 = vmax.f32 %v4972_v53, %v4976_v55 }
 0x1d5   : > { %1400 = vmax.xlane.f32.xlu1 %v1399_v56 }
 0x1d7   : > { %v4980_v57 = vpop.f32.mrb[36].mxu0 }
 0x1d8   : > { %6194 = vst [vmem:[#allocation35_spill] sm:$0xff] %v4980_v57  ;;  %v4982_v58 = vpop.f32.mrb[37].mxu0 }
 0x1d9   : > { %6195 = vst [vmem:[#allocation36_spill] sm:$0xff] %v4982_v58  ;;  %v4984_v59 = vpop.f32.mrb[38].mxu0  ;;  %v1402_v60 = vmax.f32 %v4980_v57, %v4982_v58  ;;  %v5205_v58 = vld [vmem:[#allocation2 + $0x68] sm:$0xff] }
 0x1da   : > { %6196 = vst [vmem:[#allocation37_spill] sm:$0xff] %v4984_v59  ;;  %v4988_v61 = vpop.f32.mrb[39].mxu0 }
 0x1db   : > { %6197 = vst [vmem:[#allocation38_spill] sm:$0xff] %v4988_v61  ;;  %1403 = vmax.xlane.f32.xlu0 %v1402_v60  ;;  %v1405_v62 = vmax.f32 %v4984_v59, %v4988_v61 }
 0x1dd   : > { %1406 = vmax.xlane.f32.xlu1 %v1405_v62 }
 0x1df   : > { %v4992_v63 = vpop.f32.mrb[40].mxu0 }
 0x1e0   : > { %6198 = vst [vmem:[#allocation39_spill] sm:$0xff] %v4992_v63  ;;  %v4994_v0 = vpop.f32.mrb[41].mxu0 }
 0x1e1   : > { %6199 = vst [vmem:[#allocation40_spill] sm:$0xff] %v4994_v0  ;;  %v4996_v4 = vpop.f32.mrb[42].mxu0  ;;  %v1408_v6 = vmax.f32 %v4992_v63, %v4994_v0  ;;  %v5185_v0 = vld [vmem:[#allocation2 + $0x58] sm:$0xff] }
 0x1e2   : > { %6200 = vst [vmem:[#allocation41_spill] sm:$0xff] %v4996_v4  ;;  %v5000_v10 = vpop.f32.mrb[43].mxu0 }
 0x1e3   : > { %6201 = vst [vmem:[#allocation42_spill] sm:$0xff] %v5000_v10  ;;  %1409 = vmax.xlane.f32.xlu0 %v1408_v6  ;;  %v1411_v12 = vmax.f32 %v4996_v4, %v5000_v10 }
 0x1e5   : > { %1412 = vmax.xlane.f32.xlu1 %v1411_v12 }
 0x1e7   : > { %v5004_v16 = vpop.f32.mrb[44].mxu0 }
 0x1e8   : > { %6202 = vst [vmem:[#allocation43_spill] sm:$0xff] %v5004_v16  ;;  %v5006_v18 = vpop.f32.mrb[45].mxu0 }
 0x1e9   : > { %6203 = vst [vmem:[#allocation44_spill] sm:$0xff] %v5006_v18  ;;  %v5008_v19 = vpop.f32.mrb[46].mxu0  ;;  %v1414_v23 = vmax.f32 %v5004_v16, %v5006_v18  ;;  %v5142_v18 = vld [vmem:[#allocation2 + $0x30] sm:$0xff] }
 0x1ea   : > { %6204 = vst [vmem:[#allocation45_spill] sm:$0xff] %v5008_v19  ;;  %v5012_v25 = vpop.f32.mrb[47].mxu0 }
 0x1eb   : > { %6205 = vst [vmem:[#allocation46_spill] sm:$0xff] %v5012_v25  ;;  %1415 = vmax.xlane.f32.xlu0 %v1414_v23  ;;  %v1417_v26 = vmax.f32 %v5008_v19, %v5012_v25  ;;  %v4088_v25 = vld [vmem:[%s5065_s30 + $0x30] sm:$0xff]  }
 0x1ed   : > { %1418 = vmax.xlane.f32.xlu1 %v1417_v26 }
 0x1ef   : > { %v5016_v30 = vpop.f32.mrb[48].mxu0 }
 0x1f0   : > { %6206 = vst [vmem:[#allocation47_spill] sm:$0xff] %v5016_v30  ;;  %v5018_v32 = vpop.f32.mrb[49].mxu0 }
 0x1f1   : > { %6207 = vst [vmem:[#allocation48_spill] sm:$0xff] %v5018_v32  ;;  %v5020_v36 = vpop.f32.mrb[50].mxu0  ;;  %v1420_v38 = vmax.f32 %v5016_v30, %v5018_v32  ;;  %v5114_v32 = vld [vmem:[#allocation2 + $0x20] sm:$0xff] }
 0x1f2   : > { %6208 = vst [vmem:[#allocation49_spill] sm:$0xff] %v5020_v36  ;;  %v5024_v42 = vpop.f32.mrb[51].mxu0 }
 0x1f3   : > { %6209 = vst [vmem:[#allocation50_spill] sm:$0xff] %v5024_v42  ;;  %1421 = vmax.xlane.f32.xlu0 %v1420_v38  ;;  %v1423_v44 = vmax.f32 %v5020_v36, %v5024_v42  ;;  %v5102_v42 = vld [vmem:[#allocation2 + $0x18] sm:$0xff]  ;;  %v4086_v36 = vld [vmem:[%s5065_s30 + $0x28] sm:$0xff]  }
 0x1f5   : > { %1424 = vmax.xlane.f32.xlu1 %v1423_v44 }
 0x1f7   : > { %v5028_v48 = vpop.f32.mrb[52].mxu0 }
 0x1f8   : > { %6210 = vst [vmem:[#allocation51_spill] sm:$0xff] %v5028_v48  ;;  %v5030_v50 = vpop.f32.mrb[53].mxu0 }
 0x1f9   : > { %6211 = vst [vmem:[#allocation52_spill] sm:$0xff] %v5030_v50  ;;  %v5032_v54 = vpop.f32.mrb[54].mxu0  ;;  %v1426_v56 = vmax.f32 %v5028_v48, %v5030_v50  ;;  %v4084_v48 = vld [vmem:[%s5065_s30 + $0x20] sm:$0xff]  }
 0x1fa   : > { %6212 = vst [vmem:[#allocation53_spill] sm:$0xff] %v5032_v54  ;;  %v5036_v60 = vpop.f32.mrb[55].mxu0 }
 0x1fb   : > { %6213 = vst [vmem:[#allocation54_spill] sm:$0xff] %v5036_v60  ;;  %1427 = vmax.xlane.f32.xlu0 %v1426_v56  ;;  %v1429_v62 = vmax.f32 %v5032_v54, %v5036_v60 }
 0x1fd   : > { %1430 = vmax.xlane.f32.xlu1 %v1429_v62 }
 0x1ff   : > { %v5040_v6 = vpop.f32.mrb[56].mxu0 }
 0x200   : > { %6214 = vst [vmem:[#allocation55_spill] sm:$0xff] %v5040_v6  ;;  %v5042_v12 = vpop.f32.mrb[57].mxu0 }
 0x201   : > { %6215 = vst [vmem:[#allocation56_spill] sm:$0xff] %v5042_v12  ;;  %v5044_v23 = vpop.f32.mrb[58].mxu0  ;;  %v1432_v26 = vmax.f32 %v5040_v6, %v5042_v12  ;;  %v4082_v6 = vld [vmem:[%s5065_s30 + $0x18] sm:$0xff]  }
 0x202   : > { %6216 = vst [vmem:[#allocation57_spill] sm:$0xff] %v5044_v23  ;;  %v5048_v38 = vpop.f32.mrb[59].mxu0 }
 0x203   : > { %6217 = vst [vmem:[#allocation58_spill] sm:$0xff] %v5048_v38  ;;  %1433 = vmax.xlane.f32.xlu0 %v1432_v26  ;;  %v1435_v44 = vmax.f32 %v5044_v23, %v5048_v38  ;;  %v4075_v26 = vld [vmem:[%s5065_s30 + $0x40] sm:$0xff]   ;;  %v4080_v38 = vld [vmem:[%s5065_s30 + $0x10] sm:$0xff]  }
 0x204   : > { %3854 = vmatprep.subr.bf16.mxu1 %v4075_v26  ;;  %v4083_v26 = vld [vmem:[%s5065_s30 + $0x60] sm:$0xff]  }
 0x205   : > { %1436 = vmax.xlane.f32.xlu1 %v1435_v44  ;;  %v4076_v44 = vld [vmem:[%s5065_s30] sm:$0xff]  }
 0x206   : > { %3855 = vmatpush3.bf16.msra.mxu1 %v4076_v44  ;;  %v4081_v44 = vld [vmem:[%s5065_s30 + $0x58] sm:$0xff]  }
 0x207   : > { %v5052_v56 = vpop.f32.mrb[60].mxu0 }
 0x208   : > { %6218 = vst [vmem:[#allocation59_spill] sm:$0xff] %v5052_v56  ;;  %v5054_v62 = vpop.f32.mrb[61].mxu0 }
 0x209   : > { %6219 = vst [vmem:[#allocation60_spill] sm:$0xff] %v5054_v62  ;;  %v5056_v60 = vpop.f32.mrb[62].mxu0  ;;  %v1438_v54 = vmax.f32 %v5052_v56, %v5054_v62  ;;  %v4077_v62 = vld [vmem:[%s5065_s30 + $0x48] sm:$0xff]   ;;  %v5070_v56 = vld [vmem:[#allocation2] sm:$0xff] }
 0x20a   : > { %6220 = vst [vmem:[#allocation61_spill] sm:$0xff] %v5056_v60  ;;  %v5060_v50 = vpop.f32.mrb[63].mxu0  ;;  %3856 = vmatprep.subr.bf16.mxu1 %v4077_v62 }
 0x20b   : > { %6221 = vst [vmem:[#allocation62_spill] sm:$0xff] %v5060_v50  ;;  %v1441_v12 = vmax.f32 %v5056_v60, %v5060_v50  ;;  %1439 = vmax.xlane.f32.xlu0 %v1438_v54  ;;  %v4078_v54 = vld [vmem:[%s5065_s30 + $0x8] sm:$0xff]  }
 0x20c   : > { %3857 = vmatpush3.bf16.msra.mxu1 %v4078_v54  ;;  %v5074_v60 = vld [vmem:[#allocation2 + $0x8] sm:$0xff] }
 0x20d   : > { %1442 = vmax.xlane.f32.xlu1 %v1441_v12  ;;  %v4079_v12 = vld [vmem:[%s5065_s30 + $0x50] sm:$0xff]  }
 0x20e   : > { %3858 = vmatprep.subr.bf16.mxu1 %v4079_v12  ;;  %v4085_v12 = vld [vmem:[%s5065_s30 + $0x68] sm:$0xff]  }
 0x210   : > { %3859 = vmatpush3.bf16.msra.mxu1 %v4080_v38 }
 0x211   : > { %3860 = vmatprep.subr.bf16.mxu1 %v4081_v44  ;;  %v5121_v44 = vld [vmem:[#allocation2 + $0x28] sm:$0xff] }
 0x214   : > { %3861 = vmatpush3.bf16.msra.mxu1 %v4082_v6 }
 0x215   : > { %3862 = vmatprep.subr.bf16.mxu1 %v4083_v26 }
 0x218   : > { %3863 = vmatpush3.bf16.msra.mxu1 %v4084_v48 }
 0x219   : > { %3864 = vmatprep.subr.bf16.mxu1 %v4085_v12 }
 0x21c   : > { %3865 = vmatpush3.bf16.msra.mxu1 %v4086_v36  ;;  %v4089_v36 = vld [vmem:[%s5065_s30 + $0x78] sm:$0xff]  }
 0x220   : > { %v1350_v50 = vpop.xlane.xlu0 %1349 }
 0x221   : > { %v5078_v23 = vmax.f32 %v5070_v56, %v1350_v50  ;;  %v5090_v50 = vld [vmem:[#allocation2 + $0x10] sm:$0xff] }
 0x223   : > { %2758 = vst.msk [vmem:[#allocation2] sm:$0xff] %vm770_vm0, %v5078_v23  ;;  %1574 = vperm.xlu0 %4041, %v5078_v23  }
 0x224   : > { %v1353_v62 = vpop.xlane.xlu0 %1352 }
 0x225   : > { %v5087_v54 = vmax.f32 %v5074_v60, %v1353_v62 }
 0x227   : > { %2759 = vst.msk [vmem:[#allocation2 + $0x8] sm:$0xff] %vm770_vm0, %v5087_v54  ;;  %1579 = vperm.xlu1 %4042, %v5087_v54  }
 0x228   : > { %v1356_v38 = vpop.xlane.xlu1 %1355 }
 0x229   : > { %v5099_v62 = vmax.f32 %v5090_v50, %v1356_v38 }
 0x22b   : > { %2760 = vst.msk [vmem:[#allocation2 + $0x10] sm:$0xff] %vm770_vm0, %v5099_v62  ;;  %1584 = vperm.xlu1 %4042, %v5099_v62  }
 0x22c   : > { %v1359_v6 = vpop.xlane.xlu1 %1358 }
 0x22d   : > { %v5111_v38 = vmax.f32 %v5102_v42, %v1359_v6  ;;  %v4087_v6 = vld [vmem:[%s5065_s30 + $0x70] sm:$0xff]  }
 0x22e   : > { %3866 = vmatprep.subr.bf16.mxu1 %v4087_v6  ;;  %v4090_v6 = vld [vmem:[%s5065_s30 + $0x38] sm:$0xff]  }
 0x22f   : > { %2761 = vst.msk [vmem:[#allocation2 + $0x18] sm:$0xff] %vm770_vm0, %v5111_v38  ;;  %1589 = vperm.xlu1 %4042, %v5111_v38   ;;  %3867 = vmatpush3.bf16.msra.mxu1 %v4088_v25 }
 0x230   : > { %v1362_v48 = vpop.xlane.xlu0 %1361  ;;  %3868 = vmatprep.subr.bf16.mxu1 %v4089_v36 }
 0x231   : > { %v5125_v30 = vmax.f32 %v5114_v32, %v1362_v48  ;;  %v5165_v48 = vld [vmem:[#allocation2 + $0x48] sm:$0xff] }
 0x232   : > { %v1365_v12 = vpop.xlane.xlu1 %1364 }
 0x233   : > { %2762 = vst.msk [vmem:[#allocation2 + $0x20] sm:$0xff] %vm770_vm0, %v5125_v30  ;;  %v5133_v19 = vmax.f32 %v5121_v44, %v1365_v12  ;;  %1594 = vperm.xlu1 %4042, %v5125_v30   ;;  %3869 = vmatpush3.bf16.msra.mxu1 %v4090_v6  ;;  %v5145_v12 = vld [vmem:[#allocation2 + $0x38] sm:$0xff] }
 0x235   : > { %2763 = vst.msk [vmem:[#allocation2 + $0x28] sm:$0xff] %vm770_vm0, %v5133_v19 }
 0x237   : > { %1599 = vperm.xlu1 %4042, %v5133_v19  }
 0x238   : > { %v1368_v26 = vpop.xlane.xlu0 %1367 }
 0x239   : > { %v5148_v16 = vmax.f32 %v5142_v18, %v1368_v26  ;;  %v5162_v26 = vld [vmem:[#allocation2 + $0x40] sm:$0xff] }
 0x23a   : > { %v1371_v25 = vpop.xlane.xlu1 %1370 }
 0x23b   : > { %2764 = vst.msk [vmem:[#allocation2 + $0x30] sm:$0xff] %vm770_vm0, %v5148_v16  ;;  %v5155_v10 = vmax.f32 %v5145_v12, %v1371_v25  ;;  %1604 = vperm.xlu1 %4042, %v5148_v16  }
 0x23d   : > { %2765 = vst.msk [vmem:[#allocation2 + $0x38] sm:$0xff] %vm770_vm0, %v5155_v10 }
 0x23f   : > { %1609 = vperm.xlu1 %4042, %v5155_v10  }
 0x240   : > { %v1374_v6 = vpop.xlane.xlu0 %1373 }
 0x241   : > { %v5168_v4 = vmax.f32 %v5162_v26, %v1374_v6  ;;  %v5183_v6 = vld [vmem:[#allocation2 + $0x50] sm:$0xff] }
 0x242   : > { %v1377_v25 = vpop.xlane.xlu1 %1376 }
 0x243   : > { %2766 = vst.msk [vmem:[#allocation2 + $0x40] sm:$0xff] %vm770_vm0, %v5168_v4  ;;  %v5175_v36 = vmax.f32 %v5165_v48, %v1377_v25  ;;  %1614 = vperm.xlu1 %4042, %v5168_v4  }
 0x245   : > { %2767 = vst.msk [vmem:[#allocation2 + $0x48] sm:$0xff] %vm770_vm0, %v5175_v36  ;;  %1619 = vperm.xlu0 %4041, %v5175_v36  }
 0x248   : > { %v1380_v61 = vpop.xlane.xlu0 %1379 }
 0x249   : > { %v5188_v59 = vmax.f32 %v5183_v6, %v1380_v61  ;;  %v5203_v61 = vld [vmem:[#allocation2 + $0x60] sm:$0xff] }
 0x24a   : > { %v1383_v25 = vpop.xlane.xlu1 %1382 }
 0x24b   : > { %2768 = vst.msk [vmem:[#allocation2 + $0x50] sm:$0xff] %vm770_vm0, %v5188_v59  ;;  %v5195_v63 = vmax.f32 %v5185_v0, %v1383_v25  ;;  %1624 = vperm.xlu1 %4042, %v5188_v59  }
 0x24d   : > { %2769 = vst.msk [vmem:[#allocation2 + $0x58] sm:$0xff] %vm770_vm0, %v5195_v63  ;;  %1629 = vperm.xlu0 %4041, %v5195_v63  }
 0x250   : > { %v1386_v55 = vpop.xlane.xlu0 %1385 }
 0x251   : > { %v5208_v53 = vmax.f32 %v5203_v61, %v1386_v55  ;;  %v5223_v55 = vld [vmem:[#allocation2 + $0x70] sm:$0xff] }
 0x252   : > { %v1389_v25 = vpop.xlane.xlu1 %1388 }
 0x253   : > { %2770 = vst.msk [vmem:[#allocation2 + $0x60] sm:$0xff] %vm770_vm0, %v5208_v53  ;;  %v5215_v57 = vmax.f32 %v5205_v58, %v1389_v25  ;;  %1634 = vperm.xlu1 %4042, %v5208_v53  }
 0x255   : > { %2771 = vst.msk [vmem:[#allocation2 + $0x68] sm:$0xff] %vm770_vm0, %v5215_v57  ;;  %1639 = vperm.xlu0 %4041, %v5215_v57  }
 0x258   : > { %v1392_v49 = vpop.xlane.xlu0 %1391 }
 0x259   : > { %v5228_v47 = vmax.f32 %v5223_v55, %v1392_v49  ;;  %v5243_v49 = vld [vmem:[#allocation2 + $0x80] sm:$0xff] }
 0x25a   : > { %v1395_v25 = vpop.xlane.xlu1 %1394 }
 0x25b   : > { %2772 = vst.msk [vmem:[#allocation2 + $0x70] sm:$0xff] %vm770_vm0, %v5228_v47  ;;  %v5235_v51 = vmax.f32 %v5225_v52, %v1395_v25  ;;  %1644 = vperm.xlu1 %4042, %v5228_v47  }
 0x25d   : > { %2773 = vst.msk [vmem:[#allocation2 + $0x78] sm:$0xff] %vm770_vm0, %v5235_v51  ;;  %1649 = vperm.xlu0 %4041, %v5235_v51  }
 0x260   : > { %v1398_v43 = vpop.xlane.xlu0 %1397 }
 0x261   : > { %v5248_v41 = vmax.f32 %v5243_v49, %v1398_v43  ;;  %v5263_v43 = vld [vmem:[#allocation2 + $0x90] sm:$0xff] }
 0x262   : > { %v1401_v25 = vpop.xlane.xlu1 %1400 }
 0x263   : > { %2774 = vst.msk [vmem:[#allocation2 + $0x80] sm:$0xff] %vm770_vm0, %v5248_v41  ;;  %v5255_v45 = vmax.f32 %v5245_v46, %v1401_v25  ;;  %1654 = vperm.xlu1 %4042, %v5248_v41  }
 0x265   : > { %2775 = vst.msk [vmem:[#allocation2 + $0x88] sm:$0xff] %vm770_vm0, %v5255_v45  ;;  %1659 = vperm.xlu0 %4041, %v5255_v45  }
 0x268   : > { %v1404_v37 = vpop.xlane.xlu0 %1403 }
 0x269   : > { %v5268_v35 = vmax.f32 %v5263_v43, %v1404_v37  ;;  %v5283_v37 = vld [vmem:[#allocation2 + $0xa0] sm:$0xff] }
 0x26a   : > { %v1407_v25 = vpop.xlane.xlu1 %1406 }
 0x26b   : > { %2776 = vst.msk [vmem:[#allocation2 + $0x90] sm:$0xff] %vm770_vm0, %v5268_v35  ;;  %v5275_v39 = vmax.f32 %v5265_v40, %v1407_v25  ;;  %1664 = vperm.xlu1 %4042, %v5268_v35  }
 0x26d   : > { %2777 = vst.msk [vmem:[#allocation2 + $0x98] sm:$0xff] %vm770_vm0, %v5275_v39  ;;  %1669 = vperm.xlu0 %4041, %v5275_v39  }
 0x270   : > { %v1410_v31 = vpop.xlane.xlu0 %1409 }
 0x271   : > { %v5288_v29 = vmax.f32 %v5283_v37, %v1410_v31  ;;  %v5303_v31 = vld [vmem:[#allocation2 + $0xb0] sm:$0xff] }
 0x272   : > { %v1413_v25 = vpop.xlane.xlu1 %1412  ;;  %6222 = vst [vmem:[#allocation63_spill] sm:$0xff] %v5303_v31 }
 0x273   : > { %2778 = vst.msk [vmem:[#allocation2 + $0xa0] sm:$0xff] %vm770_vm0, %v5288_v29  ;;  %v5295_v33 = vmax.f32 %v5285_v34, %v1413_v25  ;;  %1674 = vperm.xlu1 %4042, %v5288_v29  }
 0x275   : > { %2779 = vst.msk [vmem:[#allocation2 + $0xa8] sm:$0xff] %vm770_vm0, %v5295_v33  ;;  %1679 = vperm.xlu0 %4041, %v5295_v33  }
 0x278   : > { %v1416_v24 = vpop.xlane.xlu0 %1415 }
 0x279   : > { %v5308_v22 = vmax.f32 %v5303_v31, %v1416_v24  ;;  %v5323_v24 = vld [vmem:[#allocation2 + $0xc0] sm:$0xff] }
 0x27a   : > { %v1419_v25 = vpop.xlane.xlu1 %1418  ;;  %6226 = vst [vmem:[#allocation67_spill] sm:$0xff] %v5323_v24 }
 0x27b   : > { %6224 = vst [vmem:[#allocation65_spill] sm:$0xff] %v5308_v22  ;;  %2780 = vst.msk [vmem:[#allocation2 + $0xb0] sm:$0xff] %vm770_vm0, %v5308_v22  ;;  %v5315_v27 = vmax.f32 %v5305_v28, %v1419_v25  ;;  %1684 = vperm.xlu1 %4042, %v5308_v22   ;;  %v5341_v28 = vld [vmem:[#allocation2 + $0xd8] sm:$0xff] }
 0x27c   : > { %6231 = vst [vmem:[#allocation72_spill] sm:$0xff] %v5341_v28 }
 0x27d   : > { %6225 = vst [vmem:[#allocation66_spill] sm:$0xff] %v5315_v27  ;;  %2781 = vst.msk [vmem:[#allocation2 + $0xb8] sm:$0xff] %vm770_vm0, %v5315_v27  ;;  %1689 = vperm.xlu0 %4041, %v5315_v27  }
 0x280   : > { %v1422_v17 = vpop.xlane.xlu0 %1421 }
 0x281   : > { %v5328_v15 = vmax.f32 %v5323_v24, %v1422_v17 }
 0x282   : > { %v1425_v25 = vpop.xlane.xlu1 %1424 }
 0x283   : > { %6228 = vst [vmem:[#allocation69_spill] sm:$0xff] %v5328_v15  ;;  %2782 = vst.msk [vmem:[#allocation2 + $0xc0] sm:$0xff] %vm770_vm0, %v5328_v15  ;;  %v5333_v22 = vmax.f32 %v5325_v21, %v1425_v25  ;;  %1694 = vperm.xlu1 %4042, %v5328_v15   ;;  %v5355_v21 = vld [vmem:[#allocation2 + $0xe0] sm:$0xff]  ;;  %v5360_v15 = vld [vmem:[#allocation2 + $0xe8] sm:$0xff] }
 0x285   : > { %6229 = vst [vmem:[#allocation70_spill] sm:$0xff] %v5333_v22  ;;  %2783 = vst.msk [vmem:[#allocation2 + $0xc8] sm:$0xff] %vm770_vm0, %v5333_v22  ;;  %1699 = vperm.xlu0 %4041, %v5333_v22  }
 0x288   : > { %v1428_v27 = vpop.xlane.xlu0 %1427 }
 0x289   : > { %v5344_v17 = vmax.f32 %v5339_v20, %v1428_v27  ;;  %v6234_v27 = vsub.f32 %v5074_v60, %v5087_v54  ;;  %v6236_v60 = vsub.f32 %v5090_v50, %v5099_v62  ;;  %v5388_v50 = vld [vmem:[#allocation2 + $0xf8] sm:$0xff] }
 0x28a   : > { %v1431_v24 = vpop.xlane.xlu1 %1430 }
 0x28b   : > { %6232 = vst [vmem:[#allocation73_spill] sm:$0xff] %v5344_v17  ;;  %2784 = vst.msk [vmem:[#allocation2 + $0xd0] sm:$0xff] %vm770_vm0, %v5344_v17  ;;  %v5349_v25 = vmax.f32 %v5341_v28, %v1431_v24  ;;  %1704 = vperm.xlu1 %4042, %v5344_v17   ;;  %v1510_v20 = vmul.f32 1.442695, %v6234_v27  ;;  %v6235_v24 = vsub.f32 %v5070_v56, %v5078_v23  ;;  %v1512_v54 = vmul.f32 1.442695, %v6236_v60 }
 0x28c   : > { %v5383_v56 = vld [vmem:[#allocation2 + $0xf0] sm:$0xff] }
 0x28d   : > { %6233 = vst [vmem:[#allocation74_spill] sm:$0xff] %v5349_v25  ;;  %2785 = vst.msk [vmem:[#allocation2 + $0xd8] sm:$0xff] %vm770_vm0, %v5349_v25  ;;  %1709 = vperm.xlu0 %4041, %v5349_v25   ;;  %v1508_v28 = vmul.f32 1.442695, %v6235_v24  ;;  %4091 = vpow2.f32 %v1510_v20  ;;  %v6238_v20 = vsub.f32 %v5114_v32, %v5125_v30  ;;  %v6241_v32 = vsub.f32 %v5145_v12, %v5155_v10 }
 0x28f   : > { %4093 = vpow2.f32 %v1508_v28  ;;  %v6239_v28 = vsub.f32 %v5121_v44, %v5133_v19  ;;  %v6242_v19 = vsub.f32 %v5162_v26, %v5168_v4  ;;  %v6244_v4 = vsub.f32 %v5183_v6, %v5188_v59 }
 0x290   : > { %v1434_v22 = vpop.xlane.xlu0 %1433  ;;  %4095 = vpow2.f32 %v1512_v54  ;;  %v1522_v54 = vmul.f32 1.442695, %v6241_v32  ;;  %v6247_v59 = vsub.f32 %v5205_v58, %v5215_v57  ;;  %v6250_v32 = vsub.f32 %v5243_v49, %v5248_v41 }
 0x291   : > { %v5363_v31 = vmax.f32 %v5355_v21, %v1434_v22  ;;  %v6237_v22 = vsub.f32 %v5102_v42, %v5111_v38  ;;  %v1518_v24 = vmul.f32 1.442695, %v6239_v28  ;;  %v6240_v38 = vsub.f32 %v5142_v18, %v5148_v16 }
 0x292   : > { %v1437_v17 = vpop.xlane.xlu1 %1436  ;;  %v1524_v44 = vmul.f32 1.442695, %v6242_v19  ;;  %v1528_v12 = vmul.f32 1.442695, %v6244_v4  ;;  %v1534_v6 = vmul.f32 1.442695, %v6247_v59 }
 0x293   : > { %2786 = vst.msk [vmem:[#allocation2 + $0xe0] sm:$0xff] %vm770_vm0, %v5363_v31  ;;  %v5371_v25 = vmax.f32 %v5360_v15, %v1437_v17  ;;  %1714 = vperm.xlu1 %4042, %v5363_v31   ;;  %v1514_v23 = vmul.f32 1.442695, %v6237_v22  ;;  %v1516_v17 = vmul.f32 1.442695, %v6238_v20  ;;  %v6243_v22 = vsub.f32 %v5165_v48, %v5175_v36 }
 0x294   : > { %v1520_v60 = vmul.f32 1.442695, %v6240_v38 }
 0x295   : > { %2787 = vst.msk [vmem:[#allocation2 + $0xe8] sm:$0xff] %vm770_vm0, %v5371_v25  ;;  %1719 = vperm.xlu0 %4041, %v5371_v25   ;;  %4097 = vpow2.f32 %v1514_v23  ;;  %v1526_v10 = vmul.f32 1.442695, %v6243_v22  ;;  %v6245_v23 = vsub.f32 %v5185_v0, %v5195_v63 }
 0x296   : > { %4099 = vpow2.f32 %v1516_v17  ;;  %v6246_v17 = vsub.f32 %v5203_v61, %v5208_v53  ;;  %v6248_v53 = vsub.f32 %v5223_v55, %v5228_v47 }
 0x297   : > { %v5416_v18 = vpop.eup %4091  ;;  %4101 = vpow2.f32 %v1518_v24  ;;  %v1530_v20 = vmul.f32 1.442695, %v6245_v23 }
 0x298   : > { %v1440_v27 = vpop.xlane.xlu0 %1439  ;;  %4103 = vpow2.f32 %v1520_v60  ;;  %v1532_v48 = vmul.f32 1.442695, %v6246_v17  ;;  %v1536_v61 = vmul.f32 1.442695, %v6248_v53 }
 0x299   : > { %v5391_v62 = vmax.f32 %v5383_v56, %v1440_v27  ;;  %v5425_v26 = vpop.eup %4093  ;;  %4105 = vpow2.f32 %v1522_v54  ;;  %v1540_v54 = vmul.f32 1.442695, %v6250_v32  ;;  %v6260_v32 = vld [vmem:[#allocation67_spill] sm:$0xff] }
 0x29a   : > { %v1443_v42 = vpop.xlane.xlu1 %1442  ;;  %4107 = vpow2.f32 %v1524_v44  ;;  %v5434_v36 = vpop.eup %4095 }
 0x29b   : > { %2788 = vst.msk [vmem:[#allocation2 + $0xf0] sm:$0xff] %vm770_vm0, %v5391_v62  ;;  %v5402_v30 = vmax.f32 %v5388_v50, %v1443_v42  ;;  %1724 = vperm.xlu1 %4042, %v5391_v62   ;;  %4109 = vpow2.f32 %v1526_v10 }
 0x29c   : > { %4111 = vpow2.f32 %v1528_v12 }
 0x29d   : > { %2789 = vst.msk [vmem:[#allocation2 + $0xf8] sm:$0xff] %vm770_vm0, %v5402_v30  ;;  %1729 = vperm.xlu0 %4041, %v5402_v30   ;;  %4113 = vpow2.f32 %v1530_v20 }
 0x29e   : > { %4115 = vpow2.f32 %v1532_v48 }
 0x29f   : > { %2188 = vperm.xlu1 %4042, %v5416_v18   ;;  %v5442_v0 = vpop.eup %4097  ;;  %4117 = vpow2.f32 %v1534_v6 }
 0x2a0   : > { %v5448_v57 = vpop.eup %4099 }
 0x2a1   : > { %2183 = vperm.xlu0 %4041, %v5425_v26   ;;  %v5456_v47 = vpop.eup %4101 }
 0x2a2   : > { %v1575_v27 = vpop.permute.xlu0 %1574  ;;  %v5458_v55 = vpop.eup %4103 }
 0x2a3   : > { %v1732_v28 = vsub.f32 %v4840_v1, %v1575_v27  ;;  %v1733_v63 = vsub.f32 %v4842_v2, %v1575_v27  ;;  %2193 = vperm.xlu1 %4042, %v5434_v36   ;;  %v6249_v1 = vsub.f32 %v5225_v52, %v5235_v51  ;;  %v5464_v19 = vpop.eup %4105  ;;  %v6254_v27 = vsub.f32 %v5283_v37, %v5288_v29 }
 0x2a4   : > { %v5469_v22 = vpop.eup %4107 }
 0x2a5   : > { %v1796_v24 = vmul.f32 1.442695, %v1732_v28  ;;  %v1798_v42 = vmul.f32 1.442695, %v1733_v63  ;;  %2198 = vperm.xlu0 %4041, %v5442_v0   ;;  %v1538_v2 = vmul.f32 1.442695, %v6249_v1  ;;  %v5474_v49 = vpop.eup %4109 }
 0x2a6   : > { %v1580_v58 = vpop.permute.xlu1 %1579  ;;  %v5476_v4 = vpop.eup %4111 }
 0x2a7   : > { %4119 = vpow2.f32 %v1796_v24  ;;  %v1734_v38 = vsub.f32 %v4844_v3, %v1580_v58  ;;  %v1735_v60 = vsub.f32 %v4848_v5, %v1580_v58  ;;  %2203 = vperm.xlu1 %4042, %v5448_v57   ;;  %v6251_v3 = vsub.f32 %v5245_v46, %v5255_v45  ;;  %v5482_v20 = vpop.eup %4113  ;;  %v6256_v58 = vld [vmem:[#allocation63_spill] sm:$0xff] }
 0x2a8   : > { %4121 = vpow2.f32 %v1798_v42  ;;  %v6252_v45 = vsub.f32 %v5263_v43, %v5268_v35  ;;  %v5487_v48 = vpop.eup %4115 }
 0x2a9   : > { %4123 = vpow2.f32 %v1536_v61  ;;  %v1800_v51 = vmul.f32 1.442695, %v1734_v38  ;;  %v1802_v52 = vmul.f32 1.442695, %v1735_v60  ;;  %2208 = vperm.xlu0 %4041, %v5456_v47   ;;  %v1542_v5 = vmul.f32 1.442695, %v6251_v3  ;;  %v5492_v43 = vpop.eup %4117 }
 0x2aa   : > { %4125 = vpow2.f32 %v1538_v2  ;;  %v1585_v44 = vpop.permute.xlu1 %1584  ;;  %v1544_v46 = vmul.f32 1.442695, %v6252_v45  ;;  %v6257_v38 = vld [vmem:[#allocation65_spill] sm:$0xff] }
 0x2ab   : > { %4127 = vpow2.f32 %v1800_v51  ;;  %v1736_v10 = vsub.f32 %v4852_v7, %v1585_v44  ;;  %v1737_v41 = vsub.f32 %v4854_v8, %v1585_v44  ;;  %2213 = vperm.xlu1 %4042, %v5458_v55   ;;  %v6253_v7 = vsub.f32 %v5265_v40, %v5275_v39 }
 0x2ac   : > { %4129 = vpow2.f32 %v1802_v52  ;;  %v1548_v39 = vmul.f32 1.442695, %v6254_v27 }
 0x2ad   : > { %4131 = vpow2.f32 %v1540_v54  ;;  %v1804_v12 = vmul.f32 1.442695, %v1736_v10  ;;  %v1806_v23 = vmul.f32 1.442695, %v1737_v41  ;;  %2218 = vperm.xlu0 %4041, %v5464_v19   ;;  %v1546_v8 = vmul.f32 1.442695, %v6253_v7 }
 0x2ae   : > { %4133 = vpow2.f32 %v1542_v5  ;;  %v1590_v17 = vpop.permute.xlu1 %1589  ;;  %v6261_v5 = vld [vmem:[#allocation9_spill] sm:$0xff]  ;;  %v6262_v10 = vld [vmem:[#allocation10_spill] sm:$0xff]  ;;  %v6263_v7 = vld [vmem:[#allocation64_spill] sm:$0xff] }
 0x2af   : > { %4135 = vpow2.f32 %v1804_v12  ;;  %v1738_v59 = vsub.f32 %v4856_v9, %v1590_v17  ;;  %v1739_v35 = vsub.f32 %v4860_v11, %v1590_v17  ;;  %2223 = vperm.xlu1 %4042, %v5469_v22   ;;  %v6255_v9 = vsub.f32 %v5285_v34, %v5295_v33 }
 0x2b0   : > { %4137 = vpow2.f32 %v1806_v23 }
 0x2b1   : > { %v4120_v6 = vpop.eup %4119  ;;  %4139 = vpow2.f32 %v1544_v46  ;;  %v1808_v40 = vmul.f32 1.442695, %v1738_v59  ;;  %v1810_v28 = vmul.f32 1.442695, %v1739_v35  ;;  %2228 = vperm.xlu0 %4041, %v5474_v49   ;;  %v1550_v11 = vmul.f32 1.442695, %v6255_v9 }
 0x2b2   : > { %v4122_v63 = vpop.eup %4121  ;;  %4141 = vpow2.f32 %v1546_v8  ;;  %v1595_v53 = vpop.permute.xlu1 %1594  ;;  %v6264_v8 = vld [vmem:[#allocation66_spill] sm:$0xff]  ;;  %v6268_v9 = vld [vmem:[#allocation73_spill] sm:$0xff] }
 0x2b3   : > { %v5501_v61 = vpop.eup %4123  ;;  %4143 = vpow2.f32 %v1808_v40  ;;  %v1740_v24 = vsub.f32 %v4864_v13, %v1595_v53  ;;  %v1741_v42 = vsub.f32 %v4866_v14, %v1595_v53  ;;  %2233 = vperm.xlu1 %4042, %v5476_v4   ;;  %v5506_v29 = vadd.f32 %v4122_v63, %v4120_v6  ;;  %v6259_v14 = vld [vmem:[#allocation69_spill] sm:$0xff]  ;;  %v6266_v35 = vld [vmem:[#allocation70_spill] sm:$0xff] }
 0x2b4   : > { %v5508_v37 = vpop.eup %4125  ;;  %4145 = vpow2.f32 %v1810_v28  ;;  %v6258_v13 = vsub.f32 %v6256_v58, %v6257_v38  ;;  %v1500_v54 = vsub.f32 %v6260_v32, %v6259_v14  ;;  %v6265_v17 = vsub.f32 %v6263_v7, %v6264_v8  ;;  %v6274_v7 = vld [vmem:[#allocation13_spill] sm:$0xff] }
 0x2b5   : > { %v4128_v1 = vpop.eup %4127  ;;  %4147 = vpow2.f32 %v1548_v39  ;;  %v1812_v2 = vmul.f32 1.442695, %v1740_v24  ;;  %v1814_v33 = vmul.f32 1.442695, %v1741_v42  ;;  %2238 = vperm.xlu0 %4041, %v5482_v20  }
 0x2b6   : > { %v4130_v34 = vpop.eup %4129  ;;  %4149 = vpow2.f32 %v1550_v11  ;;  %v1552_v60 = vmul.f32 1.442695, %v6258_v13  ;;  %v1600_v51 = vpop.permute.xlu1 %1599  ;;  %v2373_v52 = vpack.c.bf16 %v4128_v1, %v4120_v6  ;;  %v1554_v59 = vmul.f32 1.442695, %v6265_v17  ;;  %v6267_v6 = vld [vmem:[#allocation68_spill] sm:$0xff]  ;;  %v6269_v11 = vld [vmem:[#allocation71_spill] sm:$0xff] }
 0x2b7   : > { %v5516_v3 = vpop.eup %4131  ;;  %4151 = vpow2.f32 %v1812_v2  ;;  %v1742_v44 = vsub.f32 %v6261_v5, %v1600_v51  ;;  %v1743_v41 = vsub.f32 %v6262_v10, %v1600_v51  ;;  %2243 = vperm.xlu1 %4042, %v5487_v48   ;;  %v2374_v45 = vpack.c.bf16 %v4130_v34, %v4122_v63  ;;  %v6273_v5 = vld [vmem:[#allocation72_spill] sm:$0xff]  ;;  %v6275_v17 = vld [vmem:[#allocation14_spill] sm:$0xff] }
 0x2b8   : > { %v5521_v46 = vpop.eup %4133  ;;  %4153 = vpow2.f32 %v1814_v33  ;;  %v5523_v12 = vadd.f32 %v4130_v34, %v4128_v1  ;;  %v1501_v27 = vsub.f32 %v6267_v6, %v6266_v35  ;;  %v1556_v63 = vmul.f32 1.442695, %v1500_v54  ;;  %v6270_v1 = vld [vmem:[#allocation11_spill] sm:$0xff]  ;;  %v6271_v33 = vld [vmem:[#allocation12_spill] sm:$0xff] }
 0x2b9   : > { %v4136_v23 = vpop.eup %4135  ;;  %v1816_v39 = vmul.f32 1.442695, %v1742_v44  ;;  %v1818_v40 = vmul.f32 1.442695, %v1743_v41  ;;  %2565 = vmatprep.mubr.bf16.mxu1 %v2374_v45  ;;  %2248 = vperm.xlu0 %4041, %v5492_v43   ;;  %4155 = vpow2.f32 %v1552_v60  ;;  %v1502_v53 = vsub.f32 %v6269_v11, %v6268_v9 }
 0x2ba   : > { %v4138_v28 = vpop.eup %4137  ;;  %2566 = vmatmul.mubr.bf16.vlgmr.msra.gmra.mrb[0].mxu1 %v2373_v52  ;;  %v1605_v24 = vpop.permute.xlu1 %1604  ;;  %v1558_v60 = vmul.f32 1.442695, %v1501_v27  ;;  %v6272_v52 = vld [vmem:[#allocation74_spill] sm:$0xff]  ;;  %v1504_v11 = vsub.f32 %v5355_v21, %v5363_v31 }
 0x2bb   : > { %v5533_v42 = vpop.eup %4139  ;;  %4157 = vpow2.f32 %v1816_v39  ;;  %v1744_v2 = vsub.f32 %v6270_v1, %v1605_v24  ;;  %v1745_v34 = vsub.f32 %v6271_v33, %v1605_v24  ;;  %2253 = vperm.xlu1 %4042, %v5501_v61   ;;  %v5538_v58 = vadd.f32 %v4138_v28, %v4136_v23  ;;  %v6277_v1 = vld [vmem:[#allocation16_spill] sm:$0xff] }
 0x2bc   : > { %v5540_v38 = vpop.eup %4141  ;;  %4159 = vpow2.f32 %v1818_v40  ;;  %v1560_v51 = vmul.f32 1.442695, %v1502_v53  ;;  %v1503_v44 = vsub.f32 %v6273_v5, %v6272_v52  ;;  %v6276_v53 = vld [vmem:[#allocation15_spill] sm:$0xff] }
 0x2bd   : > { %v4144_v13 = vpop.eup %4143  ;;  %4161 = vpow2.f32 %v1554_v59  ;;  %v1820_v14 = vmul.f32 1.442695, %v1744_v2  ;;  %v1822_v32 = vmul.f32 1.442695, %v1745_v34  ;;  %2258 = vperm.xlu0 %4041, %v5508_v37  }
 0x2be   : > { %v4146_v54 = vpop.eup %4145  ;;  %4163 = vpow2.f32 %v1556_v63  ;;  %v1610_v10 = vpop.permute.xlu1 %1609  ;;  %v2375_v41 = vpack.c.bf16 %v4144_v13, %v4136_v23  ;;  %v1562_v9 = vmul.f32 1.442695, %v1503_v44  ;;  %v1564_v44 = vmul.f32 1.442695, %v1504_v11  ;;  %v6283_v11 = vld [vmem:[#allocation20_spill] sm:$0xff] }
 0x2bf   : > { %v5545_v45 = vpop.eup %4147  ;;  %4165 = vpow2.f32 %v1820_v14  ;;  %v1746_v8 = vsub.f32 %v6274_v7, %v1610_v10  ;;  %v1747_v59 = vsub.f32 %v6275_v17, %v1610_v10  ;;  %2263 = vperm.xlu1 %4042, %v5516_v3   ;;  %v2376_v35 = vpack.c.bf16 %v4146_v54, %v4138_v28 }
 0x2c0   : > { %v5550_v6 = vpop.eup %4149  ;;  %4167 = vpow2.f32 %v1822_v32  ;;  %v5552_v27 = vadd.f32 %v4146_v54, %v4144_v13  ;;  %v1505_v13 = vsub.f32 %v5360_v15, %v5371_v25  ;;  %v6278_v32 = vld [vmem:[#allocation17_spill] sm:$0xff]  ;;  %v1506_v10 = vsub.f32 %v5383_v56, %v5391_v62 }
 0x2c1   : > { %v4152_v39 = vpop.eup %4151  ;;  %4169 = vpow2.f32 %v1558_v60  ;;  %v1824_v40 = vmul.f32 1.442695, %v1746_v8  ;;  %v1826_v63 = vmul.f32 1.442695, %v1747_v59  ;;  %2573 = vmatprep.mubr.bf16.mxu1 %v2376_v35  ;;  %2268 = vperm.xlu0 %4041, %v5521_v46  }
 0x2c2   : > { %v4154_v23 = vpop.eup %4153  ;;  %4171 = vpow2.f32 %v1560_v51  ;;  %2574 = vmatmul.mubr.bf16.gmra.mrb[4].mxu1 %v2375_v41  ;;  %v1615_v28 = vpop.permute.xlu1 %1614  ;;  %v6279_v51 = vld [vmem:[#allocation18_spill] sm:$0xff]  ;;  %v1566_v59 = vmul.f32 1.442695, %v1505_v13  ;;  %v1568_v62 = vmul.f32 1.442695, %v1506_v10 }
 0x2c3   : > { %4173 = vpow2.f32 %v1824_v40  ;;  %v1748_v24 = vsub.f32 %v6276_v53, %v1615_v28  ;;  %v1749_v2 = vsub.f32 %v6277_v1, %v1615_v28  ;;  %2273 = vperm.xlu1 %4042, %v5533_v42   ;;  %v5560_v33 = vadd.f32 %v4154_v23, %v4152_v39  ;;  %v5562_v34 = vpop.eup %4155 }
 0x2c4   : > { %4175 = vpow2.f32 %v1826_v63  ;;  %v1620_v60 = vpop.permute.xlu0 %1619 }
 0x2c5   : > { %v4158_v14 = vpop.eup %4157  ;;  %v1828_v21 = vmul.f32 1.442695, %v1748_v24  ;;  %v1830_v31 = vmul.f32 1.442695, %v1749_v2  ;;  %v1750_v54 = vsub.f32 %v6278_v32, %v1620_v60  ;;  %v1751_v52 = vsub.f32 %v6279_v51, %v1620_v60  ;;  %2278 = vperm.xlu0 %4041, %v5540_v38  }
 0x2c6   : > { %v4160_v5 = vpop.eup %4159  ;;  %4177 = vpow2.f32 %v1562_v9  ;;  %v2377_v41 = vpack.c.bf16 %v4158_v14, %v4152_v39 }
 0x2c7   : > { %v5571_v7 = vpop.eup %4161  ;;  %4179 = vpow2.f32 %v1828_v21  ;;  %v1832_v15 = vmul.f32 1.442695, %v1750_v54  ;;  %v1834_v25 = vmul.f32 1.442695, %v1751_v52  ;;  %2283 = vperm.xlu1 %4042, %v5545_v45   ;;  %v2378_v8 = vpack.c.bf16 %v4160_v5, %v4154_v23  ;;  %v6282_v23 = vld [vmem:[#allocation19_spill] sm:$0xff] }
 0x2c8   : > { %6280 = vst [vmem:[#allocation63_spill] sm:$0xff] %v5571_v7  ;;  %v5574_v17 = vpop.eup %4163  ;;  %4181 = vpow2.f32 %v1830_v31  ;;  %v5576_v35 = vadd.f32 %v4160_v5, %v4158_v14  ;;  %v6285_v14 = vld [vmem:[#allocation21_spill] sm:$0xff]  ;;  %v6286_v31 = vld [vmem:[#allocation22_spill] sm:$0xff] }
 0x2c9   : > { %v4166_v40 = vpop.eup %4165  ;;  %4183 = vpow2.f32 %v1832_v15  ;;  %2581 = vmatprep.mubr.bf16.mxu1 %v2378_v8  ;;  %2288 = vperm.xlu0 %4041, %v5550_v6  }
 0x2ca   : > { %v4168_v56 = vpop.eup %4167  ;;  %4185 = vpow2.f32 %v1834_v25  ;;  %2582 = vmatmul.mubr.bf16.gmra.mrb[8].mxu1 %v2377_v41  ;;  %v1625_v39 = vpop.permute.xlu1 %1624 }
 0x2cb   : > { %v5579_v63 = vpop.eup %4169  ;;  %4187 = vpow2.f32 %v1564_v44  ;;  %v1752_v9 = vsub.f32 %v6282_v23, %v1625_v39  ;;  %v1753_v28 = vsub.f32 %v6283_v11, %v1625_v39  ;;  %2293 = vperm.xlu1 %4042, %v5562_v34   ;;  %v5584_v53 = vadd.f32 %v4168_v56, %v4166_v40  ;;  %v6289_v39 = vld [vmem:[#allocation24_spill] sm:$0xff] }
 0x2cc   : > { %6281 = vst [vmem:[#allocation65_spill] sm:$0xff] %v5579_v63  ;;  %v5586_v24 = vpop.eup %4171  ;;  %4189 = vpow2.f32 %v1566_v59  ;;  %v1630_v1 = vpop.permute.xlu0 %1629 }
 0x2cd   : > { %6284 = vst [vmem:[#allocation69_spill] sm:$0xff] %v5586_v24  ;;  %v4174_v2 = vpop.eup %4173  ;;  %v1836_v13 = vmul.f32 1.442695, %v1752_v9  ;;  %v1838_v60 = vmul.f32 1.442695, %v1753_v28  ;;  %v1754_v21 = vsub.f32 %v6285_v14, %v1630_v1  ;;  %v1755_v32 = vsub.f32 %v6286_v31, %v1630_v1  ;;  %2298 = vperm.xlu0 %4041, %v5571_v7  }
 0x2ce   : > { %v4176_v54 = vpop.eup %4175  ;;  %4191 = vpow2.f32 %v1568_v62  ;;  %v2379_v51 = vpack.c.bf16 %v4174_v2, %v4166_v40  ;;  %v6288_v40 = vld [vmem:[#allocation23_spill] sm:$0xff] }
 0x2cf   : > { %4193 = vpow2.f32 %v1836_v13  ;;  %v1840_v52 = vmul.f32 1.442695, %v1754_v21  ;;  %v1842_v5 = vmul.f32 1.442695, %v1755_v32  ;;  %2303 = vperm.xlu1 %4042, %v5574_v17   ;;  %v2380_v44 = vpack.c.bf16 %v4176_v54, %v4168_v56  ;;  %v6292_v21 = vld [vmem:[#allocation26_spill] sm:$0xff] }
 0x2d0   : > { %v5592_v10 = vpop.eup %4177  ;;  %4195 = vpow2.f32 %v1838_v60  ;;  %v5594_v41 = vadd.f32 %v4176_v54, %v4174_v2  ;;  %v6291_v60 = vld [vmem:[#allocation25_spill] sm:$0xff] }
 0x2d1   : > { %6287 = vst [vmem:[#allocation67_spill] sm:$0xff] %v5592_v10  ;;  %v4180_v15 = vpop.eup %4179  ;;  %4197 = vpow2.f32 %v1840_v52  ;;  %2589 = vmatprep.mubr.bf16.mxu1 %v2380_v44  ;;  %2308 = vperm.xlu0 %4041, %v5579_v63  }
 0x2d2   : > { %v4182_v25 = vpop.eup %4181  ;;  %4199 = vpow2.f32 %v1842_v5  ;;  %2590 = vmatmul.mubr.bf16.gmra.mrb[12].mxu1 %v2379_v51  ;;  %v1635_v8 = vpop.permute.xlu1 %1634 }
 0x2d3   : > { %v4184_v59 = vpop.eup %4183  ;;  %v1756_v62 = vsub.f32 %v6288_v40, %v1635_v8  ;;  %v1757_v23 = vsub.f32 %v6289_v39, %v1635_v8  ;;  %2313 = vperm.xlu1 %4042, %v5586_v24   ;;  %v5600_v56 = vadd.f32 %v4182_v25, %v4180_v15  ;;  %v6296_v39 = vld [vmem:[#allocation28_spill] sm:$0xff] }
 0x2d4   : > { %v4186_v9 = vpop.eup %4185  ;;  %v1640_v11 = vpop.permute.xlu0 %1639  ;;  %v2381_v28 = vpack.c.bf16 %v4184_v59, %v4180_v15 }
 0x2d5   : > { %v5602_v1 = vpop.eup %4187  ;;  %v1844_v2 = vmul.f32 1.442695, %v1756_v62  ;;  %v1846_v13 = vmul.f32 1.442695, %v1757_v23  ;;  %v1758_v14 = vsub.f32 %v6291_v60, %v1640_v11  ;;  %v1759_v31 = vsub.f32 %v6292_v21, %v1640_v11  ;;  %2318 = vperm.xlu0 %4041, %v5592_v10   ;;  %v6297_v21 = vld [vmem:[#allocation29_spill] sm:$0xff] }
 0x2d6   : > { %6290 = vst [vmem:[#allocation9_spill] sm:$0xff] %v5602_v1  ;;  %v5607_v32 = vpop.eup %4189  ;;  %v2382_v54 = vpack.c.bf16 %v4186_v9, %v4182_v25  ;;  %v5609_v51 = vadd.f32 %v4186_v9, %v4184_v59  ;;  %v6295_v59 = vld [vmem:[#allocation27_spill] sm:$0xff] }
 0x2d7   : > { %6293 = vst [vmem:[#allocation10_spill] sm:$0xff] %v5607_v32  ;;  %4201 = vpow2.f32 %v1844_v2  ;;  %v1848_v52 = vmul.f32 1.442695, %v1758_v14  ;;  %v1850_v5 = vmul.f32 1.442695, %v1759_v31  ;;  %2323 = vperm.xlu1 %4042, %v5602_v1  }
 0x2d8   : > { %v5612_v44 = vpop.eup %4191  ;;  %4203 = vpow2.f32 %v1846_v13  ;;  %2597 = vmatprep.mubr.bf16.mxu1 %v2382_v54  ;;  %v6298_v54 = vld [vmem:[#allocation30_spill] sm:$0xff] }
 0x2d9   : > { %6294 = vst [vmem:[#allocation64_spill] sm:$0xff] %v5612_v44  ;;  %v4194_v15 = vpop.eup %4193  ;;  %4205 = vpow2.f32 %v1848_v52  ;;  %2328 = vperm.xlu0 %4041, %v5607_v32  }
 0x2da   : > { %v4196_v8 = vpop.eup %4195  ;;  %4207 = vpow2.f32 %v1850_v5  ;;  %2598 = vmatmul.mubr.bf16.gmra.mrb[16].mxu1 %v2381_v28  ;;  %v1645_v40 = vpop.permute.xlu1 %1644 }
 0x2db   : > { %v4198_v25 = vpop.eup %4197  ;;  %v1760_v62 = vsub.f32 %v6295_v59, %v1645_v40  ;;  %v1761_v23 = vsub.f32 %v6296_v39, %v1645_v40  ;;  %2333 = vperm.xlu1 %4042, %v5612_v44   ;;  %v5618_v9 = vadd.f32 %v4196_v8, %v4194_v15 }
 0x2dc   : > { %v4200_v11 = vpop.eup %4199  ;;  %v1650_v2 = vpop.permute.xlu0 %1649  ;;  %v2383_v13 = vpack.c.bf16 %v4198_v25, %v4194_v15 }
 0x2dd   : > { %v1852_v60 = vmul.f32 1.442695, %v1760_v62  ;;  %v1854_v14 = vmul.f32 1.442695, %v1761_v23  ;;  %v1762_v31 = vsub.f32 %v6297_v21, %v1650_v2  ;;  %v1763_v52 = vsub.f32 %v6298_v54, %v1650_v2  ;;  %v6299_v23 = vld [vmem:[#allocation31_spill] sm:$0xff]  ;;  %v6300_v21 = vld [vmem:[#allocation32_spill] sm:$0xff] }
 0x2de   : > { %v2384_v28 = vpack.c.bf16 %v4200_v11, %v4196_v8  ;;  %v5622_v5 = vadd.f32 %v4200_v11, %v4198_v25 }
 0x2df   : > { %4209 = vpow2.f32 %v1852_v60  ;;  %v1856_v59 = vmul.f32 1.442695, %v1762_v31  ;;  %v1858_v16 = vmul.f32 1.442695, %v1763_v52  ;;  %v6302_v52 = vld [vmem:[#allocation34_spill] sm:$0xff] }
 0x2e0   : > { %4211 = vpow2.f32 %v1854_v14  ;;  %2605 = vmatprep.mubr.bf16.mxu1 %v2384_v28  ;;  %v6301_v14 = vld [vmem:[#allocation33_spill] sm:$0xff] }
 0x2e1   : > { %v4202_v40 = vpop.eup %4201  ;;  %4213 = vpow2.f32 %v1856_v59 }
 0x2e2   : > { %v4204_v39 = vpop.eup %4203  ;;  %4215 = vpow2.f32 %v1858_v16  ;;  %2606 = vmatmul.mubr.bf16.gmra.mrb[20].mxu1 %v2383_v13  ;;  %v1655_v15 = vpop.permute.xlu1 %1654 }
 0x2e3   : > { %v4206_v62 = vpop.eup %4205  ;;  %v1764_v32 = vsub.f32 %v6299_v23, %v1655_v15  ;;  %v1765_v44 = vsub.f32 %v6300_v21, %v1655_v15  ;;  %v5626_v2 = vadd.f32 %v4204_v39, %v4202_v40 }
 0x2e4   : > { %v4208_v8 = vpop.eup %4207  ;;  %v1660_v25 = vpop.permute.xlu0 %1659  ;;  %v2385_v11 = vpack.c.bf16 %v4206_v62, %v4202_v40 }
 0x2e5   : > { %v1860_v60 = vmul.f32 1.442695, %v1764_v32  ;;  %v1862_v31 = vmul.f32 1.442695, %v1765_v44  ;;  %v1766_v54 = vsub.f32 %v6301_v14, %v1660_v25  ;;  %v1767_v28 = vsub.f32 %v6302_v52, %v1660_v25  ;;  %v6303_v44 = vld [vmem:[#allocation35_spill] sm:$0xff]  ;;  %v6304_v14 = vld [vmem:[#allocation36_spill] sm:$0xff] }
 0x2e6   : > { %v2386_v59 = vpack.c.bf16 %v4208_v8, %v4204_v39  ;;  %v5630_v16 = vadd.f32 %v4208_v8, %v4206_v62 }
 0x2e7   : > { %4217 = vpow2.f32 %v1860_v60  ;;  %v1864_v13 = vmul.f32 1.442695, %v1766_v54  ;;  %v1866_v10 = vmul.f32 1.442695, %v1767_v28  ;;  %v6306_v28 = vld [vmem:[#allocation38_spill] sm:$0xff] }
 0x2e8   : > { %4219 = vpow2.f32 %v1862_v31  ;;  %2613 = vmatprep.mubr.bf16.mxu1 %v2386_v59  ;;  %v6305_v31 = vld [vmem:[#allocation37_spill] sm:$0xff] }
 0x2e9   : > { %v4210_v15 = vpop.eup %4209  ;;  %4221 = vpow2.f32 %v1864_v13 }
 0x2ea   : > { %v4212_v23 = vpop.eup %4211  ;;  %4223 = vpow2.f32 %v1866_v10  ;;  %2614 = vmatmul.mubr.bf16.gmra.mrb[24].mxu1 %v2385_v11  ;;  %v1665_v40 = vpop.permute.xlu1 %1664 }
 0x2eb   : > { %v4214_v32 = vpop.eup %4213  ;;  %v1768_v21 = vsub.f32 %v6303_v44, %v1665_v40  ;;  %v1769_v1 = vsub.f32 %v6304_v14, %v1665_v40  ;;  %v5634_v25 = vadd.f32 %v4212_v23, %v4210_v15 }
 0x2ec   : > { %v4216_v39 = vpop.eup %4215  ;;  %v1670_v62 = vpop.permute.xlu0 %1669  ;;  %v2387_v8 = vpack.c.bf16 %v4214_v32, %v4210_v15 }
 0x2ed   : > { %v1868_v60 = vmul.f32 1.442695, %v1768_v21  ;;  %v1870_v54 = vmul.f32 1.442695, %v1769_v1  ;;  %v1770_v52 = vsub.f32 %v6305_v31, %v1670_v62  ;;  %v1771_v59 = vsub.f32 %v6306_v28, %v1670_v62  ;;  %v6307_v1 = vld [vmem:[#allocation39_spill] sm:$0xff]  ;;  %v6308_v31 = vld [vmem:[#allocation40_spill] sm:$0xff] }
 0x2ee   : > { %v2388_v13 = vpack.c.bf16 %v4216_v39, %v4212_v23  ;;  %v5638_v10 = vadd.f32 %v4216_v39, %v4214_v32 }
 0x2ef   : > { %4225 = vpow2.f32 %v1868_v60  ;;  %v1872_v11 = vmul.f32 1.442695, %v1770_v52  ;;  %v1874_v63 = vmul.f32 1.442695, %v1771_v59  ;;  %v6310_v59 = vld [vmem:[#allocation42_spill] sm:$0xff] }
 0x2f0   : > { %4227 = vpow2.f32 %v1870_v54  ;;  %2621 = vmatprep.mubr.bf16.mxu1 %v2388_v13  ;;  %v6309_v54 = vld [vmem:[#allocation41_spill] sm:$0xff] }
 0x2f1   : > { %v4218_v40 = vpop.eup %4217  ;;  %4229 = vpow2.f32 %v1872_v11 }
 0x2f2   : > { %v4220_v44 = vpop.eup %4219  ;;  %4231 = vpow2.f32 %v1874_v63  ;;  %2622 = vmatmul.mubr.bf16.gmra.mrb[28].mxu1 %v2387_v8  ;;  %v1675_v15 = vpop.permute.xlu1 %1674 }
 0x2f3   : > { %v4222_v21 = vpop.eup %4221  ;;  %v1772_v14 = vsub.f32 %v6307_v1, %v1675_v15  ;;  %v1773_v24 = vsub.f32 %v6308_v31, %v1675_v15  ;;  %v5642_v62 = vadd.f32 %v4220_v44, %v4218_v40 }
 0x2f4   : > { %v4224_v23 = vpop.eup %4223  ;;  %v1680_v32 = vpop.permute.xlu0 %1679  ;;  %v2389_v39 = vpack.c.bf16 %v4222_v21, %v4218_v40 }
 0x2f5   : > { %v1876_v60 = vmul.f32 1.442695, %v1772_v14  ;;  %v1878_v52 = vmul.f32 1.442695, %v1773_v24  ;;  %v1774_v28 = vsub.f32 %v6309_v54, %v1680_v32  ;;  %v1775_v13 = vsub.f32 %v6310_v59, %v1680_v32  ;;  %v6311_v14 = vld [vmem:[#allocation43_spill] sm:$0xff]  ;;  %v6312_v32 = vld [vmem:[#allocation44_spill] sm:$0xff] }
 0x2f6   : > { %v2390_v11 = vpack.c.bf16 %v4224_v23, %v4220_v44  ;;  %v5646_v63 = vadd.f32 %v4224_v23, %v4222_v21 }
 0x2f7   : > { %4233 = vpow2.f32 %v1876_v60  ;;  %v1880_v8 = vmul.f32 1.442695, %v1774_v28  ;;  %v1882_v7 = vmul.f32 1.442695, %v1775_v13  ;;  %v6313_v28 = vld [vmem:[#allocation45_spill] sm:$0xff]  ;;  %v6314_v13 = vld [vmem:[#allocation46_spill] sm:$0xff] }
 0x2f8   : > { %4235 = vpow2.f32 %v1878_v52  ;;  %2629 = vmatprep.mubr.bf16.mxu1 %v2390_v11  ;;  %1992 = vadd.xlane.f32.xlu0 %v5523_v12 }
 0x2f9   : > { %v4226_v15 = vpop.eup %4225  ;;  %4237 = vpow2.f32 %v1880_v8 }
 0x2fa   : > { %v4228_v1 = vpop.eup %4227  ;;  %4239 = vpow2.f32 %v1882_v7  ;;  %2630 = vmatmul.mubr.bf16.gmra.mrb[32].mxu1 %v2389_v39  ;;  %v1685_v24 = vpop.permute.xlu1 %1684 }
 0x2fb   : > { %v4230_v40 = vpop.eup %4229  ;;  %v1776_v31 = vsub.f32 %v6311_v14, %v1685_v24  ;;  %v1777_v44 = vsub.f32 %v6312_v32, %v1685_v24  ;;  %v5651_v21 = vadd.f32 %v4228_v1, %v4226_v15  ;;  %v6315_v32 = vld [vmem:[#allocation47_spill] sm:$0xff] }
 0x2fc   : > { %v4232_v23 = vpop.eup %4231  ;;  %v1690_v60 = vpop.permute.xlu0 %1689  ;;  %1995 = vadd.xlane.f32.xlu0 %v5538_v58  ;;  %v2391_v52 = vpack.c.bf16 %v4230_v40, %v4226_v15 }
 0x2fd   : > { %v1884_v54 = vmul.f32 1.442695, %v1776_v31  ;;  %v1886_v12 = vmul.f32 1.442695, %v1777_v44  ;;  %v1778_v59 = vsub.f32 %v6313_v28, %v1690_v60  ;;  %v1779_v7 = vsub.f32 %v6314_v13, %v1690_v60  ;;  %v6317_v28 = vld [vmem:[#allocation49_spill] sm:$0xff] }
 0x2fe   : > { %v2392_v39 = vpack.c.bf16 %v4232_v23, %v4228_v1  ;;  %v5656_v11 = vadd.f32 %v4232_v23, %v4230_v40  ;;  %v6316_v40 = vld [vmem:[#allocation48_spill] sm:$0xff] }
 0x2ff   : > { %4241 = vpow2.f32 %v1884_v54  ;;  %v1888_v8 = vmul.f32 1.442695, %v1778_v59  ;;  %v1890_v14 = vmul.f32 1.442695, %v1779_v7  ;;  %1989 = vadd.xlane.f32.xlu1 %v5506_v29 }
 0x300   : > { %4243 = vpow2.f32 %v1886_v12  ;;  %2637 = vmatprep.mubr.bf16.mxu1 %v2392_v39  ;;  %2001 = vadd.xlane.f32.xlu0 %v5560_v33 }
 0x301   : > { %v4234_v58 = vpop.eup %4233  ;;  %4245 = vpow2.f32 %v1888_v8 }
 0x302   : > { %v4236_v15 = vpop.eup %4235  ;;  %4247 = vpow2.f32 %v1890_v14  ;;  %2638 = vmatmul.mubr.bf16.gmra.mrb[36].mxu1 %v2391_v52  ;;  %v1695_v24 = vpop.permute.xlu1 %1694  ;;  %v6318_v52 = vld [vmem:[#allocation50_spill] sm:$0xff] }
 0x303   : > { %v4238_v31 = vpop.eup %4237  ;;  %v1780_v1 = vsub.f32 %v6315_v32, %v1695_v24  ;;  %v1781_v44 = vsub.f32 %v6316_v40, %v1695_v24  ;;  %1998 = vadd.xlane.f32.xlu1 %v5552_v27  ;;  %v5663_v23 = vadd.f32 %v4236_v15, %v4234_v58  ;;  %v6319_v32 = vld [vmem:[#allocation51_spill] sm:$0xff] }
 0x304   : > { %v4240_v29 = vpop.eup %4239  ;;  %v1700_v60 = vpop.permute.xlu0 %1699  ;;  %2007 = vadd.xlane.f32.xlu0 %v5584_v53  ;;  %v2393_v33 = vpack.c.bf16 %v4238_v31, %v4234_v58 }
 0x305   : > { %v1892_v54 = vmul.f32 1.442695, %v1780_v1  ;;  %v1894_v12 = vmul.f32 1.442695, %v1781_v44  ;;  %v1782_v59 = vsub.f32 %v6317_v28, %v1700_v60  ;;  %v1783_v13 = vsub.f32 %v6318_v52, %v1700_v60 }
 0x306   : > { %v2394_v7 = vpack.c.bf16 %v4240_v29, %v4236_v15  ;;  %v5668_v39 = vadd.f32 %v4240_v29, %v4238_v31  ;;  %v6320_v31 = vld [vmem:[#allocation52_spill] sm:$0xff] }
 0x307   : > { %4249 = vpow2.f32 %v1892_v54  ;;  %v1896_v8 = vmul.f32 1.442695, %v1782_v59  ;;  %v1898_v14 = vmul.f32 1.442695, %v1783_v13  ;;  %2004 = vadd.xlane.f32.xlu1 %v5576_v35  ;;  %v6321_v54 = vld [vmem:[#allocation53_spill] sm:$0xff] }
 0x308   : > { %4251 = vpow2.f32 %v1894_v12  ;;  %2645 = vmatprep.mubr.bf16.mxu1 %v2394_v7  ;;  %2013 = vadd.xlane.f32.xlu0 %v5600_v56 }
 0x309   : > { %v4242_v27 = vpop.eup %4241  ;;  %4253 = vpow2.f32 %v1896_v8 }
 0x30a   : > { %v4244_v53 = vpop.eup %4243  ;;  %4255 = vpow2.f32 %v1898_v14  ;;  %2646 = vmatmul.mubr.bf16.gmra.mrb[40].mxu1 %v2393_v33  ;;  %v1705_v58 = vpop.permute.xlu1 %1704  ;;  %v6322_v33 = vld [vmem:[#allocation54_spill] sm:$0xff] }
 0x30b   : > { %v4246_v24 = vpop.eup %4245  ;;  %v1784_v15 = vsub.f32 %v6319_v32, %v1705_v58  ;;  %v1785_v1 = vsub.f32 %v6320_v31, %v1705_v58  ;;  %2010 = vadd.xlane.f32.xlu1 %v5594_v41  ;;  %v5675_v40 = vadd.f32 %v4244_v53, %v4242_v27  ;;  %v6324_v58 = vld [vmem:[#allocation56_spill] sm:$0xff] }
 0x30c   : > { %v4248_v35 = vpop.eup %4247  ;;  %v1710_v44 = vpop.permute.xlu0 %1709  ;;  %2019 = vadd.xlane.f32.xlu0 %v5618_v9  ;;  %v2395_v56 = vpack.c.bf16 %v4246_v24, %v4242_v27  ;;  %v6323_v27 = vld [vmem:[#allocation55_spill] sm:$0xff] }
 0x30d   : > { %v1900_v29 = vmul.f32 1.442695, %v1784_v15  ;;  %v1902_v60 = vmul.f32 1.442695, %v1785_v1  ;;  %v1786_v12 = vsub.f32 %v6321_v54, %v1710_v44  ;;  %v1787_v28 = vsub.f32 %v6322_v33, %v1710_v44 }
 0x30e   : > { %v2396_v59 = vpack.c.bf16 %v4248_v35, %v4244_v53  ;;  %v5680_v52 = vadd.f32 %v4248_v35, %v4246_v24  ;;  %v6325_v35 = vld [vmem:[#allocation57_spill] sm:$0xff] }
 0x30f   : > { %4257 = vpow2.f32 %v1900_v29  ;;  %v1904_v13 = vmul.f32 1.442695, %v1786_v12  ;;  %v1906_v7 = vmul.f32 1.442695, %v1787_v28  ;;  %2016 = vadd.xlane.f32.xlu1 %v5609_v51  ;;  %v6326_v29 = vld [vmem:[#allocation58_spill] sm:$0xff] }
 0x310   : > { %4259 = vpow2.f32 %v1902_v60  ;;  %2653 = vmatprep.mubr.bf16.mxu1 %v2396_v59  ;;  %2025 = vadd.xlane.f32.xlu0 %v5626_v2 }
 0x311   : > { %v4250_v41 = vpop.eup %4249  ;;  %4261 = vpow2.f32 %v1904_v13  ;;  %v6327_v13 = vld [vmem:[#allocation59_spill] sm:$0xff] }
 0x312   : > { %v4252_v9 = vpop.eup %4251  ;;  %4263 = vpow2.f32 %v1906_v7  ;;  %2654 = vmatmul.mubr.bf16.gmra.mrb[44].mxu1 %v2395_v56  ;;  %v1715_v8 = vpop.permute.xlu1 %1714 }
 0x313   : > { %v4254_v14 = vpop.eup %4253  ;;  %v1788_v53 = vsub.f32 %v6323_v27, %v1715_v8  ;;  %v1789_v24 = vsub.f32 %v6324_v58, %v1715_v8  ;;  %2022 = vadd.xlane.f32.xlu1 %v5622_v5  ;;  %v2060_v32 = vadd.f32 %v4252_v9, %v4250_v41  ;;  %v6329_v58 = vld [vmem:[#allocation61_spill] sm:$0xff] }
 0x314   : > { %v4256_v15 = vpop.eup %4255  ;;  %v1720_v51 = vpop.permute.xlu0 %1719  ;;  %2031 = vadd.xlane.f32.xlu0 %v5634_v25  ;;  %v2397_v31 = vpack.c.bf16 %v4254_v14, %v4250_v41  ;;  %v6328_v41 = vld [vmem:[#allocation60_spill] sm:$0xff] }
 0x315   : > { %v1908_v2 = vmul.f32 1.442695, %v1788_v53  ;;  %v1910_v1 = vmul.f32 1.442695, %v1789_v24  ;;  %v1790_v44 = vsub.f32 %v6325_v35, %v1720_v51  ;;  %v1791_v56 = vsub.f32 %v6326_v29, %v1720_v51 }
 0x316   : > { %v2398_v60 = vpack.c.bf16 %v4256_v15, %v4252_v9  ;;  %v5690_v54 = vadd.f32 %v4256_v15, %v4254_v14  ;;  %v6330_v15 = vld [vmem:[#allocation62_spill] sm:$0xff] }
 0x317   : > { %4265 = vpow2.f32 %v1908_v2  ;;  %v1912_v12 = vmul.f32 1.442695, %v1790_v44  ;;  %v1914_v33 = vmul.f32 1.442695, %v1791_v56  ;;  %2028 = vadd.xlane.f32.xlu1 %v5630_v16 }
 0x318   : > { %4267 = vpow2.f32 %v1910_v1  ;;  %2661 = vmatprep.mubr.bf16.mxu1 %v2398_v60  ;;  %2037 = vadd.xlane.f32.xlu0 %v5642_v62 }
 0x319   : > { %v4258_v5 = vpop.eup %4257  ;;  %4269 = vpow2.f32 %v1912_v12 }
 0x31a   : > { %v4260_v25 = vpop.eup %4259  ;;  %4271 = vpow2.f32 %v1914_v33  ;;  %2662 = vmatmul.mubr.bf16.gmra.mrb[48].mxu1 %v2397_v31  ;;  %v1725_v28 = vpop.permute.xlu1 %1724 }
 0x31b   : > { %v4262_v59 = vpop.eup %4261  ;;  %v1792_v7 = vsub.f32 %v6327_v13, %v1725_v28  ;;  %v1793_v9 = vsub.f32 %v6328_v41, %v1725_v28  ;;  %2034 = vadd.xlane.f32.xlu1 %v5638_v10  ;;  %v2066_v8 = vadd.f32 %v4260_v25, %v4258_v5 }
 0x31c   : > { %v4264_v14 = vpop.eup %4263  ;;  %v1730_v16 = vpop.permute.xlu0 %1729  ;;  %2043 = vadd.xlane.f32.xlu0 %v5651_v21  ;;  %v2399_v27 = vpack.c.bf16 %v4262_v59, %v4258_v5 }
 0x31d   : > { %v1916_v62 = vmul.f32 1.442695, %v1792_v7  ;;  %v1918_v53 = vmul.f32 1.442695, %v1793_v9  ;;  %v1794_v24 = vsub.f32 %v6329_v58, %v1730_v16  ;;  %v1795_v51 = vsub.f32 %v6330_v15, %v1730_v16 }
 0x31e   : > { %v2400_v31 = vpack.c.bf16 %v4264_v14, %v4260_v25  ;;  %v2069_v2 = vadd.f32 %v4264_v14, %v4262_v59  ;;  %v5708_v7 = vpop.permute.xlu1 %2188  ;;  %v6331_v9 = vsub.f32 %v5388_v50, %v5402_v30 }
 0x31f   : > { %4273 = vpow2.f32 %v1916_v62  ;;  %v1920_v1 = vmul.f32 1.442695, %v1794_v24  ;;  %v1922_v35 = vmul.f32 1.442695, %v1795_v51  ;;  %2040 = vadd.xlane.f32.xlu1 %v5646_v63 }
 0x320   : > { %4275 = vpow2.f32 %v1918_v53  ;;  %2669 = vmatprep.mubr.bf16.mxu1 %v2400_v31  ;;  %2049 = vadd.xlane.f32.xlu0 %v5663_v23  ;;  %v5706_v59 = vpop.permute.xlu0 %2183 }
 0x321   : > { %v4266_v10 = vpop.eup %4265  ;;  %4277 = vpow2.f32 %v1920_v1 }
 0x322   : > { %v4268_v21 = vpop.eup %4267  ;;  %4279 = vpow2.f32 %v1922_v35  ;;  %2670 = vmatmul.mubr.bf16.gmra.mrb[52].mxu1 %v2399_v27 }
 0x323   : > { %v4270_v44 = vpop.eup %4269  ;;  %2046 = vadd.xlane.f32.xlu1 %v5656_v11  ;;  %v2072_v29 = vadd.f32 %v4268_v21, %v4266_v10 }
 0x324   : > { %v4272_v56 = vpop.eup %4271  ;;  %2055 = vadd.xlane.f32.xlu0 %v5675_v40  ;;  %v2401_v60 = vpack.c.bf16 %v4270_v44, %v4266_v10 }
 0x325   : > { %v2402_v12 = vpack.c.bf16 %v4272_v56, %v4268_v21  ;;  %v2075_v33 = vadd.f32 %v4272_v56, %v4270_v44 }
 0x327   : > { %2677 = vmatprep.mubr.bf16.mxu1 %v2402_v12  ;;  %2052 = vadd.xlane.f32.xlu1 %v5668_v39  ;;  %v5711_v39 = vpop.permute.xlu0 %2198 }
 0x328   : > { %2061 = vadd.xlane.f32.xlu0 %v2060_v32  ;;  %v5713_v32 = vpop.permute.xlu1 %2193 }
 0x329   : > { %v4274_v63 = vpop.eup %4273 }
 0x32a   : > { %v4276_v23 = vpop.eup %4275  ;;  %2678 = vmatmul.mubr.bf16.gmra.mrb[56].mxu1 %v2401_v60 }
 0x32b   : > { %v4278_v5 = vpop.eup %4277  ;;  %2058 = vadd.xlane.f32.xlu1 %v5680_v52  ;;  %v2078_v25 = vadd.f32 %v4276_v23, %v4274_v63  ;;  %v5715_v52 = vpop.permute.xlu0 %2208 }
 0x32c   : > { %v4280_v28 = vpop.eup %4279  ;;  %2067 = vadd.xlane.f32.xlu0 %v2066_v8  ;;  %v2403_v11 = vpack.c.bf16 %v4278_v5, %v4274_v63  ;;  %v5717_v41 = vpop.permute.xlu1 %2203  ;;  %v1570_v8 = vmul.f32 1.442695, %v6331_v9  ;;  %v1925_v63 = vld [vmem:[#allocation3 + $0x8] sm:$0xff]  ;;  %v1924_v9 = vld [vmem:[#allocation3] sm:$0xff] }
 0x32d   : > { %v2404_v40 = vpack.c.bf16 %v4280_v28, %v4276_v23  ;;  %v2081_v13 = vadd.f32 %v4280_v28, %v4278_v5  ;;  %v1957_v5 = vmul.f32 %v5416_v18, %v1925_v63  ;;  %v1926_v28 = vld [vmem:[#allocation3 + $0x10] sm:$0xff]  ;;  %v1927_v63 = vld [vmem:[#allocation3 + $0x18] sm:$0xff] }
 0x32e   : > { %4281 = vpow2.f32 %v1570_v8 }
 0x32f   : > { %2685 = vmatprep.mubr.bf16.mxu1 %v2404_v40  ;;  %2064 = vadd.xlane.f32.xlu1 %v5690_v54  ;;  %v5722_v54 = vpop.permute.xlu0 %2218 }
 0x330   : > { %2073 = vadd.xlane.f32.xlu0 %v2072_v29  ;;  %v5724_v14 = vpop.permute.xlu1 %2213 }
 0x332   : > { %2686 = vmatmul.mubr.bf16.gmra.mrb[60].mxu1 %v2403_v11 }
 0x333   : > { %2070 = vadd.xlane.f32.xlu1 %v2069_v2  ;;  %v5726_v16 = vpop.permute.xlu0 %2228 }
 0x334   : > { %2079 = vadd.xlane.f32.xlu0 %v2078_v25  ;;  %v5728_v27 = vpop.permute.xlu1 %2223 }
 0x337   : > { %2076 = vadd.xlane.f32.xlu1 %v2075_v33  ;;  %v5733_v53 = vpop.permute.xlu0 %2238 }
 0x338   : > { %v5730_v62 = vpop.eup %4281  ;;  %v5735_v58 = vpop.permute.xlu1 %2233 }
 0x33b   : > { %2082 = vadd.xlane.f32.xlu1 %v2081_v13  ;;  %v5737_v50 = vpop.permute.xlu0 %2248  ;;  %v1958_v13 = vmul.f32 %v5434_v36, %v1926_v28  ;;  %v2341_v36 = vmul.f32 0.0, %v5706_v59 }
 0x33c   : > { %v5739_v30 = vpop.permute.xlu1 %2243 }
 0x33f   : > { %v5741_v24 = vpop.permute.xlu0 %2258 }
 0x340   : > { %v5743_v15 = vpop.permute.xlu1 %2253 }
 0x343   : > { %v5745_v51 = vpop.permute.xlu0 %2268 }
 0x344   : > { %v5747_v31 = vpop.permute.xlu1 %2263 }
 0x347   : > { %v5749_v2 = vpop.permute.xlu0 %2278 }
 0x348   : > { %v5751_v1 = vpop.permute.xlu1 %2273 }
 0x34a   : > { %2338 = vperm.xlu0 %4041, %v5730_v62  }
 0x34b   : > { %v5753_v35 = vpop.permute.xlu0 %2288 }
 0x34c   : > { %v5755_v10 = vpop.permute.xlu1 %2283 }
 0x34f   : > { %v5757_v21 = vpop.permute.xlu0 %2298 }
 0x350   : > { %6332 = vst [vmem:[#allocation66_spill] sm:$0xff] %v5757_v21  ;;  %v5759_v44 = vpop.permute.xlu1 %2293 }
 0x353   : > { %v5761_v29 = vpop.permute.xlu0 %2308 }
 0x354   : > { %6333 = vst [vmem:[#allocation70_spill] sm:$0xff] %v5761_v29  ;;  %v5763_v56 = vpop.permute.xlu1 %2303 }
 0x355   : > { %6334 = vst [vmem:[#allocation68_spill] sm:$0xff] %v5763_v56 }
 0x357   : > { %v5765_v60 = vpop.permute.xlu0 %2318 }
 0x358   : > { %6335 = vst [vmem:[#allocation73_spill] sm:$0xff] %v5765_v60  ;;  %v5767_v12 = vpop.permute.xlu1 %2313  ;;  %v1928_v60 = vld [vmem:[#allocation3 + $0x20] sm:$0xff] }
 0x359   : > { %6336 = vst [vmem:[#allocation71_spill] sm:$0xff] %v5767_v12  ;;  %v1960_v18 = vmul.f32 %v5448_v57, %v1928_v60 }
 0x35b   : > { %v5769_v33 = vpop.permute.xlu0 %2328 }
 0x35c   : > { %6337 = vst [vmem:[#allocation11_spill] sm:$0xff] %v5769_v33  ;;  %v5771_v23 = vpop.permute.xlu1 %2323  ;;  %v1956_v33 = vmul.f32 %v5425_v26, %v1924_v9  ;;  %v1959_v26 = vmul.f32 %v5442_v0, %v1927_v63 }
 0x35d   : > { %6338 = vst [vmem:[#allocation12_spill] sm:$0xff] %v5771_v23 }
 0x360   : > { %v5774_v40 = vpop.permute.xlu1 %2333 }
 0x361   : > { %6339 = vst [vmem:[#allocation74_spill] sm:$0xff] %v5774_v40  ;;  %v1930_v40 = vld [vmem:[#allocation3 + $0x30] sm:$0xff] }
 0x385   : > { %v1993_v25 = vpop.xlane.xlu0 %1992 }
 0x386   : > { %v2085_v11 = vadd.f32 %v1993_v25, %v1957_v5 }
 0x388   : > { %2118 = vst.msk [vmem:[#allocation3 + $0x8] sm:$0xff] %vm770_vm0, %v2085_v11 }
 0x389   : > { %v1996_v8 = vpop.xlane.xlu0 %1995 }
 0x38a   : > { %v2086_v12 = vadd.f32 %v1996_v8, %v1958_v13 }
 0x38c   : > { %2119 = vst.msk [vmem:[#allocation3 + $0x10] sm:$0xff] %vm770_vm0, %v2086_v12  ;;  %v1990_v23 = vpop.xlane.xlu1 %1989  ;;  %v1962_v12 = vmul.f32 %v5458_v55, %v1930_v40  ;;  %v1931_v40 = vld [vmem:[#allocation3 + $0x38] sm:$0xff] }
 0x38d   : > { %v3870_v29 = vpop.f32.mrb[0].mxu1  ;;  %v2084_v5 = vadd.f32 %v1990_v23, %v1956_v33  ;;  %v2002_v25 = vpop.xlane.xlu0 %2001  ;;  %v1929_v33 = vld [vmem:[#allocation3 + $0x28] sm:$0xff]  ;;  %v2342_v23 = vmul.f32 0.0, %v5708_v7 }
 0x38e   : > { %v3871_v56 = vpop.f32.mrb[1].mxu1  ;;  %v2088_v11 = vadd.f32 %v2002_v25, %v1960_v18  ;;  %v1932_v25 = vld [vmem:[#allocation3 + $0x40] sm:$0xff]  ;;  %v1961_v0 = vmul.f32 %v5456_v47, %v1929_v33 }
 0x38f   : > { %v2794_v28 = vld [vmem:[#allocation3 + $0x8] sm:$0xff]  ;;  %2117 = vst.msk [vmem:[#allocation3] sm:$0xff] %vm770_vm0, %v2084_v5  ;;  %v3872_v13 = vadd.f32 %v3871_v56, %v3870_v29  ;;  %v3873_v8 = vpop.f32.mrb[2].mxu1  ;;  %v1964_v55 = vmul.f32 %v5469_v22, %v1932_v25 }
 0x390   : > { %4283 = vrcp.f32 %v2794_v28  ;;  %2121 = vst.msk [vmem:[#allocation3 + $0x20] sm:$0xff] %vm770_vm0, %v2088_v11  ;;  %v3874_v57 = vpop.f32.mrb[3].mxu1  ;;  %v1999_v60 = vpop.xlane.xlu1 %1998  ;;  %v1934_v28 = vld [vmem:[#allocation3 + $0x50] sm:$0xff] }
 0x391   : > { %v3875_v9 = vadd.f32 %v3874_v57, %v3873_v8  ;;  %v2087_v18 = vadd.f32 %v1999_v60, %v1959_v26  ;;  %v2008_v59 = vpop.xlane.xlu0 %2007  ;;  %v5787_v21 = vadd.f32 %v3872_v13, %v2341_v36  ;;  %v2343_v26 = vmul.f32 0.0, %v5713_v32 }
 0x392   : > { %v2090_v29 = vadd.f32 %v2008_v59, %v1962_v12  ;;  %v1963_v12 = vmul.f32 %v5464_v19, %v1931_v40 }
 0x393   : > { %2120 = vst.msk [vmem:[#allocation3 + $0x18] sm:$0xff] %vm770_vm0, %v2087_v18  ;;  %v5791_v56 = vadd.f32 %v3875_v9, %v2342_v23  ;;  %v2795_v57 = vld [vmem:[#allocation3 + $0x10] sm:$0xff]  ;;  %v1966_v23 = vmul.f32 %v5476_v4, %v1934_v28  ;;  %v1933_v9 = vld [vmem:[#allocation3 + $0x48] sm:$0xff]  ;;  %v2344_v18 = vmul.f32 0.0, %v5711_v39 }
 0x394   : > { %2123 = vst.msk [vmem:[#allocation3 + $0x30] sm:$0xff] %vm770_vm0, %v2090_v29  ;;  %v2005_v63 = vpop.xlane.xlu1 %2004  ;;  %v1936_v29 = vld [vmem:[#allocation3 + $0x60] sm:$0xff]  ;;  %v1965_v4 = vmul.f32 %v5474_v49, %v1933_v9 }
 0x395   : > { %v3876_v7 = vpop.f32.mrb[4].mxu1  ;;  %v2089_v5 = vadd.f32 %v2005_v63, %v1961_v0  ;;  %v2014_v11 = vpop.xlane.xlu0 %2013 }
 0x396   : > { %v2793_v8 = vld [vmem:[#allocation3] sm:$0xff]  ;;  %v3877_v36 = vpop.f32.mrb[5].mxu1  ;;  %v2092_v13 = vadd.f32 %v2014_v11, %v1964_v55  ;;  %v1935_v11 = vld [vmem:[#allocation3 + $0x58] sm:$0xff] }
 0x397   : > { %4285 = vrcp.f32 %v2793_v8  ;;  %2122 = vst.msk [vmem:[#allocation3 + $0x28] sm:$0xff] %vm770_vm0, %v2089_v5  ;;  %v3878_v47 = vadd.f32 %v3877_v36, %v3876_v7  ;;  %v3879_v60 = vpop.f32.mrb[6].mxu1  ;;  %v2797_v19 = vld [vmem:[#allocation3 + $0x20] sm:$0xff]  ;;  %v1968_v5 = vmul.f32 %v5487_v48, %v1936_v29 }
 0x398   : > { %2125 = vst.msk [vmem:[#allocation3 + $0x40] sm:$0xff] %vm770_vm0, %v2092_v13  ;;  %v3880_v22 = vpop.f32.mrb[7].mxu1  ;;  %v2011_v33 = vpop.xlane.xlu1 %2010  ;;  %4287 = vrcp.f32 %v2795_v57  ;;  %v1938_v13 = vld [vmem:[#allocation3 + $0x70] sm:$0xff] }
 0x399   : > { %v3881_v59 = vadd.f32 %v3880_v22, %v3879_v60  ;;  %v2091_v25 = vadd.f32 %v2011_v33, %v1963_v12  ;;  %v2020_v32 = vpop.xlane.xlu0 %2019  ;;  %v5801_v0 = vadd.f32 %v3878_v47, %v2343_v26  ;;  %v2345_v60 = vmul.f32 0.0, %v5717_v41 }
 0x39a   : > { %v4284_v63 = vpop.eup %4283  ;;  %v2796_v55 = vld [vmem:[#allocation3 + $0x18] sm:$0xff]  ;;  %v2094_v7 = vadd.f32 %v2020_v32, %v1966_v23  ;;  %v1967_v33 = vmul.f32 %v5482_v20, %v1935_v11  ;;  %v1970_v9 = vmul.f32 %v5501_v61, %v1938_v13 }
 0x39b   : > { %4289 = vrcp.f32 %v2796_v55  ;;  %2124 = vst.msk [vmem:[#allocation3 + $0x38] sm:$0xff] %vm770_vm0, %v2091_v25  ;;  %2896 = vperm.xlu0 %4041, %v4284_v63   ;;  %v5805_v40 = vadd.f32 %v3881_v59, %v2344_v18  ;;  %v2799_v12 = vld [vmem:[#allocation3 + $0x30] sm:$0xff]  ;;  %v1937_v18 = vld [vmem:[#allocation3 + $0x68] sm:$0xff]  ;;  %v2346_v25 = vmul.f32 0.0, %v5715_v52  ;;  %v1940_v63 = vld [vmem:[#allocation3 + $0x80] sm:$0xff] }
 0x39c   : > { %2127 = vst.msk [vmem:[#allocation3 + $0x50] sm:$0xff] %vm770_vm0, %v2094_v7  ;;  %v2017_v39 = vpop.xlane.xlu1 %2016  ;;  %4291 = vrcp.f32 %v2797_v19  ;;  %v1969_v61 = vmul.f32 %v5492_v43, %v1937_v18  ;;  %v1939_v11 = vld [vmem:[#allocation3 + $0x78] sm:$0xff]  ;;  %v2347_v43 = vmul.f32 0.0, %v5724_v14  ;;  %v1941_v18 = vld [vmem:[#allocation3 + $0x88] sm:$0xff] }
 0x39d   : > { %v3882_v28 = vpop.f32.mrb[8].mxu1  ;;  %v2093_v8 = vadd.f32 %v2017_v39, %v1965_v4  ;;  %v2026_v36 = vpop.xlane.xlu0 %2025 }
 0x39e   : > { %v2798_v26 = vld [vmem:[#allocation3 + $0x28] sm:$0xff]  ;;  %v3883_v57 = vpop.f32.mrb[9].mxu1  ;;  %v2096_v47 = vadd.f32 %v2026_v36, %v1968_v5  ;;  %v1972_v5 = vmul.f32 %v5516_v3, %v1940_v63 }
 0x39f   : > { %4293 = vrcp.f32 %v2798_v26  ;;  %2126 = vst.msk [vmem:[#allocation3 + $0x48] sm:$0xff] %vm770_vm0, %v2093_v8  ;;  %v3884_v49 = vadd.f32 %v3883_v57, %v3882_v28  ;;  %v3885_v22 = vpop.f32.mrb[10].mxu1  ;;  %v2801_v20 = vld [vmem:[#allocation3 + $0x40] sm:$0xff]  ;;  %v1942_v26 = vld [vmem:[#allocation3 + $0x90] sm:$0xff] }
 0x3a0   : > { %2129 = vst.msk [vmem:[#allocation3 + $0x60] sm:$0xff] %vm770_vm0, %v2096_v47  ;;  %v3886_v48 = vpop.f32.mrb[11].mxu1  ;;  %v2023_v23 = vpop.xlane.xlu1 %2022  ;;  %4295 = vrcp.f32 %v2799_v12 }
 0x3a1   : > { %v4286_v59 = vpop.eup %4285  ;;  %v3887_v32 = vadd.f32 %v3886_v48, %v3885_v22  ;;  %v2095_v41 = vadd.f32 %v2023_v23, %v1967_v33  ;;  %v2032_v29 = vpop.xlane.xlu0 %2031  ;;  %v5815_v55 = vadd.f32 %v3884_v49, %v2345_v60  ;;  %v1971_v22 = vmul.f32 %v5508_v37, %v1939_v11 }
 0x3a2   : > { %v2800_v7 = vld [vmem:[#allocation3 + $0x38] sm:$0xff]  ;;  %v2098_v19 = vadd.f32 %v2032_v29, %v1970_v9  ;;  %2891 = vperm.xlu1 %4042, %v4286_v59   ;;  %v4288_v39 = vpop.eup %4287  ;;  %v1974_v9 = vmul.f32 %v5533_v42, %v1942_v26  ;;  %v1944_v29 = vld [vmem:[#allocation3 + $0xa0] sm:$0xff]  ;;  %v1973_v42 = vmul.f32 %v5521_v46, %v1941_v18  ;;  %v2349_v46 = vmul.f32 0.0, %v5728_v27 }
 0x3a3   : > { %4297 = vrcp.f32 %v2800_v7  ;;  %2128 = vst.msk [vmem:[#allocation3 + $0x58] sm:$0xff] %vm770_vm0, %v2095_v41  ;;  %v5819_v4 = vadd.f32 %v3887_v32, %v2346_v25  ;;  %v2803_v12 = vld [vmem:[#allocation3 + $0x50] sm:$0xff]  ;;  %v2348_v25 = vmul.f32 0.0, %v5722_v54 }
 0x3a4   : > { %2131 = vst.msk [vmem:[#allocation3 + $0x70] sm:$0xff] %vm770_vm0, %v2098_v19  ;;  %v2029_v52 = vpop.xlane.xlu1 %2028  ;;  %4299 = vrcp.f32 %v2801_v20 }
 0x3a5   : > { %v4290_v28 = vpop.eup %4289  ;;  %v3888_v8 = vpop.f32.mrb[12].mxu1  ;;  %v2097_v36 = vadd.f32 %v2029_v52, %v1969_v61  ;;  %v1943_v52 = vld [vmem:[#allocation3 + $0x98] sm:$0xff] }
 0x3a6   : > { %v2038_v13 = vpop.xlane.xlu0 %2037  ;;  %v2802_v57 = vld [vmem:[#allocation3 + $0x48] sm:$0xff]  ;;  %v3889_v47 = vpop.f32.mrb[13].mxu1  ;;  %2901 = vperm.xlu1 %4042, %v4288_v39   ;;  %2906 = vperm.xlu0 %4041, %v4290_v28   ;;  %v1976_v39 = vmul.f32 %v5545_v45, %v1944_v29 }
 0x3a7   : > { %v2100_v60 = vadd.f32 %v2038_v13, %v1972_v5  ;;  %4301 = vrcp.f32 %v2802_v57  ;;  %2130 = vst.msk [vmem:[#allocation3 + $0x68] sm:$0xff] %vm770_vm0, %v2097_v36  ;;  %v3890_v49 = vadd.f32 %v3889_v47, %v3888_v8  ;;  %v3891_v3 = vpop.f32.mrb[14].mxu1  ;;  %v4292_v33 = vpop.eup %4291  ;;  %v2805_v19 = vld [vmem:[#allocation3 + $0x60] sm:$0xff]  ;;  %v1946_v36 = vld [vmem:[#allocation3 + $0xb0] sm:$0xff] }
 0x3a8   : > { %v3892_v48 = vpop.f32.mrb[15].mxu1  ;;  %v2035_v23 = vpop.xlane.xlu1 %2034  ;;  %4303 = vrcp.f32 %v2803_v12 }
 0x3a9   : > { %2133 = vst.msk [vmem:[#allocation3 + $0x80] sm:$0xff] %vm770_vm0, %v2100_v60  ;;  %v4294_v59 = vpop.eup %4293  ;;  %v3893_v14 = vadd.f32 %v3892_v48, %v3891_v3  ;;  %v2099_v32 = vadd.f32 %v2035_v23, %v1971_v22  ;;  %v5829_v63 = vadd.f32 %v3890_v49, %v2347_v43  ;;  %v1975_v43 = vmul.f32 %v5540_v38, %v1943_v52 }
 0x3aa   : > { %v2044_v41 = vpop.xlane.xlu0 %2043  ;;  %v2804_v7 = vld [vmem:[#allocation3 + $0x58] sm:$0xff]  ;;  %2911 = vperm.xlu1 %4042, %v4292_v33   ;;  %2916 = vperm.xlu0 %4041, %v4294_v59   ;;  %v4296_v54 = vpop.eup %4295  ;;  %v1978_v22 = vmul.f32 %v5562_v34, %v1946_v36  ;;  %v1945_v33 = vld [vmem:[#allocation3 + $0xa8] sm:$0xff]  ;;  %v2350_v23 = vmul.f32 0.0, %v5726_v16  ;;  %v1948_v59 = vld [vmem:[#allocation3 + $0xc0] sm:$0xff] }
 0x3ab   : > { %v2102_v37 = vadd.f32 %v2044_v41, %v1974_v9  ;;  %4305 = vrcp.f32 %v2804_v7  ;;  %2132 = vst.msk [vmem:[#allocation3 + $0x78] sm:$0xff] %vm770_vm0, %v2099_v32  ;;  %v5833_v20 = vadd.f32 %v3893_v14, %v2348_v25  ;;  %v2807_v47 = vld [vmem:[#allocation3 + $0x70] sm:$0xff]  ;;  %v1977_v34 = vmul.f32 %v5550_v6, %v1945_v33 }
 0x3ac   : > { %v2041_v61 = vpop.xlane.xlu1 %2040  ;;  %4307 = vrcp.f32 %v2805_v19  ;;  %v1980_v7 = vmul.f32 %v5574_v17, %v1948_v59  ;;  %v2351_v6 = vmul.f32 0.0, %v5735_v58  ;;  %v6340_v36 = vld [vmem:[#allocation63_spill] sm:$0xff] }
 0x3ad   : > { %2135 = vst.msk [vmem:[#allocation3 + $0x90] sm:$0xff] %vm770_vm0, %v2102_v37  ;;  %v4298_v5 = vpop.eup %4297  ;;  %v3894_v11 = vpop.f32.mrb[16].mxu1  ;;  %v2101_v28 = vadd.f32 %v2041_v61, %v1973_v42  ;;  %v1947_v37 = vld [vmem:[#allocation3 + $0xb8] sm:$0xff] }
 0x3ae   : > { %v2050_v8 = vpop.xlane.xlu0 %2049  ;;  %v2806_v13 = vld [vmem:[#allocation3 + $0x68] sm:$0xff]  ;;  %v3895_v26 = vpop.f32.mrb[17].mxu1  ;;  %2921 = vperm.xlu1 %4042, %v4296_v54   ;;  %2926 = vperm.xlu0 %4041, %v4298_v5  }
 0x3af   : > { %v2104_v57 = vadd.f32 %v2050_v8, %v1976_v39  ;;  %4309 = vrcp.f32 %v2806_v13  ;;  %2134 = vst.msk [vmem:[#allocation3 + $0x88] sm:$0xff] %vm770_vm0, %v2101_v28  ;;  %v3896_v60 = vadd.f32 %v3895_v26, %v3894_v11  ;;  %v3897_v45 = vpop.f32.mrb[18].mxu1  ;;  %v4300_v12 = vpop.eup %4299  ;;  %v1950_v39 = vld [vmem:[#allocation3 + $0xd0] sm:$0xff]  ;;  %v1979_v13 = vmul.f32 %v6340_v36, %v1947_v37 }
 0x3b0   : > { %v3898_v49 = vpop.f32.mrb[19].mxu1  ;;  %v2047_v3 = vpop.xlane.xlu1 %2046  ;;  %4311 = vrcp.f32 %v2807_v47  ;;  %v2809_v32 = vld [vmem:[#allocation3 + $0x80] sm:$0xff] }
 0x3b1   : > { %2137 = vst.msk [vmem:[#allocation3 + $0xa0] sm:$0xff] %vm770_vm0, %v2104_v57  ;;  %v4302_v48 = vpop.eup %4301  ;;  %v3899_v27 = vadd.f32 %v3898_v49, %v3897_v45  ;;  %v2103_v9 = vadd.f32 %v2047_v3, %v1975_v43  ;;  %v5843_v25 = vadd.f32 %v3896_v60, %v2349_v46  ;;  %v6341_v47 = vld [vmem:[#allocation69_spill] sm:$0xff]  ;;  %v1949_v45 = vld [vmem:[#allocation3 + $0xc8] sm:$0xff] }
 0x3b2   : > { %v2056_v18 = vpop.xlane.xlu0 %2055  ;;  %v2808_v14 = vld [vmem:[#allocation3 + $0x78] sm:$0xff]  ;;  %2931 = vperm.xlu1 %4042, %v4300_v12   ;;  %2936 = vperm.xlu0 %4041, %v4302_v48   ;;  %v4304_v16 = vpop.eup %4303  ;;  %v1982_v60 = vmul.f32 %v6341_v47, %v1950_v39  ;;  %v2352_v12 = vmul.f32 0.0, %v5733_v53  ;;  %v2353_v39 = vmul.f32 0.0, %v5739_v30  ;;  %v2354_v47 = vmul.f32 0.0, %v5737_v50 }
 0x3b3   : > { %v2106_v38 = vadd.f32 %v2056_v18, %v1978_v22  ;;  %4313 = vrcp.f32 %v2808_v14  ;;  %2136 = vst.msk [vmem:[#allocation3 + $0x98] sm:$0xff] %vm770_vm0, %v2103_v9  ;;  %v5847_v41 = vadd.f32 %v3899_v27, %v2350_v23  ;;  %v1952_v22 = vld [vmem:[#allocation3 + $0xe0] sm:$0xff] }
 0x3b4   : > { %v2053_v29 = vpop.xlane.xlu1 %2052  ;;  %4315 = vrcp.f32 %v2809_v32  ;;  %v2811_v28 = vld [vmem:[#allocation3 + $0x90] sm:$0xff]  ;;  %v6342_v9 = vld [vmem:[#allocation65_spill] sm:$0xff] }
 0x3b5   : > { %2139 = vst.msk [vmem:[#allocation3 + $0xb0] sm:$0xff] %vm770_vm0, %v2106_v38  ;;  %v4306_v19 = vpop.eup %4305  ;;  %v3900_v42 = vpop.f32.mrb[20].mxu1  ;;  %v2105_v54 = vadd.f32 %v2053_v29, %v1977_v34  ;;  %v1981_v18 = vmul.f32 %v6342_v9, %v1949_v45  ;;  %v6343_v38 = vld [vmem:[#allocation9_spill] sm:$0xff]  ;;  %v1951_v34 = vld [vmem:[#allocation3 + $0xd8] sm:$0xff] }
 0x3b6   : > { %v2062_v61 = vpop.xlane.xlu0 %2061  ;;  %v2810_v52 = vld [vmem:[#allocation3 + $0x88] sm:$0xff]  ;;  %v3901_v5 = vpop.f32.mrb[21].mxu1  ;;  %2941 = vperm.xlu1 %4042, %v4304_v16   ;;  %2946 = vperm.xlu0 %4041, %v4306_v19   ;;  %v1984_v32 = vmul.f32 %v6343_v38, %v1952_v22  ;;  %v1954_v19 = vld [vmem:[#allocation3 + $0xf0] sm:$0xff] }
 0x3b7   : > { %v2108_v11 = vadd.f32 %v2062_v61, %v1980_v7  ;;  %4317 = vrcp.f32 %v2810_v52  ;;  %2138 = vst.msk [vmem:[#allocation3 + $0xa8] sm:$0xff] %vm770_vm0, %v2105_v54  ;;  %v3902_v8 = vadd.f32 %v3901_v5, %v3900_v42  ;;  %v3903_v17 = vpop.f32.mrb[22].mxu1  ;;  %v4308_v26 = vpop.eup %4307 }
 0x3b8   : > { %v3904_v57 = vpop.f32.mrb[23].mxu1  ;;  %v2059_v46 = vpop.xlane.xlu1 %2058  ;;  %4319 = vrcp.f32 %v2811_v28  ;;  %v2813_v27 = vld [vmem:[#allocation3 + $0xa0] sm:$0xff] }
 0x3b9   : > { %2141 = vst.msk [vmem:[#allocation3 + $0xc0] sm:$0xff] %vm770_vm0, %v2108_v11  ;;  %v4310_v43 = vpop.eup %4309  ;;  %v3905_v58 = vadd.f32 %v3904_v57, %v3903_v17  ;;  %v2107_v49 = vadd.f32 %v2059_v46, %v1979_v13  ;;  %v5857_v33 = vadd.f32 %v3902_v8, %v2351_v6  ;;  %v6344_v6 = vld [vmem:[#allocation67_spill] sm:$0xff]  ;;  %v6345_v13 = vld [vmem:[#allocation64_spill] sm:$0xff]  ;;  %v1953_v57 = vld [vmem:[#allocation3 + $0xe8] sm:$0xff] }
 0x3ba   : > { %v2068_v3 = vpop.xlane.xlu0 %2067  ;;  %v2812_v48 = vld [vmem:[#allocation3 + $0x98] sm:$0xff]  ;;  %2951 = vperm.xlu1 %4042, %v4308_v26   ;;  %2956 = vperm.xlu0 %4041, %v4310_v43   ;;  %v4312_v53 = vpop.eup %4311  ;;  %v1983_v28 = vmul.f32 %v6344_v6, %v1951_v34  ;;  %v1986_v26 = vmul.f32 %v6345_v13, %v1954_v19 }
 0x3bb   : > { %v2110_v23 = vadd.f32 %v2068_v3, %v1982_v60  ;;  %4321 = vrcp.f32 %v2812_v48  ;;  %2140 = vst.msk [vmem:[#allocation3 + $0xb8] sm:$0xff] %vm770_vm0, %v2107_v49  ;;  %v5861_v59 = vadd.f32 %v3905_v58, %v2352_v12  ;;  %v6346_v3 = vld [vmem:[#allocation10_spill] sm:$0xff] }
 0x3bc   : > { %v2065_v14 = vpop.xlane.xlu1 %2064  ;;  %4323 = vrcp.f32 %v2813_v27  ;;  %v2815_v52 = vld [vmem:[#allocation3 + $0xb0] sm:$0xff]  ;;  %v1985_v22 = vmul.f32 %v6346_v3, %v1953_v57  ;;  %v1955_v27 = vld [vmem:[#allocation3 + $0xf8] sm:$0xff] }
 0x3bd   : > { %2143 = vst.msk [vmem:[#allocation3 + $0xd0] sm:$0xff] %vm770_vm0, %v2110_v23  ;;  %v4314_v16 = vpop.eup %4313  ;;  %v3906_v29 = vpop.f32.mrb[24].mxu1  ;;  %v2109_v7 = vadd.f32 %v2065_v14, %v1981_v18 }
 0x3be   : > { %v2074_v37 = vpop.xlane.xlu0 %2073  ;;  %v2814_v42 = vld [vmem:[#allocation3 + $0xa8] sm:$0xff]  ;;  %v3907_v54 = vpop.f32.mrb[25].mxu1  ;;  %2961 = vperm.xlu1 %4042, %v4312_v53   ;;  %2966 = vperm.xlu0 %4041, %v4314_v16  }
 0x3bf   : > { %v2112_v61 = vadd.f32 %v2074_v37, %v1984_v32  ;;  %4325 = vrcp.f32 %v2814_v42  ;;  %2142 = vst.msk [vmem:[#allocation3 + $0xc8] sm:$0xff] %vm770_vm0, %v2109_v7  ;;  %v3908_v5 = vadd.f32 %v3907_v54, %v3906_v29  ;;  %v3909_v11 = vpop.f32.mrb[26].mxu1  ;;  %v4316_v8 = vpop.eup %4315  ;;  %v2355_v32 = vmul.f32 0.0, %v5743_v15 }
 0x3c0   : > { %v3910_v17 = vpop.f32.mrb[27].mxu1  ;;  %v2071_v36 = vpop.xlane.xlu1 %2070  ;;  %4327 = vrcp.f32 %v2815_v52  ;;  %v2817_v49 = vld [vmem:[#allocation3 + $0xc0] sm:$0xff]  ;;  %v1987_v7 = vmul.f32 %v5730_v62, %v1955_v27 }
 0x3c1   : > { %2145 = vst.msk [vmem:[#allocation3 + $0xe0] sm:$0xff] %vm770_vm0, %v2112_v61  ;;  %v4318_v46 = vpop.eup %4317  ;;  %v3911_v30 = vadd.f32 %v3910_v17, %v3909_v11  ;;  %v2111_v60 = vadd.f32 %v2071_v36, %v1983_v28  ;;  %v5871_v43 = vadd.f32 %v3908_v5, %v2353_v39  ;;  %v2356_v61 = vmul.f32 0.0, %v5741_v24 }
 0x3c2   : > { %v2080_v45 = vpop.xlane.xlu0 %2079  ;;  %v2816_v12 = vld [vmem:[#allocation3 + $0xb8] sm:$0xff]  ;;  %2971 = vperm.xlu1 %4042, %v4316_v8   ;;  %2976 = vperm.xlu0 %4041, %v4318_v46   ;;  %v4320_v23 = vpop.eup %4319  ;;  %v2357_v36 = vmul.f32 0.0, %v5747_v31 }
 0x3c3   : > { %v2114_v58 = vadd.f32 %v2080_v45, %v1986_v26  ;;  %4329 = vrcp.f32 %v2816_v12  ;;  %2144 = vst.msk [vmem:[#allocation3 + $0xd8] sm:$0xff] %vm770_vm0, %v2111_v60  ;;  %v5875_v48 = vadd.f32 %v3911_v30, %v2354_v47  ;;  %v2358_v60 = vmul.f32 0.0, %v5745_v51 }
 0x3c4   : > { %v2077_v50 = vpop.xlane.xlu1 %2076  ;;  %4331 = vrcp.f32 %v2817_v49  ;;  %v2819_v34 = vld [vmem:[#allocation3 + $0xd0] sm:$0xff] }
 0x3c5   : > { %2147 = vst.msk [vmem:[#allocation3 + $0xf0] sm:$0xff] %vm770_vm0, %v2114_v58  ;;  %v4322_v9 = vpop.eup %4321  ;;  %v3912_v18 = vpop.f32.mrb[28].mxu1  ;;  %v2113_v53 = vadd.f32 %v2077_v50, %v1985_v22  ;;  %v2359_v50 = vmul.f32 0.0, %v5751_v1  ;;  %v2361_v1 = vmul.f32 0.0, %v5755_v10 }
 0x3c6   : > { %v2818_v14 = vld [vmem:[#allocation3 + $0xc8] sm:$0xff]  ;;  %v3913_v38 = vpop.f32.mrb[29].mxu1  ;;  %2981 = vperm.xlu1 %4042, %v4320_v23   ;;  %2986 = vperm.xlu0 %4041, %v4322_v9   ;;  %v4324_v37 = vpop.eup %4323 }
 0x3c7   : > { %4333 = vrcp.f32 %v2818_v14  ;;  %2146 = vst.msk [vmem:[#allocation3 + $0xe8] sm:$0xff] %vm770_vm0, %v2113_v53  ;;  %v3914_v16 = vadd.f32 %v3913_v38, %v3912_v18  ;;  %v3915_v29 = vpop.f32.mrb[30].mxu1  ;;  %v2360_v14 = vmul.f32 0.0, %v5749_v2  ;;  %v2362_v2 = vmul.f32 0.0, %v5753_v35 }
 0x3c8   : > { %v3916_v19 = vpop.f32.mrb[31].mxu1  ;;  %v2083_v42 = vpop.xlane.xlu1 %2082  ;;  %4335 = vrcp.f32 %v2819_v34  ;;  %v2821_v11 = vld [vmem:[#allocation3 + $0xe0] sm:$0xff] }
 0x3c9   : > { %v4326_v54 = vpop.eup %4325  ;;  %v3917_v39 = vadd.f32 %v3916_v19, %v3915_v29  ;;  %v2115_v52 = vadd.f32 %v2083_v42, %v1987_v7  ;;  %v5882_v5 = vadd.f32 %v3914_v16, %v2355_v32 }
 0x3ca   : > { %v2820_v15 = vld [vmem:[#allocation3 + $0xd8] sm:$0xff]  ;;  %2991 = vperm.xlu1 %4042, %v4324_v37   ;;  %2996 = vperm.xlu0 %4041, %v4326_v54   ;;  %v4328_v62 = vpop.eup %4327 }
 0x3cb   : > { %4337 = vrcp.f32 %v2820_v15  ;;  %2148 = vst.msk [vmem:[#allocation3 + $0xf8] sm:$0xff] %vm770_vm0, %v2115_v52  ;;  %v5885_v6 = vadd.f32 %v3917_v39, %v2356_v61 }
 0x3cc   : > { %4339 = vrcp.f32 %v2821_v11  ;;  %v2823_v13 = vld [vmem:[#allocation3 + $0xf0] sm:$0xff] }
 0x3cd   : > { %v4330_v28 = vpop.eup %4329  ;;  %v3918_v8 = vpop.f32.mrb[32].mxu1 }
 0x3ce   : > { %v2822_v17 = vld [vmem:[#allocation3 + $0xe8] sm:$0xff]  ;;  %v3919_v24 = vpop.f32.mrb[33].mxu1  ;;  %3001 = vperm.xlu1 %4042, %v4328_v62   ;;  %3006 = vperm.xlu0 %4041, %v4330_v28   ;;  %v4332_v46 = vpop.eup %4331  ;;  %v2363_v62 = vmul.f32 0.0, %v5759_v44 }
 0x3cf   : > { %4341 = vrcp.f32 %v2822_v17  ;;  %v3920_v26 = vadd.f32 %v3919_v24, %v3918_v8  ;;  %v3921_v57 = vpop.f32.mrb[34].mxu1  ;;  %v6347_v24 = vld [vmem:[#allocation66_spill] sm:$0xff] }
 0x3d0   : > { %v3922_v47 = vpop.f32.mrb[35].mxu1  ;;  %4343 = vrcp.f32 %v2823_v13 }
 0x3d1   : > { %v4334_v30 = vpop.eup %4333  ;;  %v3923_v45 = vadd.f32 %v3922_v47, %v3921_v57  ;;  %v5889_v12 = vadd.f32 %v3920_v26, %v2357_v36  ;;  %v2364_v36 = vmul.f32 0.0, %v6347_v24 }
 0x3d2   : > { %v2824_v58 = vld [vmem:[#allocation3 + $0xf8] sm:$0xff]  ;;  %3011 = vperm.xlu1 %4042, %v4332_v46   ;;  %3016 = vperm.xlu0 %4041, %v4334_v30   ;;  %v4336_v31 = vpop.eup %4335 }
 0x3d3   : > { %4345 = vrcp.f32 %v2824_v58  ;;  %v5891_v49 = vadd.f32 %v3923_v45, %v2358_v60  ;;  %v6348_v46 = vld [vmem:[#allocation68_spill] sm:$0xff]  ;;  %v6349_v58 = vld [vmem:[#allocation70_spill] sm:$0xff] }
 0x3d4   : > { %v2365_v47 = vmul.f32 0.0, %v6348_v46 }
 0x3d5   : > { %v4338_v3 = vpop.eup %4337  ;;  %v3924_v22 = vpop.f32.mrb[36].mxu1 }
 0x3d6   : > { %v3925_v23 = vpop.f32.mrb[37].mxu1  ;;  %3021 = vperm.xlu1 %4042, %v4336_v31   ;;  %3026 = vperm.xlu0 %4041, %v4338_v3   ;;  %v4340_v9 = vpop.eup %4339  ;;  %v2366_v31 = vmul.f32 0.0, %v6349_v58 }
 0x3d7   : > { %v3926_v27 = vadd.f32 %v3925_v23, %v3924_v22  ;;  %v3927_v51 = vpop.f32.mrb[38].mxu1 }
 0x3d8   : > { %v3928_v18 = vpop.f32.mrb[39].mxu1 }
 0x3d9   : > { %v4342_v53 = vpop.eup %4341  ;;  %v3929_v38 = vadd.f32 %v3928_v18, %v3927_v51  ;;  %v5895_v32 = vadd.f32 %v3926_v27, %v2359_v50  ;;  %v6350_v27 = vld [vmem:[#allocation71_spill] sm:$0xff] }
 0x3da   : > { %3031 = vperm.xlu1 %4042, %v4340_v9   ;;  %3036 = vperm.xlu0 %4041, %v4342_v53   ;;  %v4344_v16 = vpop.eup %4343  ;;  %v2367_v51 = vmul.f32 0.0, %v6350_v27 }
 0x3db   : > { %v5897_v34 = vadd.f32 %v3929_v38, %v2360_v14  ;;  %v6351_v14 = vld [vmem:[#allocation73_spill] sm:$0xff] }
 0x3dc   : > { %v2368_v38 = vmul.f32 0.0, %v6351_v14 }
 0x3dd   : > { %v4346_v29 = vpop.eup %4345  ;;  %v3930_v7 = vpop.f32.mrb[40].mxu1 }
 0x3de   : > { %v3931_v37 = vpop.f32.mrb[41].mxu1  ;;  %3041 = vperm.xlu1 %4042, %v4344_v16   ;;  %3046 = vperm.xlu0 %4041, %v4346_v29  }
 0x3df   : > { %v3932_v19 = vadd.f32 %v3931_v37, %v3930_v7  ;;  %v3933_v42 = vpop.f32.mrb[42].mxu1 }
 0x3e0   : > { %v3934_v54 = vpop.f32.mrb[43].mxu1 }
 0x3e1   : > { %v3935_v61 = vadd.f32 %v3934_v54, %v3933_v42  ;;  %v5901_v39 = vadd.f32 %v3932_v19, %v2361_v1  ;;  %v6352_v19 = vld [vmem:[#allocation12_spill] sm:$0xff] }
 0x3e2   : > { %v2369_v42 = vmul.f32 0.0, %v6352_v19 }
 0x3e3   : > { %v5903_v52 = vadd.f32 %v3935_v61, %v2362_v2 }
 0x3e5   : > { %v3936_v15 = vpop.f32.mrb[44].mxu1 }
 0x3e6   : > { %v3937_v11 = vpop.f32.mrb[45].mxu1 }
 0x3e7   : > { %v3938_v28 = vadd.f32 %v3937_v11, %v3936_v15  ;;  %v3939_v8 = vpop.f32.mrb[46].mxu1  ;;  %v6353_v15 = vld [vmem:[#allocation11_spill] sm:$0xff] }
 0x3e8   : > { %v3940_v17 = vpop.f32.mrb[47].mxu1  ;;  %v2370_v11 = vmul.f32 0.0, %v6353_v15 }
 0x3e9   : > { %v3941_v10 = vadd.f32 %v3940_v17, %v3939_v8  ;;  %v5907_v13 = vadd.f32 %v3938_v28, %v2363_v62 }
 0x3eb   : > { %v5909_v26 = vadd.f32 %v3941_v10, %v2364_v36  ;;  %v6354_v36 = vld [vmem:[#allocation74_spill] sm:$0xff] }
 0x3ec   : > { %v2371_v10 = vmul.f32 0.0, %v6354_v36 }
 0x3ed   : > { %v3942_v35 = vpop.f32.mrb[48].mxu1 }
 0x3ee   : > { %v3943_v57 = vpop.f32.mrb[49].mxu1 }
 0x3ef   : > { %v3944_v30 = vadd.f32 %v3943_v57, %v3942_v35  ;;  %v3945_v60 = vpop.f32.mrb[50].mxu1 }
 0x3f0   : > { %v3946_v45 = vpop.f32.mrb[51].mxu1 }
 0x3f1   : > { %v3947_v44 = vadd.f32 %v3946_v45, %v3945_v60  ;;  %v5913_v3 = vadd.f32 %v3944_v30, %v2365_v47  ;;  %v5934_v60 = vpop.permute.xlu0 %2338 }
 0x3f3   : > { %v5915_v22 = vadd.f32 %v3947_v44, %v2366_v31 }
 0x3f5   : > { %v3948_v23 = vpop.f32.mrb[52].mxu1 }
 0x3f6   : > { %v3949_v50 = vpop.f32.mrb[53].mxu1 }
 0x3f7   : > { %v3950_v9 = vadd.f32 %v3949_v50, %v3948_v23  ;;  %v3951_v18 = vpop.f32.mrb[54].mxu1 }
 0x3f8   : > { %v3952_v53 = vpop.f32.mrb[55].mxu1 }
 0x3f9   : > { %v3953_v16 = vadd.f32 %v3952_v53, %v3951_v18  ;;  %v5919_v29 = vadd.f32 %v3950_v9, %v2367_v51 }
 0x3fb   : > { %v5921_v7 = vadd.f32 %v3953_v16, %v2368_v38 }
 0x3fd   : > { %v3954_v37 = vpop.f32.mrb[56].mxu1 }
 0x3fe   : > { %v3955_v1 = vpop.f32.mrb[57].mxu1 }
 0x3ff   : > { %v3956_v54 = vadd.f32 %v3955_v1, %v3954_v37  ;;  %v3957_v2 = vpop.f32.mrb[58].mxu1 }
 0x400   : > { %v3958_v61 = vpop.f32.mrb[59].mxu1 }
 0x401   : > { %v3959_v62 = vadd.f32 %v3958_v61, %v3957_v2  ;;  %v5925_v28 = vadd.f32 %v3956_v54, %v2369_v42 }
 0x403   : > { %v5927_v8 = vadd.f32 %v3959_v62, %v2370_v11 }
 0x405   : > { %v3960_v17 = vpop.f32.mrb[60].mxu1 }
 0x406   : > { %v3961_v24 = vpop.f32.mrb[61].mxu1 }
 0x407   : > { %v3962_v35 = vadd.f32 %v3961_v24, %v3960_v17  ;;  %v3963_v57 = vpop.f32.mrb[62].mxu1 }
 0x408   : > { %v3964_v46 = vpop.f32.mrb[63].mxu1 }
 0x409   : > { %v5930_v47 = vadd.f32 %v3964_v46, %v3963_v57  ;;  %v5932_v30 = vadd.f32 %v3962_v35, %v2371_v10 }
 0x41a   : > { %v2897_v45 = vpop.permute.xlu0 %2896 }
 0x41b   : > { %v3050_v31 = vmul.f32 %v2897_v45, %v5791_v56 }
 0x421   : > { %v2892_v58 = vpop.permute.xlu1 %2891 }
 0x422   : > { %v3049_v44 = vmul.f32 %v2892_v58, %v5787_v21 }
 0x424   : > { %v3714_v23 = vpack.c.bf16 %v3050_v31, %v3049_v44 }
 0x425   : > { %v2907_v50 = vpop.permute.xlu0 %2906  ;;  %v2902_v27 = vpop.permute.xlu1 %2901 }
 0x426   : > { %3715 = vst [vmem:[%s5939_s12] sm:$0xff] %v3714_v23   ;;  %v3052_v51 = vmul.f32 %v2907_v50, %v5805_v40  ;;  %v3051_v9 = vmul.f32 %v2902_v27, %v5801_v0 }
 0x428   : > { %v3719_v18 = vpack.c.bf16 %v3052_v51, %v3051_v9 }
 0x429   : > { %v2917_v53 = vpop.permute.xlu0 %2916  ;;  %v2912_v14 = vpop.permute.xlu1 %2911 }
 0x42a   : > { %3791 = vst [vmem:[%s5939_s12 + $0x8] sm:$0xff] %v3719_v18   ;;  %v3054_v21 = vmul.f32 %v2917_v53, %v5819_v4  ;;  %v3053_v56 = vmul.f32 %v2912_v14, %v5815_v55 }
 0x42c   : > { %v3724_v38 = vpack.c.bf16 %v3054_v21, %v3053_v56 }
 0x42d   : > { %v2927_v16 = vpop.permute.xlu0 %2926  ;;  %v2922_v37 = vpop.permute.xlu1 %2921 }
 0x42e   : > { %3792 = vst [vmem:[%s5939_s12 + $0x10] sm:$0xff] %v3724_v38   ;;  %v3056_v1 = vmul.f32 %v2927_v16, %v5833_v20  ;;  %v3055_v40 = vmul.f32 %v2922_v37, %v5829_v63 }
 0x430   : > { %v3729_v0 = vpack.c.bf16 %v3056_v1, %v3055_v40  ;;  %v2372_v1 = vmul.f32 0.0, %v5934_v60 }
 0x431   : > { %v2937_v19 = vpop.permute.xlu0 %2936  ;;  %v2932_v42 = vpop.permute.xlu1 %2931 }
 0x432   : > { %3793 = vst [vmem:[%s5939_s12 + $0x18] sm:$0xff] %v3729_v0   ;;  %v3058_v54 = vmul.f32 %v2937_v19, %v5847_v41  ;;  %v3057_v4 = vmul.f32 %v2932_v42, %v5843_v25  ;;  %v2725_v0 = vadd.f32 %v5930_v47, %v2372_v1  ;;  %v3274_v47 = vld [vmem:[%s5939_s12 + $0x8] sm:$0xf] (%p4532_p10) }
 0x433   : > { %3275 = vst [vmem:[%s6002_s21 + $0x10] sm:$0xf] (%p4532_p10), %v3274_v47 }
 0x434   : > { %v3734_v55 = vpack.c.bf16 %v3058_v54, %v3057_v4 }
 0x435   : > { %v2947_v2 = vpop.permute.xlu0 %2946  ;;  %v2942_v61 = vpop.permute.xlu1 %2941  ;;  %v3278_v60 = vld [vmem:[%s5939_s12 + $0x10] sm:$0xf] (%p4532_p10)  ;;  %v3280_v4 = vld [vmem:[%s5939_s12 + $0x14] sm:$0xf] (%p4532_p10) }
 0x436   : > { %3794 = vst [vmem:[%s5939_s12 + $0x20] sm:$0xff] %v3734_v55   ;;  %v3060_v15 = vmul.f32 %v2947_v2, %v5861_v59  ;;  %v3059_v20 = vmul.f32 %v2942_v61, %v5857_v33  ;;  %3279 = vst [vmem:[%s6002_s21 + $0x20] sm:$0xf] (%p4532_p10), %v3278_v60 }
 0x437   : > { %3281 = vst [vmem:[%s6002_s21 + $0x28] sm:$0xf] (%p4532_p10), %v3280_v4 }
 0x438   : > { %v3739_v63 = vpack.c.bf16 %v3060_v15, %v3059_v20 }
 0x439   : > { %v2957_v11 = vpop.permute.xlu0 %2956  ;;  %v2952_v62 = vpop.permute.xlu1 %2951  ;;  %v3282_v55 = vld [vmem:[%s5939_s12 + $0x18] sm:$0xf] (%p4532_p10)  ;;  %v3284_v2 = vld [vmem:[%s5939_s12 + $0x1c] sm:$0xf] (%p4532_p10) }
 0x43a   : > { %3795 = vst [vmem:[%s5939_s12 + $0x28] sm:$0xff] %v3739_v63   ;;  %v3062_v17 = vmul.f32 %v2957_v11, %v5875_v48  ;;  %v3061_v41 = vmul.f32 %v2952_v62, %v5871_v43  ;;  %3283 = vst [vmem:[%s6002_s21 + $0x30] sm:$0xf] (%p4532_p10), %v3282_v55 }
 0x43b   : > { %3285 = vst [vmem:[%s6002_s21 + $0x38] sm:$0xf] (%p4532_p10), %v3284_v2 }
 0x43c   : > { %v3744_v25 = vpack.c.bf16 %v3062_v17, %v3061_v41 }
 0x43d   : > { %v2967_v24 = vpop.permute.xlu0 %2966  ;;  %v2962_v36 = vpop.permute.xlu1 %2961  ;;  %v3286_v61 = vld [vmem:[%s5939_s12 + $0x20] sm:$0xf] (%p4532_p10)  ;;  %v3288_v15 = vld [vmem:[%s5939_s12 + $0x24] sm:$0xf] (%p4532_p10) }
 0x43e   : > { %3796 = vst [vmem:[%s5939_s12 + $0x30] sm:$0xff] %v3744_v25   ;;  %v3064_v10 = vmul.f32 %v2967_v24, %v5885_v6  ;;  %v3063_v59 = vmul.f32 %v2962_v36, %v5882_v5  ;;  %3287 = vst [vmem:[%s6002_s21 + $0x40] sm:$0xf] (%p4532_p10), %v3286_v61 }
 0x43f   : > { %3289 = vst [vmem:[%s6002_s21 + $0x48] sm:$0xf] (%p4532_p10), %v3288_v15 }
 0x440   : > { %v3749_v33 = vpack.c.bf16 %v3064_v10, %v3063_v59 }
 0x441   : > { %v2977_v35 = vpop.permute.xlu0 %2976  ;;  %v2972_v57 = vpop.permute.xlu1 %2971  ;;  %v3290_v20 = vld [vmem:[%s5939_s12 + $0x28] sm:$0xf] (%p4532_p10)  ;;  %v3292_v63 = vld [vmem:[%s5939_s12 + $0x2c] sm:$0xf] (%p4532_p10) }
 0x442   : > { %3797 = vst [vmem:[%s5939_s12 + $0x38] sm:$0xff] %v3749_v33   ;;  %v3066_v46 = vmul.f32 %v2977_v35, %v5891_v49  ;;  %v3065_v48 = vmul.f32 %v2972_v57, %v5889_v12  ;;  %3291 = vst [vmem:[%s6002_s21 + $0x50] sm:$0xf] (%p4532_p10), %v3290_v20 }
 0x443   : > { %3293 = vst [vmem:[%s6002_s21 + $0x58] sm:$0xf] (%p4532_p10), %v3292_v63 }
 0x444   : > { %v3754_v43 = vpack.c.bf16 %v3066_v46, %v3065_v48 }
 0x445   : > { %v2987_v45 = vpop.permute.xlu0 %2986  ;;  %v2982_v58 = vpop.permute.xlu1 %2981  ;;  %v3294_v11 = vld [vmem:[%s5939_s12 + $0x30] sm:$0xf] (%p4532_p10)  ;;  %v3296_v62 = vld [vmem:[%s5939_s12 + $0x34] sm:$0xf] (%p4532_p10) }
 0x446   : > { %3798 = vst [vmem:[%s5939_s12 + $0x40] sm:$0xff] %v3754_v43   ;;  %v3068_v31 = vmul.f32 %v2987_v45, %v5897_v34  ;;  %v3067_v6 = vmul.f32 %v2982_v58, %v5895_v32  ;;  %3295 = vst [vmem:[%s6002_s21 + $0x60] sm:$0xf] (%p4532_p10), %v3294_v11 }
 0x447   : > { %3297 = vst [vmem:[%s6002_s21 + $0x68] sm:$0xf] (%p4532_p10), %v3296_v62 }
 0x448   : > { %v3759_v5 = vpack.c.bf16 %v3068_v31, %v3067_v6 }
 0x449   : > { %v2997_v44 = vpop.permute.xlu0 %2996  ;;  %v2992_v23 = vpop.permute.xlu1 %2991  ;;  %v3298_v17 = vld [vmem:[%s5939_s12 + $0x38] sm:$0xf] (%p4532_p10)  ;;  %v3300_v41 = vld [vmem:[%s5939_s12 + $0x3c] sm:$0xf] (%p4532_p10) }
 0x44a   : > { %3799 = vst [vmem:[%s5939_s12 + $0x48] sm:$0xff] %v3759_v5   ;;  %v3070_v50 = vmul.f32 %v2997_v44, %v5903_v52  ;;  %v3069_v49 = vmul.f32 %v2992_v23, %v5901_v39  ;;  %3299 = vst [vmem:[%s6002_s21 + $0x70] sm:$0xf] (%p4532_p10), %v3298_v17 }
 0x44b   : > { %3301 = vst [vmem:[%s6002_s21 + $0x78] sm:$0xf] (%p4532_p10), %v3300_v41 }
 0x44c   : > { %v3764_v12 = vpack.c.bf16 %v3070_v50, %v3069_v49 }
 0x44d   : > { %v3007_v27 = vpop.permute.xlu0 %3006  ;;  %v3002_v51 = vpop.permute.xlu1 %3001  ;;  %v3302_v25 = vld [vmem:[%s5939_s12 + $0x40] sm:$0xf] (%p4532_p10)  ;;  %v3304_v24 = vld [vmem:[%s5939_s12 + $0x44] sm:$0xf] (%p4532_p10) }
 0x44e   : > { %3800 = vst [vmem:[%s5939_s12 + $0x50] sm:$0xff] %v3764_v12   ;;  %v3072_v9 = vmul.f32 %v3007_v27, %v5909_v26  ;;  %v3071_v34 = vmul.f32 %v3002_v51, %v5907_v13  ;;  %3303 = vst [vmem:[%s6002_s21 + $0x80] sm:$0xf] (%p4532_p10), %v3302_v25 }
 0x44f   : > { %3305 = vst [vmem:[%s6002_s21 + $0x88] sm:$0xf] (%p4532_p10), %v3304_v24 }
 0x450   : > { %v3769_v18 = vpack.c.bf16 %v3072_v9, %v3071_v34 }
 0x451   : > { %v3017_v32 = vpop.permute.xlu0 %3016  ;;  %v3012_v53 = vpop.permute.xlu1 %3011  ;;  %v3306_v36 = vld [vmem:[%s5939_s12 + $0x48] sm:$0xf] (%p4532_p10)  ;;  %v3308_v10 = vld [vmem:[%s5939_s12 + $0x4c] sm:$0xf] (%p4532_p10) }
 0x452   : > { %3801 = vst [vmem:[%s5939_s12 + $0x58] sm:$0xff] %v3769_v18   ;;  %v3074_v14 = vmul.f32 %v3017_v32, %v5915_v22  ;;  %v3073_v52 = vmul.f32 %v3012_v53, %v5913_v3  ;;  %3307 = vst [vmem:[%s6002_s21 + $0x90] sm:$0xf] (%p4532_p10), %v3306_v36 }
 0x453   : > { %3309 = vst [vmem:[%s6002_s21 + $0x98] sm:$0xf] (%p4532_p10), %v3308_v10 }
 0x454   : > { %v3774_v21 = vpack.c.bf16 %v3074_v14, %v3073_v52 }
 0x455   : > { %v3027_v39 = vpop.permute.xlu0 %3026  ;;  %v3022_v56 = vpop.permute.xlu1 %3021  ;;  %v3310_v59 = vld [vmem:[%s5939_s12 + $0x50] sm:$0xf] (%p4532_p10)  ;;  %v3312_v33 = vld [vmem:[%s5939_s12 + $0x54] sm:$0xf] (%p4532_p10) }
 0x456   : > { %3802 = vst [vmem:[%s5939_s12 + $0x60] sm:$0xff] %v3774_v21   ;;  %v3076_v38 = vmul.f32 %v3027_v39, %v5921_v7  ;;  %v3075_v26 = vmul.f32 %v3022_v56, %v5919_v29  ;;  %3311 = vst [vmem:[%s6002_s21 + $0xa0] sm:$0xf] (%p4532_p10), %v3310_v59 }
 0x457   : > { %3313 = vst [vmem:[%s6002_s21 + $0xa8] sm:$0xf] (%p4532_p10), %v3312_v33 }
 0x458   : > { %v3779_v13 = vpack.c.bf16 %v3076_v38, %v3075_v26 }
 0x459   : > { %v3037_v16 = vpop.permute.xlu0 %3036  ;;  %v3032_v37 = vpop.permute.xlu1 %3031  ;;  %v3314_v35 = vld [vmem:[%s5939_s12 + $0x58] sm:$0xf] (%p4532_p10)  ;;  %v3316_v57 = vld [vmem:[%s5939_s12 + $0x5c] sm:$0xf] (%p4532_p10) }
 0x45a   : > { %3803 = vst [vmem:[%s5939_s12 + $0x68] sm:$0xff] %v3779_v13   ;;  %v3078_v22 = vmul.f32 %v3037_v16, %v5927_v8  ;;  %v3077_v3 = vmul.f32 %v3032_v37, %v5925_v28  ;;  %v3270_v28 = vld [vmem:[%s5939_s12] sm:$0xf] (%p4532_p10)  ;;  %v3272_v8 = vld [vmem:[%s5939_s12 + $0x4] sm:$0xf] (%p4532_p10) }
 0x45b   : > { %3271 = vst [vmem:[%s6002_s21] sm:$0xf] (%p4532_p10), %v3270_v28  ;;  %3273 = vst [vmem:[%s6002_s21 + $0x8] sm:$0xf] (%p4532_p10), %v3272_v8 }
 0x45c   : > { %v3784_v40 = vpack.c.bf16 %v3078_v22, %v3077_v3  ;;  %3247 = sbr.rel (!%p4532_p10) target bundleno = 1131 (0x46b), region = 167  ;;  %3315 = vst [vmem:[%s6002_s21 + $0xb0] sm:$0xf] (%p4532_p10), %v3314_v35  ;;  %3317 = vst [vmem:[%s6002_s21 + $0xb8] sm:$0xf] (%p4532_p10), %v3316_v57 }
 0x45d   : > { %v3047_v19 = vpop.permute.xlu0 %3046  ;;  %v3042_v42 = vpop.permute.xlu1 %3041  ;;  %v3318_v46 = vld [vmem:[%s5939_s12 + $0x60] sm:$0xf] (%p4532_p10)  ;;  %v3320_v48 = vld [vmem:[%s5939_s12 + $0x64] sm:$0xf] (%p4532_p10) }
 0x45e   : > { %3804 = vst [vmem:[%s5939_s12 + $0x70] sm:$0xff] %v3784_v40   ;;  %v3080_v7 = vmul.f32 %v3047_v19, %v2725_v0  ;;  %v3079_v29 = vmul.f32 %v3042_v42, %v5932_v30  ;;  %v3276_v30 = vld [vmem:[%s5939_s12 + $0xc] sm:$0xf] (%p4532_p10)  ;;  %3319 = vst [vmem:[%s6002_s21 + $0xc0] sm:$0xf] (%p4532_p10), %v3318_v46 }
 0x45f   : > { %3277 = vst [vmem:[%s6002_s21 + $0x18] sm:$0xf] (%p4532_p10), %v3276_v30  ;;  %3321 = vst [vmem:[%s6002_s21 + $0xc8] sm:$0xf] (%p4532_p10), %v3320_v48 }
 0x460   : > { %v3789_v54 = vpack.c.bf16 %v3080_v7, %v3079_v29 }
 0x461   : > { %v3322_v43 = vld [vmem:[%s5939_s12 + $0x68] sm:$0xf] (%p4532_p10)  ;;  %v3324_v45 = vld [vmem:[%s5939_s12 + $0x6c] sm:$0xf] (%p4532_p10) }
 0x462   : > { %3805 = vst [vmem:[%s5939_s12 + $0x78] sm:$0xff] %v3789_v54   ;;  %3323 = vst [vmem:[%s6002_s21 + $0xd0] sm:$0xf] (%p4532_p10), %v3322_v43 }
 0x463   : > { %3325 = vst [vmem:[%s6002_s21 + $0xd8] sm:$0xf] %v3324_v45 }
 0x465   : > { %v3326_v58 = vld [vmem:[%s5939_s12 + $0x70] sm:$0xf]  ;;  %v3328_v31 = vld [vmem:[%s5939_s12 + $0x74] sm:$0xf] }
 0x466   : > { %3327 = vst [vmem:[%s6002_s21 + $0xe0] sm:$0xf] %v3326_v58  ;;  %3329 = vst [vmem:[%s6002_s21 + $0xe8] sm:$0xf] %v3328_v31 }
 0x469   : > { %v3330_v6 = vld [vmem:[%s5939_s12 + $0x78] sm:$0xf]  ;;  %v3332_v5 = vld [vmem:[%s5939_s12 + $0x7c] sm:$0xf] }
 0x46a   : > { %3331 = vst [vmem:[%s6002_s21 + $0xf0] sm:$0xf] %v3330_v6  ;;  %3333 = vst [vmem:[%s6002_s21 + $0xf8] sm:$0xf] %v3332_v5 }
 0x46b PF: > { %s13_s20 = sadd.s32 1, %s4417_s20   ;;  %s6355_s12 = smov %s4389_s13 }
 0x46c   : > { %p10_p1 = scmp.ge.s32.totalorder %s13_s20, 6   ;;  %s6356_s13 = smov %s4527_s9 }
 0x46d   : > { %s6357_s14 = smov %s4397_s15  ;;  %s6358_s15 = smov %s4524_s8 }
 0x46e   : > { %s6359_s16 = smov %s4409_s18  ;;  %s6360_s17 = smov %s4413_s19 }
 0x46f   : > { %s6361_s18 = smov %s6364_s22  ;;  %s6362_s19 = smov %s6368_s23 }
 0x470   :  { %12 = sbr.rel (!%p10_p1) target bundleno = 5 (0x5), region = 255 }

</bundles_post_ra>
